<compile_context>
chip_gen: v7x
topology: tpu7x:2x2x1
jax: 0.10.0
libtpu: 0.0.40
codegen_flags: <defaults>
</compile_context>

<pallas_src>
import functools

import jax
import jax.numpy as jnp
from jax.experimental import pallas as pl
from jax.experimental.pallas import tpu as pltpu

LEAKY_SLOPE = 0.1
BN_EPS = 1e-5
LANE = 128


# ------------------------------ small helpers --------------------------------

def _rup(n, m=LANE):
    return ((n + m - 1) // m) * m


def _pad_dim(a, axis, target):
    if a.shape[axis] == target:
        return a
    pad = [(0, 0)] * a.ndim
    pad[axis] = (0, target - a.shape[axis])
    return jnp.pad(a, pad)


def _pad_last(a, target):
    return _pad_dim(a, a.ndim - 1, target)


# ------------------------------- fused kernel --------------------------------

def _yolo_branch_kernel(x_ref,
                        w0_ref, b0_ref, w1_ref, b1_ref,
                        w2_ref, b2_ref, w3_ref, b3_ref,
                        w4_ref, b4_ref, w5_ref, b5_ref,
                        wtb_ref, btb_ref,
                        feat_ref, det_ref,
                        mid_ref, acc_ref):
    """Whole YOLOBranch (prev_ch=None) for one image; activations stay in VMEM."""
    _, H, W, C0 = x_ref.shape
    C1 = w0_ref.shape[1]          # padded in_//2 (lane multiple)
    HW = H * W

    # Zero only the regions of `mid` that the interior writes below never touch:
    # the two halo rows (h=0, h=H+1) and the shifted-out edge column of the
    # kx=0 / kx=2 lane blocks.  Everything else is fully overwritten before each
    # use, so this tiny per-step fill replaces the old full-scratch zeroing.
    zero_row = jnp.zeros((1, W, 3 * C1), jnp.bfloat16)
    zero_col = jnp.zeros((H + 2, 1, C1), jnp.bfloat16)
    mid_ref[0:1] = zero_row
    mid_ref[H + 1:H + 2] = zero_row
    mid_ref[:, 0:1, 0:C1] = zero_col                       # w-1 < 0   (kx = 0)
    mid_ref[:, W - 1:W, 2 * C1:3 * C1] = zero_col          # w+1 >= W  (kx = 2)

    def cbl_1x1(x_bf16, w_ref, b_ref):
        # 1x1 conv (BN scale pre-folded into the bf16 weight) + bias + LeakyReLU.
        y = jnp.dot(x_bf16, w_ref[...], preferred_element_type=jnp.float32)
        y = y + b_ref[...]
        return jnp.maximum(y, LEAKY_SLOPE * y)             # f32 (HW, Cout)

    def cbl_3x3(y_f32, w_ref, b_ref):
        # Fill the H-halo'd, W-aligned scratch: three kx-shifted copies of the
        # input along the lane axis (1 aligned store + 2 shift-by-one stores).
        yb = y_f32.astype(jnp.bfloat16).reshape(H, W, C1)
        mid_ref[1:H + 1, :, C1:2 * C1] = yb                        # kx = 1
        mid_ref[1:H + 1, 1:W, 0:C1] = yb[:, 0:W - 1, :]            # kx = 0
        mid_ref[1:H + 1, 0:W - 1, 2 * C1:3 * C1] = yb[:, 1:W, :]   # kx = 2
        # Three aligned major-dim slices, K = 3*C1 each; accumulate in VMEM f32.
        acc_ref[...] = jnp.dot(mid_ref[0:H].reshape(HW, 3 * C1), w_ref[0],
                               preferred_element_type=jnp.float32)
        acc_ref[...] += jnp.dot(mid_ref[1:H + 1].reshape(HW, 3 * C1), w_ref[1],
                                preferred_element_type=jnp.float32)
        acc_ref[...] += jnp.dot(mid_ref[2:H + 2].reshape(HW, 3 * C1), w_ref[2],
                                preferred_element_type=jnp.float32)
        z = acc_ref[...] + b_ref[...]
        z = jnp.maximum(z, LEAKY_SLOPE * z)
        return z.astype(jnp.bfloat16)                      # bf16 (HW, Cout)

    x2d = x_ref[0].reshape(HW, C0)                         # bf16, lane-padded
    a = cbl_1x1(x2d, w0_ref, b0_ref)                       # cbl_0 (1x1)
    a = cbl_3x3(a, w1_ref, b1_ref)                         # cbl_1 (3x3)
    a = cbl_1x1(a, w2_ref, b2_ref)                         # cbl_2 (1x1)
    a = cbl_3x3(a, w3_ref, b3_ref)                         # cbl_3 (3x3)
    feat = cbl_1x1(a, w4_ref, b4_ref)                      # cbl_4 -> feature
    feat_ref[0] = feat.reshape(H, W, C1).astype(feat_ref.dtype)
    a = cbl_3x3(feat, w5_ref, b5_ref)                      # cbl_5 (3x3)
    det = jnp.dot(a, wtb_ref[...],                         # to_box (1x1 + bias)
                  preferred_element_type=jnp.float32) + btb_ref[...]
    det_ref[0] = det.reshape(H, W, det_ref.shape[-1]).astype(det_ref.dtype)


# ------------------------------ pallas_call wrapper ---------------------------

def yolo_branch_pallas(packed, x_nhwc_bf16):
    N, H, W, C0 = x_nhwc_bf16.shape
    C1 = packed["cbl_0"]["w"].shape[1]
    C2 = packed["cbl_1"]["w"].shape[2]
    C3 = packed["to_box"]["w"].shape[1]

    def img(C):
        return pl.BlockSpec((1, H, W, C), lambda n: (n, 0, 0, 0))

    def const(shape):
        # Constant index map + single buffer: weights are fetched once and do
        # not pay for a second VMEM buffer (matters on v7x's 64 MiB).
        return pl.BlockSpec(shape, lambda n: (0,) * len(shape),
                            pipeline_mode=pl.Buffered(1))

    in_specs = [img(C0)]
    args = [x_nhwc_bf16]
    for name in ("cbl_0", "cbl_1", "cbl_2", "cbl_3", "cbl_4", "cbl_5"):
        p = packed[name]
        in_specs += [const(p["w"].shape), const(p["b"].shape)]
        args += [p["w"], p["b"]]
    in_specs += [const(packed["to_box"]["w"].shape),
                 const(packed["to_box"]["b"].shape)]
    args += [packed["to_box"]["w"], packed["to_box"]["b"]]

    # Request only what the kernel actually needs (+ headroom), never all of a
    # v7x core's 64 MiB.
    scratch_bytes = (H + 2) * W * 3 * C1 * 2 + H * W * C2 * 4
    weight_bytes = sum(int(a.size) * a.dtype.itemsize for a in args[1:])
    io_bytes = 2 * (H * W * C0 * 2 + H * W * C1 * 4 + H * W * C3 * 4)
    footprint = scratch_bytes + weight_bytes + io_bytes
    vmem_limit = int(min(48 * 1024 * 1024, max(8 * 1024 * 1024, 2 * footprint)))

    feat, det = pl.pallas_call(
        _yolo_branch_kernel,
        out_shape=(jax.ShapeDtypeStruct((N, H, W, C1), jnp.float32),
                   jax.ShapeDtypeStruct((N, H, W, C3), jnp.float32)),
        grid=(N,),
        in_specs=in_specs,
        out_specs=(img(C1), img(C3)),
        scratch_shapes=[pltpu.VMEM((H + 2, W, 3 * C1), jnp.bfloat16),   # mid
                        pltpu.VMEM((H * W, C2), jnp.float32)],          # acc
        compiler_params=pltpu.CompilerParams(
            dimension_semantics=("parallel",),
            vmem_limit_bytes=vmem_limit),
    )(*args)
    return feat, det


# ----------------------------- parameter packing ------------------------------

def pack_params(params):
    """One-time packing outside the hot path: fold the BN scale into the conv
    weights (f32, then cast to bf16), pad every channel dim to a lane multiple,
    and reshape 3x3 weights to (ky, kx*Cin + ci, co) to match the kx-blocked
    lane layout of the in-kernel `mid` scratch."""
    def pack_1x1(p):
        w = p["w"] * p["scale"]                       # fold BN scale (f32)
        cin, cout = w.shape
        w = _pad_dim(_pad_dim(w, 0, _rup(cin)), 1, _rup(cout))
        return {"w": w.astype(jnp.bfloat16),
                "b": _pad_last(p["bias"][None, :], _rup(cout)).astype(jnp.float32)}

    def pack_3x3(p):
        w = p["w"] * p["scale"]                       # (3,3,cin,cout), folded
        kh, kw, cin, cout = w.shape
        cin_p, cout_p = _rup(cin), _rup(cout)
        w = _pad_dim(_pad_dim(w, 2, cin_p), 3, cout_p)
        w = w.reshape(kh, kw * cin_p, cout_p)         # K index = kx*Cin_p + ci
        return {"w": w.astype(jnp.bfloat16),
                "b": _pad_last(p["bias"][None, :], _rup(cout)).astype(jnp.float32)}

    packed = {}
    for name in ("cbl_0", "cbl_1", "cbl_2", "cbl_3", "cbl_4", "cbl_5"):
        p = params[name]
        packed[name] = pack_3x3(p) if p["k"] == 3 else pack_1x1(p)
    tbw = params["to_box"]["w"]
    cin, cout = tbw.shape
    packed["to_box"] = {
        "w": _pad_dim(_pad_dim(tbw, 0, _rup(cin)), 1, _rup(cout)).astype(jnp.bfloat16),
        "b": _pad_last(params["to_box"]["b"][None, :], _rup(cout)).astype(jnp.float32),
    }
    return packed


# -------------------------------- forward pass --------------------------------

@functools.partial(jax.jit, static_argnames=("out_ch", "feat_ch"))
def yolo_branch_forward(packed, x_nchw, *, out_ch, feat_ch):
    """Pallas implementation of YOLOBranch.forward(x, previous=None)."""
    x = jnp.transpose(x_nchw, (0, 2, 3, 1))                  # NCHW -> NHWC once
    x = _pad_last(x, _rup(x.shape[-1])).astype(jnp.bfloat16)  # lane-dense, bf16
    feat, det = yolo_branch_pallas(packed, x)
    detection = jnp.transpose(det[..., :out_ch], (0, 3, 1, 2))   # NHWC -> NCHW
    feature = jnp.transpose(feat[..., :feat_ch], (0, 3, 1, 2))
    return detection, feature


# ------------------------- deterministic parameters ---------------------------

def make_cbl_params(key, cin, cout, k):
    k1, k2, k3, k4, k5 = jax.random.split(key, 5)
    if k == 1:
        w = jax.random.normal(k1, (cin, cout), jnp.float32) / jnp.sqrt(cin)
    else:
        w = jax.random.normal(k1, (3, 3, cin, cout), jnp.float32) / jnp.sqrt(9 * cin)
    gamma = 1.0 + 0.1 * jax.random.normal(k2, (cout,), jnp.float32)
    beta = 0.1 * jax.random.normal(k3, (cout,), jnp.float32)
    mean = 0.1 * jax.random.normal(k4, (cout,), jnp.float32)
    var = jnp.abs(1.0 + 0.1 * jax.random.normal(k5, (cout,), jnp.float32))
    scale = gamma / jnp.sqrt(var + BN_EPS)
    bias = beta - mean * scale
    return {"w": w, "scale": scale, "bias": bias, "k": k}


def init_yolo_branch_params(key, in_, out_=18):
    assert in_ % 2 == 0
    keys = jax.random.split(key, 8)
    c2 = in_ // 2
    params = {
        "cbl_0": make_cbl_params(keys[0], in_, c2, 1),
        "cbl_1": make_cbl_params(keys[1], c2, in_, 3),
        "cbl_2": make_cbl_params(keys[2], in_, c2, 1),
        "cbl_3": make_cbl_params(keys[3], c2, in_, 3),
        "cbl_4": make_cbl_params(keys[4], in_, c2, 1),
        "cbl_5": make_cbl_params(keys[5], c2, in_, 3),
    }
    wk, bk = jax.random.split(keys[6])
    params["to_box"] = {
        "w": jax.random.normal(wk, (in_, out_), jnp.float32) / jnp.sqrt(in_),
        "b": 0.1 * jax.random.normal(bk, (out_,), jnp.float32),
    }
    return params


# ------------------------- pure-JAX reference (lax.conv) -----------------------

def ref_forward(params, x_nchw):
    def conv_nchw(x, w_oihw, pad):
        return jax.lax.conv_general_dilated(
            x, w_oihw, (1, 1), [(pad, pad), (pad, pad)],
            dimension_numbers=("NCHW", "OIHW", "NCHW"),
            precision=jax.lax.Precision.HIGHEST)

    def cbl_ref(x, p):
        if p["k"] == 1:
            w = p["w"]
            w_oihw = jnp.transpose(w, (1, 0)).reshape(w.shape[1], w.shape[0], 1, 1)
            pad = 0
        else:
            w_oihw = jnp.transpose(p["w"], (3, 2, 0, 1))
            pad = 1
        y = conv_nchw(x, w_oihw, pad)
        y = y * p["scale"][None, :, None, None] + p["bias"][None, :, None, None]
        return jnp.where(y > 0, y, LEAKY_SLOPE * y)

    x = cbl_ref(x_nchw, params["cbl_0"])
    x = cbl_ref(x, params["cbl_1"])
    x = cbl_ref(x, params["cbl_2"])
    x = cbl_ref(x, params["cbl_3"])
    feature = cbl_ref(x, params["cbl_4"])
    x = cbl_ref(feature, params["cbl_5"])
    wtb = params["to_box"]["w"]
    w_oihw = jnp.transpose(wtb, (1, 0)).reshape(wtb.shape[1], wtb.shape[0], 1, 1)
    det = conv_nchw(x, w_oihw, 0) + params["to_box"]["b"][None, :, None, None]
    return det, feature


# ----------------------------------- main --------------------------------------

if __name__ == "__main__":
    N, in_, H, W, out_ = 2, 4, 16, 16, 18
    key = jax.random.PRNGKey(0)
    pkey, xkey = jax.random.split(key)
    params = init_yolo_branch_params(pkey, in_, out_)
    x = jax.random.normal(xkey, (N, in_, H, W), jnp.float32)

    packed = pack_params(params)  # one-time packing, outside the hot path
    detection, feature = yolo_branch_forward(packed, x, out_ch=out_, feat_ch=in_ // 2)
    jax.block_until_ready((detection, feature))

    assert detection.shape == (N, out_, H, W), detection.shape
    assert feature.shape == (N, in_ // 2, H, W), feature.shape

    det_ref, feature_ref = ref_forward(params, x)
    # bf16 MXU operands (f32 accumulation) + BN scale folded into bf16 weights
    # vs. an f32-HIGHEST reference -> modest tolerance.
    assert jnp.allclose(detection, det_ref, rtol=3e-2, atol=3e-2), \
        float(jnp.max(jnp.abs(detection - det_ref)))
    assert jnp.allclose(feature, feature_ref, rtol=3e-2, atol=3e-2), \
        float(jnp.max(jnp.abs(feature - feature_ref)))

    print("KERNEL_OK")
</pallas_src>

<mosaic_0001>
module attributes {stable_mosaic.version = 11 : i64} {
  func.func @_yolo_branch_kernel(%arg0: i32, %arg1: memref<1x16x16x128xbf16, #tpu.memory_space<vmem>>, %arg2: memref<128x128xbf16, #tpu.memory_space<vmem>>, %arg3: memref<1x128xf32, #tpu.memory_space<vmem>>, %arg4: memref<3x384x128xbf16, #tpu.memory_space<vmem>>, %arg5: memref<1x128xf32, #tpu.memory_space<vmem>>, %arg6: memref<128x128xbf16, #tpu.memory_space<vmem>>, %arg7: memref<1x128xf32, #tpu.memory_space<vmem>>, %arg8: memref<3x384x128xbf16, #tpu.memory_space<vmem>>, %arg9: memref<1x128xf32, #tpu.memory_space<vmem>>, %arg10: memref<128x128xbf16, #tpu.memory_space<vmem>>, %arg11: memref<1x128xf32, #tpu.memory_space<vmem>>, %arg12: memref<3x384x128xbf16, #tpu.memory_space<vmem>>, %arg13: memref<1x128xf32, #tpu.memory_space<vmem>>, %arg14: memref<128x128xbf16, #tpu.memory_space<vmem>>, %arg15: memref<1x128xf32, #tpu.memory_space<vmem>>, %arg16: memref<1x16x16x128xf32, #tpu.memory_space<vmem>>, %arg17: memref<1x16x16x128xf32, #tpu.memory_space<vmem>>, %arg18: memref<18x16x384xbf16, #tpu.memory_space<vmem>>, %arg19: memref<256x128xf32, #tpu.memory_space<vmem>>) attributes {dimension_semantics = [#tpu.dimension_semantics<parallel>], iteration_bounds = array<i64: 2>, scalar_prefetch = 0 : i64, scratch_operands = 2 : i64, tpu.core_type = #tpu.core_type<tc>, window_params = [{transform_indices = @transform_0, window_bounds = array<i64: 1, 16, 16, 128>}, {pipeline_mode = #tpu.pipeline_mode<synchronous>, transform_indices = @transform_1, window_bounds = array<i64: 128, 128>}, {pipeline_mode = #tpu.pipeline_mode<synchronous>, transform_indices = @transform_2, window_bounds = array<i64: 1, 128>}, {pipeline_mode = #tpu.pipeline_mode<synchronous>, transform_indices = @transform_3, window_bounds = array<i64: 3, 384, 128>}, {pipeline_mode = #tpu.pipeline_mode<synchronous>, transform_indices = @transform_4, window_bounds = array<i64: 1, 128>}, {pipeline_mode = #tpu.pipeline_mode<synchronous>, transform_indices = @transform_5, window_bounds = array<i64: 128, 128>}, {pipeline_mode = #tpu.pipeline_mode<synchronous>, transform_indices = @transform_6, window_bounds = array<i64: 1, 128>}, {pipeline_mode = #tpu.pipeline_mode<synchronous>, transform_indices = @transform_7, window_bounds = array<i64: 3, 384, 128>}, {pipeline_mode = #tpu.pipeline_mode<synchronous>, transform_indices = @transform_8, window_bounds = array<i64: 1, 128>}, {pipeline_mode = #tpu.pipeline_mode<synchronous>, transform_indices = @transform_9, window_bounds = array<i64: 128, 128>}, {pipeline_mode = #tpu.pipeline_mode<synchronous>, transform_indices = @transform_10, window_bounds = array<i64: 1, 128>}, {pipeline_mode = #tpu.pipeline_mode<synchronous>, transform_indices = @transform_11, window_bounds = array<i64: 3, 384, 128>}, {pipeline_mode = #tpu.pipeline_mode<synchronous>, transform_indices = @transform_12, window_bounds = array<i64: 1, 128>}, {pipeline_mode = #tpu.pipeline_mode<synchronous>, transform_indices = @transform_13, window_bounds = array<i64: 128, 128>}, {pipeline_mode = #tpu.pipeline_mode<synchronous>, transform_indices = @transform_14, window_bounds = array<i64: 1, 128>}, {transform_indices = @transform_15, window_bounds = array<i64: 1, 16, 16, 128>}, {transform_indices = @transform_16, window_bounds = array<i64: 1, 16, 16, 128>}]} {
    %cst = arith.constant 0.000000e+00 : bf16
    %0 = vector.broadcast %cst : bf16 to vector<1x16x384xbf16>
    %cst_0 = arith.constant 0.000000e+00 : bf16
    %1 = vector.broadcast %cst_0 : bf16 to vector<18x1x128xbf16>
    %c0 = arith.constant 0 : index
    %c0_1 = arith.constant 0 : index
    %c0_2 = arith.constant 0 : index
    %2 = vector.load %arg18[%c0, %c0_1, %c0_2] : memref<18x16x384xbf16, #tpu.memory_space<vmem>>, vector<1x16x384xbf16>
    tpu.vector_store %arg18[%c0, %c0_1, %c0_2], %0 {strides = array<i32>} : memref<18x16x384xbf16, #tpu.memory_space<vmem>>, vector<1x16x384xbf16>,
    %c17 = arith.constant 17 : index
    %c0_3 = arith.constant 0 : index
    %c0_4 = arith.constant 0 : index
    %3 = vector.load %arg18[%c17, %c0_3, %c0_4] : memref<18x16x384xbf16, #tpu.memory_space<vmem>>, vector<1x16x384xbf16>
    tpu.vector_store %arg18[%c17, %c0_3, %c0_4], %0 {strides = array<i32>} : memref<18x16x384xbf16, #tpu.memory_space<vmem>>, vector<1x16x384xbf16>,
    %c0_5 = arith.constant 0 : index
    %c0_6 = arith.constant 0 : index
    %c0_7 = arith.constant 0 : index
    %4 = vector.load %arg18[%c0_5, %c0_6, %c0_7] : memref<18x16x384xbf16, #tpu.memory_space<vmem>>, vector<18x1x128xbf16>
    tpu.vector_store %arg18[%c0_5, %c0_6, %c0_7], %1 {strides = array<i32>} : memref<18x16x384xbf16, #tpu.memory_space<vmem>>, vector<18x1x128xbf16>,
    %c0_8 = arith.constant 0 : index
    %c15 = arith.constant 15 : index
    %c256 = arith.constant 256 : index
    %5 = vector.load %arg18[%c0_8, %c15, %c256] : memref<18x16x384xbf16, #tpu.memory_space<vmem>>, vector<18x1x128xbf16>
    tpu.vector_store %arg18[%c0_8, %c15, %c256], %1 {strides = array<i32>} : memref<18x16x384xbf16, #tpu.memory_space<vmem>>, vector<18x1x128xbf16>,
    %c0_9 = arith.constant 0 : index
    %c0_10 = arith.constant 0 : index
    %c0_11 = arith.constant 0 : index
    %c0_12 = arith.constant 0 : index
    %6 = vector.load %arg1[%c0_9, %c0_10, %c0_11, %c0_12] : memref<1x16x16x128xbf16, #tpu.memory_space<vmem>>, vector<1x16x16x128xbf16>
    %7 = vector.shape_cast %6 : vector<1x16x16x128xbf16> to vector<16x16x128xbf16>
    %8 = vector.shape_cast %7 : vector<16x16x128xbf16> to vector<256x128xbf16>
    %c0_13 = arith.constant 0 : index
    %c0_14 = arith.constant 0 : index
    %9 = vector.load %arg2[%c0_13, %c0_14] : memref<128x128xbf16, #tpu.memory_space<vmem>>, vector<128x128xbf16>
    %cst_15 = arith.constant dense<0.000000e+00> : vector<256x128xf32>
    %10 = tpu.matmul %8, %9, %cst_15 {dimension_numbers = #tpu.dot_dimension_numbers<[1], [0], [0], [1], [0, 0, 1, 1], [], []>} : vector<256x128xbf16>, vector<128x128xbf16>, vector<256x128xf32> -> vector<256x128xf32>
    %c0_16 = arith.constant 0 : index
    %c0_17 = arith.constant 0 : index
    %11 = vector.load %arg3[%c0_16, %c0_17] : memref<1x128xf32, #tpu.memory_space<vmem>>, vector<1x128xf32>
    %12 = vector.broadcast %11 : vector<1x128xf32> to vector<256x128xf32>
    %13 = arith.addf %10, %12 : vector<256x128xf32>
    %cst_18 = arith.constant 1.000000e-01 : f32
    %14 = vector.broadcast %cst_18 : f32 to vector<256x128xf32>
    %15 = arith.mulf %14, %13 : vector<256x128xf32>
    %16 = arith.maximumf %13, %15 : vector<256x128xf32>
    %17 = arith.truncf %16 : vector<256x128xf32> to vector<256x128xbf16>
    %18 = vector.shape_cast %17 : vector<256x128xbf16> to vector<16x16x128xbf16>
    %c1 = arith.constant 1 : index
    %c0_19 = arith.constant 0 : index
    %c128 = arith.constant 128 : index
    %19 = vector.load %arg18[%c1, %c0_19, %c128] : memref<18x16x384xbf16, #tpu.memory_space<vmem>>, vector<16x16x128xbf16>
    tpu.vector_store %arg18[%c1, %c0_19, %c128], %18 {strides = array<i32>} : memref<18x16x384xbf16, #tpu.memory_space<vmem>>, vector<16x16x128xbf16>,
    %20 = vector.extract_strided_slice %18 {offsets = [0, 0, 0], sizes = [16, 15, 128], strides = [1, 1, 1]} : vector<16x16x128xbf16> to vector<16x15x128xbf16>
    %c1_20 = arith.constant 1 : index
    %c1_21 = arith.constant 1 : index
    %c0_22 = arith.constant 0 : index
    %21 = vector.load %arg18[%c1_20, %c1_21, %c0_22] : memref<18x16x384xbf16, #tpu.memory_space<vmem>>, vector<16x15x128xbf16>
    tpu.vector_store %arg18[%c1_20, %c1_21, %c0_22], %20 {strides = array<i32>} : memref<18x16x384xbf16, #tpu.memory_space<vmem>>, vector<16x15x128xbf16>,
    %22 = vector.extract_strided_slice %18 {offsets = [0, 1, 0], sizes = [16, 15, 128], strides = [1, 1, 1]} : vector<16x16x128xbf16> to vector<16x15x128xbf16>
    %c1_23 = arith.constant 1 : index
    %c0_24 = arith.constant 0 : index
    %c256_25 = arith.constant 256 : index
    %23 = vector.load %arg18[%c1_23, %c0_24, %c256_25] : memref<18x16x384xbf16, #tpu.memory_space<vmem>>, vector<16x15x128xbf16>
    tpu.vector_store %arg18[%c1_23, %c0_24, %c256_25], %22 {strides = array<i32>} : memref<18x16x384xbf16, #tpu.memory_space<vmem>>, vector<16x15x128xbf16>,
    %c0_26 = arith.constant 0 : index
    %c0_27 = arith.constant 0 : index
    %c0_28 = arith.constant 0 : index
    %24 = vector.load %arg18[%c0_26, %c0_27, %c0_28] : memref<18x16x384xbf16, #tpu.memory_space<vmem>>, vector<16x16x384xbf16>
    %25 = vector.shape_cast %24 : vector<16x16x384xbf16> to vector<256x384xbf16>
    %c0_29 = arith.constant 0 : index
    %c0_30 = arith.constant 0 : index
    %c0_31 = arith.constant 0 : index
    %26 = vector.load %arg4[%c0_29, %c0_30, %c0_31] : memref<3x384x128xbf16, #tpu.memory_space<vmem>>, vector<1x384x128xbf16>
    %27 = vector.shape_cast %26 : vector<1x384x128xbf16> to vector<384x128xbf16>
    %cst_32 = arith.constant dense<0.000000e+00> : vector<256x128xf32>
    %28 = tpu.matmul %25, %27, %cst_32 {dimension_numbers = #tpu.dot_dimension_numbers<[1], [0], [0], [1], [0, 0, 1, 1], [], []>} : vector<256x384xbf16>, vector<384x128xbf16>, vector<256x128xf32> -> vector<256x128xf32>
    %c0_33 = arith.constant 0 : index
    %c0_34 = arith.constant 0 : index
    %29 = vector.load %arg19[%c0_33, %c0_34] : memref<256x128xf32, #tpu.memory_space<vmem>>, vector<256x128xf32>
    tpu.vector_store %arg19[%c0_33, %c0_34], %28 {strides = array<i32>} : memref<256x128xf32, #tpu.memory_space<vmem>>, vector<256x128xf32>,
    %c0_35 = arith.constant 0 : index
    %c0_36 = arith.constant 0 : index
    %30 = vector.load %arg19[%c0_35, %c0_36] : memref<256x128xf32, #tpu.memory_space<vmem>>, vector<256x128xf32>
    %c1_37 = arith.constant 1 : index
    %c0_38 = arith.constant 0 : index
    %c0_39 = arith.constant 0 : index
    %31 = vector.load %arg18[%c1_37, %c0_38, %c0_39] : memref<18x16x384xbf16, #tpu.memory_space<vmem>>, vector<16x16x384xbf16>
    %32 = vector.shape_cast %31 : vector<16x16x384xbf16> to vector<256x384xbf16>
    %c1_40 = arith.constant 1 : index
    %c0_41 = arith.constant 0 : index
    %c0_42 = arith.constant 0 : index
    %33 = vector.load %arg4[%c1_40, %c0_41, %c0_42] : memref<3x384x128xbf16, #tpu.memory_space<vmem>>, vector<1x384x128xbf16>
    %34 = vector.shape_cast %33 : vector<1x384x128xbf16> to vector<384x128xbf16>
    %cst_43 = arith.constant dense<0.000000e+00> : vector<256x128xf32>
    %35 = tpu.matmul %32, %34, %cst_43 {dimension_numbers = #tpu.dot_dimension_numbers<[1], [0], [0], [1], [0, 0, 1, 1], [], []>} : vector<256x384xbf16>, vector<384x128xbf16>, vector<256x128xf32> -> vector<256x128xf32>
    %36 = arith.addf %30, %35 : vector<256x128xf32>
    %c0_44 = arith.constant 0 : index
    %c0_45 = arith.constant 0 : index
    %37 = vector.load %arg19[%c0_44, %c0_45] : memref<256x128xf32, #tpu.memory_space<vmem>>, vector<256x128xf32>
    tpu.vector_store %arg19[%c0_44, %c0_45], %36 {strides = array<i32>} : memref<256x128xf32, #tpu.memory_space<vmem>>, vector<256x128xf32>,
    %c0_46 = arith.constant 0 : index
    %c0_47 = arith.constant 0 : index
    %38 = vector.load %arg19[%c0_46, %c0_47] : memref<256x128xf32, #tpu.memory_space<vmem>>, vector<256x128xf32>
    %c2 = arith.constant 2 : index
    %c0_48 = arith.constant 0 : index
    %c0_49 = arith.constant 0 : index
    %39 = vector.load %arg18[%c2, %c0_48, %c0_49] : memref<18x16x384xbf16, #tpu.memory_space<vmem>>, vector<16x16x384xbf16>
    %40 = vector.shape_cast %39 : vector<16x16x384xbf16> to vector<256x384xbf16>
    %c2_50 = arith.constant 2 : index
    %c0_51 = arith.constant 0 : index
    %c0_52 = arith.constant 0 : index
    %41 = vector.load %arg4[%c2_50, %c0_51, %c0_52] : memref<3x384x128xbf16, #tpu.memory_space<vmem>>, vector<1x384x128xbf16>
    %42 = vector.shape_cast %41 : vector<1x384x128xbf16> to vector<384x128xbf16>
    %cst_53 = arith.constant dense<0.000000e+00> : vector<256x128xf32>
    %43 = tpu.matmul %40, %42, %cst_53 {dimension_numbers = #tpu.dot_dimension_numbers<[1], [0], [0], [1], [0, 0, 1, 1], [], []>} : vector<256x384xbf16>, vector<384x128xbf16>, vector<256x128xf32> -> vector<256x128xf32>
    %44 = arith.addf %38, %43 : vector<256x128xf32>
    %c0_54 = arith.constant 0 : index
    %c0_55 = arith.constant 0 : index
    %45 = vector.load %arg19[%c0_54, %c0_55] : memref<256x128xf32, #tpu.memory_space<vmem>>, vector<256x128xf32>
    tpu.vector_store %arg19[%c0_54, %c0_55], %44 {strides = array<i32>} : memref<256x128xf32, #tpu.memory_space<vmem>>, vector<256x128xf32>,
    %c0_56 = arith.constant 0 : index
    %c0_57 = arith.constant 0 : index
    %46 = vector.load %arg19[%c0_56, %c0_57] : memref<256x128xf32, #tpu.memory_space<vmem>>, vector<256x128xf32>
    %c0_58 = arith.constant 0 : index
    %c0_59 = arith.constant 0 : index
    %47 = vector.load %arg5[%c0_58, %c0_59] : memref<1x128xf32, #tpu.memory_space<vmem>>, vector<1x128xf32>
    %48 = vector.broadcast %47 : vector<1x128xf32> to vector<256x128xf32>
    %49 = arith.addf %46, %48 : vector<256x128xf32>
    %cst_60 = arith.constant 1.000000e-01 : f32
    %50 = vector.broadcast %cst_60 : f32 to vector<256x128xf32>
    %51 = arith.mulf %50, %49 : vector<256x128xf32>
    %52 = arith.maximumf %49, %51 : vector<256x128xf32>
    %53 = arith.truncf %52 : vector<256x128xf32> to vector<256x128xbf16>
    %c0_61 = arith.constant 0 : index
    %c0_62 = arith.constant 0 : index
    %54 = vector.load %arg6[%c0_61, %c0_62] : memref<128x128xbf16, #tpu.memory_space<vmem>>, vector<128x128xbf16>
    %cst_63 = arith.constant dense<0.000000e+00> : vector<256x128xf32>
    %55 = tpu.matmul %53, %54, %cst_63 {dimension_numbers = #tpu.dot_dimension_numbers<[1], [0], [0], [1], [0, 0, 1, 1], [], []>} : vector<256x128xbf16>, vector<128x128xbf16>, vector<256x128xf32> -> vector<256x128xf32>
    %c0_64 = arith.constant 0 : index
    %c0_65 = arith.constant 0 : index
    %56 = vector.load %arg7[%c0_64, %c0_65] : memref<1x128xf32, #tpu.memory_space<vmem>>, vector<1x128xf32>
    %57 = vector.broadcast %56 : vector<1x128xf32> to vector<256x128xf32>
    %58 = arith.addf %55, %57 : vector<256x128xf32>
    %cst_66 = arith.constant 1.000000e-01 : f32
    %59 = vector.broadcast %cst_66 : f32 to vector<256x128xf32>
    %60 = arith.mulf %59, %58 : vector<256x128xf32>
    %61 = arith.maximumf %58, %60 : vector<256x128xf32>
    %62 = arith.truncf %61 : vector<256x128xf32> to vector<256x128xbf16>
    %63 = vector.shape_cast %62 : vector<256x128xbf16> to vector<16x16x128xbf16>
    %c1_67 = arith.constant 1 : index
    %c0_68 = arith.constant 0 : index
    %c128_69 = arith.constant 128 : index
    %64 = vector.load %arg18[%c1_67, %c0_68, %c128_69] : memref<18x16x384xbf16, #tpu.memory_space<vmem>>, vector<16x16x128xbf16>
    tpu.vector_store %arg18[%c1_67, %c0_68, %c128_69], %63 {strides = array<i32>} : memref<18x16x384xbf16, #tpu.memory_space<vmem>>, vector<16x16x128xbf16>,
    %65 = vector.extract_strided_slice %63 {offsets = [0, 0, 0], sizes = [16, 15, 128], strides = [1, 1, 1]} : vector<16x16x128xbf16> to vector<16x15x128xbf16>
    %c1_70 = arith.constant 1 : index
    %c1_71 = arith.constant 1 : index
    %c0_72 = arith.constant 0 : index
    %66 = vector.load %arg18[%c1_70, %c1_71, %c0_72] : memref<18x16x384xbf16, #tpu.memory_space<vmem>>, vector<16x15x128xbf16>
    tpu.vector_store %arg18[%c1_70, %c1_71, %c0_72], %65 {strides = array<i32>} : memref<18x16x384xbf16, #tpu.memory_space<vmem>>, vector<16x15x128xbf16>,
    %67 = vector.extract_strided_slice %63 {offsets = [0, 1, 0], sizes = [16, 15, 128], strides = [1, 1, 1]} : vector<16x16x128xbf16> to vector<16x15x128xbf16>
    %c1_73 = arith.constant 1 : index
    %c0_74 = arith.constant 0 : index
    %c256_75 = arith.constant 256 : index
    %68 = vector.load %arg18[%c1_73, %c0_74, %c256_75] : memref<18x16x384xbf16, #tpu.memory_space<vmem>>, vector<16x15x128xbf16>
    tpu.vector_store %arg18[%c1_73, %c0_74, %c256_75], %67 {strides = array<i32>} : memref<18x16x384xbf16, #tpu.memory_space<vmem>>, vector<16x15x128xbf16>,
    %c0_76 = arith.constant 0 : index
    %c0_77 = arith.constant 0 : index
    %c0_78 = arith.constant 0 : index
    %69 = vector.load %arg18[%c0_76, %c0_77, %c0_78] : memref<18x16x384xbf16, #tpu.memory_space<vmem>>, vector<16x16x384xbf16>
    %70 = vector.shape_cast %69 : vector<16x16x384xbf16> to vector<256x384xbf16>
    %c0_79 = arith.constant 0 : index
    %c0_80 = arith.constant 0 : index
    %c0_81 = arith.constant 0 : index
    %71 = vector.load %arg8[%c0_79, %c0_80, %c0_81] : memref<3x384x128xbf16, #tpu.memory_space<vmem>>, vector<1x384x128xbf16>
    %72 = vector.shape_cast %71 : vector<1x384x128xbf16> to vector<384x128xbf16>
    %cst_82 = arith.constant dense<0.000000e+00> : vector<256x128xf32>
    %73 = tpu.matmul %70, %72, %cst_82 {dimension_numbers = #tpu.dot_dimension_numbers<[1], [0], [0], [1], [0, 0, 1, 1], [], []>} : vector<256x384xbf16>, vector<384x128xbf16>, vector<256x128xf32> -> vector<256x128xf32>
    %c0_83 = arith.constant 0 : index
    %c0_84 = arith.constant 0 : index
    %74 = vector.load %arg19[%c0_83, %c0_84] : memref<256x128xf32, #tpu.memory_space<vmem>>, vector<256x128xf32>
    tpu.vector_store %arg19[%c0_83, %c0_84], %73 {strides = array<i32>} : memref<256x128xf32, #tpu.memory_space<vmem>>, vector<256x128xf32>,
    %c0_85 = arith.constant 0 : index
    %c0_86 = arith.constant 0 : index
    %75 = vector.load %arg19[%c0_85, %c0_86] : memref<256x128xf32, #tpu.memory_space<vmem>>, vector<256x128xf32>
    %c1_87 = arith.constant 1 : index
    %c0_88 = arith.constant 0 : index
    %c0_89 = arith.constant 0 : index
    %76 = vector.load %arg18[%c1_87, %c0_88, %c0_89] : memref<18x16x384xbf16, #tpu.memory_space<vmem>>, vector<16x16x384xbf16>
    %77 = vector.shape_cast %76 : vector<16x16x384xbf16> to vector<256x384xbf16>
    %c1_90 = arith.constant 1 : index
    %c0_91 = arith.constant 0 : index
    %c0_92 = arith.constant 0 : index
    %78 = vector.load %arg8[%c1_90, %c0_91, %c0_92] : memref<3x384x128xbf16, #tpu.memory_space<vmem>>, vector<1x384x128xbf16>
    %79 = vector.shape_cast %78 : vector<1x384x128xbf16> to vector<384x128xbf16>
    %cst_93 = arith.constant dense<0.000000e+00> : vector<256x128xf32>
    %80 = tpu.matmul %77, %79, %cst_93 {dimension_numbers = #tpu.dot_dimension_numbers<[1], [0], [0], [1], [0, 0, 1, 1], [], []>} : vector<256x384xbf16>, vector<384x128xbf16>, vector<256x128xf32> -> vector<256x128xf32>
    %81 = arith.addf %75, %80 : vector<256x128xf32>
    %c0_94 = arith.constant 0 : index
    %c0_95 = arith.constant 0 : index
    %82 = vector.load %arg19[%c0_94, %c0_95] : memref<256x128xf32, #tpu.memory_space<vmem>>, vector<256x128xf32>
    tpu.vector_store %arg19[%c0_94, %c0_95], %81 {strides = array<i32>} : memref<256x128xf32, #tpu.memory_space<vmem>>, vector<256x128xf32>,
    %c0_96 = arith.constant 0 : index
    %c0_97 = arith.constant 0 : index
    %83 = vector.load %arg19[%c0_96, %c0_97] : memref<256x128xf32, #tpu.memory_space<vmem>>, vector<256x128xf32>
    %c2_98 = arith.constant 2 : index
    %c0_99 = arith.constant 0 : index
    %c0_100 = arith.constant 0 : index
    %84 = vector.load %arg18[%c2_98, %c0_99, %c0_100] : memref<18x16x384xbf16, #tpu.memory_space<vmem>>, vector<16x16x384xbf16>
    %85 = vector.shape_cast %84 : vector<16x16x384xbf16> to vector<256x384xbf16>
    %c2_101 = arith.constant 2 : index
    %c0_102 = arith.constant 0 : index
    %c0_103 = arith.constant 0 : index
    %86 = vector.load %arg8[%c2_101, %c0_102, %c0_103] : memref<3x384x128xbf16, #tpu.memory_space<vmem>>, vector<1x384x128xbf16>
    %87 = vector.shape_cast %86 : vector<1x384x128xbf16> to vector<384x128xbf16>
    %cst_104 = arith.constant dense<0.000000e+00> : vector<256x128xf32>
    %88 = tpu.matmul %85, %87, %cst_104 {dimension_numbers = #tpu.dot_dimension_numbers<[1], [0], [0], [1], [0, 0, 1, 1], [], []>} : vector<256x384xbf16>, vector<384x128xbf16>, vector<256x128xf32> -> vector<256x128xf32>
    %89 = arith.addf %83, %88 : vector<256x128xf32>
    %c0_105 = arith.constant 0 : index
    %c0_106 = arith.constant 0 : index
    %90 = vector.load %arg19[%c0_105, %c0_106] : memref<256x128xf32, #tpu.memory_space<vmem>>, vector<256x128xf32>
    tpu.vector_store %arg19[%c0_105, %c0_106], %89 {strides = array<i32>} : memref<256x128xf32, #tpu.memory_space<vmem>>, vector<256x128xf32>,
    %c0_107 = arith.constant 0 : index
    %c0_108 = arith.constant 0 : index
    %91 = vector.load %arg19[%c0_107, %c0_108] : memref<256x128xf32, #tpu.memory_space<vmem>>, vector<256x128xf32>
    %c0_109 = arith.constant 0 : index
    %c0_110 = arith.constant 0 : index
    %92 = vector.load %arg9[%c0_109, %c0_110] : memref<1x128xf32, #tpu.memory_space<vmem>>, vector<1x128xf32>
    %93 = vector.broadcast %92 : vector<1x128xf32> to vector<256x128xf32>
    %94 = arith.addf %91, %93 : vector<256x128xf32>
    %cst_111 = arith.constant 1.000000e-01 : f32
    %95 = vector.broadcast %cst_111 : f32 to vector<256x128xf32>
    %96 = arith.mulf %95, %94 : vector<256x128xf32>
    %97 = arith.maximumf %94, %96 : vector<256x128xf32>
    %98 = arith.truncf %97 : vector<256x128xf32> to vector<256x128xbf16>
    %c0_112 = arith.constant 0 : index
    %c0_113 = arith.constant 0 : index
    %99 = vector.load %arg10[%c0_112, %c0_113] : memref<128x128xbf16, #tpu.memory_space<vmem>>, vector<128x128xbf16>
    %cst_114 = arith.constant dense<0.000000e+00> : vector<256x128xf32>
    %100 = tpu.matmul %98, %99, %cst_114 {dimension_numbers = #tpu.dot_dimension_numbers<[1], [0], [0], [1], [0, 0, 1, 1], [], []>} : vector<256x128xbf16>, vector<128x128xbf16>, vector<256x128xf32> -> vector<256x128xf32>
    %c0_115 = arith.constant 0 : index
    %c0_116 = arith.constant 0 : index
    %101 = vector.load %arg11[%c0_115, %c0_116] : memref<1x128xf32, #tpu.memory_space<vmem>>, vector<1x128xf32>
    %102 = vector.broadcast %101 : vector<1x128xf32> to vector<256x128xf32>
    %103 = arith.addf %100, %102 : vector<256x128xf32>
    %cst_117 = arith.constant 1.000000e-01 : f32
    %104 = vector.broadcast %cst_117 : f32 to vector<256x128xf32>
    %105 = arith.mulf %104, %103 : vector<256x128xf32>
    %106 = arith.maximumf %103, %105 : vector<256x128xf32>
    %107 = vector.shape_cast %106 : vector<256x128xf32> to vector<16x16x128xf32>
    %c0_118 = arith.constant 0 : index
    %c0_119 = arith.constant 0 : index
    %c0_120 = arith.constant 0 : index
    %c0_121 = arith.constant 0 : index
    %108 = vector.load %arg16[%c0_118, %c0_119, %c0_120, %c0_121] : memref<1x16x16x128xf32, #tpu.memory_space<vmem>>, vector<1x16x16x128xf32>
    %109 = vector.shape_cast %108 : vector<1x16x16x128xf32> to vector<16x16x128xf32>
    %110 = vector.shape_cast %107 : vector<16x16x128xf32> to vector<1x16x16x128xf32>
    tpu.vector_store %arg16[%c0_118, %c0_119, %c0_120, %c0_121], %110 {strides = array<i32>} : memref<1x16x16x128xf32, #tpu.memory_space<vmem>>, vector<1x16x16x128xf32>,
    %111 = arith.truncf %106 : vector<256x128xf32> to vector<256x128xbf16>
    %112 = vector.shape_cast %111 : vector<256x128xbf16> to vector<16x16x128xbf16>
    %c1_122 = arith.constant 1 : index
    %c0_123 = arith.constant 0 : index
    %c128_124 = arith.constant 128 : index
    %113 = vector.load %arg18[%c1_122, %c0_123, %c128_124] : memref<18x16x384xbf16, #tpu.memory_space<vmem>>, vector<16x16x128xbf16>
    tpu.vector_store %arg18[%c1_122, %c0_123, %c128_124], %112 {strides = array<i32>} : memref<18x16x384xbf16, #tpu.memory_space<vmem>>, vector<16x16x128xbf16>,
    %114 = vector.extract_strided_slice %112 {offsets = [0, 0, 0], sizes = [16, 15, 128], strides = [1, 1, 1]} : vector<16x16x128xbf16> to vector<16x15x128xbf16>
    %c1_125 = arith.constant 1 : index
    %c1_126 = arith.constant 1 : index
    %c0_127 = arith.constant 0 : index
    %115 = vector.load %arg18[%c1_125, %c1_126, %c0_127] : memref<18x16x384xbf16, #tpu.memory_space<vmem>>, vector<16x15x128xbf16>
    tpu.vector_store %arg18[%c1_125, %c1_126, %c0_127], %114 {strides = array<i32>} : memref<18x16x384xbf16, #tpu.memory_space<vmem>>, vector<16x15x128xbf16>,
    %116 = vector.extract_strided_slice %112 {offsets = [0, 1, 0], sizes = [16, 15, 128], strides = [1, 1, 1]} : vector<16x16x128xbf16> to vector<16x15x128xbf16>
    %c1_128 = arith.constant 1 : index
    %c0_129 = arith.constant 0 : index
    %c256_130 = arith.constant 256 : index
    %117 = vector.load %arg18[%c1_128, %c0_129, %c256_130] : memref<18x16x384xbf16, #tpu.memory_space<vmem>>, vector<16x15x128xbf16>
    tpu.vector_store %arg18[%c1_128, %c0_129, %c256_130], %116 {strides = array<i32>} : memref<18x16x384xbf16, #tpu.memory_space<vmem>>, vector<16x15x128xbf16>,
    %c0_131 = arith.constant 0 : index
    %c0_132 = arith.constant 0 : index
    %c0_133 = arith.constant 0 : index
    %118 = vector.load %arg18[%c0_131, %c0_132, %c0_133] : memref<18x16x384xbf16, #tpu.memory_space<vmem>>, vector<16x16x384xbf16>
    %119 = vector.shape_cast %118 : vector<16x16x384xbf16> to vector<256x384xbf16>
    %c0_134 = arith.constant 0 : index
    %c0_135 = arith.constant 0 : index
    %c0_136 = arith.constant 0 : index
    %120 = vector.load %arg12[%c0_134, %c0_135, %c0_136] : memref<3x384x128xbf16, #tpu.memory_space<vmem>>, vector<1x384x128xbf16>
    %121 = vector.shape_cast %120 : vector<1x384x128xbf16> to vector<384x128xbf16>
    %cst_137 = arith.constant dense<0.000000e+00> : vector<256x128xf32>
    %122 = tpu.matmul %119, %121, %cst_137 {dimension_numbers = #tpu.dot_dimension_numbers<[1], [0], [0], [1], [0, 0, 1, 1], [], []>} : vector<256x384xbf16>, vector<384x128xbf16>, vector<256x128xf32> -> vector<256x128xf32>
    %c0_138 = arith.constant 0 : index
    %c0_139 = arith.constant 0 : index
    %123 = vector.load %arg19[%c0_138, %c0_139] : memref<256x128xf32, #tpu.memory_space<vmem>>, vector<256x128xf32>
    tpu.vector_store %arg19[%c0_138, %c0_139], %122 {strides = array<i32>} : memref<256x128xf32, #tpu.memory_space<vmem>>, vector<256x128xf32>,
    %c0_140 = arith.constant 0 : index
    %c0_141 = arith.constant 0 : index
    %124 = vector.load %arg19[%c0_140, %c0_141] : memref<256x128xf32, #tpu.memory_space<vmem>>, vector<256x128xf32>
    %c1_142 = arith.constant 1 : index
    %c0_143 = arith.constant 0 : index
    %c0_144 = arith.constant 0 : index
    %125 = vector.load %arg18[%c1_142, %c0_143, %c0_144] : memref<18x16x384xbf16, #tpu.memory_space<vmem>>, vector<16x16x384xbf16>
    %126 = vector.shape_cast %125 : vector<16x16x384xbf16> to vector<256x384xbf16>
    %c1_145 = arith.constant 1 : index
    %c0_146 = arith.constant 0 : index
    %c0_147 = arith.constant 0 : index
    %127 = vector.load %arg12[%c1_145, %c0_146, %c0_147] : memref<3x384x128xbf16, #tpu.memory_space<vmem>>, vector<1x384x128xbf16>
    %128 = vector.shape_cast %127 : vector<1x384x128xbf16> to vector<384x128xbf16>
    %cst_148 = arith.constant dense<0.000000e+00> : vector<256x128xf32>
    %129 = tpu.matmul %126, %128, %cst_148 {dimension_numbers = #tpu.dot_dimension_numbers<[1], [0], [0], [1], [0, 0, 1, 1], [], []>} : vector<256x384xbf16>, vector<384x128xbf16>, vector<256x128xf32> -> vector<256x128xf32>
    %130 = arith.addf %124, %129 : vector<256x128xf32>
    %c0_149 = arith.constant 0 : index
    %c0_150 = arith.constant 0 : index
    %131 = vector.load %arg19[%c0_149, %c0_150] : memref<256x128xf32, #tpu.memory_space<vmem>>, vector<256x128xf32>
    tpu.vector_store %arg19[%c0_149, %c0_150], %130 {strides = array<i32>} : memref<256x128xf32, #tpu.memory_space<vmem>>, vector<256x128xf32>,
    %c0_151 = arith.constant 0 : index
    %c0_152 = arith.constant 0 : index
    %132 = vector.load %arg19[%c0_151, %c0_152] : memref<256x128xf32, #tpu.memory_space<vmem>>, vector<256x128xf32>
    %c2_153 = arith.constant 2 : index
    %c0_154 = arith.constant 0 : index
    %c0_155 = arith.constant 0 : index
    %133 = vector.load %arg18[%c2_153, %c0_154, %c0_155] : memref<18x16x384xbf16, #tpu.memory_space<vmem>>, vector<16x16x384xbf16>
    %134 = vector.shape_cast %133 : vector<16x16x384xbf16> to vector<256x384xbf16>
    %c2_156 = arith.constant 2 : index
    %c0_157 = arith.constant 0 : index
    %c0_158 = arith.constant 0 : index
    %135 = vector.load %arg12[%c2_156, %c0_157, %c0_158] : memref<3x384x128xbf16, #tpu.memory_space<vmem>>, vector<1x384x128xbf16>
    %136 = vector.shape_cast %135 : vector<1x384x128xbf16> to vector<384x128xbf16>
    %cst_159 = arith.constant dense<0.000000e+00> : vector<256x128xf32>
    %137 = tpu.matmul %134, %136, %cst_159 {dimension_numbers = #tpu.dot_dimension_numbers<[1], [0], [0], [1], [0, 0, 1, 1], [], []>} : vector<256x384xbf16>, vector<384x128xbf16>, vector<256x128xf32> -> vector<256x128xf32>
    %138 = arith.addf %132, %137 : vector<256x128xf32>
    %c0_160 = arith.constant 0 : index
    %c0_161 = arith.constant 0 : index
    %139 = vector.load %arg19[%c0_160, %c0_161] : memref<256x128xf32, #tpu.memory_space<vmem>>, vector<256x128xf32>
    tpu.vector_store %arg19[%c0_160, %c0_161], %138 {strides = array<i32>} : memref<256x128xf32, #tpu.memory_space<vmem>>, vector<256x128xf32>,
    %c0_162 = arith.constant 0 : index
    %c0_163 = arith.constant 0 : index
    %140 = vector.load %arg19[%c0_162, %c0_163] : memref<256x128xf32, #tpu.memory_space<vmem>>, vector<256x128xf32>
    %c0_164 = arith.constant 0 : index
    %c0_165 = arith.constant 0 : index
    %141 = vector.load %arg13[%c0_164, %c0_165] : memref<1x128xf32, #tpu.memory_space<vmem>>, vector<1x128xf32>
    %142 = vector.broadcast %141 : vector<1x128xf32> to vector<256x128xf32>
    %143 = arith.addf %140, %142 : vector<256x128xf32>
    %cst_166 = arith.constant 1.000000e-01 : f32
    %144 = vector.broadcast %cst_166 : f32 to vector<256x128xf32>
    %145 = arith.mulf %144, %143 : vector<256x128xf32>
    %146 = arith.maximumf %143, %145 : vector<256x128xf32>
    %147 = arith.truncf %146 : vector<256x128xf32> to vector<256x128xbf16>
    %c0_167 = arith.constant 0 : index
    %c0_168 = arith.constant 0 : index
    %148 = vector.load %arg14[%c0_167, %c0_168] : memref<128x128xbf16, #tpu.memory_space<vmem>>, vector<128x128xbf16>
    %cst_169 = arith.constant dense<0.000000e+00> : vector<256x128xf32>
    %149 = tpu.matmul %147, %148, %cst_169 {dimension_numbers = #tpu.dot_dimension_numbers<[1], [0], [0], [1], [0, 0, 1, 1], [], []>} : vector<256x128xbf16>, vector<128x128xbf16>, vector<256x128xf32> -> vector<256x128xf32>
    %c0_170 = arith.constant 0 : index
    %c0_171 = arith.constant 0 : index
    %150 = vector.load %arg15[%c0_170, %c0_171] : memref<1x128xf32, #tpu.memory_space<vmem>>, vector<1x128xf32>
    %151 = vector.broadcast %150 : vector<1x128xf32> to vector<256x128xf32>
    %152 = arith.addf %149, %151 : vector<256x128xf32>
    %153 = vector.shape_cast %152 : vector<256x128xf32> to vector<16x16x128xf32>
    %c0_172 = arith.constant 0 : index
    %c0_173 = arith.constant 0 : index
    %c0_174 = arith.constant 0 : index
    %c0_175 = arith.constant 0 : index
    %154 = vector.load %arg17[%c0_172, %c0_173, %c0_174, %c0_175] : memref<1x16x16x128xf32, #tpu.memory_space<vmem>>, vector<1x16x16x128xf32>
    %155 = vector.shape_cast %154 : vector<1x16x16x128xf32> to vector<16x16x128xf32>
    %156 = vector.shape_cast %153 : vector<16x16x128xf32> to vector<1x16x16x128xf32>
    tpu.vector_store %arg17[%c0_172, %c0_173, %c0_174, %c0_175], %156 {strides = array<i32>} : memref<1x16x16x128xf32, #tpu.memory_space<vmem>>, vector<1x16x16x128xf32>,
    return
  }
  func.func @transform_0(%arg0: i32) -> (i32, i32, i32, i32) {
    %c0_i32 = arith.constant 0 : i32
    %c0_i32_0 = arith.constant 0 : i32
    %c0_i32_1 = arith.constant 0 : i32
    %c0_i32_2 = arith.constant 0 : i32
    return %arg0, %c0_i32, %c0_i32_0, %c0_i32_1 : i32, i32, i32, i32
  }
  func.func @transform_1(%arg0: i32) -> (i32, i32) {
    %c0_i32 = arith.constant 0 : i32
    %c0_i32_0 = arith.constant 0 : i32
    %c0_i32_1 = arith.constant 0 : i32
    return %c0_i32, %c0_i32_0 : i32, i32
  }
  func.func @transform_2(%arg0: i32) -> (i32, i32) {
    %c0_i32 = arith.constant 0 : i32
    %c0_i32_0 = arith.constant 0 : i32
    %c0_i32_1 = arith.constant 0 : i32
    return %c0_i32, %c0_i32_0 : i32, i32
  }
  func.func @transform_3(%arg0: i32) -> (i32, i32, i32) {
    %c0_i32 = arith.constant 0 : i32
    %c0_i32_0 = arith.constant 0 : i32
    %c0_i32_1 = arith.constant 0 : i32
    %c0_i32_2 = arith.constant 0 : i32
    return %c0_i32, %c0_i32_0, %c0_i32_1 : i32, i32, i32
  }
  func.func @transform_4(%arg0: i32) -> (i32, i32) {
    %c0_i32 = arith.constant 0 : i32
    %c0_i32_0 = arith.constant 0 : i32
    %c0_i32_1 = arith.constant 0 : i32
    return %c0_i32, %c0_i32_0 : i32, i32
  }
  func.func @transform_5(%arg0: i32) -> (i32, i32) {
    %c0_i32 = arith.constant 0 : i32
    %c0_i32_0 = arith.constant 0 : i32
    %c0_i32_1 = arith.constant 0 : i32
    return %c0_i32, %c0_i32_0 : i32, i32
  }
  func.func @transform_6(%arg0: i32) -> (i32, i32) {
    %c0_i32 = arith.constant 0 : i32
    %c0_i32_0 = arith.constant 0 : i32
    %c0_i32_1 = arith.constant 0 : i32
    return %c0_i32, %c0_i32_0 : i32, i32
  }
  func.func @transform_7(%arg0: i32) -> (i32, i32, i32) {
    %c0_i32 = arith.constant 0 : i32
    %c0_i32_0 = arith.constant 0 : i32
    %c0_i32_1 = arith.constant 0 : i32
    %c0_i32_2 = arith.constant 0 : i32
    return %c0_i32, %c0_i32_0, %c0_i32_1 : i32, i32, i32
  }
  func.func @transform_8(%arg0: i32) -> (i32, i32) {
    %c0_i32 = arith.constant 0 : i32
    %c0_i32_0 = arith.constant 0 : i32
    %c0_i32_1 = arith.constant 0 : i32
    return %c0_i32, %c0_i32_0 : i32, i32
  }
  func.func @transform_9(%arg0: i32) -> (i32, i32) {
    %c0_i32 = arith.constant 0 : i32
    %c0_i32_0 = arith.constant 0 : i32
    %c0_i32_1 = arith.constant 0 : i32
    return %c0_i32, %c0_i32_0 : i32, i32
  }
  func.func @transform_10(%arg0: i32) -> (i32, i32) {
    %c0_i32 = arith.constant 0 : i32
    %c0_i32_0 = arith.constant 0 : i32
    %c0_i32_1 = arith.constant 0 : i32
    return %c0_i32, %c0_i32_0 : i32, i32
  }
  func.func @transform_11(%arg0: i32) -> (i32, i32, i32) {
    %c0_i32 = arith.constant 0 : i32
    %c0_i32_0 = arith.constant 0 : i32
    %c0_i32_1 = arith.constant 0 : i32
    %c0_i32_2 = arith.constant 0 : i32
    return %c0_i32, %c0_i32_0, %c0_i32_1 : i32, i32, i32
  }
  func.func @transform_12(%arg0: i32) -> (i32, i32) {
    %c0_i32 = arith.constant 0 : i32
    %c0_i32_0 = arith.constant 0 : i32
    %c0_i32_1 = arith.constant 0 : i32
    return %c0_i32, %c0_i32_0 : i32, i32
  }
  func.func @transform_13(%arg0: i32) -> (i32, i32) {
    %c0_i32 = arith.constant 0 : i32
    %c0_i32_0 = arith.constant 0 : i32
    %c0_i32_1 = arith.constant 0 : i32
    return %c0_i32, %c0_i32_0 : i32, i32
  }
  func.func @transform_14(%arg0: i32) -> (i32, i32) {
    %c0_i32 = arith.constant 0 : i32
    %c0_i32_0 = arith.constant 0 : i32
    %c0_i32_1 = arith.constant 0 : i32
    return %c0_i32, %c0_i32_0 : i32, i32
  }
  func.func @transform_15(%arg0: i32) -> (i32, i32, i32, i32) {
    %c0_i32 = arith.constant 0 : i32
    %c0_i32_0 = arith.constant 0 : i32
    %c0_i32_1 = arith.constant 0 : i32
    %c0_i32_2 = arith.constant 0 : i32
    return %arg0, %c0_i32, %c0_i32_0, %c0_i32_1 : i32, i32, i32, i32
  }
  func.func @transform_16(%arg0: i32) -> (i32, i32, i32, i32) {
    %c0_i32 = arith.constant 0 : i32
    %c0_i32_0 = arith.constant 0 : i32
    %c0_i32_1 = arith.constant 0 : i32
    %c0_i32_2 = arith.constant 0 : i32
    return %arg0, %c0_i32, %c0_i32_0, %c0_i32_1 : i32, i32, i32, i32
  }
}

</mosaic_0001>

<bundles_post_ra>
// kernel: yolo_branch_forward.1
= control target key start
LH: loop header
LB: loop body
LE: loop exit
PB: predicated region body
PF: predicated region fallthrough
CT: control target
= control target key end

     0   :  { %s15266_s0 = inlined_call_operand.vmem [shape: bf16[2,16,16,128], index: 0, kind: input, shape index: {}]   ;;  %s15267_s1 = inlined_call_operand.vmem [shape: bf16[128,128], index: 1, kind: input, shape index: {}]   ;;  %s15268_s2 = inlined_call_operand.vmem [shape: f32[1,128], index: 2, kind: input, shape index: {}]   ;;  %s15269_s3 = inlined_call_operand.vmem [shape: bf16[3,384,128], index: 3, kind: input, shape index: {}]   ;;  %s15270_s4 = inlined_call_operand.vmem [shape: f32[1,128], index: 4, kind: input, shape index: {}]   ;;  %s15271_s5 = inlined_call_operand.vmem [shape: bf16[128,128], index: 5, kind: input, shape index: {}]   ;;  %s15272_s6 = inlined_call_operand.vmem [shape: f32[1,128], index: 6, kind: input, shape index: {}]   ;;  %s15273_s7 = inlined_call_operand.hbm [shape: bf16[3,384,128], index: 7, kind: input, shape index: {}]   ;;  %s15274_s8 = inlined_call_operand.vmem [shape: f32[1,128], index: 8, kind: input, shape index: {}]   ;;  %s15275_s9 = inlined_call_operand.vmem [shape: bf16[128,128], index: 9, kind: input, shape index: {}]   ;;  %s15276_s10 = inlined_call_operand.vmem [shape: f32[1,128], index: 10, kind: input, shape index: {}]   ;;  %s15277_s11 = inlined_call_operand.hbm [shape: bf16[3,384,128], index: 11, kind: input, shape index: {}]   ;;  %s15278_s12 = inlined_call_operand.vmem [shape: f32[1,128], index: 12, kind: input, shape index: {}]   ;;  %s15279_s13 = inlined_call_operand.vmem [shape: bf16[128,128], index: 13, kind: input, shape index: {}]   ;;  %s15280_s14 = inlined_call_operand.vmem [shape: f32[1,128], index: 14, kind: input, shape index: {}]   ;;  %s15281_s15 = inlined_call_operand.vmem [shape: f32[2,16,16,128], index: 15, kind: output, shape index: {0}]   ;;  %s15282_s16 = inlined_call_operand.vmem [shape: f32[2,16,16,128], index: 16, kind: output, shape index: {1}]  }
   0x1   :  { %15286 = sst [smem:[#allocation11_spill]] %s15266_s0 }
   0x2   :  { %15287 = sst [smem:[#allocation12_spill]] %s15282_s16 }
   0x3   :  { %22 = vsyncpa [#allocation5], 0 }
   0x4   :  { %23 = vsyncpa [#allocation7], 0  ;;  %s12507_s21 = smov 0  }
   0x5 LB: > { %15288 = sst [smem:[#allocation10_spill]] %s12415_s21  ;;  %s12513_s22 = sadd.s32 4294967295, %s12415_s21   ;;  %s12415_s21 = sphi %s12507_s21, %s29_s21  }
   0x6   : > { %p9219_p0 = scmp.ge.s32.totalorder %s12415_s21, 1  ;;  %p406_p1 = scmp.lt.s32.totalorder %s12415_s21, 3 }
   0x7   : > { %s12417_s23 = smov [#allocation4]   ;;  %p15283_p3 = scmp.eq.s32.totalorder %s12513_s22, 0 }
   0x8   : > { %s436_s24 = sshll.u32 %s12417_s23, 4  ;;  %p12517_p2 = pnand %p9219_p0, %p406_p1  ;;  %s437_s24 = int_to_ptr.vmem [resolvable:$true] %s436_s24 }
   0x9   : > { %s12418_s26 = smov [#allocation6]   ;;  %s12345_s0 = scalar_lea.hbm %s15273_s7, 9216 }
   0xa   : > { %s15289_s25 = scalar_select %p12517_p2, 1, 0 }
   0xb   : > { %p12052_p4 = pneg %p12517_p2  ;;  %s458_s27 = sshll.u32 %s12418_s26, 4  ;;  %s12530_s27 = int_to_ptr.vmem [resolvable:$true] %s458_s27 }
   0xc   : > { %p12346_p6 = scmp.ne.s32.totalorder %s15273_s7, %s12345_s0  ;;  %p12352_p10 = scmp.lt.u32.totalorder %s12345_s0, %s15273_s7 }
   0xd   : > { %p12526_p5 = pnand %p15283_p3, %p12052_p4 }
   0xf   : > { %p12347_p7 = pneg %p12526_p5 }
  0x11   : > { %p12348_p8 = pnand %p12347_p7, %p12346_p6 }
  0x13   : > { %p12349_p9 = pneg %p12348_p8 }
  0x15   : > { %p12354_p11 = pnand %p12352_p10, %p12349_p9 }
  0x17   : > { %12357 = shalt.err (!%p12354_p11)
}
  0x18   : > { %s12358_s23 = scalar_lea.vmem %s437_s24, 9216  ;;  %p12366_p1 = scmp.lt.s32.totalorder %s437_s24, %s437_s24 }
  0x19   : > { %p12359_p12 = scmp.ne.s32.totalorder %s437_s24, %s12358_s23  ;;  %p12367_p4 = scmp.lt.s32.totalorder %s12358_s23, %s12358_s23 }
  0x1b   : > { %p12361_p13 = pnand %p12359_p12, %p12347_p7  ;;  %p12368_p3 = por %p12367_p4, %p12366_p1 }
  0x1d   : > { %p12362_p0 = pneg %p12361_p13 }
  0x1f   : > { %p12369_p2 = pnand %p12368_p3, %p12362_p0 }
  0x21   : > { %12372 = shalt.err (!%p12369_p2)
}
  0x22   : > { %s12419_s26 = smov 64   ;;  %s12420_s29 = smov 4  }
  0x23   : > { %12055 = dma.hbm_to_vmem [thread:$0]  (!%p12526_p5), %s15273_s7, 9216, %s437_s24, [#allocation5], %s12419_s26, %s12419_s26, %s12420_s29  }
  0x24   : > { %s12373_s19 = scalar_lea.hbm %s15277_s11, 9216 }
  0x25   : > { %p12374_p6 = scmp.ne.s32.totalorder %s15277_s11, %s12373_s19  ;;  %p12380_p8 = scmp.lt.u32.totalorder %s12373_s19, %s15277_s11 }
  0x27   : > { %p12376_p2 = pnand %p12374_p6, %p12347_p7 }
  0x29   : > { %p12377_p3 = pneg %p12376_p2 }
  0x2b   : > { %p12382_p9 = pnand %p12380_p8, %p12377_p3 }
  0x2d   : > { %12385 = shalt.err (!%p12382_p9)
}
  0x2e   : > { %s12386_s24 = scalar_lea.vmem %s12530_s27, 9216  ;;  %p12394_p13 = scmp.lt.s32.totalorder %s12530_s27, %s12530_s27 }
  0x2f   : > { %p12387_p10 = scmp.ne.s32.totalorder %s12530_s27, %s12386_s24  ;;  %p12395_p0 = scmp.lt.s32.totalorder %s12386_s24, %s12386_s24 }
  0x31   : > { %p12389_p11 = pnand %p12387_p10, %p12347_p7  ;;  %p12396_p1 = por %p12395_p0, %p12394_p13 }
  0x33   : > { %p12390_p12 = pneg %p12389_p11 }
  0x35   : > { %p12397_p4 = pnand %p12396_p1, %p12390_p12 }
  0x37   : > { %12400 = shalt.err (!%p12397_p4)
}
  0x38   : > { %12058 = dma.hbm_to_vmem [thread:$0]  (!%p12526_p5), %s15277_s11, 9216, %s12530_s27, [#allocation7], %s12419_s26, %s12419_s26, %s12420_s29  }
  0x39   : > { %p15291_p6 = scmp.ne.s32.totalorder %s15289_s25, 0 }
  0x3a   : > { %p15292_p2 = scmp.eq.s32.totalorder (!%p15291_p6), %s12513_s22, 0 }
  0x3b   : > { %491 = sbr.rel (%p15291_p6) target bundleno = 2519 (0x9d7), region = 80 }
  0x42   : > { %12406 = dma.done.wait (%p15292_p2), [#allocation5], 9216   ;;  %p15293_p7 = pmov %p15292_p2 }
  0x43   : > { %p15294_p3 = pmov %p15292_p2 }
  0x44   : > { %12408 = vsyncadd (%p15293_p7), [#allocation5], 4294958080 }
  0x45   : > { %12410 = dma.done.wait (%p15294_p3), [#allocation7], 9216   ;;  %p15295_p8 = pmov %p15292_p2 }
  0x46   : > { %p550_p9 = scmp.lt.s32.totalorder %s12513_s22, 1  ;;  %v12076_v0 = vld [vmem:[%s15267_s1] sm:$0xff]   ;;  %v12077_v1 = vld [vmem:[%s15267_s1 + $0x8] sm:$0xff]   ;;  %v12078_v2 = vld [vmem:[%s15267_s1 + $0x10] sm:$0xff]   ;;  %s15296_s19 = sld [smem:[#allocation11_spill]]  ;;  %v12421_v37 = vmov 0  }
  0x47   : > { %12412 = vsyncadd (%p15295_p8), [#allocation7], 4294958080  ;;  %10924 = vmatprep.subr.bf16.mxu0 %v12076_v0  ;;  %11548 = vmatprep.subr.bf16.mxu1 %v12076_v0  ;;  %v12079_v3 = vld [vmem:[%s15267_s1 + $0x18] sm:$0xff]   ;;  %v12080_v5 = vld [vmem:[%s15267_s1 + $0x20] sm:$0xff]   ;;  %567 = vst [vmem:[#allocation2 + $0x8] sm:$0xff] %v12421_v37  ;;  %vm573_vm0 = vcmask 1040384  }
  0x48   : > { %s15308_s22 = smov (!%p550_p9, %s12513_s22), 1  ;;  %10925 = vmatpush3.bf16.msra.mxu0 %v12076_v0  ;;  %11556 = vmatpush3.bf16.msra.mxu1 %v12076_v0  ;;  %v12081_v6 = vld [vmem:[%s15267_s1 + $0x28] sm:$0xff]   ;;  %v12082_v8 = vld [vmem:[%s15267_s1 + $0x30] sm:$0xff]   ;;  %v12083_v9 = vld [vmem:[%s15267_s1 + $0x38] sm:$0xff]   ;;  %566 = vst [vmem:[#allocation2] sm:$0xff] %v12421_v37  ;;  %vm630_vm3 = vcmask 1047559  }
  0x49   : > { %s9601_s29 = sshll.u32 %s15308_s22, 7  ;;  %10926 = vmatprep.subr.bf16.mxu0 %v12077_v1  ;;  %11549 = vmatprep.subr.bf16.mxu1 %v12077_v1  ;;  %v12100_v10 = vld [vmem:[%s15269_s3 + $0x40] sm:$0xff]   ;;  %v12102_v17 = vld [vmem:[%s15269_s3 + $0x48] sm:$0xff]   ;;  %v12105_v20 = vld [vmem:[%s15269_s3 + $0x50] sm:$0xff]   ;;  %568 = vst [vmem:[#allocation2 + $0x10] sm:$0xff] %v12421_v37  ;;  %vm1272_vm6 = vcmask 1047552  }
  0x4a   : > { %v12104_v13 = vld [vmem:[%s15269_s3 + $0x80] sm:$0xff]   ;;  %v12107_v18 = vld [vmem:[%s15269_s3 + $0x88] sm:$0xff]   ;;  %v12106_v25 = vld [vmem:[%s15269_s3 + $0x10] sm:$0xff]   ;;  %570 = vst [vmem:[#allocation2 + $0x198] sm:$0xff] %v12421_v37  ;;  %vm574_vm1 = vsmask.f32 256 }
  0x4b   : > { %v12101_v16 = vld [vmem:[%s15269_s3] sm:$0xff]   ;;  %v12103_v19 = vld [vmem:[%s15269_s3 + $0x8] sm:$0xff]   ;;  %v12108_v26 = vld [vmem:[%s15269_s3 + $0x58] sm:$0xff]   ;;  %572 = vst [vmem:[#allocation2 + $0x1a8] sm:$0xff] %v12421_v37  ;;  %vm631_vm4 = vsmask.f32 7966 }
  0x4c   : > { %s12606_s20 = scalar_lea.vmem %s15296_s19, %s9601_s29  ;;  %10927 = vmatpush3.bf16.msra.mxu0 %v12077_v1  ;;  %11557 = vmatpush3.bf16.msra.mxu1 %v12077_v1  ;;  %v12109_v33 = vld [vmem:[%s15269_s3 + $0x18] sm:$0xff]   ;;  %v12110_v34 = vld [vmem:[%s15269_s3 + $0x90] sm:$0xff]   ;;  %v12111_v35 = vld [vmem:[%s15269_s3 + $0x60] sm:$0xff]   ;;  %vm1273_vm7 = vsmask.f32 7938  ;;  %s9602_s21 = sshll.u32 %s15308_s22, 8 }
  0x4d   : > { %10928 = vmatprep.subr.bf16.mxu0 %v12078_v2  ;;  %v12084_v4 = vld [vmem:[%s12606_s20] sm:$0xff]   ;;  %11550 = vmatprep.subr.bf16.mxu1 %v12078_v2  ;;  %v12085_v11 = vld [vmem:[%s12606_s20 + $0x8] sm:$0xff]   ;;  %v12086_v14 = vld [vmem:[%s12606_s20 + $0x10] sm:$0xff]   ;;  %vm1371_vm8 = vsmask.f32 7424  ;;  %s14462_s28 = scalar_lea.vmem %s15281_s15, %s9602_s21  ;;  %s15305_s23 = sld [smem:[#allocation12_spill]] }
  0x4e   : > { %10940 = vmatprep.mubr.bf16.mxu0 %v12084_v4  ;;  %v12092_v7 = vld [vmem:[%s12606_s20 + $0x40] sm:$0xff]   ;;  %v12093_v12 = vld [vmem:[%s12606_s20 + $0x48] sm:$0xff]   ;;  %v12094_v15 = vld [vmem:[%s12606_s20 + $0x50] sm:$0xff]  }
  0x4f   : > { %10956 = vmatprep.mubr.bf16.mxu1 %v12092_v7  ;;  %v12087_v21 = vld [vmem:[%s12606_s20 + $0x18] sm:$0xff]   ;;  %v12088_v23 = vld [vmem:[%s12606_s20 + $0x20] sm:$0xff]   ;;  %v12089_v27 = vld [vmem:[%s12606_s20 + $0x28] sm:$0xff]  }
  0x50   : > { %10929 = vmatpush3.bf16.msra.mxu0 %v12078_v2  ;;  %11558 = vmatpush3.bf16.msra.mxu1 %v12078_v2  ;;  %v12095_v22 = vld [vmem:[%s12606_s20 + $0x58] sm:$0xff]   ;;  %v12096_v24 = vld [vmem:[%s12606_s20 + $0x60] sm:$0xff]   ;;  %v12097_v28 = vld [vmem:[%s12606_s20 + $0x68] sm:$0xff]  }
  0x51   : > { %10930 = vmatprep.subr.bf16.mxu0 %v12079_v3  ;;  %11551 = vmatprep.subr.bf16.mxu1 %v12079_v3  ;;  %v12090_v29 = vld [vmem:[%s12606_s20 + $0x30] sm:$0xff]   ;;  %v12091_v31 = vld [vmem:[%s12606_s20 + $0x38] sm:$0xff]   ;;  %v12112_v36 = vld [vmem:[%s15269_s3 + $0x20] sm:$0xff]  }
  0x52   : > { %v12098_v30 = vld [vmem:[%s12606_s20 + $0x70] sm:$0xff]   ;;  %v12099_v32 = vld [vmem:[%s12606_s20 + $0x78] sm:$0xff]   ;;  %v12114_v39 = vld [vmem:[%s15269_s3 + $0x68] sm:$0xff]  }
  0x53   : > { %v12113_v38 = vld [vmem:[%s15269_s3 + $0x98] sm:$0xff]   ;;  %v12115_v40 = vld [vmem:[%s15269_s3 + $0x28] sm:$0xff]   ;;  %vm12687_vm2 = vmand %vm573_vm0, %vm574_vm1  ;;  %s15197_s24 = scalar_lea.vmem %s15305_s23, %s9602_s21 }
  0x54   : > { %10931 = vmatpush3.bf16.msra.mxu0 %v12079_v3  ;;  %11559 = vmatpush3.bf16.msra.mxu1 %v12079_v3  ;;  %v12116_v42 = vld [vmem:[%s15269_s3 + $0xa0] sm:$0xff]   ;;  %v12117_v43 = vld [vmem:[%s15269_s3 + $0x70] sm:$0xff]   ;;  %v12119_v47 = vld [vmem:[%s15269_s3 + $0xa8] sm:$0xff]  }
  0x55   : > { %10932 = vmatprep.subr.bf16.mxu0 %v12080_v5  ;;  %11552 = vmatprep.subr.bf16.mxu1 %v12080_v5  ;;  %v12118_v44 = vld [vmem:[%s15269_s3 + $0x30] sm:$0xff]   ;;  %v576_v45 = vld [vmem:[#allocation2] sm:$0x1]  ;;  %v12120_v48 = vld [vmem:[%s15269_s3 + $0x78] sm:$0xff]  }
  0x56   : > { %v577_v46 = vsel %vm12687_vm2, 0, %v576_v45  ;;  %v582_v49 = vld [vmem:[#allocation2 + $0x30] sm:$0x1]  ;;  %v12121_v50 = vld [vmem:[%s15269_s3 + $0x38] sm:$0xff]   ;;  %vm12713_vm5 = vmand %vm630_vm3, %vm631_vm4 }
  0x57   : > { %578 = vst [vmem:[#allocation2] sm:$0x1] %v577_v46  ;;  %v583_v51 = vsel %vm12687_vm2, 0, %v582_v49  ;;  %v639_v53 = vld [vmem:[#allocation2 + $0x40] sm:$0x80]  ;;  %v12122_v59 = vld [vmem:[%s15269_s3 + $0xb0] sm:$0xff]   ;;  %vm12877_vm9 = vmand %vm1272_vm6, %vm1273_vm7 }
  0x58   : > { %10933 = vmatpush3.bf16.msra.mxu0 %v12080_v5  ;;  %11560 = vmatpush3.bf16.msra.mxu1 %v12080_v5  ;;  %584 = vst [vmem:[#allocation2 + $0x30] sm:$0x1] %v583_v51  ;;  %v640_v54 = vsel %vm12713_vm5, 0, %v639_v53  ;;  %v579_v55 = vld [vmem:[#allocation2 + $0x18] sm:$0x1]  ;;  %vm12883_vm10 = vmand %vm1272_vm6, %vm1371_vm8 }
  0x59   : > { %10934 = vmatprep.subr.bf16.mxu0 %v12081_v6  ;;  %11553 = vmatprep.subr.bf16.mxu1 %v12081_v6  ;;  %v636_v56 = vld [vmem:[#allocation2 + $0x28] sm:$0x80]  ;;  %641 = vst [vmem:[#allocation2 + $0x40] sm:$0x80] %v640_v54  ;;  %v580_v57 = vsel %vm12687_vm2, 0, %v579_v55  ;;  %v12123_v63 = vld [vmem:[%s15269_s3 + $0xb8] sm:$0xff]  }
  0x5a   : > { %v637_v58 = vsel %vm12713_vm5, 0, %v636_v56  ;;  %v633_v60 = vld [vmem:[#allocation2 + $0x10] sm:$0x80]  ;;  %581 = vst [vmem:[#allocation2 + $0x18] sm:$0x1] %v580_v57 }
  0x5b   : > { %638 = vst [vmem:[#allocation2 + $0x28] sm:$0x80] %v637_v58  ;;  %v634_v61 = vsel %vm12713_vm5, 0, %v633_v60  ;;  %v588_v0 = vld [vmem:[#allocation2 + $0x60] sm:$0x1] }
  0x5c   : > { %10935 = vmatpush3.bf16.msra.mxu0 %v12081_v6  ;;  %11561 = vmatpush3.bf16.msra.mxu1 %v12081_v6  ;;  %635 = vst [vmem:[#allocation2 + $0x10] sm:$0x80] %v634_v61  ;;  %v589_v1 = vsel %vm12687_vm2, 0, %v588_v0  ;;  %v645_v2 = vld [vmem:[#allocation2 + $0x70] sm:$0x80]  ;;  %v12140_v60 = vld [vmem:[%s15269_s3 + $0x1c0] sm:$0xff]  }
  0x5d   : > { %10936 = vmatprep.subr.bf16.mxu0 %v12082_v8  ;;  %11554 = vmatprep.subr.bf16.mxu1 %v12082_v8  ;;  %590 = vst [vmem:[#allocation2 + $0x60] sm:$0x1] %v589_v1  ;;  %v585_v3 = vld [vmem:[#allocation2 + $0x48] sm:$0x1]  ;;  %v642_v4 = vld [vmem:[#allocation2 + $0x58] sm:$0x80] }
  0x5e   : > { %v1421_v62 = vld [vmem:[#allocation2] sm:$0xff]  ;;  %v646_v5 = vsel %vm12713_vm5, 0, %v645_v2  ;;  %v586_v6 = vsel %vm12687_vm2, 0, %v585_v3  ;;  %v643_v7 = vsel %vm12713_vm5, 0, %v642_v4  ;;  %v681_v53 = vld [vmem:[#allocation2 + $0x190] sm:$0x80] }
  0x5f   : > { %647 = vst [vmem:[#allocation2 + $0x70] sm:$0x80] %v646_v5  ;;  %587 = vst [vmem:[#allocation2 + $0x48] sm:$0x1] %v586_v6  ;;  %v624_v51 = vld [vmem:[#allocation2 + $0x180] sm:$0x1] }
  0x60   : > { %10937 = vmatpush3.bf16.msra.mxu0 %v12082_v8  ;;  %11562 = vmatpush3.bf16.msra.mxu1 %v12082_v8  ;;  %644 = vst [vmem:[#allocation2 + $0x58] sm:$0x80] %v643_v7  ;;  %v625_v54 = vsel %vm12687_vm2, 0, %v624_v51  ;;  %v682_v55 = vsel %vm12713_vm5, 0, %v681_v53  ;;  %v621_v56 = vld [vmem:[#allocation2 + $0x168] sm:$0x1] }
  0x61   : > { %10938 = vmatprep.subr.bf16.mxu0 %v12083_v9  ;;  %11555 = vmatprep.subr.bf16.mxu1 %v12083_v9  ;;  %626 = vst [vmem:[#allocation2 + $0x180] sm:$0x1] %v625_v54  ;;  %683 = vst [vmem:[#allocation2 + $0x190] sm:$0x80] %v682_v55  ;;  %v622_v57 = vsel %vm12687_vm2, 0, %v621_v56  ;;  %v12141_v61 = vld [vmem:[%s15269_s3 + $0x180] sm:$0xff]  }
  0x62   : > { %v678_v58 = vld [vmem:[#allocation2 + $0x178] sm:$0x80]  ;;  %623 = vst [vmem:[#allocation2 + $0x168] sm:$0x1] %v622_v57  ;;  %v12146_v0 = vld [vmem:[%s15269_s3 + $0x1d0] sm:$0xff]   ;;  %v12151_v4 = vld [vmem:[%s15269_s3 + $0x1e0] sm:$0xff]  }
  0x63   : > { %v1423_v8 = vld [vmem:[#allocation2 + $0x10] sm:$0xff]  ;;  %v12149_v2 = vld [vmem:[%s15269_s3 + $0x1d8] sm:$0xff]   ;;  %v12152_v5 = vld [vmem:[%s15269_s3 + $0x1a0] sm:$0xff]  }
  0x64   : > { %10939 = vmatpush3.bf16.msra.mxu0 %v12083_v9  ;;  %11563 = vmatpush3.bf16.msra.mxu1 %v12083_v9  ;;  %v594_v9 = vld [vmem:[#allocation2 + $0x90] sm:$0x1]  ;;  %v12150_v3 = vld [vmem:[%s15269_s3 + $0x198] sm:$0xff]   ;;  %v12153_v6 = vld [vmem:[%s15269_s3 + $0x1e8] sm:$0xff]  }
  0x65   : > { %9628 = vmatprep.subr.bf16.mxu1 %v12100_v10  ;;  %10972 = vmatprep.subr.bf16.mxu0 %v12104_v13  ;;  %v651_v10 = vld [vmem:[#allocation2 + $0xa0] sm:$0x80]  ;;  %v12147_v1 = vld [vmem:[%s15269_s3 + $0x190] sm:$0xff]   ;;  %v12826_v7 = vld [vmem:[%s15268_s2] ss:$0 sm:$0xff] }
  0x67   : > { %10941 = vmatmul.mubr.bf16.vlgmr.msra.gmra.mrb[0].mxu0 %v12085_v11  ;;  %10957 = vmatmul.mubr.bf16.vlgmr.msra.gmra.mrb[0].mxu1 %v12093_v12  ;;  %v595_v11 = vsel %vm12687_vm2, 0, %v594_v9  ;;  %v652_v12 = vsel %vm12713_vm5, 0, %v651_v10 }
  0x68   : > { %10944 = vmatprep.mubr.bf16.mxu0 %v12086_v14  ;;  %10960 = vmatprep.mubr.bf16.mxu1 %v12094_v15  ;;  %v648_v14 = vld [vmem:[#allocation2 + $0x88] sm:$0x80]  ;;  %596 = vst [vmem:[#allocation2 + $0x90] sm:$0x1] %v595_v11  ;;  %653 = vst [vmem:[#allocation2 + $0xa0] sm:$0x80] %v652_v12 }
  0x69   : > { %9629 = vmatpush3.bf16.msra.mxu1 %v12101_v16  ;;  %10973 = vmatpush3.bf16.msra.mxu0 %v12104_v13  ;;  %v591_v13 = vld [vmem:[#allocation2 + $0x78] sm:$0x1]  ;;  %v649_v16 = vsel %vm12713_vm5, 0, %v648_v14 }
  0x6a   : > { %9630 = vmatprep.subr.bf16.mxu1 %v12102_v17  ;;  %10974 = vmatprep.subr.bf16.mxu0 %v12107_v18  ;;  %v592_v15 = vsel %vm12687_vm2, 0, %v591_v13  ;;  %650 = vst [vmem:[#allocation2 + $0x88] sm:$0x80] %v649_v16  ;;  %v600_v17 = vld [vmem:[#allocation2 + $0xc0] sm:$0x1] }
  0x6b   : > { %593 = vst [vmem:[#allocation2 + $0x78] sm:$0x1] %v592_v15 }
  0x6d   : > { %9631 = vmatpush3.bf16.msra.mxu1 %v12103_v19  ;;  %10975 = vmatpush3.bf16.msra.mxu0 %v12107_v18  ;;  %v657_v18 = vld [vmem:[#allocation2 + $0xd0] sm:$0x80]  ;;  %v601_v19 = vsel %vm12687_vm2, 0, %v600_v17 }
  0x6e   : > { %9632 = vmatprep.subr.bf16.mxu1 %v12105_v20  ;;  %10976 = vmatprep.subr.bf16.mxu0 %v12110_v34  ;;  %v658_v20 = vsel %vm12713_vm5, 0, %v657_v18  ;;  %602 = vst [vmem:[#allocation2 + $0xc0] sm:$0x1] %v601_v19 }
  0x6f   : > { %10945 = vmatmul.mubr.bf16.gmra.mrb[4].mxu0 %v12087_v21  ;;  %10961 = vmatmul.mubr.bf16.gmra.mrb[4].mxu1 %v12095_v22  ;;  %v597_v21 = vld [vmem:[#allocation2 + $0xa8] sm:$0x1]  ;;  %659 = vst [vmem:[#allocation2 + $0xd0] sm:$0x80] %v658_v20 }
  0x70   : > { %10948 = vmatprep.mubr.bf16.mxu0 %v12088_v23  ;;  %10964 = vmatprep.mubr.bf16.mxu1 %v12096_v24  ;;  %v598_v22 = vsel %vm12687_vm2, 0, %v597_v21  ;;  %v654_v23 = vld [vmem:[#allocation2 + $0xb8] sm:$0x80] }
  0x71   : > { %9633 = vmatpush3.bf16.msra.mxu1 %v12106_v25  ;;  %10977 = vmatpush3.bf16.msra.mxu0 %v12110_v34  ;;  %599 = vst [vmem:[#allocation2 + $0xa8] sm:$0x1] %v598_v22  ;;  %v655_v24 = vsel %vm12713_vm5, 0, %v654_v23  ;;  %v606_v25 = vld [vmem:[#allocation2 + $0xf0] sm:$0x1] }
  0x72   : > { %9634 = vmatprep.subr.bf16.mxu1 %v12108_v26  ;;  %10978 = vmatprep.subr.bf16.mxu0 %v12113_v38  ;;  %v663_v26 = vld [vmem:[#allocation2 + $0x100] sm:$0x80]  ;;  %656 = vst [vmem:[#allocation2 + $0xb8] sm:$0x80] %v655_v24  ;;  %v612_v34 = vld [vmem:[#allocation2 + $0x120] sm:$0x1] }
  0x75   : > { %9635 = vmatpush3.bf16.msra.mxu1 %v12109_v33  ;;  %10979 = vmatpush3.bf16.msra.mxu0 %v12113_v38  ;;  %v12124_v33 = vld [vmem:[%s15269_s3 + $0x100] sm:$0xff]   ;;  %v666_v38 = vld [vmem:[#allocation2 + $0x118] sm:$0x80] }
  0x76   : > { %9636 = vmatprep.subr.bf16.mxu1 %v12111_v35  ;;  %10980 = vmatprep.subr.bf16.mxu0 %v12116_v42  ;;  %v613_v35 = vsel %vm12687_vm2, 0, %v612_v34  ;;  %v12158_v34 = vld [vmem:[%s15269_s3 + $0x1f8] sm:$0xff]  }
  0x77   : > { %10949 = vmatmul.mubr.bf16.gmra.mrb[8].mxu0 %v12089_v27  ;;  %10965 = vmatmul.mubr.bf16.gmra.mrb[8].mxu1 %v12097_v28  ;;  %v607_v27 = vsel %vm12687_vm2, 0, %v606_v25  ;;  %v664_v28 = vsel %vm12713_vm5, 0, %v663_v26  ;;  %614 = vst [vmem:[#allocation2 + $0x120] sm:$0x1] %v613_v35 }
  0x78   : > { %10952 = vmatprep.mubr.bf16.mxu0 %v12090_v29  ;;  %10968 = vmatprep.mubr.bf16.mxu1 %v12098_v30  ;;  %v603_v29 = vld [vmem:[#allocation2 + $0xd8] sm:$0x1]  ;;  %v660_v30 = vld [vmem:[#allocation2 + $0xe8] sm:$0x80]  ;;  %608 = vst [vmem:[#allocation2 + $0xf0] sm:$0x1] %v607_v27 }
  0x79   : > { %9637 = vmatpush3.bf16.msra.mxu1 %v12112_v36  ;;  %10981 = vmatpush3.bf16.msra.mxu0 %v12116_v42  ;;  %665 = vst [vmem:[#allocation2 + $0x100] sm:$0x80] %v664_v28  ;;  %v669_v36 = vld [vmem:[#allocation2 + $0x130] sm:$0x80]  ;;  %v667_v42 = vsel %vm12713_vm5, 0, %v666_v38 }
  0x7a   : > { %9638 = vmatprep.subr.bf16.mxu1 %v12114_v39  ;;  %10982 = vmatprep.subr.bf16.mxu0 %v12119_v47  ;;  %v670_v39 = vsel %vm12713_vm5, 0, %v669_v36  ;;  %668 = vst [vmem:[#allocation2 + $0x118] sm:$0x80] %v667_v42  ;;  %v12159_v42 = vld [vmem:[%s15269_s3 + $0x1b8] sm:$0xff]  }
  0x7b   : > { %671 = vst [vmem:[#allocation2 + $0x130] sm:$0x80] %v670_v39 }
  0x7d   : > { %9639 = vmatpush3.bf16.msra.mxu1 %v12115_v40  ;;  %10983 = vmatpush3.bf16.msra.mxu0 %v12119_v47  ;;  %v615_v47 = vld [vmem:[#allocation2 + $0x138] sm:$0x1] }
  0x7e   : > { %9640 = vmatprep.subr.bf16.mxu1 %v12117_v43  ;;  %10984 = vmatprep.subr.bf16.mxu0 %v12122_v59  ;;  %v618_v43 = vld [vmem:[#allocation2 + $0x150] sm:$0x1]  ;;  %v616_v49 = vsel %vm12687_vm2, 0, %v615_v47 }
  0x7f   : > { %10953 = vmatmul.mubr.bf16.gmra.mrb[12].mxu0 %v12091_v31  ;;  %10969 = vmatmul.mubr.bf16.gmra.mrb[12].mxu1 %v12099_v32  ;;  %v604_v31 = vsel %vm12687_vm2, 0, %v603_v29  ;;  %v661_v32 = vsel %vm12713_vm5, 0, %v660_v30  ;;  %v619_v45 = vsel %vm12687_vm2, 0, %v618_v43  ;;  %617 = vst [vmem:[#allocation2 + $0x138] sm:$0x1] %v616_v49  ;;  %v12156_v29 = vld [vmem:[%s15269_s3 + $0x1f0] sm:$0xff]  }
  0x80   : > { %1693 = vmatprep.mubr.bf16.mxu1 %v12421_v37  ;;  %10988 = vmatprep.mubr.bf16.mxu0 %v1423_v8  ;;  %605 = vst [vmem:[#allocation2 + $0xd8] sm:$0x1] %v604_v31  ;;  %662 = vst [vmem:[#allocation2 + $0xe8] sm:$0x80] %v661_v32  ;;  %v609_v37 = vld [vmem:[#allocation2 + $0x108] sm:$0x1] }
  0x81   : > { %9641 = vmatpush3.bf16.msra.mxu1 %v12118_v44  ;;  %10985 = vmatpush3.bf16.msra.mxu0 %v12122_v59  ;;  %v610_v40 = vsel %vm12687_vm2, 0, %v609_v37  ;;  %v675_v44 = vld [vmem:[#allocation2 + $0x160] sm:$0x80]  ;;  %620 = vst [vmem:[#allocation2 + $0x150] sm:$0x1] %v619_v45  ;;  %v679_v59 = vsel %vm12713_vm5, 0, %v678_v58 }
  0x82   : > { %9642 = vmatprep.subr.bf16.mxu1 %v12120_v48  ;;  %10986 = vmatprep.subr.bf16.mxu0 %v12123_v63  ;;  %611 = vst [vmem:[#allocation2 + $0x108] sm:$0x1] %v610_v40  ;;  %v676_v46 = vsel %vm12713_vm5, 0, %v675_v44  ;;  %v672_v48 = vld [vmem:[#allocation2 + $0x148] sm:$0x80] }
  0x83   : > { %677 = vst [vmem:[#allocation2 + $0x160] sm:$0x80] %v676_v46  ;;  %680 = vst [vmem:[#allocation2 + $0x178] sm:$0x80] %v679_v59  ;;  %v12154_v8 = vld [vmem:[%s15269_s3 + $0x1a8] sm:$0xff]  }
  0x85   : > { %9643 = vmatpush3.bf16.msra.mxu1 %v12121_v50  ;;  %10987 = vmatpush3.bf16.msra.mxu0 %v12123_v63  ;;  %v673_v50 = vsel %vm12713_vm5, 0, %v672_v48  ;;  %v12144_v63 = vld [vmem:[%s15269_s3 + $0x188] sm:$0xff]  }
  0x86   : > { %9764 = vmatprep.subr.bf16.mxu0 %v12124_v33  ;;  %674 = vst [vmem:[#allocation2 + $0x148] sm:$0x80] %v673_v50  ;;  %9900 = vmatprep.subr.bf16.mxu1 %v12140_v60  ;;  %v12157_v33 = vld [vmem:[%s15269_s3 + $0x1b0] sm:$0xff]  }
  0x88   : > { %1694 = vmatmul.mubr.bf16.vlgmr.msra.gmra.mrb[16].mxu1 %v1421_v62  ;;  %v12143_v62 = vld [vmem:[%s15269_s3 + $0x1c8] sm:$0xff]  }
  0x89   : > { %9901 = vmatpush3.bf16.msra.mxu1 %v12141_v61 }
  0x8a   : > { %9902 = vmatprep.subr.bf16.mxu1 %v12143_v62 }
  0x8d   : > { %9903 = vmatpush3.bf16.msra.mxu1 %v12144_v63 }
  0x8e   : > { %9904 = vmatprep.subr.bf16.mxu1 %v12146_v0 }
  0x91   : > { %9905 = vmatpush3.bf16.msra.mxu1 %v12147_v1 }
  0x92   : > { %9906 = vmatprep.subr.bf16.mxu1 %v12149_v2 }
  0x95   : > { %9907 = vmatpush3.bf16.msra.mxu1 %v12150_v3 }
  0x96   : > { %9908 = vmatprep.subr.bf16.mxu1 %v12151_v4 }
  0x99   : > { %9909 = vmatpush3.bf16.msra.mxu1 %v12152_v5 }
  0x9a   : > { %9910 = vmatprep.subr.bf16.mxu1 %v12153_v6 }
  0x9d   : > { %9911 = vmatpush3.bf16.msra.mxu1 %v12154_v8 }
  0x9e   : > { %9912 = vmatprep.subr.bf16.mxu1 %v12156_v29 }
  0xa1   : > { %9913 = vmatpush3.bf16.msra.mxu1 %v12157_v33 }
  0xa2   : > { %9914 = vmatprep.subr.bf16.mxu1 %v12158_v34 }
  0xa5   : > { %9915 = vmatpush3.bf16.msra.mxu1 %v12159_v42 }
 0x13a   : > { %v10942_v9 = vpop.f32.mrb[0].mxu0  ;;  %v10958_v10 = vpop.f32.mrb[0].mxu1 }
 0x13b   : > { %v929_v11 = vadd.f32 %v10942_v9, %v12826_v7  ;;  %v920_v12 = vpop.f32.mrb[1].mxu0  ;;  %v993_v13 = vadd.f32 %v10958_v10, %v12826_v7  ;;  %v984_v14 = vpop.f32.mrb[1].mxu1 }
 0x13c   : > { %v921_v15 = vadd.f32 %v12826_v7, %v920_v12  ;;  %v10943_v16 = vpop.f32.mrb[2].mxu0  ;;  %v985_v17 = vadd.f32 %v12826_v7, %v984_v14  ;;  %v10959_v18 = vpop.f32.mrb[2].mxu1 }
 0x13d   : > { %v1049_v19 = vmul.f32 0.1, %v929_v11  ;;  %v932_v20 = vadd.f32 %v10943_v16, %v12826_v7  ;;  %v923_v21 = vpop.f32.mrb[3].mxu0  ;;  %v1065_v22 = vmul.f32 0.1, %v993_v13  ;;  %v996_v23 = vadd.f32 %v10959_v18, %v12826_v7  ;;  %v987_v24 = vpop.f32.mrb[3].mxu1 }
 0x13e   : > { %v1047_v25 = vmul.f32 0.1, %v921_v15  ;;  %v924_v26 = vadd.f32 %v12826_v7, %v923_v21  ;;  %v1063_v27 = vmul.f32 0.1, %v985_v17  ;;  %v988_v28 = vadd.f32 %v12826_v7, %v987_v24 }
 0x13f   : > { %v1050_v30 = vmul.f32 0.1, %v932_v20  ;;  %v1097_v31 = vmax.f32 %v993_v13, %v1065_v22  ;;  %v1066_v32 = vmul.f32 0.1, %v996_v23  ;;  %v1081_v38 = vmax.f32 %v929_v11, %v1049_v19  ;;  %v1278_v13 = vld [vmem:[#allocation2 + $0x30] sm:$0xff]  ;;  %v1275_v22 = vld [vmem:[#allocation2 + $0x18] sm:$0xff] }
 0x140   : > { %v1048_v35 = vmul.f32 0.1, %v924_v26  ;;  %v1095_v36 = vmax.f32 %v985_v17, %v1063_v27  ;;  %v1064_v37 = vmul.f32 0.1, %v988_v28  ;;  %v1079_v43 = vmax.f32 %v921_v15, %v1047_v25  ;;  %v1376_v15 = vld [vmem:[#allocation2 + $0x40] sm:$0xff] }
 0x141   : > { %v1082_v39 = vmax.f32 %v932_v20, %v1050_v30  ;;  %v1098_v40 = vmax.f32 %v996_v23, %v1066_v32  ;;  %v1373_v23 = vld [vmem:[#allocation2 + $0x28] sm:$0xff] }
 0x142   : > { %v1080_v44 = vmax.f32 %v924_v26, %v1048_v35  ;;  %v10946_v45 = vpop.f32.mrb[4].mxu0  ;;  %v1096_v46 = vmax.f32 %v988_v28, %v1064_v37  ;;  %v10962_v47 = vpop.f32.mrb[4].mxu1 }
 0x143   : > { %v12851_v48 = vpack.c.bf16 %v1082_v39, %v1081_v38  ;;  %v945_v49 = vadd.f32 %v10946_v45, %v12826_v7  ;;  %v936_v50 = vpop.f32.mrb[5].mxu0  ;;  %v12854_v51 = vpack.c.bf16 %v1098_v40, %v1097_v31  ;;  %v12857_v53 = vadd.f32 %v10962_v47, %v12826_v7  ;;  %v1000_v54 = vpop.f32.mrb[5].mxu1  ;;  %v12125_v31 = vld [vmem:[%s15269_s3 + $0xc0] sm:$0xff]   ;;  %v12126_v38 = vld [vmem:[%s15269_s3 + $0x108] sm:$0xff]  }
 0x144   : > { %v1111_v55 = vpack.c.bf16 %v1080_v44, %v1079_v43  ;;  %v937_v56 = vadd.f32 %v12826_v7, %v936_v50  ;;  %v10947_v57 = vpop.f32.mrb[6].mxu0  ;;  %v12860_v58 = vpack.c.bf16 %v1096_v46, %v1095_v36  ;;  %v12863_v59 = vadd.f32 %v12826_v7, %v1000_v54  ;;  %v12865_v60 = vpop.f32.mrb[6].mxu1 }
 0x145   : > { %1129 = vst [vmem:[#allocation2 + $0x38] sm:$0xff] %v12851_v48  ;;  %v1152_v61 = vshrl.u32 %v12851_v48, 16  ;;  %v1155_v62 = vshll.u32 %v12851_v48, 16  ;;  %v1053_v63 = vmul.f32 0.1, %v945_v49  ;;  %v948_v0 = vadd.f32 %v10947_v57, %v12826_v7  ;;  %v939_v1 = vpop.f32.mrb[7].mxu0 }
 0x146   : > { %1137 = vst [vmem:[#allocation2 + $0xf8] sm:$0xff] %v12854_v51  ;;  %v12872_v2 = vpop.f32.mrb[7].mxu1  ;;  %1128 = vst [vmem:[#allocation2 + $0x20] sm:$0xff] %v1111_v55  ;;  %v1145_v3 = vshrl.u32 %v1111_v55, 16  ;;  %v1148_v4 = vshll.u32 %v1111_v55, 16  ;;  %v940_v6 = vadd.f32 %v12826_v7, %v939_v1  ;;  %1701 = vmatprep.mubr.bf16.mxu1 %v1111_v55  ;;  %v1208_v25 = vshrl.u32 %v12854_v51, 16 }
 0x147   : > { %v1051_v5 = vmul.f32 0.1, %v937_v56  ;;  %v1154_v8 = vrot.slane %v1152_v61, 7  ;;  %v1325_v10 = vrot.slane %v1155_v62, 1  ;;  %v1085_v11 = vmax.f32 %v945_v49, %v1053_v63 }
 0x148   : > { %v1054_v12 = vmul.f32 0.1, %v948_v0  ;;  %v1147_v16 = vrot.slane %v1145_v3, 7  ;;  %v1323_v17 = vrot.slane %v1148_v4, 1  ;;  %v1052_v19 = vmul.f32 0.1, %v940_v6 }
 0x149   : > { %v1083_v18 = vmax.f32 %v937_v56, %v1051_v5  ;;  %v1157_v20 = vor.u32 %v1155_v62, %v1154_v8  ;;  %v1326_v21 = vor.u32 %v1325_v10, %v1152_v61  ;;  %v1211_v30 = vshll.u32 %v12854_v51, 16  ;;  %v1284_v8 = vld [vmem:[#allocation2 + $0x60] sm:$0xff]  ;;  %v1382_v10 = vld [vmem:[#allocation2 + $0x70] sm:$0xff] }
 0x14a   : > { %v1086_v24 = vmax.f32 %v948_v0, %v1054_v12  ;;  %v1150_v26 = vor.u32 %v1148_v4, %v1147_v16  ;;  %v1324_v27 = vor.u32 %v1323_v17, %v1145_v3  ;;  %v1084_v28 = vmax.f32 %v940_v6, %v1052_v19  ;;  %v10950_v29 = vpop.f32.mrb[8].mxu0  ;;  %v12892_v32 = vpop.f32.mrb[8].mxu1  ;;  %v12127_v0 = vld [vmem:[%s15269_s3 + $0xc8] sm:$0xff]   ;;  %v12128_v6 = vld [vmem:[%s15269_s3 + $0x110] sm:$0xff]  }
 0x14b   : > { %v12896_v33 = vsel %vm12877_vm9, %v1157_v20, %v1278_v13  ;;  %v1377_v34 = vsel %vm12883_vm10, %v1326_v21, %v1376_v15  ;;  %v961_v36 = vadd.f32 %v10950_v29, %v12826_v7  ;;  %v952_v37 = vpop.f32.mrb[9].mxu0  ;;  %v12906_v39 = vpop.f32.mrb[9].mxu1  ;;  %v1281_v17 = vld [vmem:[#allocation2 + $0x48] sm:$0xff]  ;;  %v12937_v20 = vrot.slane %v1208_v25, 7 }
 0x14c   : > { %v12900_v35 = vpack.c.bf16 %v1086_v24, %v1085_v11  ;;  %1280 = vst [vmem:[#allocation2 + $0x30] sm:$0xff] %v12896_v33  ;;  %1378 = vst [vmem:[#allocation2 + $0x40] sm:$0xff] %v1377_v34  ;;  %v1276_v40 = vsel %vm12877_vm9, %v1150_v26, %v1275_v22  ;;  %v1374_v42 = vsel %vm12883_vm10, %v1324_v27, %v1373_v23  ;;  %v10951_v45 = vpop.f32.mrb[10].mxu0  ;;  %v12916_v46 = vpop.f32.mrb[10].mxu1  ;;  %v12941_v26 = vrot.slane %v1211_v30, 1 }
 0x14d   : > { %v12913_v43 = vpack.c.bf16 %v1084_v28, %v1083_v18  ;;  %v953_v44 = vadd.f32 %v12826_v7, %v952_v37  ;;  %1277 = vst [vmem:[#allocation2 + $0x18] sm:$0xff] %v1276_v40  ;;  %1375 = vst [vmem:[#allocation2 + $0x28] sm:$0xff] %v1374_v42  ;;  %v1057_v50 = vmul.f32 0.1, %v961_v36  ;;  %v964_v54 = vadd.f32 %v10951_v45, %v12826_v7  ;;  %v955_v55 = vpop.f32.mrb[11].mxu0  ;;  %v12922_v56 = vpop.f32.mrb[11].mxu1 }
 0x14e   : > { %1131 = vst [vmem:[#allocation2 + $0x68] sm:$0xff] %v12900_v35  ;;  %v1166_v47 = vshrl.u32 %v12900_v35, 16  ;;  %v1169_v49 = vshll.u32 %v12900_v35, 16  ;;  %1702 = vmatmul.mubr.bf16.gmra.mrb[20].mxu1 %v1276_v40  ;;  %10989 = vmatmul.mubr.bf16.vlgmr.msra.gmra.mrb[16].mxu0 %v1374_v42  ;;  %v956_v63 = vadd.f32 %v12826_v7, %v955_v55  ;;  %v1379_v18 = vld [vmem:[#allocation2 + $0x58] sm:$0xff]  ;;  %v12129_v37 = vld [vmem:[%s15269_s3 + $0xd0] sm:$0xff]  }
 0x14f   : > { %1130 = vst [vmem:[#allocation2 + $0x50] sm:$0xff] %v12913_v43  ;;  %v1159_v57 = vshrl.u32 %v12913_v43, 16  ;;  %v1162_v61 = vshll.u32 %v12913_v43, 16  ;;  %v1055_v62 = vmul.f32 0.1, %v953_v44  ;;  %9765 = vmatpush3.bf16.msra.mxu0 %v12125_v31  ;;  %1709 = vmatprep.mubr.bf16.mxu1 %v12851_v48  ;;  %v1089_v4 = vmax.f32 %v961_v36, %v1057_v50 }
 0x150   : > { %v1168_v1 = vrot.slane %v1166_v47, 7  ;;  %v1329_v3 = vrot.slane %v1169_v49, 1  ;;  %v1058_v5 = vmul.f32 0.1, %v964_v54  ;;  %10992 = vmatprep.mubr.bf16.mxu0 %v1377_v34  ;;  %9766 = vmatprep.subr.bf16.mxu0 %v12126_v38  ;;  %v1056_v48 = vmul.f32 0.1, %v956_v63 }
 0x151   : > { %v1161_v11 = vrot.slane %v1159_v57, 7  ;;  %v1327_v12 = vrot.slane %v1162_v61, 1  ;;  %v1087_v13 = vmax.f32 %v953_v44, %v1055_v62 }
 0x152   : > { %v1171_v15 = vor.u32 %v1169_v49, %v1168_v1  ;;  %v1330_v16 = vor.u32 %v1329_v3, %v1166_v47  ;;  %v1090_v19 = vmax.f32 %v964_v54, %v1058_v5  ;;  %v1088_v23 = vmax.f32 %v956_v63, %v1056_v48  ;;  %v10954_v24 = vpop.f32.mrb[12].mxu0  ;;  %v12943_v27 = vpop.f32.mrb[12].mxu1  ;;  %v12130_v49 = vld [vmem:[%s15269_s3 + $0x118] sm:$0xff]  }
 0x153   : > { %v1164_v21 = vor.u32 %v1162_v61, %v1161_v11  ;;  %v1328_v22 = vor.u32 %v1327_v12, %v1159_v57  ;;  %9767 = vmatpush3.bf16.msra.mxu0 %v12127_v0  ;;  %v977_v34 = vadd.f32 %v10954_v24, %v12826_v7  ;;  %v968_v36 = vpop.f32.mrb[13].mxu0  ;;  %v12957_v38 = vpop.f32.mrb[13].mxu1  ;;  %v1290_v0 = vld [vmem:[#allocation2 + $0x90] sm:$0xff]  ;;  %v12131_v12 = vld [vmem:[%s15269_s3 + $0xd8] sm:$0xff]   ;;  %v1213_v24 = vor.u32 %v1211_v30, %v12937_v20  ;;  %v12133_v20 = vld [vmem:[%s15269_s3 + $0xe0] sm:$0xff]  }
 0x154   : > { %v12947_v28 = vsel %vm12877_vm9, %v1171_v15, %v1284_v8  ;;  %v1383_v29 = vsel %vm12883_vm10, %v1330_v16, %v1382_v10  ;;  %v12951_v31 = vpack.c.bf16 %v1090_v19, %v1089_v4  ;;  %9768 = vmatprep.subr.bf16.mxu0 %v12128_v6  ;;  %v12966_v44 = vpack.c.bf16 %v1088_v23, %v1087_v13  ;;  %v10955_v47 = vpop.f32.mrb[14].mxu0  ;;  %v12972_v50 = vpop.f32.mrb[14].mxu1  ;;  %v1388_v10 = vld [vmem:[#allocation2 + $0xa0] sm:$0xff] }
 0x155   : > { %1286 = vst [vmem:[#allocation2 + $0x60] sm:$0xff] %v12947_v28  ;;  %1384 = vst [vmem:[#allocation2 + $0x70] sm:$0xff] %v1383_v29  ;;  %v12962_v40 = vsel %vm12877_vm9, %v1164_v21, %v1281_v17  ;;  %v1380_v42 = vsel %vm12883_vm10, %v1328_v22, %v1379_v18  ;;  %v969_v45 = vadd.f32 %v12826_v7, %v968_v36  ;;  %v1061_v57 = vmul.f32 0.1, %v977_v34  ;;  %v971_v62 = vpop.f32.mrb[15].mxu0  ;;  %v12980_v63 = vpop.f32.mrb[15].mxu1 }
 0x156   : > { %1283 = vst [vmem:[#allocation2 + $0x48] sm:$0xff] %v12962_v40  ;;  %1381 = vst [vmem:[#allocation2 + $0x58] sm:$0xff] %v1380_v42  ;;  %v1180_v54 = vshrl.u32 %v12951_v31, 16  ;;  %v1183_v55 = vshll.u32 %v12951_v31, 16  ;;  %v980_v61 = vadd.f32 %v10955_v47, %v12826_v7  ;;  %1710 = vmatmul.mubr.bf16.gmra.mrb[24].mxu1 %v12896_v33  ;;  %10993 = vmatmul.mubr.bf16.gmra.mrb[20].mxu0 %v1380_v42  ;;  %v1173_v1 = vshrl.u32 %v12966_v44, 16  ;;  %v1302_v17 = vld [vmem:[#allocation2 + $0xf0] sm:$0xff] }
 0x157   : > { %1133 = vst [vmem:[#allocation2 + $0x98] sm:$0xff] %v12951_v31  ;;  %1132 = vst [vmem:[#allocation2 + $0x80] sm:$0xff] %v12966_v44  ;;  %v1176_v3 = vshll.u32 %v12966_v44, 16  ;;  %v1059_v4 = vmul.f32 0.1, %v969_v45  ;;  %v972_v5 = vadd.f32 %v12826_v7, %v971_v62  ;;  %1717 = vmatprep.mubr.bf16.mxu1 %v12913_v43  ;;  %10996 = vmatprep.mubr.bf16.mxu0 %v1383_v29  ;;  %v12132_v43 = vld [vmem:[%s15269_s3 + $0x120] sm:$0xff]  }
 0x158   : > { %v1182_v6 = vrot.slane %v1180_v54, 7  ;;  %v1333_v8 = vrot.slane %v1183_v55, 1  ;;  %v1093_v33 = vmax.f32 %v977_v34, %v1061_v57  ;;  %v1062_v11 = vmul.f32 0.1, %v980_v61  ;;  %9769 = vmatpush3.bf16.msra.mxu0 %v12129_v37  ;;  %v1287_v21 = vld [vmem:[#allocation2 + $0x78] sm:$0xff]  ;;  %v1385_v22 = vld [vmem:[#allocation2 + $0x88] sm:$0xff] }
 0x159   : > { %v1175_v13 = vrot.slane %v1173_v1, 7  ;;  %v1331_v48 = vrot.slane %v1176_v3, 1  ;;  %v1091_v15 = vmax.f32 %v969_v45, %v1059_v4  ;;  %v1060_v16 = vmul.f32 0.1, %v972_v5  ;;  %9770 = vmatprep.subr.bf16.mxu0 %v12130_v49  ;;  %v1400_v29 = vld [vmem:[#allocation2 + $0x100] sm:$0xff]  ;;  %v12134_v57 = vld [vmem:[%s15269_s3 + $0x128] sm:$0xff]  }
 0x15a   : > { %v1185_v18 = vor.u32 %v1183_v55, %v1182_v6  ;;  %v1334_v19 = vor.u32 %v1333_v8, %v1180_v54  ;;  %v1094_v23 = vmax.f32 %v980_v61, %v1062_v11  ;;  %v1342_v42 = vor.u32 %v12941_v26, %v1208_v25 }
 0x15b   : > { %v1178_v34 = vor.u32 %v1176_v3, %v1175_v13  ;;  %v1332_v36 = vor.u32 %v1331_v48, %v1173_v1  ;;  %v1092_v37 = vmax.f32 %v972_v5, %v1060_v16  ;;  %v13009_v30 = vsel %vm12877_vm9, %v1213_v24, %v1302_v17  ;;  %v1296_v3 = vld [vmem:[#allocation2 + $0xc0] sm:$0xff]  ;;  %v12135_v13 = vld [vmem:[%s15269_s3 + $0xe8] sm:$0xff]   ;;  %v1299_v16 = vld [vmem:[#allocation2 + $0xd8] sm:$0xff] }
 0x15c   : > { %v13001_v45 = vsel %vm12877_vm9, %v1185_v18, %v1290_v0  ;;  %v1389_v47 = vsel %vm12883_vm10, %v1334_v19, %v1388_v10  ;;  %v13005_v49 = vpack.c.bf16 %v1094_v23, %v1093_v33  ;;  %9771 = vmatpush3.bf16.msra.mxu0 %v12131_v12  ;;  %1304 = vst [vmem:[#allocation2 + $0xf0] sm:$0xff] %v13009_v30  ;;  %v1201_v0 = vshrl.u32 %v12860_v58, 16  ;;  %v1397_v17 = vld [vmem:[#allocation2 + $0xe8] sm:$0xff]  ;;  %v12136_v18 = vld [vmem:[%s15269_s3 + $0x130] sm:$0xff]   ;;  %v1391_v23 = vld [vmem:[#allocation2 + $0xb8] sm:$0xff] }
 0x15d   : > { %1292 = vst [vmem:[#allocation2 + $0x90] sm:$0xff] %v13001_v45  ;;  %1390 = vst [vmem:[#allocation2 + $0xa0] sm:$0xff] %v1389_v47  ;;  %v13017_v25 = vsel %vm12877_vm9, %v1178_v34, %v1287_v21  ;;  %v1386_v26 = vsel %vm12883_vm10, %v1332_v36, %v1385_v22  ;;  %v13021_v54 = vpack.c.bf16 %v1092_v37, %v1091_v15  ;;  %9772 = vmatprep.subr.bf16.mxu0 %v12132_v43  ;;  %v1293_v22 = vld [vmem:[#allocation2 + $0xa8] sm:$0xff]  ;;  %v13308_v52 = vld [vmem:[#allocation2 + $0x58] sm:$0xff] }
 0x15e   : > { %v13026_v55 = vsel %vm12883_vm10, %v1342_v42, %v1400_v29  ;;  %1289 = vst [vmem:[#allocation2 + $0x78] sm:$0xff] %v13017_v25  ;;  %1387 = vst [vmem:[#allocation2 + $0x88] sm:$0xff] %v1386_v26  ;;  %v1194_v61 = vshrl.u32 %v13005_v49, 16  ;;  %v1197_v62 = vshll.u32 %v13005_v49, 16  ;;  %v1204_v1 = vshll.u32 %v12860_v58, 16  ;;  %1718 = vmatmul.mubr.bf16.gmra.mrb[28].mxu1 %v12962_v40  ;;  %10997 = vmatmul.mubr.bf16.gmra.mrb[24].mxu0 %v1386_v26  ;;  %v1394_v40 = vld [vmem:[#allocation2 + $0xd0] sm:$0xff] }
 0x15f   : > { %1135 = vst [vmem:[#allocation2 + $0xc8] sm:$0xff] %v13005_v49  ;;  %1402 = vst [vmem:[#allocation2 + $0x100] sm:$0xff] %v13026_v55  ;;  %v1187_v4 = vshrl.u32 %v13021_v54, 16  ;;  %v1190_v5 = vshll.u32 %v13021_v54, 16  ;;  %v13043_v6 = vmul.f32 0.1, %v12857_v53  ;;  %1725 = vmatprep.mubr.bf16.mxu1 %v12900_v35  ;;  %11000 = vmatprep.mubr.bf16.mxu0 %v1389_v47  ;;  %v1012_v37 = vadd.f32 %v12865_v60, %v12826_v7 }
 0x160   : > { %1134 = vst [vmem:[#allocation2 + $0xb0] sm:$0xff] %v13021_v54  ;;  %v13046_v8 = vmul.f32 0.1, %v12863_v59  ;;  %v1196_v10 = vrot.slane %v1194_v61, 7  ;;  %v1337_v33 = vrot.slane %v1197_v62, 1  ;;  %v1203_v11 = vrot.slane %v1201_v0, 7  ;;  %9773 = vmatpush3.bf16.msra.mxu0 %v12133_v20 }
 0x161   : > { %v1339_v12 = vrot.slane %v1204_v1, 1  ;;  %v1189_v48 = vrot.slane %v1187_v4, 7  ;;  %v1335_v15 = vrot.slane %v1190_v5, 1  ;;  %v1101_v43 = vmax.f32 %v12857_v53, %v13043_v6  ;;  %9774 = vmatprep.subr.bf16.mxu0 %v12134_v57  ;;  %v2717_v41 = vld [vmem:[#allocation2 + $0x80] sm:$0xff] }
 0x162   : > { %v1099_v35 = vmax.f32 %v12863_v59, %v13046_v8  ;;  %v1199_v19 = vor.u32 %v1197_v62, %v1196_v10  ;;  %v1338_v21 = vor.u32 %v1337_v33, %v1194_v61  ;;  %v1206_v24 = vor.u32 %v1204_v1, %v1203_v11  ;;  %v12137_v61 = vld [vmem:[%s15269_s3 + $0xf0] sm:$0xff]  }
 0x163   : > { %v1340_v29 = vor.u32 %v1339_v12, %v1201_v0  ;;  %v1192_v34 = vor.u32 %v1190_v5, %v1189_v48  ;;  %v1336_v36 = vor.u32 %v1335_v15, %v1187_v4  ;;  %v1004_v53 = vadd.f32 %v12826_v7, %v12872_v2  ;;  %v12138_v4 = vld [vmem:[%s15269_s3 + $0x138] sm:$0xff]   ;;  %v13128_v48 = vld [vmem:[%s15269_s3 + $0x140] sm:$0xff]  }
 0x164   : > { %v13065_v59 = vsel %vm12877_vm9, %v1199_v19, %v1296_v3  ;;  %v1395_v42 = vsel %vm12883_vm10, %v1338_v21, %v1394_v40  ;;  %v13071_v47 = vsel %vm12877_vm9, %v1206_v24, %v1299_v16  ;;  %9775 = vmatpush3.bf16.msra.mxu0 %v12135_v13  ;;  %v1070_v26 = vmul.f32 0.1, %v1012_v37  ;;  %v1406_v24 = vld [vmem:[#allocation2 + $0x130] sm:$0xff] }
 0x165   : > { %v13075_v20 = vsel %vm12883_vm10, %v1340_v29, %v1397_v17  ;;  %1298 = vst [vmem:[#allocation2 + $0xc0] sm:$0xff] %v13065_v59  ;;  %1396 = vst [vmem:[#allocation2 + $0xd0] sm:$0xff] %v1395_v42  ;;  %v13080_v60 = vsel %vm12877_vm9, %v1192_v34, %v1293_v22  ;;  %v1392_v2 = vsel %vm12883_vm10, %v1336_v36, %v1391_v23  ;;  %v1068_v57 = vmul.f32 0.1, %v1004_v53  ;;  %v1308_v22 = vld [vmem:[#allocation2 + $0x120] sm:$0xff]  ;;  %v1305_v36 = vld [vmem:[#allocation2 + $0x108] sm:$0xff] }
 0x166   : > { %1301 = vst [vmem:[#allocation2 + $0xd8] sm:$0xff] %v13071_v47  ;;  %1399 = vst [vmem:[#allocation2 + $0xe8] sm:$0xff] %v13075_v20  ;;  %9776 = vmatprep.subr.bf16.mxu0 %v12136_v18  ;;  %v1025_v62 = vadd.f32 %v12892_v32, %v12826_v7  ;;  %v1017_v0 = vadd.f32 %v12826_v7, %v12906_v39  ;;  %v1028_v1 = vadd.f32 %v12916_v46, %v12826_v7 }
 0x167   : > { %1295 = vst [vmem:[#allocation2 + $0xa8] sm:$0xff] %v13080_v60  ;;  %1393 = vst [vmem:[#allocation2 + $0xb8] sm:$0xff] %v1392_v2  ;;  %v1020_v3 = vadd.f32 %v12826_v7, %v12922_v56  ;;  %1726 = vmatmul.mubr.bf16.gmra.mrb[32].mxu1 %v12947_v28  ;;  %v1102_v5 = vmax.f32 %v1012_v37, %v1070_v26  ;;  %v1100_v6 = vmax.f32 %v1004_v53, %v1068_v57  ;;  %v1403_v37 = vld [vmem:[#allocation2 + $0x118] sm:$0xff] }
 0x168   : > { %v13104_v32 = vadd.f32 %v12943_v27, %v12826_v7  ;;  %11001 = vmatmul.mubr.bf16.gmra.mrb[28].mxu0 %v1392_v2  ;;  %v1073_v39 = vmul.f32 0.1, %v1025_v62  ;;  %v1071_v8 = vmul.f32 0.1, %v1017_v0  ;;  %v1074_v10 = vmul.f32 0.1, %v1028_v1  ;;  %1733 = vmatprep.mubr.bf16.mxu1 %v12966_v44 }
 0x169   : > { %v13108_v46 = vadd.f32 %v12826_v7, %v12957_v38  ;;  %11004 = vmatprep.mubr.bf16.mxu0 %v1395_v42  ;;  %v13111_v56 = vpack.c.bf16 %v1102_v5, %v1101_v43  ;;  %v13113_v28 = vpack.c.bf16 %v1100_v6, %v1099_v35  ;;  %v1072_v33 = vmul.f32 0.1, %v1020_v3  ;;  %9777 = vmatpush3.bf16.msra.mxu0 %v12137_v61  ;;  %v12139_v27 = vld [vmem:[%s15269_s3 + $0xf8] sm:$0xff]  }
 0x16a   : > { %v13116_v40 = vmul.f32 0.1, %v13104_v32  ;;  %v1105_v11 = vmax.f32 %v1025_v62, %v1073_v39  ;;  %v1103_v12 = vmax.f32 %v1017_v0, %v1071_v8  ;;  %v1106_v38 = vmax.f32 %v1028_v1, %v1074_v10  ;;  %9778 = vmatprep.subr.bf16.mxu0 %v12138_v4  ;;  %v1314_v8 = vld [vmem:[#allocation2 + $0x150] sm:$0xff]  ;;  %v1412_v10 = vld [vmem:[#allocation2 + $0x160] sm:$0xff] }
 0x16b   : > { %v13123_v13 = vadd.f32 %v12972_v50, %v12826_v7  ;;  %v1222_v15 = vshrl.u32 %v13111_v56, 16  ;;  %v1225_v16 = vshll.u32 %v13111_v56, 16  ;;  %v1215_v17 = vshrl.u32 %v13113_v28, 16 }
 0x16c   : > { %v1218_v43 = vshll.u32 %v13113_v28, 16  ;;  %v13134_v35 = vpack.c.bf16 %v1106_v38, %v1105_v11  ;;  %v1104_v18 = vmax.f32 %v1020_v3, %v1072_v33  ;;  %v1109_v50 = vmax.f32 %v13104_v32, %v13116_v40  ;;  %v1409_v11 = vld [vmem:[#allocation2 + $0x148] sm:$0xff] }
 0x16d   : > { %v13139_v19 = vmul.f32 0.1, %v13108_v46  ;;  %v1224_v21 = vrot.slane %v1222_v15, 7  ;;  %v1345_v23 = vrot.slane %v1225_v16, 1  ;;  %v1217_v29 = vrot.slane %v1215_v17, 7  ;;  %9779 = vmatpush3.bf16.msra.mxu0 %v12139_v27  ;;  %v1311_v27 = vld [vmem:[#allocation2 + $0x138] sm:$0xff] }
 0x16e   : > { %v1343_v34 = vrot.slane %v1218_v43, 1  ;;  %v1236_v53 = vshrl.u32 %v13134_v35, 16  ;;  %v1239_v42 = vshll.u32 %v13134_v35, 16  ;;  %v13143_v2 = vpack.c.bf16 %v1104_v18, %v1103_v12  ;;  %11020 = vmatprep.subr.bf16.mxu0 %v13128_v48 }
 0x16f   : > { %v1078_v26 = vmul.f32 0.1, %v13123_v13  ;;  %1734 = vmatmul.mubr.bf16.gmra.mrb[36].mxu1 %v13017_v25  ;;  %v1227_v57 = vor.u32 %v1225_v16, %v1224_v21  ;;  %v1346_v61 = vor.u32 %v1345_v23, %v1222_v15  ;;  %v1220_v62 = vor.u32 %v1218_v43, %v1217_v29  ;;  %v1320_v29 = vld [vmem:[#allocation2 + $0x180] sm:$0xff] }
 0x170   : > { %v1344_v0 = vor.u32 %v1343_v34, %v1215_v17  ;;  %11005 = vmatmul.mubr.bf16.gmra.mrb[32].mxu0 %v13075_v20  ;;  %v1238_v1 = vrot.slane %v1236_v53, 7  ;;  %v1349_v3 = vrot.slane %v1239_v42, 1  ;;  %v1229_v4 = vshrl.u32 %v13143_v2, 16  ;;  %1741 = vmatprep.mubr.bf16.mxu1 %v12951_v31  ;;  %v1418_v34 = vld [vmem:[#allocation2 + $0x190] sm:$0xff] }
 0x171   : > { %v1232_v5 = vshll.u32 %v13143_v2, 16  ;;  %11008 = vmatprep.mubr.bf16.mxu0 %v13026_v55  ;;  %v13155_v6 = vsel %vm12877_vm9, %v1227_v57, %v1308_v22  ;;  %v1407_v32 = vsel %vm12883_vm10, %v1346_v61, %v1406_v24  ;;  %v13161_v20 = vsel %vm12877_vm9, %v1220_v62, %v1305_v36  ;;  %v1317_v62 = vld [vmem:[#allocation2 + $0x168] sm:$0xff] }
 0x172   : > { %v1404_v39 = vsel %vm12883_vm10, %v1344_v0, %v1403_v37  ;;  %1310 = vst [vmem:[#allocation2 + $0x120] sm:$0xff] %v13155_v6  ;;  %1408 = vst [vmem:[#allocation2 + $0x130] sm:$0xff] %v1407_v32  ;;  %v1241_v31 = vor.u32 %v1239_v42, %v1238_v1  ;;  %v1350_v55 = vor.u32 %v1349_v3, %v1236_v53  ;;  %v1231_v33 = vrot.slane %v1229_v4, 7  ;;  %v1415_v0 = vld [vmem:[#allocation2 + $0x178] sm:$0xff] }
 0x173   : > { %1307 = vst [vmem:[#allocation2 + $0x108] sm:$0xff] %v13161_v20  ;;  %1405 = vst [vmem:[#allocation2 + $0x118] sm:$0xff] %v1404_v39  ;;  %v1347_v40 = vrot.slane %v1232_v5, 1  ;;  %v1110_v12 = vmax.f32 %v13123_v13, %v1078_v26  ;;  %v1036_v38 = vadd.f32 %v12826_v7, %v12980_v63  ;;  %v1107_v18 = vmax.f32 %v13108_v46, %v13139_v19 }
 0x174   : > { %v13172_v15 = vsel %vm12877_vm9, %v1241_v31, %v1314_v8  ;;  %v1413_v16 = vsel %vm12883_vm10, %v1350_v55, %v1412_v10  ;;  %v1234_v17 = vor.u32 %v1232_v5, %v1231_v33  ;;  %v13230_v8 = vld [vmem:[#allocation2 + $0x38] sm:$0xff]  ;;  %v2050_v31 = vld [vmem:[#allocation2 + $0x30] sm:$0xff]  ;;  %v12160_v55 = vld [vmem:[%s15269_s3 + $0x160] sm:$0xff]   ;;  %v9644_v33 = vpop.f32.mrb[16].mxu1 }
 0x175   : > { %v1348_v43 = vor.u32 %v1347_v40, %v1229_v4  ;;  %1316 = vst [vmem:[#allocation2 + $0x150] sm:$0xff] %v13172_v15  ;;  %1414 = vst [vmem:[#allocation2 + $0x160] sm:$0xff] %v1413_v16  ;;  %v13179_v21 = vpack.c.bf16 %v1110_v12, %v1109_v50  ;;  %v1076_v13 = vmul.f32 0.1, %v1036_v38  ;;  %v12155_v10 = vld [vmem:[%s15269_s3 + $0x158] sm:$0xff]   ;;  %v9645_v40 = vpop.f32.mrb[17].mxu1 }
 0x176   : > { %v13183_v7 = vsel %vm12877_vm9, %v1234_v17, %v1311_v27  ;;  %v13245_v27 = vadd.f32 %v9645_v40, %v9644_v33  ;;  %v2053_v12 = vld [vmem:[#allocation2 + $0x48] sm:$0xff]  ;;  %v12172_v40 = vld [vmem:[%s15271_s5] sm:$0xff]  }
 0x177   : > { %v13187_v63 = vsel %vm12883_vm10, %v1348_v43, %v1409_v11  ;;  %1742 = vmatmul.mubr.bf16.gmra.mrb[40].mxu1 %v13001_v45  ;;  %1313 = vst [vmem:[#allocation2 + $0x138] sm:$0xff] %v13183_v7  ;;  %v1250_v22 = vshrl.u32 %v13179_v21, 16  ;;  %v1253_v46 = vshll.u32 %v13179_v21, 16  ;;  %v1108_v50 = vmax.f32 %v1036_v38, %v1076_v13  ;;  %v12161_v11 = vld [vmem:[%s15269_s3 + $0x168] sm:$0xff]   ;;  %v12162_v43 = vld [vmem:[%s15269_s3 + $0x170] sm:$0xff]   ;;  %v12163_v13 = vld [vmem:[%s15269_s3 + $0x178] sm:$0xff]   ;;  %11116 = vmatprep.subr.bf16.mxu1 %v12172_v40 }
 0x178   : > { %1411 = vst [vmem:[#allocation2 + $0x148] sm:$0xff] %v13187_v63  ;;  %11009 = vmatmul.mubr.bf16.gmra.mrb[36].mxu0 %v1404_v39  ;;  %1749 = vmatprep.mubr.bf16.mxu1 %v13021_v54  ;;  %v2047_v39 = vld [vmem:[#allocation2 + $0x18] sm:$0xff]  ;;  %v2057_v38 = vld [vmem:[#allocation2 + $0x68] sm:$0xff] }
 0x179   : > { %11012 = vmatprep.mubr.bf16.mxu0 %v1407_v32  ;;  %v1252_v19 = vrot.slane %v1250_v22, 7  ;;  %v1353_v23 = vrot.slane %v1253_v46, 1  ;;  %v13195_v24 = vpack.c.bf16 %v1108_v50, %v1107_v18  ;;  %v12145_v32 = vld [vmem:[%s15269_s3 + $0x148] sm:$0xff]   ;;  %v2063_v50 = vld [vmem:[#allocation2 + $0x98] sm:$0xff] }
 0x17b   : > { %v1255_v45 = vor.u32 %v1253_v46, %v1252_v19  ;;  %v1354_v36 = vor.u32 %v1353_v23, %v1250_v22  ;;  %v1243_v37 = vshrl.u32 %v13195_v24, 16  ;;  %v1246_v53 = vshll.u32 %v13195_v24, 16  ;;  %v2056_v22 = vld [vmem:[#allocation2 + $0x60] sm:$0xff]  ;;  %v627_v19 = vld [vmem:[#allocation2 + $0x198] sm:$0x1] }
 0x17c   : > { %v13266_v46 = vld [vmem:[%s15269_s3 + $0x200] sm:$0xff]   ;;  %v628_v23 = vsel %vm12687_vm2, 0, %v627_v19 }
 0x17d   : > { %v13201_v42 = vsel %vm12877_vm9, %v1255_v45, %v1320_v29  ;;  %v13205_v26 = vsel %vm12883_vm10, %v1354_v36, %v1418_v34  ;;  %v1245_v57 = vrot.slane %v1243_v37, 7  ;;  %v1351_v61 = vrot.slane %v1246_v53, 1  ;;  %629 = vst [vmem:[#allocation2 + $0x198] sm:$0x1] %v628_v23  ;;  %v2068_v29 = vld [vmem:[#allocation2 + $0xc0] sm:$0xff]  ;;  %v2731_v36 = vld [vmem:[#allocation2 + $0xf0] sm:$0xff] }
 0x17e   : > { %1322 = vst [vmem:[#allocation2 + $0x180] sm:$0xff] %v13201_v42  ;;  %1420 = vst [vmem:[#allocation2 + $0x190] sm:$0xff] %v13205_v26  ;;  %v684_v34 = vld [vmem:[#allocation2 + $0x1a8] sm:$0x80] }
 0x17f   : > { %1750 = vmatmul.mubr.bf16.gmra.mrb[44].mxu1 %v13080_v60  ;;  %v1248_v1 = vor.u32 %v1246_v53, %v1245_v57  ;;  %v1352_v3 = vor.u32 %v1351_v61, %v1243_v37  ;;  %v685_v45 = vsel %vm12713_vm5, 0, %v684_v34  ;;  %v13304_v37 = vld [vmem:[#allocation2 + $0x40] sm:$0xff]  ;;  %v13319_v53 = vld [vmem:[#allocation2 + $0x70] sm:$0xff] }
 0x180   : > { %11013 = vmatmul.mubr.bf16.gmra.mrb[40].mxu0 %v13187_v63  ;;  %1757 = vmatprep.mubr.bf16.mxu1 %v13005_v49  ;;  %v2048_v49 = vld [vmem:[#allocation2 + $0x20] sm:$0xff]  ;;  %686 = vst [vmem:[#allocation2 + $0x1a8] sm:$0x80] %v685_v45 }
 0x181   : > { %11016 = vmatprep.mubr.bf16.mxu0 %v1413_v16  ;;  %v13214_v4 = vsel %vm12877_vm9, %v1248_v1, %v1317_v62  ;;  %v13218_v5 = vsel %vm12883_vm10, %v1352_v3, %v1415_v0  ;;  %v9647_v16 = vpop.f32.mrb[18].mxu1  ;;  %v12168_v57 = vld [vmem:[%s15269_s3 + $0x220] sm:$0xff]   ;;  %v12170_v0 = vld [vmem:[%s15269_s3 + $0x230] sm:$0xff]  }
 0x182   : > { %1319 = vst [vmem:[#allocation2 + $0x168] sm:$0xff] %v13214_v4  ;;  %1417 = vst [vmem:[#allocation2 + $0x178] sm:$0xff] %v13218_v5  ;;  %v9648_v17 = vpop.f32.mrb[19].mxu1  ;;  %v13333_v61 = vld [vmem:[#allocation2 + $0xa0] sm:$0xff] }
 0x183   : > { %v13255_v18 = vadd.f32 %v9648_v17, %v9647_v16 }
 0x187   : > { %1758 = vmatmul.mubr.bf16.gmra.mrb[48].mxu1 %v13065_v59  ;;  %v12148_v59 = vld [vmem:[%s15269_s3 + $0x150] sm:$0xff]  }
 0x188   : > { %11017 = vmatmul.mubr.bf16.gmra.mrb[44].mxu0 %v13218_v5  ;;  %1765 = vmatprep.mubr.bf16.mxu1 %v12860_v58 }
 0x189   : > { %2320 = vmatprep.mubr.bf16.mxu0 %v2048_v49 }
 0x18f   : > { %1766 = vmatmul.mubr.bf16.gmra.mrb[52].mxu1 %v13071_v47 }
 0x190   : > { %2321 = vmatmul.mubr.bf16.vlgmr.msra.gmra.mrb[48].mxu0 %v2047_v39  ;;  %1773 = vmatprep.mubr.bf16.mxu1 %v12854_v51  ;;  %v13351_v39 = vld [vmem:[#allocation2 + $0xd0] sm:$0xff] }
 0x191   : > { %11021 = vmatpush3.bf16.msra.mxu0 %v13128_v48  ;;  %2328 = vmatprep.mubr.bf16.mxu0 %v13230_v8  ;;  %v2054_v48 = vld [vmem:[#allocation2 + $0x50] sm:$0xff] }
 0x192   : > { %11022 = vmatprep.subr.bf16.mxu0 %v12145_v32 }
 0x195   : > { %11023 = vmatpush3.bf16.msra.mxu0 %v12145_v32 }
 0x196   : > { %11024 = vmatprep.subr.bf16.mxu0 %v12148_v59 }
 0x197   : > { %1774 = vmatmul.mubr.bf16.gmra.mrb[56].mxu1 %v13009_v30 }
 0x198   : > { %2329 = vmatmul.mubr.bf16.gmra.mrb[52].mxu0 %v2050_v31  ;;  %1781 = vmatprep.mubr.bf16.mxu1 %v13113_v28 }
 0x199   : > { %2336 = vmatprep.mubr.bf16.mxu0 %v2054_v48  ;;  %11025 = vmatpush3.bf16.msra.mxu0 %v12148_v59 }
 0x19a   : > { %11026 = vmatprep.subr.bf16.mxu0 %v12155_v10 }
 0x19d   : > { %11027 = vmatpush3.bf16.msra.mxu0 %v12155_v10 }
 0x19e   : > { %11028 = vmatprep.subr.bf16.mxu0 %v12160_v55 }
 0x19f   : > { %1782 = vmatmul.mubr.bf16.gmra.mrb[60].mxu1 %v13161_v20 }
 0x1a0   : > { %2337 = vmatmul.mubr.bf16.gmra.mrb[56].mxu0 %v2053_v12  ;;  %1789 = vmatprep.mubr.bf16.mxu1 %v13111_v56 }
 0x1a1   : > { %2344 = vmatprep.mubr.bf16.mxu0 %v2057_v38  ;;  %11029 = vmatpush3.bf16.msra.mxu0 %v12160_v55 }
 0x1a2   : > { %11030 = vmatprep.subr.bf16.mxu0 %v12161_v11 }
 0x1a5   : > { %11031 = vmatpush3.bf16.msra.mxu0 %v12161_v11 }
 0x1a6   : > { %11032 = vmatprep.subr.bf16.mxu0 %v12162_v43 }
 0x1a7   : > { %1790 = vmatmul.mubr.bf16.gmra.mrb[64].mxu1 %v13155_v6 }
 0x1a8   : > { %2345 = vmatmul.mubr.bf16.gmra.mrb[60].mxu0 %v2056_v22  ;;  %1797 = vmatprep.mubr.bf16.mxu1 %v13143_v2 }
 0x1a9   : > { %2352 = vmatprep.mubr.bf16.mxu0 %v12966_v44  ;;  %11033 = vmatpush3.bf16.msra.mxu0 %v12162_v43  ;;  %v2062_v44 = vld [vmem:[#allocation2 + $0x90] sm:$0xff] }
 0x1aa   : > { %11034 = vmatprep.subr.bf16.mxu0 %v12163_v13  ;;  %v13378_v43 = vld [vmem:[#allocation2 + $0x130] sm:$0xff] }
 0x1ad   : > { %11035 = vmatpush3.bf16.msra.mxu0 %v12163_v13 }
 0x1ae   : > { %11068 = vmatprep.subr.bf16.mxu0 %v13266_v46 }
 0x1af   : > { %1798 = vmatmul.mubr.bf16.gmra.mrb[68].mxu1 %v13183_v7 }
 0x1b0   : > { %2353 = vmatmul.mubr.bf16.gmra.mrb[64].mxu0 %v13017_v25  ;;  %1805 = vmatprep.mubr.bf16.mxu1 %v13134_v35  ;;  %v2069_v25 = vld [vmem:[#allocation2 + $0xc8] sm:$0xff] }
 0x1b1   : > { %2360 = vmatprep.mubr.bf16.mxu0 %v2063_v50 }
 0x1b7   : > { %1806 = vmatmul.mubr.bf16.gmra.mrb[72].mxu1 %v13172_v15 }
 0x1b8   : > { %2361 = vmatmul.mubr.bf16.gmra.mrb[68].mxu0 %v2062_v44  ;;  %1813 = vmatprep.mubr.bf16.mxu1 %v13195_v24 }
 0x1b9   : > { %2368 = vmatprep.mubr.bf16.mxu0 %v13021_v54  ;;  %v2716_v54 = vld [vmem:[#allocation2 + $0x78] sm:$0xff] }
 0x1bf   : > { %1814 = vmatmul.mubr.bf16.gmra.mrb[76].mxu1 %v13214_v4 }
 0x1c0   : > { %2369 = vmatmul.mubr.bf16.gmra.mrb[72].mxu0 %v13080_v60  ;;  %2980 = vmatprep.mubr.bf16.mxu1 %v13230_v8  ;;  %v2723_v60 = vld [vmem:[#allocation2 + $0xb0] sm:$0xff]  ;;  %v13355_v8 = vld [vmem:[#allocation2 + $0xe8] sm:$0xff] }
 0x1c1   : > { %2376 = vmatprep.mubr.bf16.mxu0 %v2069_v25 }
 0x1c7   : > { %2981 = vmatmul.mubr.bf16.vlgmr.msra.gmra.mrb[80].mxu1 %v2050_v31 }
 0x1c8   : > { %2377 = vmatmul.mubr.bf16.gmra.mrb[76].mxu0 %v2068_v29  ;;  %2988 = vmatprep.mubr.bf16.mxu1 %v2054_v48 }
 0x1c9   : > { %2384 = vmatprep.mubr.bf16.mxu0 %v12860_v58  ;;  %11117 = vmatpush3.bf16.msra.mxu1 %v12172_v40 }
 0x1cf   : > { %2989 = vmatmul.mubr.bf16.gmra.mrb[84].mxu1 %v2053_v12 }
 0x1d0   : > { %2385 = vmatmul.mubr.bf16.gmra.mrb[80].mxu0 %v13071_v47  ;;  %2996 = vmatprep.mubr.bf16.mxu1 %v2057_v38 }
 0x1d1   : > { %2392 = vmatprep.mubr.bf16.mxu0 %v12854_v51  ;;  %v2722_v51 = vld [vmem:[#allocation2 + $0xa8] sm:$0xff] }
 0x1d7   : > { %2997 = vmatmul.mubr.bf16.gmra.mrb[88].mxu1 %v2056_v22 }
 0x1d8   : > { %2393 = vmatmul.mubr.bf16.gmra.mrb[84].mxu0 %v13009_v30  ;;  %3004 = vmatprep.mubr.bf16.mxu1 %v2717_v41  ;;  %v2732_v30 = vld [vmem:[#allocation2 + $0xf8] sm:$0xff] }
 0x1d9   : > { %2400 = vmatprep.mubr.bf16.mxu0 %v13113_v28 }
 0x1df   : > { %3005 = vmatmul.mubr.bf16.gmra.mrb[92].mxu1 %v2716_v54 }
 0x1e0   : > { %2401 = vmatmul.mubr.bf16.gmra.mrb[88].mxu0 %v13161_v20  ;;  %3012 = vmatprep.mubr.bf16.mxu1 %v2063_v50 }
 0x1e1   : > { %2408 = vmatprep.mubr.bf16.mxu0 %v13111_v56 }
 0x1e7   : > { %3013 = vmatmul.mubr.bf16.gmra.mrb[96].mxu1 %v2062_v44  ;;  %v2752_v44 = vld [vmem:[#allocation2 + $0x198] sm:$0xff] }
 0x1e8   : > { %2409 = vmatmul.mubr.bf16.gmra.mrb[92].mxu0 %v13155_v6  ;;  %3020 = vmatprep.mubr.bf16.mxu1 %v2723_v60 }
 0x1e9   : > { %2416 = vmatprep.mubr.bf16.mxu0 %v13143_v2 }
 0x1ef   : > { %3021 = vmatmul.mubr.bf16.gmra.mrb[100].mxu1 %v2722_v51 }
 0x1f0   : > { %2417 = vmatmul.mubr.bf16.gmra.mrb[96].mxu0 %v13183_v7  ;;  %3028 = vmatprep.mubr.bf16.mxu1 %v2069_v25  ;;  %v13387_v25 = vld [vmem:[#allocation2 + $0x160] sm:$0xff] }
 0x1f1   : > { %2424 = vmatprep.mubr.bf16.mxu0 %v13134_v35 }
 0x1f7   : > { %3029 = vmatmul.mubr.bf16.gmra.mrb[104].mxu1 %v2068_v29 }
 0x1f8   : > { %2425 = vmatmul.mubr.bf16.gmra.mrb[100].mxu0 %v13172_v15  ;;  %3036 = vmatprep.mubr.bf16.mxu1 %v12860_v58  ;;  %v2049_v58 = vld [vmem:[#allocation2 + $0x28] sm:$0xff] }
 0x1f9   : > { %2432 = vmatprep.mubr.bf16.mxu0 %v13195_v24 }
 0x1ff   : > { %3037 = vmatmul.mubr.bf16.gmra.mrb[108].mxu1 %v13071_v47  ;;  %v12165_v47 = vld [vmem:[%s15269_s3 + $0x208] sm:$0xff]  }
 0x200   : > { %2433 = vmatmul.mubr.bf16.gmra.mrb[104].mxu0 %v13214_v4  ;;  %3044 = vmatprep.mubr.bf16.mxu1 %v2732_v30 }
 0x201   : > { %2440 = vmatprep.mubr.bf16.mxu0 %v13179_v21 }
 0x207   : > { %3045 = vmatmul.mubr.bf16.gmra.mrb[112].mxu1 %v2731_v36 }
 0x208   : > { %2441 = vmatmul.mubr.bf16.gmra.mrb[108].mxu0 %v13201_v42  ;;  %3052 = vmatprep.mubr.bf16.mxu1 %v13113_v28  ;;  %v12166_v28 = vld [vmem:[%s15269_s3 + $0x210] sm:$0xff]  }
 0x209   : > { %11036 = vmatprep.mubr.bf16.mxu0 %v2049_v58 }
 0x20f   : > { %3053 = vmatmul.mubr.bf16.gmra.mrb[116].mxu1 %v13161_v20  ;;  %v12167_v20 = vld [vmem:[%s15269_s3 + $0x218] sm:$0xff]  }
 0x210   : > { %11037 = vmatmul.mubr.bf16.vlgmr.msra.gmra.mrb[16].mxu0 %v13304_v37  ;;  %3060 = vmatprep.mubr.bf16.mxu1 %v13111_v56  ;;  %v13323_v56 = vld [vmem:[#allocation2 + $0x88] sm:$0xff] }
 0x211   : > { %11069 = vmatpush3.bf16.msra.mxu0 %v13266_v46  ;;  %11040 = vmatprep.mubr.bf16.mxu0 %v13308_v52 }
 0x212   : > { %11070 = vmatprep.subr.bf16.mxu0 %v12165_v47 }
 0x215   : > { %11071 = vmatpush3.bf16.msra.mxu0 %v12165_v47  ;;  %v12174_v47 = vld [vmem:[%s15271_s5 + $0x10] sm:$0xff]  }
 0x216   : > { %11072 = vmatprep.subr.bf16.mxu0 %v12166_v28 }
 0x217   : > { %3061 = vmatmul.mubr.bf16.gmra.mrb[120].mxu1 %v13155_v6  ;;  %v12169_v6 = vld [vmem:[%s15269_s3 + $0x228] sm:$0xff]  }
 0x218   : > { %11041 = vmatmul.mubr.bf16.gmra.mrb[20].mxu0 %v13319_v53  ;;  %3068 = vmatprep.mubr.bf16.mxu1 %v13143_v2  ;;  %v13337_v2 = vld [vmem:[#allocation2 + $0xb8] sm:$0xff] }
 0x219   : > { %11044 = vmatprep.mubr.bf16.mxu0 %v13323_v56  ;;  %11073 = vmatpush3.bf16.msra.mxu0 %v12166_v28 }
 0x21a   : > { %11074 = vmatprep.subr.bf16.mxu0 %v12167_v20 }
 0x21d   : > { %11075 = vmatpush3.bf16.msra.mxu0 %v12167_v20 }
 0x21e   : > { %11076 = vmatprep.subr.bf16.mxu0 %v12168_v57 }
 0x21f   : > { %3069 = vmatmul.mubr.bf16.gmra.mrb[124].mxu1 %v13183_v7 }
 0x220   : > { %11045 = vmatmul.mubr.bf16.gmra.mrb[24].mxu0 %v13333_v61  ;;  %3076 = vmatprep.mubr.bf16.mxu1 %v13134_v35  ;;  %v12171_v35 = vld [vmem:[%s15269_s3 + $0x238] sm:$0xff]  }
 0x221   : > { %11048 = vmatprep.mubr.bf16.mxu0 %v13337_v2  ;;  %11077 = vmatpush3.bf16.msra.mxu0 %v12168_v57  ;;  %v9650_v62 = vpop.f32.mrb[20].mxu1 }
 0x222   : > { %11078 = vmatprep.subr.bf16.mxu0 %v12169_v6  ;;  %v9651_v1 = vpop.f32.mrb[21].mxu1 }
 0x223   : > { %v13344_v3 = vadd.f32 %v9651_v1, %v9650_v62  ;;  %v9653_v49 = vpop.f32.mrb[22].mxu1 }
 0x224   : > { %v9654_v7 = vpop.f32.mrb[23].mxu1 }
 0x225   : > { %11079 = vmatpush3.bf16.msra.mxu0 %v12169_v6  ;;  %v13346_v32 = vadd.f32 %v9654_v7, %v9653_v49  ;;  %v12175_v7 = vld [vmem:[%s15271_s5 + $0x18] sm:$0xff]  }
 0x226   : > { %11080 = vmatprep.subr.bf16.mxu0 %v12170_v0 }
 0x227   : > { %3077 = vmatmul.mubr.bf16.gmra.mrb[128].mxu1 %v13172_v15  ;;  %v13363_v15 = vld [vmem:[#allocation2 + $0x100] sm:$0xff] }
 0x228   : > { %11049 = vmatmul.mubr.bf16.gmra.mrb[28].mxu0 %v13351_v39  ;;  %3084 = vmatprep.mubr.bf16.mxu1 %v13195_v24  ;;  %v13367_v24 = vld [vmem:[#allocation2 + $0x118] sm:$0xff] }
 0x229   : > { %11052 = vmatprep.mubr.bf16.mxu0 %v13355_v8  ;;  %11081 = vmatpush3.bf16.msra.mxu0 %v12170_v0  ;;  %v9656_v59 = vpop.f32.mrb[24].mxu1 }
 0x22a   : > { %11082 = vmatprep.subr.bf16.mxu0 %v12171_v35  ;;  %v9657_v10 = vpop.f32.mrb[25].mxu1 }
 0x22b   : > { %v13359_v31 = vadd.f32 %v9657_v10, %v9656_v59  ;;  %v9659_v48 = vpop.f32.mrb[26].mxu1 }
 0x22c   : > { %v9660_v55 = vpop.f32.mrb[27].mxu1 }
 0x22d   : > { %11083 = vmatpush3.bf16.msra.mxu0 %v12171_v35  ;;  %v13361_v33 = vadd.f32 %v9660_v55, %v9659_v48 }
 0x22f   : > { %3085 = vmatmul.mubr.bf16.gmra.mrb[132].mxu1 %v13214_v4 }
 0x230   : > { %11053 = vmatmul.mubr.bf16.gmra.mrb[32].mxu0 %v13363_v15  ;;  %3092 = vmatprep.mubr.bf16.mxu1 %v13179_v21  ;;  %v12340_v21 = vld [vmem:[#allocation2 + $0x8] sm:$0xff] }
 0x231   : > { %11056 = vmatprep.mubr.bf16.mxu0 %v13367_v24  ;;  %v9662_v11 = vpop.f32.mrb[28].mxu1 }
 0x232   : > { %v9663_v12 = vpop.f32.mrb[29].mxu1 }
 0x233   : > { %v13374_v38 = vadd.f32 %v9663_v12, %v9662_v11  ;;  %v9665_v16 = vpop.f32.mrb[30].mxu1 }
 0x234   : > { %v9666_v4 = vpop.f32.mrb[31].mxu1 }
 0x235   : > { %v13376_v17 = vadd.f32 %v9666_v4, %v9665_v16 }
 0x237   : > { %3093 = vmatmul.mubr.bf16.gmra.mrb[136].mxu1 %v13201_v42 }
 0x238   : > { %11057 = vmatmul.mubr.bf16.gmra.mrb[36].mxu0 %v13378_v43  ;;  %3100 = vmatprep.mubr.bf16.mxu1 %v12340_v21 }
 0x239   : > { %11060 = vmatprep.mubr.bf16.mxu0 %v13187_v63  ;;  %v12173_v63 = vld [vmem:[%s15271_s5 + $0x8] sm:$0xff]  }
 0x23a   : > { %v9668_v13 = vpop.f32.mrb[32].mxu1  ;;  %11118 = vmatprep.subr.bf16.mxu1 %v12173_v63 }
 0x23b   : > { %v9669_v22 = vpop.f32.mrb[33].mxu1  ;;  %11119 = vmatpush3.bf16.msra.mxu1 %v12173_v63 }
 0x23c   : > { %v13383_v46 = vadd.f32 %v9669_v22, %v9668_v13  ;;  %v9671_v50 = vpop.f32.mrb[34].mxu1  ;;  %11120 = vmatprep.subr.bf16.mxu1 %v12174_v47 }
 0x23d   : > { %v9672_v19 = vpop.f32.mrb[35].mxu1 }
 0x23e   : > { %v13385_v23 = vadd.f32 %v9672_v19, %v9671_v50 }
 0x23f   : > { %3101 = vmatmul.mubr.bf16.gmra.mrb[140].mxu1 %v2752_v44 }
 0x240   : > { %11061 = vmatmul.mubr.bf16.gmra.mrb[40].mxu0 %v13387_v25  ;;  %11121 = vmatpush3.bf16.msra.mxu1 %v12174_v47 }
 0x241   : > { %11064 = vmatprep.mubr.bf16.mxu0 %v13218_v5  ;;  %11122 = vmatprep.subr.bf16.mxu1 %v12175_v7 }
 0x242   : > { %v9674_v42 = vpop.f32.mrb[36].mxu1 }
 0x243   : > { %v9675_v29 = vpop.f32.mrb[37].mxu1 }
 0x244   : > { %v13394_v41 = vadd.f32 %v9675_v29, %v9674_v42  ;;  %v9677_v54 = vpop.f32.mrb[38].mxu1  ;;  %11123 = vmatpush3.bf16.msra.mxu1 %v12175_v7 }
 0x245   : > { %v9678_v60 = vpop.f32.mrb[39].mxu1 }
 0x246   : > { %v13396_v51 = vadd.f32 %v9678_v60, %v9677_v54 }
 0x248   : > { %11065 = vmatmul.mubr.bf16.gmra.mrb[44].mxu0 %v13205_v26 }
 0x249   : > { %11084 = vmatprep.mubr.bf16.mxu0 %v13304_v37 }
 0x24a   : > { %v9680_v30 = vpop.f32.mrb[40].mxu1 }
 0x24b   : > { %v9681_v5 = vpop.f32.mrb[41].mxu1 }
 0x24c   : > { %v13400_v34 = vadd.f32 %v9681_v5, %v9680_v30  ;;  %v9683_v45 = vpop.f32.mrb[42].mxu1 }
 0x24d   : > { %v9684_v36 = vpop.f32.mrb[43].mxu1 }
 0x24e   : > { %v13402_v58 = vadd.f32 %v9684_v36, %v9683_v45 }
 0x250   : > { %11085 = vmatmul.mubr.bf16.vlgmr.msra.gmra.mrb[16].mxu0 %v13308_v52 }
 0x251   : > { %11088 = vmatprep.mubr.bf16.mxu0 %v13319_v53 }
 0x252   : > { %v9686_v28 = vpop.f32.mrb[44].mxu1 }
 0x253   : > { %v9687_v26 = vpop.f32.mrb[45].mxu1 }
 0x254   : > { %v13409_v37 = vadd.f32 %v9687_v26, %v9686_v28  ;;  %v9689_v20 = vpop.f32.mrb[46].mxu1 }
 0x255   : > { %v9690_v57 = vpop.f32.mrb[47].mxu1 }
 0x256   : > { %v13411_v6 = vadd.f32 %v9690_v57, %v9689_v20 }
 0x258   : > { %11089 = vmatmul.mubr.bf16.gmra.mrb[20].mxu0 %v13323_v56 }
 0x259   : > { %11092 = vmatprep.mubr.bf16.mxu0 %v13333_v61 }
 0x25a   : > { %v9692_v52 = vpop.f32.mrb[48].mxu1 }
 0x25b   : > { %v9693_v53 = vpop.f32.mrb[49].mxu1 }
 0x25c   : > { %v13415_v62 = vadd.f32 %v9693_v53, %v9692_v52  ;;  %v9695_v0 = vpop.f32.mrb[50].mxu1  ;;  %v2742_v53 = vld [vmem:[#allocation2 + $0x148] sm:$0xff] }
 0x25d   : > { %v9696_v1 = vpop.f32.mrb[51].mxu1 }
 0x25e   : > { %v13417_v49 = vadd.f32 %v9696_v1, %v9695_v0 }
 0x260   : > { %11093 = vmatmul.mubr.bf16.gmra.mrb[24].mxu0 %v13337_v2 }
 0x261   : > { %11096 = vmatprep.mubr.bf16.mxu0 %v13351_v39 }
 0x262   : > { %v9698_v35 = vpop.f32.mrb[52].mxu1 }
 0x263   : > { %v9780_v56 = vpop.f32.mrb[48].mxu0  ;;  %v9699_v59 = vpop.f32.mrb[53].mxu1 }
 0x264   : > { %v13424_v61 = vadd.f32 %v9699_v59, %v9698_v35  ;;  %v9781_v10 = vpop.f32.mrb[49].mxu0  ;;  %v9701_v48 = vpop.f32.mrb[54].mxu1 }
 0x265   : > { %v9782_v55 = vadd.f32 %v9781_v10, %v9780_v56  ;;  %v9783_v40 = vpop.f32.mrb[50].mxu0  ;;  %v9702_v11 = vpop.f32.mrb[55].mxu1 }
 0x266   : > { %v13426_v12 = vadd.f32 %v9702_v11, %v9701_v48  ;;  %v9784_v2 = vpop.f32.mrb[51].mxu0 }
 0x267   : > { %v9785_v39 = vadd.f32 %v9784_v2, %v9783_v40  ;;  %v13429_v16 = vadd.f32 %v9782_v55, %v13245_v27 }
 0x268   : > { %11097 = vmatmul.mubr.bf16.gmra.mrb[28].mxu0 %v13355_v8  ;;  %v12176_v8 = vld [vmem:[%s15271_s5 + $0x20] sm:$0xff]  }
 0x269   : > { %11100 = vmatprep.mubr.bf16.mxu0 %v13363_v15  ;;  %v13434_v4 = vadd.f32 %v9785_v39, %v13255_v18  ;;  %11124 = vmatprep.subr.bf16.mxu1 %v12176_v8  ;;  %v2751_v39 = vld [vmem:[#allocation2 + $0x190] sm:$0xff] }
 0x26a   : > { %v9704_v21 = vpop.f32.mrb[56].mxu1  ;;  %11125 = vmatpush3.bf16.msra.mxu1 %v12176_v8 }
 0x26b   : > { %v9786_v13 = vpop.f32.mrb[52].mxu0  ;;  %v9705_v22 = vpop.f32.mrb[57].mxu1 }
 0x26c   : > { %v13436_v50 = vadd.f32 %v9705_v22, %v9704_v21  ;;  %v9787_v44 = vpop.f32.mrb[53].mxu0  ;;  %v9707_v19 = vpop.f32.mrb[58].mxu1 }
 0x26d   : > { %v9788_v63 = vadd.f32 %v9787_v44, %v9786_v13  ;;  %v9789_v42 = vpop.f32.mrb[54].mxu0  ;;  %v9708_v29 = vpop.f32.mrb[59].mxu1 }
 0x26e   : > { %v13438_v54 = vadd.f32 %v9708_v29, %v9707_v19  ;;  %v9790_v27 = vpop.f32.mrb[55].mxu0 }
 0x26f   : > { %v9791_v15 = vadd.f32 %v9790_v27, %v9789_v42  ;;  %v13444_v18 = vadd.f32 %v9788_v63, %v13344_v3 }
 0x270   : > { %11101 = vmatmul.mubr.bf16.gmra.mrb[32].mxu0 %v13367_v24 }
 0x271   : > { %11104 = vmatprep.mubr.bf16.mxu0 %v13378_v43  ;;  %v13449_v60 = vadd.f32 %v9791_v15, %v13346_v32 }
 0x272   : > { %v9710_v30 = vpop.f32.mrb[60].mxu1 }
 0x273   : > { %v9792_v5 = vpop.f32.mrb[56].mxu0  ;;  %v9711_v45 = vpop.f32.mrb[61].mxu1 }
 0x274   : > { %v13451_v36 = vadd.f32 %v9711_v45, %v9710_v30  ;;  %v9793_v47 = vpop.f32.mrb[57].mxu0  ;;  %v9713_v28 = vpop.f32.mrb[62].mxu1 }
 0x275   : > { %v9794_v26 = vadd.f32 %v9793_v47, %v9792_v5  ;;  %v9795_v20 = vpop.f32.mrb[58].mxu0  ;;  %v9714_v3 = vpop.f32.mrb[63].mxu1 }
 0x276   : > { %v13453_v57 = vadd.f32 %v9714_v3, %v9713_v28  ;;  %v9796_v24 = vpop.f32.mrb[59].mxu0 }
 0x277   : > { %v9797_v52 = vadd.f32 %v9796_v24, %v9795_v20  ;;  %v13456_v43 = vadd.f32 %v9794_v26, %v13359_v31 }
 0x278   : > { %11105 = vmatmul.mubr.bf16.gmra.mrb[36].mxu0 %v2742_v53 }
 0x279   : > { %11108 = vmatprep.mubr.bf16.mxu0 %v13387_v25  ;;  %v13460_v32 = vadd.f32 %v9797_v52, %v13361_v33  ;;  %v12177_v25 = vld [vmem:[%s15271_s5 + $0x28] sm:$0xff]   ;;  %v2748_v33 = vld [vmem:[#allocation2 + $0x178] sm:$0xff] }
 0x27a   : > { %v9716_v0 = vpop.f32.mrb[64].mxu1  ;;  %11126 = vmatprep.subr.bf16.mxu1 %v12177_v25 }
 0x27b   : > { %v9798_v1 = vpop.f32.mrb[60].mxu0  ;;  %v9717_v7 = vpop.f32.mrb[65].mxu1  ;;  %11127 = vmatpush3.bf16.msra.mxu1 %v12177_v25 }
 0x27c   : > { %v13462_v35 = vadd.f32 %v9717_v7, %v9716_v0  ;;  %v9799_v56 = vpop.f32.mrb[61].mxu0  ;;  %v9719_v59 = vpop.f32.mrb[66].mxu1 }
 0x27d   : > { %v9800_v10 = vadd.f32 %v9799_v56, %v9798_v1  ;;  %v9801_v48 = vpop.f32.mrb[62].mxu0  ;;  %v9720_v55 = vpop.f32.mrb[67].mxu1 }
 0x27e   : > { %v13464_v40 = vadd.f32 %v9720_v55, %v9719_v59  ;;  %v9802_v31 = vpop.f32.mrb[63].mxu0 }
 0x27f   : > { %v9803_v11 = vadd.f32 %v9802_v31, %v9801_v48  ;;  %v13470_v2 = vadd.f32 %v9800_v10, %v13374_v38  ;;  %v2754_v38 = vld [vmem:[#allocation2 + $0x1a8] sm:$0xff] }
 0x280   : > { %11109 = vmatmul.mubr.bf16.gmra.mrb[40].mxu0 %v2748_v33 }
 0x281   : > { %11112 = vmatprep.mubr.bf16.mxu0 %v2751_v39  ;;  %v13473_v21 = vadd.f32 %v9803_v11, %v13376_v17 }
 0x282   : > { %v9722_v13 = vpop.f32.mrb[68].mxu1 }
 0x283   : > { %v9804_v22 = vpop.f32.mrb[64].mxu0  ;;  %v9723_v44 = vpop.f32.mrb[69].mxu1 }
 0x284   : > { %v13475_v19 = vadd.f32 %v9723_v44, %v9722_v13  ;;  %v9805_v63 = vpop.f32.mrb[65].mxu0  ;;  %v9725_v42 = vpop.f32.mrb[70].mxu1 }
 0x285   : > { %v9806_v29 = vadd.f32 %v9805_v63, %v9804_v22  ;;  %v9807_v27 = vpop.f32.mrb[66].mxu0  ;;  %v9726_v8 = vpop.f32.mrb[71].mxu1 }
 0x286   : > { %v13477_v15 = vadd.f32 %v9726_v8, %v9725_v42  ;;  %v9808_v30 = vpop.f32.mrb[67].mxu0 }
 0x287   : > { %v9809_v5 = vadd.f32 %v9808_v30, %v9807_v27  ;;  %v13480_v45 = vadd.f32 %v9806_v29, %v13383_v46  ;;  %v12178_v46 = vld [vmem:[%s15271_s5 + $0x30] sm:$0xff]  }
 0x288   : > { %11113 = vmatmul.mubr.bf16.gmra.mrb[44].mxu0 %v2754_v38  ;;  %11128 = vmatprep.subr.bf16.mxu1 %v12178_v46 }
 0x289   : > { %v13483_v17 = vadd.f32 %v9809_v5, %v13385_v23  ;;  %11129 = vmatpush3.bf16.msra.mxu1 %v12178_v46 }
 0x28a   : > { %v9728_v47 = vpop.f32.mrb[72].mxu1 }
 0x28b   : > { %v9810_v28 = vpop.f32.mrb[68].mxu0  ;;  %v9729_v26 = vpop.f32.mrb[73].mxu1 }
 0x28c   : > { %v13485_v20 = vadd.f32 %v9729_v26, %v9728_v47  ;;  %v9811_v3 = vpop.f32.mrb[69].mxu0  ;;  %v9731_v24 = vpop.f32.mrb[74].mxu1 }
 0x28d   : > { %v9812_v52 = vadd.f32 %v9811_v3, %v9810_v28  ;;  %v9813_v53 = vpop.f32.mrb[70].mxu0  ;;  %v9732_v0 = vpop.f32.mrb[75].mxu1 }
 0x28e   : > { %v13487_v1 = vadd.f32 %v9732_v0, %v9731_v24  ;;  %v9814_v7 = vpop.f32.mrb[71].mxu0 }
 0x28f   : > { %v9815_v56 = vadd.f32 %v9814_v7, %v9813_v53  ;;  %v13493_v23 = vadd.f32 %v9812_v52, %v13394_v41  ;;  %v12179_v41 = vld [vmem:[%s15271_s5 + $0x38] sm:$0xff]  }
 0x290   : > { %11130 = vmatprep.subr.bf16.mxu1 %v12179_v41 }
 0x291   : > { %v13496_v59 = vadd.f32 %v9815_v56, %v13396_v51  ;;  %11131 = vmatpush3.bf16.msra.mxu1 %v12179_v41 }
 0x292   : > { %v9734_v10 = vpop.f32.mrb[76].mxu1 }
 0x293   : > { %v9816_v48 = vpop.f32.mrb[72].mxu0  ;;  %v9735_v55 = vpop.f32.mrb[77].mxu1 }
 0x294   : > { %v13498_v31 = vadd.f32 %v9735_v55, %v9734_v10  ;;  %v9817_v25 = vpop.f32.mrb[73].mxu0  ;;  %v9737_v11 = vpop.f32.mrb[78].mxu1 }
 0x295   : > { %v9818_v33 = vadd.f32 %v9817_v25, %v9816_v48  ;;  %v9819_v39 = vpop.f32.mrb[74].mxu0  ;;  %v9738_v13 = vpop.f32.mrb[79].mxu1 }
 0x296   : > { %v13500_v22 = vadd.f32 %v9738_v13, %v9737_v11  ;;  %v9820_v44 = vpop.f32.mrb[75].mxu0 }
 0x297   : > { %v9821_v63 = vadd.f32 %v9820_v44, %v9819_v39  ;;  %v13506_v51 = vadd.f32 %v9818_v33, %v13400_v34 }
 0x299   : > { %v13509_v42 = vadd.f32 %v9821_v63, %v13402_v58 }
 0x29a   : > { %v9916_v29 = vpop.f32.mrb[80].mxu1 }
 0x29b   : > { %v9822_v27 = vpop.f32.mrb[76].mxu0  ;;  %v9917_v8 = vpop.f32.mrb[81].mxu1 }
 0x29c   : > { %v9823_v38 = vpop.f32.mrb[77].mxu0  ;;  %v9918_v30 = vadd.f32 %v9917_v8, %v9916_v29  ;;  %v9919_v5 = vpop.f32.mrb[82].mxu1 }
 0x29d   : > { %v9824_v47 = vadd.f32 %v9823_v38, %v9822_v27  ;;  %v9825_v28 = vpop.f32.mrb[78].mxu0  ;;  %v9920_v26 = vpop.f32.mrb[83].mxu1 }
 0x29e   : > { %v9826_v3 = vpop.f32.mrb[79].mxu0  ;;  %v9921_v24 = vadd.f32 %v9920_v26, %v9919_v5  ;;  %v13512_v52 = vadd.f32 %v13429_v16, %v9918_v30 }
 0x29f   : > { %v9827_v34 = vadd.f32 %v9826_v3, %v9825_v28  ;;  %v13515_v53 = vadd.f32 %v9824_v47, %v13409_v37 }
 0x2a0   : > { %v13518_v58 = vadd.f32 %v13434_v4, %v9921_v24 }
 0x2a1   : > { %v13521_v0 = vadd.f32 %v9827_v34, %v13411_v6 }
 0x2a2   : > { %v9922_v7 = vpop.f32.mrb[84].mxu1 }
 0x2a3   : > { %v9828_v46 = vpop.f32.mrb[80].mxu0  ;;  %v9923_v56 = vpop.f32.mrb[85].mxu1 }
 0x2a4   : > { %v9829_v10 = vpop.f32.mrb[81].mxu0  ;;  %v9924_v48 = vadd.f32 %v9923_v56, %v9922_v7  ;;  %v9925_v55 = vpop.f32.mrb[86].mxu1 }
 0x2a5   : > { %v9830_v25 = vadd.f32 %v9829_v10, %v9828_v46  ;;  %v9831_v11 = vpop.f32.mrb[82].mxu0  ;;  %v9926_v16 = vpop.f32.mrb[87].mxu1 }
 0x2a6   : > { %v9832_v33 = vpop.f32.mrb[83].mxu0  ;;  %v9927_v39 = vadd.f32 %v9926_v16, %v9925_v55  ;;  %v13524_v37 = vadd.f32 %v13444_v18, %v9924_v48 }
 0x2a7   : > { %v13527_v4 = vadd.f32 %v9830_v25, %v13415_v62  ;;  %v9833_v13 = vadd.f32 %v9832_v33, %v9831_v11 }
 0x2a8   : > { %v13530_v6 = vadd.f32 %v13449_v60, %v9927_v39 }
 0x2a9   : > { %v13533_v44 = vadd.f32 %v9833_v13, %v13417_v49 }
 0x2aa   : > { %v9928_v41 = vpop.f32.mrb[88].mxu1 }
 0x2ab   : > { %v9834_v63 = vpop.f32.mrb[84].mxu0  ;;  %v9929_v29 = vpop.f32.mrb[89].mxu1 }
 0x2ac   : > { %v9835_v27 = vpop.f32.mrb[85].mxu0  ;;  %v9930_v8 = vadd.f32 %v9929_v29, %v9928_v41  ;;  %v9931_v38 = vpop.f32.mrb[90].mxu1 }
 0x2ad   : > { %v9836_v30 = vadd.f32 %v9835_v27, %v9834_v63  ;;  %v9837_v5 = vpop.f32.mrb[86].mxu0  ;;  %v9932_v18 = vpop.f32.mrb[91].mxu1 }
 0x2ae   : > { %v9838_v47 = vpop.f32.mrb[87].mxu0  ;;  %v9933_v28 = vadd.f32 %v9932_v18, %v9931_v38  ;;  %v13536_v62 = vadd.f32 %v13456_v43, %v9930_v8 }
 0x2af   : > { %v13539_v60 = vadd.f32 %v9836_v30, %v13424_v61  ;;  %v9839_v26 = vadd.f32 %v9838_v47, %v9837_v5 }
 0x2b0   : > { %v13542_v49 = vadd.f32 %v13460_v32, %v9933_v28 }
 0x2b1   : > { %v13545_v3 = vadd.f32 %v9839_v26, %v13426_v12 }
 0x2b2   : > { %v9934_v24 = vpop.f32.mrb[92].mxu1 }
 0x2b3   : > { %v9840_v34 = vpop.f32.mrb[88].mxu0  ;;  %v9935_v7 = vpop.f32.mrb[93].mxu1 }
 0x2b4   : > { %v9841_v46 = vpop.f32.mrb[89].mxu0  ;;  %v9936_v56 = vadd.f32 %v9935_v7, %v9934_v24  ;;  %v9937_v10 = vpop.f32.mrb[94].mxu1 }
 0x2b5   : > { %v9842_v48 = vadd.f32 %v9841_v46, %v9840_v34  ;;  %v9843_v55 = vpop.f32.mrb[90].mxu0  ;;  %v9938_v43 = vpop.f32.mrb[95].mxu1 }
 0x2b6   : > { %v9844_v25 = vpop.f32.mrb[91].mxu0  ;;  %v9939_v11 = vadd.f32 %v9938_v43, %v9937_v10  ;;  %v13548_v61 = vadd.f32 %v13470_v2, %v9936_v56 }
 0x2b7   : > { %v13551_v32 = vadd.f32 %v9842_v48, %v13436_v50  ;;  %v9845_v16 = vadd.f32 %v9844_v25, %v9843_v55 }
 0x2b8   : > { %v13554_v12 = vadd.f32 %v13473_v21, %v9939_v11 }
 0x2b9   : > { %v13557_v33 = vadd.f32 %v9845_v16, %v13438_v54 }
 0x2ba   : > { %v9940_v39 = vpop.f32.mrb[96].mxu1 }
 0x2bb   : > { %v9846_v13 = vpop.f32.mrb[92].mxu0  ;;  %v9941_v41 = vpop.f32.mrb[97].mxu1 }
 0x2bc   : > { %v9847_v63 = vpop.f32.mrb[93].mxu0  ;;  %v9942_v29 = vadd.f32 %v9941_v41, %v9940_v39  ;;  %v9943_v27 = vpop.f32.mrb[98].mxu1 }
 0x2bd   : > { %v9848_v8 = vadd.f32 %v9847_v63, %v9846_v13  ;;  %v9849_v38 = vpop.f32.mrb[94].mxu0  ;;  %v9944_v2 = vpop.f32.mrb[99].mxu1 }
 0x2be   : > { %v9850_v30 = vpop.f32.mrb[95].mxu0  ;;  %v9945_v5 = vadd.f32 %v9944_v2, %v9943_v27  ;;  %v13560_v50 = vadd.f32 %v13480_v45, %v9942_v29 }
 0x2bf   : > { %v13563_v21 = vadd.f32 %v9848_v8, %v13451_v36  ;;  %v9851_v18 = vadd.f32 %v9850_v30, %v9849_v38 }
 0x2c0   : > { %v13566_v54 = vadd.f32 %v13483_v17, %v9945_v5 }
 0x2c1   : > { %v13569_v47 = vadd.f32 %v9851_v18, %v13453_v57 }
 0x2c2   : > { %v9946_v28 = vpop.f32.mrb[100].mxu1 }
 0x2c3   : > { %v9852_v26 = vpop.f32.mrb[96].mxu0  ;;  %v9947_v24 = vpop.f32.mrb[101].mxu1 }
 0x2c4   : > { %v9853_v34 = vpop.f32.mrb[97].mxu0  ;;  %v9948_v7 = vadd.f32 %v9947_v24, %v9946_v28  ;;  %v9949_v46 = vpop.f32.mrb[102].mxu1 }
 0x2c5   : > { %v9854_v56 = vadd.f32 %v9853_v34, %v9852_v26  ;;  %v9855_v10 = vpop.f32.mrb[98].mxu0  ;;  %v9950_v45 = vpop.f32.mrb[103].mxu1 }
 0x2c6   : > { %v9856_v48 = vpop.f32.mrb[99].mxu0  ;;  %v9951_v55 = vadd.f32 %v9950_v45, %v9949_v46  ;;  %v13572_v36 = vadd.f32 %v13493_v23, %v9948_v7 }
 0x2c7   : > { %v13575_v17 = vadd.f32 %v9854_v56, %v13462_v35  ;;  %v9857_v43 = vadd.f32 %v9856_v48, %v9855_v10 }
 0x2c8   : > { %v13578_v57 = vadd.f32 %v13496_v59, %v9951_v55 }
 0x2c9   : > { %v13581_v25 = vadd.f32 %v9857_v43, %v13464_v40 }
 0x2ca   : > { %v9952_v11 = vpop.f32.mrb[104].mxu1 }
 0x2cb   : > { %v9858_v16 = vpop.f32.mrb[100].mxu0  ;;  %v9953_v39 = vpop.f32.mrb[105].mxu1 }
 0x2cc   : > { %v9859_v13 = vpop.f32.mrb[101].mxu0  ;;  %v9954_v41 = vadd.f32 %v9953_v39, %v9952_v11  ;;  %v9955_v63 = vpop.f32.mrb[106].mxu1 }
 0x2cd   : > { %v9860_v29 = vadd.f32 %v9859_v13, %v9858_v16  ;;  %v9861_v27 = vpop.f32.mrb[102].mxu0  ;;  %v9956_v23 = vpop.f32.mrb[107].mxu1 }
 0x2ce   : > { %v9862_v8 = vpop.f32.mrb[103].mxu0  ;;  %v9957_v38 = vadd.f32 %v9956_v23, %v9955_v63  ;;  %v13584_v35 = vadd.f32 %v13506_v51, %v9954_v41 }
 0x2cf   : > { %v13587_v59 = vadd.f32 %v9860_v29, %v13475_v19  ;;  %v9863_v2 = vadd.f32 %v9862_v8, %v9861_v27 }
 0x2d0   : > { %v13590_v40 = vadd.f32 %v13509_v42, %v9957_v38 }
 0x2d1   : > { %v13593_v30 = vadd.f32 %v9863_v2, %v13477_v15 }
 0x2d2   : > { %v9958_v5 = vpop.f32.mrb[108].mxu1 }
 0x2d3   : > { %v9864_v18 = vpop.f32.mrb[104].mxu0  ;;  %v9959_v28 = vpop.f32.mrb[109].mxu1 }
 0x2d4   : > { %v9865_v26 = vpop.f32.mrb[105].mxu0  ;;  %v9960_v24 = vadd.f32 %v9959_v28, %v9958_v5  ;;  %v9961_v34 = vpop.f32.mrb[110].mxu1 }
 0x2d5   : > { %v9866_v7 = vadd.f32 %v9865_v26, %v9864_v18  ;;  %v9867_v46 = vpop.f32.mrb[106].mxu0  ;;  %v9962_v51 = vpop.f32.mrb[111].mxu1 }
 0x2d6   : > { %v9868_v56 = vpop.f32.mrb[107].mxu0  ;;  %v9963_v10 = vadd.f32 %v9962_v51, %v9961_v34  ;;  %v13596_v19 = vadd.f32 %v13515_v53, %v9960_v24  ;;  %v12180_v34 = vld [vmem:[#allocation4 + $0x80] sm:$0xff]  }
 0x2d7   : > { %v13599_v42 = vadd.f32 %v9866_v7, %v13485_v20  ;;  %v9869_v45 = vadd.f32 %v9868_v56, %v9867_v46  ;;  %v12181_v7 = vld [vmem:[#allocation4 + $0x88] sm:$0xff]   ;;  %v12184_v46 = vld [vmem:[#allocation4 + $0x40] sm:$0xff]   ;;  %11164 = vmatprep.subr.bf16.mxu0 %v12180_v34 }
 0x2d8   : > { %v13602_v15 = vadd.f32 %v13521_v0, %v9963_v10  ;;  %11165 = vmatpush3.bf16.msra.mxu0 %v12180_v34  ;;  %10060 = vmatprep.subr.bf16.mxu1 %v12184_v46 }
 0x2d9   : > { %v13605_v48 = vadd.f32 %v9869_v45, %v13487_v1  ;;  %11166 = vmatprep.subr.bf16.mxu0 %v12181_v7 }
 0x2da   : > { %v9964_v55 = vpop.f32.mrb[112].mxu1 }
 0x2db   : > { %v9870_v43 = vpop.f32.mrb[108].mxu0  ;;  %v9965_v11 = vpop.f32.mrb[113].mxu1 }
 0x2dc   : > { %v9871_v16 = vpop.f32.mrb[109].mxu0  ;;  %v9966_v39 = vadd.f32 %v9965_v11, %v9964_v55  ;;  %v9967_v13 = vpop.f32.mrb[114].mxu1  ;;  %11167 = vmatpush3.bf16.msra.mxu0 %v12181_v7 }
 0x2dd   : > { %v9872_v41 = vadd.f32 %v9871_v16, %v9870_v43  ;;  %v9873_v63 = vpop.f32.mrb[110].mxu0  ;;  %v9968_v53 = vpop.f32.mrb[115].mxu1  ;;  %v12183_v43 = vld [vmem:[#allocation4 + $0x98] sm:$0xff]  }
 0x2de   : > { %v9874_v29 = vpop.f32.mrb[111].mxu0  ;;  %v9969_v27 = vadd.f32 %v9968_v53, %v9967_v13  ;;  %v13608_v20 = vadd.f32 %v13527_v4, %v9966_v39 }
 0x2df   : > { %v13611_v0 = vadd.f32 %v9872_v41, %v13498_v31  ;;  %v9875_v23 = vadd.f32 %v9874_v29, %v9873_v63 }
 0x2e0   : > { %v13614_v1 = vadd.f32 %v13533_v44, %v9969_v27 }
 0x2e1   : > { %v13617_v8 = vadd.f32 %v9875_v23, %v13500_v22 }
 0x2e2   : > { %v9970_v38 = vpop.f32.mrb[116].mxu1 }
 0x2e3   : > { %v9971_v2 = vpop.f32.mrb[117].mxu1 }
 0x2e4   : > { %v9972_v5 = vadd.f32 %v9971_v2, %v9970_v38  ;;  %v9973_v18 = vpop.f32.mrb[118].mxu1 }
 0x2e5   : > { %v9974_v28 = vpop.f32.mrb[119].mxu1 }
 0x2e6   : > { %v9975_v26 = vadd.f32 %v9974_v28, %v9973_v18  ;;  %v13620_v24 = vadd.f32 %v13539_v60, %v9972_v5  ;;  %v12182_v60 = vld [vmem:[#allocation4 + $0x90] sm:$0xff]  }
 0x2e7   : > { %11168 = vmatprep.subr.bf16.mxu0 %v12182_v60 }
 0x2e8   : > { %v13623_v4 = vadd.f32 %v13545_v3, %v9975_v26  ;;  %11169 = vmatpush3.bf16.msra.mxu0 %v12182_v60 }
 0x2e9   : > { %11170 = vmatprep.subr.bf16.mxu0 %v12183_v43 }
 0x2ea   : > { %v9976_v31 = vpop.f32.mrb[120].mxu1 }
 0x2eb   : > { %v9977_v44 = vpop.f32.mrb[121].mxu1 }
 0x2ec   : > { %v9978_v51 = vadd.f32 %v9977_v44, %v9976_v31  ;;  %v9979_v22 = vpop.f32.mrb[122].mxu1  ;;  %11171 = vmatpush3.bf16.msra.mxu0 %v12183_v43 }
 0x2ed   : > { %v9980_v56 = vpop.f32.mrb[123].mxu1 }
 0x2ee   : > { %v9981_v10 = vadd.f32 %v9980_v56, %v9979_v22  ;;  %v13626_v45 = vadd.f32 %v13551_v32, %v9978_v51  ;;  %v12188_v32 = vld [vmem:[#allocation4 + $0xa0] sm:$0xff]  }
 0x2ef   : > { %11172 = vmatprep.subr.bf16.mxu0 %v12188_v32 }
 0x2f0   : > { %v13629_v3 = vadd.f32 %v13557_v33, %v9981_v10  ;;  %11173 = vmatpush3.bf16.msra.mxu0 %v12188_v32 }
 0x2f2   : > { %v9982_v55 = vpop.f32.mrb[124].mxu1 }
 0x2f3   : > { %v9983_v11 = vpop.f32.mrb[125].mxu1 }
 0x2f4   : > { %v9984_v16 = vadd.f32 %v9983_v11, %v9982_v55  ;;  %v9985_v39 = vpop.f32.mrb[126].mxu1 }
 0x2f5   : > { %v9986_v13 = vpop.f32.mrb[127].mxu1 }
 0x2f6   : > { %v9987_v41 = vadd.f32 %v9986_v13, %v9985_v39  ;;  %v13632_v63 = vadd.f32 %v13563_v21, %v9984_v16 }
 0x2f8   : > { %v13635_v53 = vadd.f32 %v13569_v47, %v9987_v41 }
 0x2fa   : > { %v9988_v33 = vpop.f32.mrb[128].mxu1 }
 0x2fb   : > { %v9989_v29 = vpop.f32.mrb[129].mxu1 }
 0x2fc   : > { %v9990_v27 = vadd.f32 %v9989_v29, %v9988_v33  ;;  %v9991_v23 = vpop.f32.mrb[130].mxu1 }
 0x2fd   : > { %v9992_v38 = vpop.f32.mrb[131].mxu1 }
 0x2fe   : > { %v9993_v2 = vadd.f32 %v9992_v38, %v9991_v23  ;;  %v13638_v5 = vadd.f32 %v13575_v17, %v9990_v27 }
 0x300   : > { %v13641_v21 = vadd.f32 %v13581_v25, %v9993_v2 }
 0x302   : > { %v9994_v18 = vpop.f32.mrb[132].mxu1 }
 0x303   : > { %v9995_v28 = vpop.f32.mrb[133].mxu1 }
 0x304   : > { %v9996_v26 = vadd.f32 %v9995_v28, %v9994_v18  ;;  %v9997_v47 = vpop.f32.mrb[134].mxu1 }
 0x305   : > { %v9998_v31 = vpop.f32.mrb[135].mxu1 }
 0x306   : > { %v9999_v34 = vadd.f32 %v9998_v31, %v9997_v47  ;;  %v13644_v7 = vadd.f32 %v13587_v59, %v9996_v26 }
 0x308   : > { %v13647_v44 = vadd.f32 %v13593_v30, %v9999_v34 }
 0x30a   : > { %v10000_v46 = vpop.f32.mrb[136].mxu1 }
 0x30b   : > { %v10001_v51 = vpop.f32.mrb[137].mxu1 }
 0x30c   : > { %v10002_v22 = vadd.f32 %v10001_v51, %v10000_v46  ;;  %v10003_v17 = vpop.f32.mrb[138].mxu1 }
 0x30d   : > { %v10004_v56 = vpop.f32.mrb[139].mxu1 }
 0x30e   : > { %v10005_v10 = vadd.f32 %v10004_v56, %v10003_v17  ;;  %v13650_v25 = vadd.f32 %v13599_v42, %v10002_v22  ;;  %v13664_v42 = vld [vmem:[%s15270_s4] ss:$0 sm:$0xff] }
 0x310   : > { %v13653_v60 = vadd.f32 %v13605_v48, %v10005_v10 }
 0x312   : > { %v10006_v55 = vpop.f32.mrb[140].mxu1 }
 0x313   : > { %v10007_v43 = vpop.f32.mrb[141].mxu1 }
 0x314   : > { %v10008_v11 = vadd.f32 %v10007_v43, %v10006_v55  ;;  %v10009_v59 = vpop.f32.mrb[142].mxu1 }
 0x315   : > { %v10010_v16 = vpop.f32.mrb[143].mxu1 }
 0x316   : > { %v10011_v39 = vadd.f32 %v10010_v16, %v10009_v59  ;;  %v13656_v30 = vadd.f32 %v13611_v0, %v10008_v11 }
 0x318   : > { %v13659_v13 = vadd.f32 %v13617_v8, %v10011_v39  ;;  %v12185_v39 = vld [vmem:[#allocation4] sm:$0xff]  }
 0x323   : > { %v11086_v41 = vpop.f32.mrb[16].mxu0 }
 0x324   : > { %v11566_v48 = vadd.f32 %v13524_v37, %v11086_v41  ;;  %v3143_v32 = vpop.f32.mrb[17].mxu0 }
 0x325   : > { %v11569_v33 = vadd.f32 %v13512_v52, %v3143_v32  ;;  %v11087_v29 = vpop.f32.mrb[18].mxu0 }
 0x326   : > { %v3375_v27 = vadd.f32 %v11566_v48, %v13664_v42  ;;  %v11572_v0 = vadd.f32 %v13530_v6, %v11087_v29  ;;  %v3146_v23 = vpop.f32.mrb[19].mxu0  ;;  %v12186_v48 = vld [vmem:[#allocation4 + $0x48] sm:$0xff]  }
 0x327   : > { %v3373_v8 = vadd.f32 %v11569_v33, %v13664_v42  ;;  %v11575_v38 = vadd.f32 %v13518_v58, %v3146_v23 }
 0x328   : > { %v3407_v2 = vmul.f32 0.1, %v3375_v27  ;;  %v3376_v18 = vadd.f32 %v11572_v0, %v13664_v42 }
 0x329   : > { %v3405_v28 = vmul.f32 0.1, %v3373_v8  ;;  %v3374_v26 = vadd.f32 %v11575_v38, %v13664_v42  ;;  %v12189_v38 = vld [vmem:[#allocation4 + $0x50] sm:$0xff]  }
 0x32a   : > { %v3408_v37 = vmul.f32 0.1, %v3376_v18  ;;  %v3439_v52 = vmax.f32 %v3375_v27, %v3407_v2 }
 0x32b   : > { %v3406_v47 = vmul.f32 0.1, %v3374_v26  ;;  %v11090_v31 = vpop.f32.mrb[20].mxu0  ;;  %v3437_v6 = vmax.f32 %v3373_v8, %v3405_v28 }
 0x32c   : > { %v3440_v34 = vmax.f32 %v3376_v18, %v3408_v37  ;;  %v11578_v46 = vadd.f32 %v13548_v61, %v11090_v31  ;;  %v3159_v51 = vpop.f32.mrb[21].mxu0 }
 0x32d   : > { %v3438_v22 = vmax.f32 %v3374_v26, %v3406_v47  ;;  %v11581_v17 = vadd.f32 %v13536_v62, %v3159_v51  ;;  %v11091_v56 = vpop.f32.mrb[22].mxu0 }
 0x32e   : > { %v3470_v58 = vpack.c.bf16 %v3440_v34, %v3439_v52  ;;  %v3379_v10 = vadd.f32 %v11578_v46, %v13664_v42  ;;  %v11584_v55 = vadd.f32 %v13554_v12, %v11091_v56  ;;  %v3162_v43 = vpop.f32.mrb[23].mxu0  ;;  %v12187_v12 = vld [vmem:[#allocation4 + $0x8] sm:$0xff]  }
 0x32f   : > { %v3377_v11 = vadd.f32 %v11581_v17, %v13664_v42  ;;  %v11587_v59 = vadd.f32 %v13542_v49, %v3162_v43  ;;  %v3469_v16 = vpack.c.bf16 %v3438_v22, %v3437_v6  ;;  %v12191_v17 = vld [vmem:[#allocation4 + $0x58] sm:$0xff]  }
 0x330   : > { %v3411_v41 = vmul.f32 0.1, %v3379_v10  ;;  %v3380_v61 = vadd.f32 %v11584_v55, %v13664_v42 }
 0x331   : > { %v3409_v32 = vmul.f32 0.1, %v3377_v11  ;;  %v3378_v62 = vadd.f32 %v11587_v59, %v13664_v42  ;;  %11132 = vmatprep.mubr.bf16.mxu1 %v3469_v16 }
 0x332   : > { %v3412_v33 = vmul.f32 0.1, %v3380_v61  ;;  %11133 = vmatmul.mubr.bf16.vlgmr.msra.gmra.mrb[144].mxu1 %v3470_v58  ;;  %v3443_v0 = vmax.f32 %v3379_v10, %v3411_v41 }
 0x333   : > { %v3410_v29 = vmul.f32 0.1, %v3378_v62  ;;  %v11094_v27 = vpop.f32.mrb[24].mxu0  ;;  %10061 = vmatpush3.bf16.msra.mxu1 %v12185_v39  ;;  %v3441_v2 = vmax.f32 %v3377_v11, %v3409_v32 }
 0x334   : > { %v3444_v23 = vmax.f32 %v3380_v61, %v3412_v33  ;;  %v11590_v49 = vadd.f32 %v13572_v36, %v11094_v27  ;;  %v3175_v8 = vpop.f32.mrb[25].mxu0  ;;  %10062 = vmatprep.subr.bf16.mxu1 %v12186_v48  ;;  %v12190_v36 = vld [vmem:[#allocation4 + $0x10] sm:$0xff]  }
 0x335   : > { %v3442_v18 = vmax.f32 %v3378_v62, %v3410_v29  ;;  %v11593_v28 = vadd.f32 %v13560_v50, %v3175_v8  ;;  %v11095_v26 = vpop.f32.mrb[26].mxu0 }
 0x336   : > { %v3383_v37 = vadd.f32 %v11590_v49, %v13664_v42  ;;  %v11596_v47 = vadd.f32 %v13578_v57, %v11095_v26  ;;  %v3178_v31 = vpop.f32.mrb[27].mxu0  ;;  %v3472_v52 = vpack.c.bf16 %v3444_v23, %v3443_v0 }
 0x337   : > { %v3381_v34 = vadd.f32 %v11593_v28, %v13664_v42  ;;  %v11599_v46 = vadd.f32 %v13566_v54, %v3178_v31  ;;  %v3471_v51 = vpack.c.bf16 %v3442_v18, %v3441_v2  ;;  %10063 = vmatpush3.bf16.msra.mxu1 %v12187_v12 }
 0x338   : > { %v3415_v6 = vmul.f32 0.1, %v3383_v37  ;;  %v3384_v22 = vadd.f32 %v11596_v47, %v13664_v42  ;;  %10064 = vmatprep.subr.bf16.mxu1 %v12189_v38 }
 0x339   : > { %v3413_v50 = vmul.f32 0.1, %v3381_v34  ;;  %v3382_v56 = vadd.f32 %v11599_v46, %v13664_v42  ;;  %11136 = vmatprep.mubr.bf16.mxu1 %v3471_v51 }
 0x33a   : > { %v3416_v58 = vmul.f32 0.1, %v3384_v22  ;;  %11137 = vmatmul.mubr.bf16.gmra.mrb[148].mxu1 %v3472_v52  ;;  %v3447_v55 = vmax.f32 %v3383_v37, %v3415_v6 }
 0x33b   : > { %v3414_v57 = vmul.f32 0.1, %v3382_v56  ;;  %v11098_v10 = vpop.f32.mrb[28].mxu0  ;;  %10065 = vmatpush3.bf16.msra.mxu1 %v12190_v36  ;;  %v3445_v59 = vmax.f32 %v3381_v34, %v3413_v50 }
 0x33c   : > { %v3448_v43 = vmax.f32 %v3384_v22, %v3416_v58  ;;  %v11602_v54 = vadd.f32 %v13596_v19, %v11098_v10  ;;  %v3191_v11 = vpop.f32.mrb[29].mxu0  ;;  %10066 = vmatprep.subr.bf16.mxu1 %v12191_v17 }
 0x33d   : > { %v3446_v16 = vmax.f32 %v3382_v56, %v3414_v57  ;;  %v11605_v39 = vadd.f32 %v13584_v35, %v3191_v11  ;;  %v11099_v41 = vpop.f32.mrb[30].mxu0 }
 0x33e   : > { %v3387_v61 = vadd.f32 %v11602_v54, %v13664_v42  ;;  %v11608_v48 = vadd.f32 %v13602_v15, %v11099_v41  ;;  %v3194_v32 = vpop.f32.mrb[31].mxu0  ;;  %v3474_v62 = vpack.c.bf16 %v3448_v43, %v3447_v55 }
 0x33f   : > { %v3385_v33 = vadd.f32 %v11605_v39, %v13664_v42  ;;  %v11611_v29 = vadd.f32 %v13590_v40, %v3194_v32  ;;  %v3473_v27 = vpack.c.bf16 %v3446_v16, %v3445_v59 }
 0x340   : > { %v3419_v12 = vmul.f32 0.1, %v3387_v61  ;;  %v3388_v19 = vadd.f32 %v11608_v48, %v13664_v42 }
 0x341   : > { %v3417_v0 = vmul.f32 0.1, %v3385_v33  ;;  %v3386_v23 = vadd.f32 %v11611_v29, %v13664_v42  ;;  %11140 = vmatprep.mubr.bf16.mxu1 %v3473_v27 }
 0x342   : > { %v3420_v35 = vmul.f32 0.1, %v3388_v19  ;;  %11141 = vmatmul.mubr.bf16.gmra.mrb[152].mxu1 %v3474_v62  ;;  %v3451_v38 = vmax.f32 %v3387_v61, %v3419_v12 }
 0x343   : > { %v3418_v49 = vmul.f32 0.1, %v3386_v23  ;;  %v11102_v8 = vpop.f32.mrb[32].mxu0  ;;  %v3449_v28 = vmax.f32 %v3385_v33, %v3417_v0 }
 0x344   : > { %v3452_v15 = vmax.f32 %v3388_v19, %v3420_v35  ;;  %v11614_v2 = vadd.f32 %v13620_v24, %v11102_v8  ;;  %v3207_v18 = vpop.f32.mrb[33].mxu0 }
 0x345   : > { %v3450_v26 = vmax.f32 %v3386_v23, %v3418_v49  ;;  %v11617_v40 = vadd.f32 %v13608_v20, %v3207_v18  ;;  %v11103_v37 = vpop.f32.mrb[34].mxu0 }
 0x346   : > { %v3391_v47 = vadd.f32 %v11614_v2, %v13664_v42  ;;  %v11620_v31 = vadd.f32 %v13623_v4, %v11103_v37  ;;  %v3210_v52 = vpop.f32.mrb[35].mxu0  ;;  %v3476_v34 = vpack.c.bf16 %v3452_v15, %v3451_v38 }
 0x347   : > { %v3389_v46 = vadd.f32 %v11617_v40, %v13664_v42  ;;  %v11623_v51 = vadd.f32 %v13614_v1, %v3210_v52  ;;  %v3475_v36 = vpack.c.bf16 %v3450_v26, %v3449_v28 }
 0x348   : > { %v3423_v6 = vmul.f32 0.1, %v3391_v47  ;;  %v3392_v24 = vadd.f32 %v11620_v31, %v13664_v42 }
 0x349   : > { %v3421_v22 = vmul.f32 0.1, %v3389_v46  ;;  %v3390_v17 = vadd.f32 %v11623_v51, %v13664_v42  ;;  %11144 = vmatprep.mubr.bf16.mxu1 %v3475_v36 }
 0x34a   : > { %v3424_v20 = vmul.f32 0.1, %v3392_v24  ;;  %11145 = vmatmul.mubr.bf16.gmra.mrb[156].mxu1 %v3476_v34  ;;  %v3455_v58 = vmax.f32 %v3391_v47, %v3423_v6 }
 0x34b   : > { %v3422_v50 = vmul.f32 0.1, %v3390_v17  ;;  %v11106_v56 = vpop.f32.mrb[36].mxu0  ;;  %v3453_v55 = vmax.f32 %v3389_v46, %v3421_v22 }
 0x34c   : > { %v3456_v4 = vmax.f32 %v3392_v24, %v3424_v20  ;;  %v11626_v57 = vadd.f32 %v13632_v63, %v11106_v56  ;;  %v3223_v10 = vpop.f32.mrb[37].mxu0 }
 0x34d   : > { %v3454_v43 = vmax.f32 %v3390_v17, %v3422_v50  ;;  %v11629_v1 = vadd.f32 %v13626_v45, %v3223_v10  ;;  %v11107_v54 = vpop.f32.mrb[38].mxu0 }
 0x34e   : > { %v3395_v11 = vadd.f32 %v11626_v57, %v13664_v42  ;;  %v11632_v59 = vadd.f32 %v13635_v53, %v11107_v54  ;;  %v3226_v16 = vpop.f32.mrb[39].mxu0  ;;  %v3478_v39 = vpack.c.bf16 %v3456_v4, %v3455_v58 }
 0x34f   : > { %v3393_v41 = vadd.f32 %v11629_v1, %v13664_v42  ;;  %v11635_v61 = vadd.f32 %v13629_v3, %v3226_v16  ;;  %v3477_v48 = vpack.c.bf16 %v3454_v43, %v3453_v55 }
 0x350   : > { %v3427_v32 = vmul.f32 0.1, %v3395_v11  ;;  %v3396_v63 = vadd.f32 %v11632_v59, %v13664_v42 }
 0x351   : > { %v3425_v62 = vmul.f32 0.1, %v3393_v41  ;;  %v3394_v33 = vadd.f32 %v11635_v61, %v13664_v42  ;;  %11148 = vmatprep.mubr.bf16.mxu1 %v3477_v48  ;;  %v12195_v61 = vld [vmem:[#allocation4 + $0x20] sm:$0xff]   ;;  %v12197_v48 = vld [vmem:[#allocation4 + $0x28] sm:$0xff]  }
 0x352   : > { %v3428_v45 = vmul.f32 0.1, %v3396_v63  ;;  %11149 = vmatmul.mubr.bf16.gmra.mrb[160].mxu1 %v3478_v39  ;;  %v3459_v12 = vmax.f32 %v3395_v11, %v3427_v32  ;;  %v12192_v39 = vld [vmem:[#allocation4 + $0x18] sm:$0xff]   ;;  %v12199_v32 = vld [vmem:[#allocation4 + $0x70] sm:$0xff]  }
 0x353   : > { %v3426_v29 = vmul.f32 0.1, %v3394_v33  ;;  %v11110_v27 = vpop.f32.mrb[40].mxu0  ;;  %v3457_v23 = vmax.f32 %v3393_v41, %v3425_v62  ;;  %10067 = vmatpush3.bf16.msra.mxu1 %v12192_v39  ;;  %v12194_v41 = vld [vmem:[#allocation4 + $0x60] sm:$0xff]   ;;  %v12193_v62 = vld [vmem:[#allocation4 + $0xa8] sm:$0xff]  }
 0x354   : > { %v3460_v53 = vmax.f32 %v3396_v63, %v3428_v45  ;;  %v11638_v19 = vadd.f32 %v13644_v7, %v11110_v27  ;;  %v3239_v0 = vpop.f32.mrb[41].mxu0  ;;  %10068 = vmatprep.subr.bf16.mxu1 %v12194_v41  ;;  %v12200_v63 = vld [vmem:[#allocation4 + $0x30] sm:$0xff]   ;;  %11174 = vmatprep.subr.bf16.mxu0 %v12193_v62  ;;  %v12202_v45 = vld [vmem:[#allocation4 + $0x38] sm:$0xff]  }
 0x355   : > { %v3458_v35 = vmax.f32 %v3394_v33, %v3426_v29  ;;  %v11641_v3 = vadd.f32 %v13638_v5, %v3239_v0  ;;  %v11111_v49 = vpop.f32.mrb[42].mxu0  ;;  %v12201_v33 = vld [vmem:[#allocation4 + $0x78] sm:$0xff]   ;;  %11175 = vmatpush3.bf16.msra.mxu0 %v12193_v62  ;;  %v12198_v29 = vld [vmem:[#allocation4 + $0xb0] sm:$0xff]   ;;  %v12220_v0 = vld [vmem:[#allocation4 + $0x1c0] sm:$0xff]  }
 0x356   : > { %v3399_v8 = vadd.f32 %v11638_v19, %v13664_v42  ;;  %v11644_v38 = vadd.f32 %v13647_v44, %v11111_v49  ;;  %v3242_v15 = vpop.f32.mrb[43].mxu0  ;;  %v3480_v2 = vpack.c.bf16 %v3460_v53, %v3459_v12  ;;  %v4085_v27 = vld [vmem:[#allocation2] sm:$0xff]  ;;  %11176 = vmatprep.subr.bf16.mxu0 %v12198_v29  ;;  %v12203_v12 = vld [vmem:[#allocation4 + $0xb8] sm:$0xff]   ;;  %v4087_v53 = vld [vmem:[#allocation2 + $0x10] sm:$0xff] }
 0x357   : > { %v3397_v18 = vadd.f32 %v11641_v3, %v13664_v42  ;;  %v11647_v28 = vadd.f32 %v13641_v21, %v3242_v15  ;;  %v3479_v26 = vpack.c.bf16 %v3458_v35, %v3457_v23  ;;  %10069 = vmatpush3.bf16.msra.mxu1 %v12195_v61  ;;  %11180 = vmatprep.mubr.bf16.mxu0 %v4087_v53  ;;  %v12204_v19 = vld [vmem:[#allocation4 + $0x100] sm:$0xff]   ;;  %v12223_v35 = vld [vmem:[#allocation4 + $0x1c8] sm:$0xff]   ;;  %v12226_v49 = vld [vmem:[#allocation4 + $0x1d0] sm:$0xff]  }
 0x358   : > { %v3431_v40 = vmul.f32 0.1, %v3399_v8  ;;  %v3400_v7 = vadd.f32 %v11644_v38, %v13664_v42  ;;  %v12221_v23 = vld [vmem:[#allocation4 + $0x180] sm:$0xff]   ;;  %v12224_v3 = vld [vmem:[#allocation4 + $0x188] sm:$0xff]   ;;  %v12229_v38 = vld [vmem:[#allocation4 + $0x1d8] sm:$0xff]  }
 0x359   : > { %v3429_v37 = vmul.f32 0.1, %v3397_v18  ;;  %v3398_v47 = vadd.f32 %v11647_v28, %v13664_v42  ;;  %11152 = vmatprep.mubr.bf16.mxu1 %v3479_v26  ;;  %11177 = vmatpush3.bf16.msra.mxu0 %v12198_v29  ;;  %v12230_v15 = vld [vmem:[#allocation4 + $0x198] sm:$0xff]   ;;  %v12233_v28 = vld [vmem:[#allocation4 + $0x1e8] sm:$0xff]   ;;  %v13733_v26 = vld [vmem:[%s15272_s6] ss:$0 sm:$0xff] }
 0x35a   : > { %v3432_v5 = vmul.f32 0.1, %v3400_v7  ;;  %11153 = vmatmul.mubr.bf16.gmra.mrb[164].mxu1 %v3480_v2  ;;  %v3463_v34 = vmax.f32 %v3399_v8, %v3431_v40  ;;  %11178 = vmatprep.subr.bf16.mxu0 %v12203_v12  ;;  %v12227_v8 = vld [vmem:[#allocation4 + $0x190] sm:$0xff]   ;;  %v12231_v2 = vld [vmem:[#allocation4 + $0x1e0] sm:$0xff]   ;;  %v12234_v40 = vld [vmem:[#allocation4 + $0x1a8] sm:$0xff]  }
 0x35b   : > { %v3430_v31 = vmul.f32 0.1, %v3398_v47  ;;  %v11114_v52 = vpop.f32.mrb[44].mxu0  ;;  %v3461_v36 = vmax.f32 %v3397_v18, %v3429_v37  ;;  %v12232_v18 = vld [vmem:[#allocation4 + $0x1a0] sm:$0xff]   ;;  %v4040_v53 = vld [vmem:[#allocation2 + $0x40] sm:$0xff] }
 0x35c   : > { %v3464_v44 = vmax.f32 %v3400_v7, %v3432_v5  ;;  %v11650_v46 = vadd.f32 %v13656_v30, %v11114_v52  ;;  %v3255_v51 = vpop.f32.mrb[45].mxu0 }
 0x35d   : > { %v3462_v6 = vmax.f32 %v3398_v47, %v3430_v31  ;;  %v11653_v21 = vadd.f32 %v13650_v25, %v3255_v51  ;;  %v11115_v24 = vpop.f32.mrb[46].mxu0  ;;  %11179 = vmatpush3.bf16.msra.mxu0 %v12203_v12  ;;  %v3944_v12 = vld [vmem:[#allocation2 + $0x30] sm:$0xff] }
 0x35e   : > { %v3403_v22 = vadd.f32 %v11650_v46, %v13664_v42  ;;  %v11656_v17 = vadd.f32 %v13659_v13, %v11115_v24  ;;  %v3258_v20 = vpop.f32.mrb[47].mxu0  ;;  %v3482_v50 = vpack.c.bf16 %v3464_v44, %v3463_v34  ;;  %10196 = vmatprep.subr.bf16.mxu0 %v12204_v19  ;;  %v12236_v46 = vld [vmem:[#allocation4 + $0x1f0] sm:$0xff]  }
 0x35f   : > { %v3401_v56 = vadd.f32 %v11653_v21, %v13664_v42  ;;  %v11659_v58 = vadd.f32 %v13653_v60, %v3258_v20  ;;  %v3481_v4 = vpack.c.bf16 %v3462_v6, %v3461_v36  ;;  %v12341_v60 = vld [vmem:[#allocation2 + $0x8] sm:$0xff]  ;;  %v12237_v6 = vld [vmem:[#allocation4 + $0x1b0] sm:$0xff]  }
 0x360   : > { %v3435_v57 = vmul.f32 0.1, %v3403_v22  ;;  %v3404_v30 = vadd.f32 %v11656_v17, %v13664_v42  ;;  %v12238_v21 = vld [vmem:[#allocation4 + $0x1f8] sm:$0xff]  }
 0x361   : > { %v3433_v10 = vmul.f32 0.1, %v3401_v56  ;;  %v3402_v55 = vadd.f32 %v11659_v58, %v13664_v42  ;;  %11156 = vmatprep.mubr.bf16.mxu1 %v3481_v4  ;;  %v12196_v42 = vld [vmem:[#allocation4 + $0x68] sm:$0xff]   ;;  %v12239_v17 = vld [vmem:[#allocation4 + $0x1b8] sm:$0xff]  }
 0x362   : > { %v3436_v25 = vmul.f32 0.1, %v3404_v30  ;;  %11157 = vmatmul.mubr.bf16.gmra.mrb[168].mxu1 %v3482_v50  ;;  %v3467_v1 = vmax.f32 %v3403_v22, %v3435_v57  ;;  %10070 = vmatprep.subr.bf16.mxu1 %v12196_v42 }
 0x363   : > { %v3434_v43 = vmul.f32 0.1, %v3402_v55  ;;  %v3465_v13 = vmax.f32 %v3401_v56, %v3433_v10  ;;  %10071 = vmatpush3.bf16.msra.mxu1 %v12197_v48 }
 0x364   : > { %v3468_v54 = vmax.f32 %v3404_v30, %v3436_v25  ;;  %10072 = vmatprep.subr.bf16.mxu1 %v12199_v32 }
 0x365   : > { %v3466_v11 = vmax.f32 %v3402_v55, %v3434_v43 }
 0x366   : > { %v3484_v59 = vpack.c.bf16 %v3468_v54, %v3467_v1 }
 0x367   : > { %v3483_v16 = vpack.c.bf16 %v3466_v11, %v3465_v13  ;;  %10073 = vmatpush3.bf16.msra.mxu1 %v12200_v63 }
 0x368   : > { %10074 = vmatprep.subr.bf16.mxu1 %v12201_v33 }
 0x369   : > { %11160 = vmatprep.mubr.bf16.mxu1 %v3483_v16 }
 0x36a   : > { %11161 = vmatmul.mubr.bf16.gmra.mrb[172].mxu1 %v3484_v59 }
 0x36b   : > { %4357 = vmatprep.mubr.bf16.mxu1 %v12341_v60  ;;  %10075 = vmatpush3.bf16.msra.mxu1 %v12202_v45 }
 0x36c   : > { %10332 = vmatprep.subr.bf16.mxu1 %v12220_v0 }
 0x372   : > { %4358 = vmatmul.mubr.bf16.vlgmr.msra.gmra.mrb[176].mxu1 %v4085_v27 }
 0x373   : > { %10333 = vmatpush3.bf16.msra.mxu1 %v12221_v23 }
 0x374   : > { %10334 = vmatprep.subr.bf16.mxu1 %v12223_v35 }
 0x377   : > { %10335 = vmatpush3.bf16.msra.mxu1 %v12224_v3 }
 0x378   : > { %10336 = vmatprep.subr.bf16.mxu1 %v12226_v49  ;;  %v12205_v49 = vld [vmem:[#allocation4 + $0xc0] sm:$0xff]  }
 0x37b   : > { %10337 = vmatpush3.bf16.msra.mxu1 %v12227_v8 }
 0x37c   : > { %10338 = vmatprep.subr.bf16.mxu1 %v12229_v38 }
 0x37f   : > { %10339 = vmatpush3.bf16.msra.mxu1 %v12230_v15  ;;  %v3941_v15 = vld [vmem:[#allocation2 + $0x18] sm:$0xff] }
 0x380   : > { %10340 = vmatprep.subr.bf16.mxu1 %v12231_v2  ;;  %v4037_v2 = vld [vmem:[#allocation2 + $0x28] sm:$0xff] }
 0x383   : > { %10341 = vmatpush3.bf16.msra.mxu1 %v12232_v18 }
 0x384   : > { %10342 = vmatprep.subr.bf16.mxu1 %v12233_v28 }
 0x387   : > { %10343 = vmatpush3.bf16.msra.mxu1 %v12234_v40 }
 0x388   : > { %10344 = vmatprep.subr.bf16.mxu1 %v12236_v46 }
 0x38b   : > { %10345 = vmatpush3.bf16.msra.mxu1 %v12237_v6 }
 0x38c   : > { %10346 = vmatprep.subr.bf16.mxu1 %v12238_v21 }
 0x38f   : > { %10347 = vmatpush3.bf16.msra.mxu1 %v12239_v17  ;;  %v12207_v17 = vld [vmem:[#allocation4 + $0xc8] sm:$0xff]  }
 0x405   : > { %v11134_v7 = vpop.f32.mrb[144].mxu1 }
 0x406   : > { %v3599_v37 = vadd.f32 %v11134_v7, %v13733_v26  ;;  %v3590_v47 = vpop.f32.mrb[145].mxu1  ;;  %v12206_v7 = vld [vmem:[#allocation4 + $0x108] sm:$0xff]  }
 0x407   : > { %v3591_v5 = vadd.f32 %v13733_v26, %v3590_v47  ;;  %v11135_v31 = vpop.f32.mrb[146].mxu1 }
 0x408   : > { %v3719_v52 = vmul.f32 0.1, %v3599_v37  ;;  %v3602_v34 = vadd.f32 %v11135_v31, %v13733_v26  ;;  %v3593_v44 = vpop.f32.mrb[147].mxu1 }
 0x409   : > { %v3717_v51 = vmul.f32 0.1, %v3591_v5  ;;  %v3594_v36 = vadd.f32 %v13733_v26, %v3593_v44 }
 0x40a   : > { %v3720_v24 = vmul.f32 0.1, %v3602_v34  ;;  %v3751_v20 = vmax.f32 %v3599_v37, %v3719_v52 }
 0x40b   : > { %v3718_v22 = vmul.f32 0.1, %v3594_v36  ;;  %v3749_v56 = vmax.f32 %v3591_v5, %v3717_v51 }
 0x40c   : > { %v3752_v50 = vmax.f32 %v3602_v34, %v3720_v24 }
 0x40d   : > { %v3750_v58 = vmax.f32 %v3594_v36, %v3718_v22  ;;  %v11138_v4 = vpop.f32.mrb[148].mxu1 }
 0x40e   : > { %v13739_v57 = vpack.c.bf16 %v3752_v50, %v3751_v20  ;;  %v3615_v30 = vadd.f32 %v11138_v4, %v13733_v26  ;;  %v3606_v10 = vpop.f32.mrb[149].mxu1 }
 0x40f   : > { %v13742_v55 = vpack.c.bf16 %v3750_v58, %v3749_v56  ;;  %v3607_v25 = vadd.f32 %v13733_v26, %v3606_v10  ;;  %v11139_v43 = vpop.f32.mrb[150].mxu1  ;;  %v12208_v58 = vld [vmem:[#allocation4 + $0x110] sm:$0xff]  }
 0x410   : > { %3798 = vst [vmem:[#allocation2 + $0x38] sm:$0xff] %v13739_v57  ;;  %v3821_v1 = vshrl.u32 %v13739_v57, 16  ;;  %v3824_v54 = vshll.u32 %v13739_v57, 16  ;;  %v3723_v13 = vmul.f32 0.1, %v3615_v30  ;;  %v3618_v11 = vadd.f32 %v11139_v43, %v13733_v26  ;;  %v3609_v59 = vpop.f32.mrb[151].mxu1 }
 0x411   : > { %v3814_v16 = vshrl.u32 %v13742_v55, 16  ;;  %v3817_v60 = vshll.u32 %v13742_v55, 16  ;;  %v3721_v39 = vmul.f32 0.1, %v3607_v25  ;;  %v3610_v41 = vadd.f32 %v13733_v26, %v3609_v59  ;;  %4365 = vmatprep.mubr.bf16.mxu1 %v13742_v55 }
 0x412   : > { %v3823_v61 = vrot.slane %v3821_v1, 7  ;;  %v3991_v42 = vrot.slane %v3824_v54, 1  ;;  %v3724_v48 = vmul.f32 0.1, %v3618_v11  ;;  %v3755_v29 = vmax.f32 %v3615_v30, %v3723_v13  ;;  %v3950_v13 = vld [vmem:[#allocation2 + $0x60] sm:$0xff] }
 0x413   : > { %v3816_v32 = vrot.slane %v3814_v16, 7  ;;  %v3989_v63 = vrot.slane %v3817_v60, 1  ;;  %v3722_v62 = vmul.f32 0.1, %v3610_v41  ;;  %v3753_v23 = vmax.f32 %v3607_v25, %v3721_v39 }
 0x414   : > { %v3826_v33 = vor.u32 %v3824_v54, %v3823_v61  ;;  %v3992_v45 = vor.u32 %v3991_v42, %v3821_v1  ;;  %v3756_v27 = vmax.f32 %v3618_v11, %v3724_v48  ;;  %v4046_v11 = vld [vmem:[#allocation2 + $0x70] sm:$0xff]  ;;  %v3947_v42 = vld [vmem:[#allocation2 + $0x48] sm:$0xff]  ;;  %v4043_v48 = vld [vmem:[#allocation2 + $0x58] sm:$0xff] }
 0x415   : > { %v3819_v19 = vor.u32 %v3817_v60, %v3816_v32  ;;  %v3990_v0 = vor.u32 %v3989_v63, %v3814_v16  ;;  %v3754_v35 = vmax.f32 %v3610_v41, %v3722_v62  ;;  %v11142_v3 = vpop.f32.mrb[152].mxu1 }
 0x416   : > { %v13755_v8 = vsel %vm12877_vm9, %v3826_v33, %v3944_v12  ;;  %v4041_v38 = vsel %vm12883_vm10, %v3992_v45, %v4040_v53  ;;  %v13759_v18 = vpack.c.bf16 %v3756_v27, %v3755_v29  ;;  %v3631_v28 = vadd.f32 %v11142_v3, %v13733_v26  ;;  %v3622_v40 = vpop.f32.mrb[153].mxu1  ;;  %v12209_v33 = vld [vmem:[#allocation4 + $0xd0] sm:$0xff]  }
 0x417   : > { %3946 = vst [vmem:[#allocation2 + $0x30] sm:$0xff] %v13755_v8  ;;  %4042 = vst [vmem:[#allocation2 + $0x40] sm:$0xff] %v4041_v38  ;;  %v13765_v37 = vsel %vm12877_vm9, %v3819_v19, %v3941_v15  ;;  %v4038_v47 = vsel %vm12883_vm10, %v3990_v0, %v4037_v2  ;;  %v13769_v5 = vpack.c.bf16 %v3754_v35, %v3753_v23  ;;  %v11143_v52 = vpop.f32.mrb[154].mxu1  ;;  %v12210_v19 = vld [vmem:[#allocation4 + $0x118] sm:$0xff]  }
 0x418   : > { %v3623_v31 = vadd.f32 %v13733_v26, %v3622_v40  ;;  %3943 = vst [vmem:[#allocation2 + $0x18] sm:$0xff] %v13765_v37  ;;  %4039 = vst [vmem:[#allocation2 + $0x28] sm:$0xff] %v4038_v47  ;;  %v3835_v34 = vshrl.u32 %v13759_v18, 16  ;;  %v3838_v44 = vshll.u32 %v13759_v18, 16  ;;  %v3727_v46 = vmul.f32 0.1, %v3631_v28  ;;  %4366 = vmatmul.mubr.bf16.gmra.mrb[180].mxu1 %v13765_v37  ;;  %11181 = vmatmul.mubr.bf16.vlgmr.msra.gmra.mrb[112].mxu0 %v4038_v47 }
 0x419   : > { %3800 = vst [vmem:[#allocation2 + $0x68] sm:$0xff] %v13759_v18  ;;  %v3634_v51 = vadd.f32 %v11143_v52, %v13733_v26  ;;  %v3625_v36 = vpop.f32.mrb[155].mxu1  ;;  %3799 = vst [vmem:[#allocation2 + $0x50] sm:$0xff] %v13769_v5  ;;  %v3828_v6 = vshrl.u32 %v13769_v5, 16  ;;  %v3831_v21 = vshll.u32 %v13769_v5, 16  ;;  %10197 = vmatpush3.bf16.msra.mxu0 %v12205_v49  ;;  %4373 = vmatprep.mubr.bf16.mxu1 %v13739_v57 }
 0x41a   : > { %v3725_v24 = vmul.f32 0.1, %v3623_v31  ;;  %v3626_v22 = vadd.f32 %v13733_v26, %v3625_v36  ;;  %v3837_v20 = vrot.slane %v3835_v34, 7  ;;  %v3995_v50 = vrot.slane %v3838_v44, 1  ;;  %11184 = vmatprep.mubr.bf16.mxu0 %v4041_v38  ;;  %10198 = vmatprep.subr.bf16.mxu0 %v12206_v7 }
 0x41b   : > { %v3728_v56 = vmul.f32 0.1, %v3634_v51  ;;  %v3830_v4 = vrot.slane %v3828_v6, 7  ;;  %v3993_v30 = vrot.slane %v3831_v21, 1  ;;  %v3759_v1 = vmax.f32 %v3631_v28, %v3727_v46 }
 0x41c   : > { %v3726_v10 = vmul.f32 0.1, %v3626_v22  ;;  %v3840_v25 = vor.u32 %v3838_v44, %v3837_v20  ;;  %v3996_v43 = vor.u32 %v3995_v50, %v3835_v34  ;;  %v3757_v60 = vmax.f32 %v3623_v31, %v3725_v24  ;;  %v12211_v31 = vld [vmem:[#allocation4 + $0xd8] sm:$0xff]   ;;  %v12212_v44 = vld [vmem:[#allocation4 + $0x120] sm:$0xff]   ;;  %v4052_v24 = vld [vmem:[#allocation2 + $0xa0] sm:$0xff] }
 0x41d   : > { %v3760_v54 = vmax.f32 %v3634_v51, %v3728_v56  ;;  %v3833_v59 = vor.u32 %v3831_v21, %v3830_v4  ;;  %v3994_v16 = vor.u32 %v3993_v30, %v3828_v6  ;;  %v11146_v39 = vpop.f32.mrb[156].mxu1  ;;  %10199 = vmatpush3.bf16.msra.mxu0 %v12207_v17  ;;  %v3956_v21 = vld [vmem:[#allocation2 + $0x90] sm:$0xff]  ;;  %v3953_v30 = vld [vmem:[#allocation2 + $0x78] sm:$0xff] }
 0x41e   : > { %v3758_v57 = vmax.f32 %v3626_v22, %v3726_v10  ;;  %v13785_v41 = vsel %vm12877_vm9, %v3840_v25, %v3950_v13  ;;  %v4047_v61 = vsel %vm12883_vm10, %v3996_v43, %v4046_v11  ;;  %v3647_v63 = vadd.f32 %v11146_v39, %v13733_v26  ;;  %v3638_v62 = vpop.f32.mrb[157].mxu1  ;;  %10200 = vmatprep.subr.bf16.mxu0 %v12208_v58  ;;  %v4049_v10 = vld [vmem:[#allocation2 + $0x88] sm:$0xff] }
 0x41f   : > { %v13789_v32 = vpack.c.bf16 %v3760_v54, %v3759_v1  ;;  %3952 = vst [vmem:[#allocation2 + $0x60] sm:$0xff] %v13785_v41  ;;  %4048 = vst [vmem:[#allocation2 + $0x70] sm:$0xff] %v4047_v61  ;;  %v13795_v45 = vsel %vm12877_vm9, %v3833_v59, %v3947_v42  ;;  %v4044_v29 = vsel %vm12883_vm10, %v3994_v16, %v4043_v48  ;;  %v11147_v53 = vpop.f32.mrb[158].mxu1  ;;  %v12213_v54 = vld [vmem:[#allocation4 + $0xe0] sm:$0xff]  }
 0x420   : > { %v13799_v27 = vpack.c.bf16 %v3758_v57, %v3757_v60  ;;  %v3639_v12 = vadd.f32 %v13733_v26, %v3638_v62  ;;  %3949 = vst [vmem:[#allocation2 + $0x48] sm:$0xff] %v13795_v45  ;;  %4045 = vst [vmem:[#allocation2 + $0x58] sm:$0xff] %v4044_v29  ;;  %v3731_v35 = vmul.f32 0.1, %v3647_v63  ;;  %v3650_v3 = vadd.f32 %v11147_v53, %v13733_v26  ;;  %v3641_v49 = vpop.f32.mrb[159].mxu1  ;;  %v12214_v57 = vld [vmem:[#allocation4 + $0x128] sm:$0xff]  }
 0x421   : > { %3802 = vst [vmem:[#allocation2 + $0x98] sm:$0xff] %v13789_v32  ;;  %v3849_v0 = vshrl.u32 %v13789_v32, 16  ;;  %v3852_v23 = vshll.u32 %v13789_v32, 16  ;;  %4374 = vmatmul.mubr.bf16.gmra.mrb[184].mxu1 %v13755_v8  ;;  %11185 = vmatmul.mubr.bf16.gmra.mrb[116].mxu0 %v4044_v29  ;;  %v3642_v28 = vadd.f32 %v13733_v26, %v3641_v49 }
 0x422   : > { %3801 = vst [vmem:[#allocation2 + $0x80] sm:$0xff] %v13799_v27  ;;  %v3842_v38 = vshrl.u32 %v13799_v27, 16  ;;  %v3845_v15 = vshll.u32 %v13799_v27, 16  ;;  %v3729_v2 = vmul.f32 0.1, %v3639_v12  ;;  %4381 = vmatprep.mubr.bf16.mxu1 %v13769_v5  ;;  %11188 = vmatprep.mubr.bf16.mxu0 %v4047_v61  ;;  %v3763_v36 = vmax.f32 %v3647_v63, %v3731_v35 }
 0x423   : > { %v3851_v40 = vrot.slane %v3849_v0, 7  ;;  %v3999_v7 = vrot.slane %v3852_v23, 1  ;;  %v3732_v47 = vmul.f32 0.1, %v3650_v3  ;;  %10201 = vmatpush3.bf16.msra.mxu0 %v12209_v33  ;;  %v3730_v34 = vmul.f32 0.1, %v3642_v28 }
 0x424   : > { %v3844_v52 = vrot.slane %v3842_v38, 7  ;;  %v3997_v8 = vrot.slane %v3845_v15, 1  ;;  %10202 = vmatprep.subr.bf16.mxu0 %v12210_v19  ;;  %v3761_v20 = vmax.f32 %v3639_v12, %v3729_v2 }
 0x425   : > { %v3854_v46 = vor.u32 %v3852_v23, %v3851_v40  ;;  %v4000_v51 = vor.u32 %v3999_v7, %v3849_v0  ;;  %v3764_v6 = vmax.f32 %v3650_v3, %v3732_v47  ;;  %v3762_v50 = vmax.f32 %v3642_v28, %v3730_v34  ;;  %v11150_v56 = vpop.f32.mrb[160].mxu1  ;;  %v12215_v23 = vld [vmem:[#allocation4 + $0xe8] sm:$0xff]   ;;  %v3962_v7 = vld [vmem:[#allocation2 + $0xc0] sm:$0xff]  ;;  %v4058_v47 = vld [vmem:[#allocation2 + $0xd0] sm:$0xff] }
 0x426   : > { %v3847_v22 = vor.u32 %v3845_v15, %v3844_v52  ;;  %v3998_v17 = vor.u32 %v3997_v8, %v3842_v38  ;;  %v3663_v43 = vadd.f32 %v11150_v56, %v13733_v26  ;;  %v3654_v1 = vpop.f32.mrb[161].mxu1  ;;  %v12216_v38 = vld [vmem:[#allocation4 + $0x130] sm:$0xff]  }
 0x427   : > { %v13815_v58 = vsel %vm12877_vm9, %v3854_v46, %v3956_v21  ;;  %v4053_v4 = vsel %vm12883_vm10, %v4000_v51, %v4052_v24  ;;  %v13819_v25 = vpack.c.bf16 %v3764_v6, %v3763_v36  ;;  %10203 = vmatpush3.bf16.msra.mxu0 %v12211_v31  ;;  %v13829_v59 = vpack.c.bf16 %v3762_v50, %v3761_v20  ;;  %v11151_v60 = vpop.f32.mrb[162].mxu1  ;;  %v3959_v36 = vld [vmem:[#allocation2 + $0xa8] sm:$0xff]  ;;  %v4055_v6 = vld [vmem:[#allocation2 + $0xb8] sm:$0xff] }
 0x428   : > { %3958 = vst [vmem:[#allocation2 + $0x90] sm:$0xff] %v13815_v58  ;;  %4054 = vst [vmem:[#allocation2 + $0xa0] sm:$0xff] %v4053_v4  ;;  %v13825_v13 = vsel %vm12877_vm9, %v3847_v22, %v3953_v30  ;;  %v4050_v11 = vsel %vm12883_vm10, %v3998_v17, %v4049_v10  ;;  %v3655_v16 = vadd.f32 %v13733_v26, %v3654_v1  ;;  %10204 = vmatprep.subr.bf16.mxu0 %v12212_v44  ;;  %v3657_v63 = vpop.f32.mrb[163].mxu1  ;;  %v12217_v17 = vld [vmem:[#allocation4 + $0xf0] sm:$0xff]   ;;  %v12218_v10 = vld [vmem:[#allocation4 + $0x138] sm:$0xff]  }
 0x429   : > { %3955 = vst [vmem:[#allocation2 + $0x78] sm:$0xff] %v13825_v13  ;;  %4051 = vst [vmem:[#allocation2 + $0x88] sm:$0xff] %v4050_v11  ;;  %v3863_v39 = vshrl.u32 %v13819_v25, 16  ;;  %v3866_v61 = vshll.u32 %v13819_v25, 16  ;;  %v3735_v42 = vmul.f32 0.1, %v3663_v43  ;;  %v3666_v48 = vadd.f32 %v11151_v60, %v13733_v26  ;;  %4382 = vmatmul.mubr.bf16.gmra.mrb[188].mxu1 %v13795_v45  ;;  %11189 = vmatmul.mubr.bf16.gmra.mrb[120].mxu0 %v4050_v11 }
 0x42a   : > { %3804 = vst [vmem:[#allocation2 + $0xc8] sm:$0xff] %v13819_v25  ;;  %v3856_v62 = vshrl.u32 %v13829_v59, 16  ;;  %v3859_v33 = vshll.u32 %v13829_v59, 16  ;;  %v3733_v29 = vmul.f32 0.1, %v3655_v16  ;;  %v3658_v12 = vadd.f32 %v13733_v26, %v3657_v63  ;;  %4389 = vmatprep.mubr.bf16.mxu1 %v13759_v18  ;;  %11192 = vmatprep.mubr.bf16.mxu0 %v4053_v4 }
 0x42b   : > { %v3865_v53 = vrot.slane %v3863_v39, 7  ;;  %v4003_v19 = vrot.slane %v3866_v61, 1  ;;  %v3736_v0 = vmul.f32 0.1, %v3666_v48  ;;  %10205 = vmatpush3.bf16.msra.mxu0 %v12213_v54  ;;  %v3767_v28 = vmax.f32 %v3663_v43, %v3735_v42 }
 0x42c   : > { %v3858_v35 = vrot.slane %v3856_v62, 7  ;;  %v4001_v3 = vrot.slane %v3859_v33, 1  ;;  %v3734_v49 = vmul.f32 0.1, %v3658_v12  ;;  %10206 = vmatprep.subr.bf16.mxu0 %v12214_v57  ;;  %v3765_v8 = vmax.f32 %v3655_v16, %v3733_v29 }
 0x42d   : > { %v3868_v15 = vor.u32 %v3866_v61, %v3865_v53  ;;  %v4004_v2 = vor.u32 %v4003_v19, %v3863_v39  ;;  %v3768_v40 = vmax.f32 %v3666_v48, %v3736_v0  ;;  %v11154_v44 = vpop.f32.mrb[164].mxu1  ;;  %v13870_v53 = vld [vmem:[#allocation4 + $0x140] sm:$0xff]  }
 0x42e   : > { %v3861_v31 = vor.u32 %v3859_v33, %v3858_v35  ;;  %v4002_v52 = vor.u32 %v4001_v3, %v3856_v62  ;;  %v3766_v34 = vmax.f32 %v3658_v12, %v3734_v49  ;;  %v3679_v24 = vadd.f32 %v11154_v44, %v13733_v26  ;;  %v3670_v22 = vpop.f32.mrb[165].mxu1  ;;  %v12219_v62 = vld [vmem:[#allocation4 + $0xf8] sm:$0xff]   ;;  %v3968_v3 = vld [vmem:[#allocation2 + $0xf0] sm:$0xff]  ;;  %v4064_v49 = vld [vmem:[#allocation2 + $0x100] sm:$0xff] }
 0x42f   : > { %v13844_v46 = vsel %vm12877_vm9, %v3868_v15, %v3962_v7  ;;  %v4059_v51 = vsel %vm12883_vm10, %v4004_v2, %v4058_v47  ;;  %v13848_v21 = vpack.c.bf16 %v3768_v40, %v3767_v28  ;;  %10207 = vmatpush3.bf16.msra.mxu0 %v12215_v23  ;;  %v3671_v4 = vadd.f32 %v13733_v26, %v3670_v22  ;;  %v11155_v30 = vpop.f32.mrb[166].mxu1 }
 0x430   : > { %3964 = vst [vmem:[#allocation2 + $0xc0] sm:$0xff] %v13844_v46  ;;  %4060 = vst [vmem:[#allocation2 + $0xd0] sm:$0xff] %v4059_v51  ;;  %v13854_v20 = vsel %vm12877_vm9, %v3861_v31, %v3959_v36  ;;  %v4056_v50 = vsel %vm12883_vm10, %v4002_v52, %v4055_v6  ;;  %v13858_v56 = vpack.c.bf16 %v3766_v34, %v3765_v8  ;;  %10208 = vmatprep.subr.bf16.mxu0 %v12216_v38  ;;  %v3673_v16 = vpop.f32.mrb[167].mxu1  ;;  %v3965_v31 = vld [vmem:[#allocation2 + $0xd8] sm:$0xff]  ;;  %v4061_v52 = vld [vmem:[#allocation2 + $0xe8] sm:$0xff] }
 0x431   : > { %3961 = vst [vmem:[#allocation2 + $0xa8] sm:$0xff] %v13854_v20  ;;  %4057 = vst [vmem:[#allocation2 + $0xb8] sm:$0xff] %v4056_v50  ;;  %v3877_v43 = vshrl.u32 %v13848_v21, 16  ;;  %v3880_v1 = vshll.u32 %v13848_v21, 16  ;;  %v3739_v54 = vmul.f32 0.1, %v3679_v24  ;;  %v3682_v11 = vadd.f32 %v11155_v30, %v13733_v26  ;;  %4390 = vmatmul.mubr.bf16.gmra.mrb[192].mxu1 %v13785_v41  ;;  %11193 = vmatmul.mubr.bf16.gmra.mrb[124].mxu0 %v4056_v50 }
 0x432   : > { %v3870_v60 = vshrl.u32 %v13858_v56, 16  ;;  %v3873_v57 = vshll.u32 %v13858_v56, 16  ;;  %v3737_v39 = vmul.f32 0.1, %v3671_v4  ;;  %v3674_v61 = vadd.f32 %v13733_v26, %v3673_v16  ;;  %4397 = vmatprep.mubr.bf16.mxu1 %v13799_v27  ;;  %11196 = vmatprep.mubr.bf16.mxu0 %v4059_v51 }
 0x433   : > { %v3879_v42 = vrot.slane %v3877_v43, 7  ;;  %v4007_v48 = vrot.slane %v3880_v1, 1  ;;  %v3740_v63 = vmul.f32 0.1, %v3682_v11  ;;  %10209 = vmatpush3.bf16.msra.mxu0 %v12217_v17  ;;  %v3771_v23 = vmax.f32 %v3679_v24, %v3739_v54 }
 0x434   : > { %v3872_v33 = vrot.slane %v3870_v60, 7  ;;  %v4005_v29 = vrot.slane %v3873_v57, 1  ;;  %v3738_v12 = vmul.f32 0.1, %v3674_v61  ;;  %10210 = vmatprep.subr.bf16.mxu0 %v12218_v10  ;;  %v3769_v2 = vmax.f32 %v3671_v4, %v3737_v39 }
 0x435   : > { %v3882_v19 = vor.u32 %v3880_v1, %v3879_v42  ;;  %v4008_v0 = vor.u32 %v4007_v48, %v3877_v43  ;;  %v3772_v35 = vmax.f32 %v3682_v11, %v3740_v63  ;;  %v11158_v40 = vpop.f32.mrb[168].mxu1 }
 0x436   : > { %v3875_v38 = vor.u32 %v3873_v57, %v3872_v33  ;;  %v4006_v15 = vor.u32 %v4005_v29, %v3870_v60  ;;  %v3770_v28 = vmax.f32 %v3674_v61, %v3738_v12  ;;  %v3695_v34 = vadd.f32 %v11158_v40, %v13733_v26  ;;  %v3686_v44 = vpop.f32.mrb[169].mxu1  ;;  %v3974_v29 = vld [vmem:[#allocation2 + $0x120] sm:$0xff]  ;;  %v4070_v12 = vld [vmem:[#allocation2 + $0x130] sm:$0xff] }
 0x437   : > { %v13874_v7 = vsel %vm12877_vm9, %v3882_v19, %v3968_v3  ;;  %v4065_v47 = vsel %vm12883_vm10, %v4008_v0, %v4064_v49  ;;  %v13878_v8 = vpack.c.bf16 %v3772_v35, %v3771_v23  ;;  %10211 = vmatpush3.bf16.msra.mxu0 %v12219_v62  ;;  %v3687_v24 = vadd.f32 %v13733_v26, %v3686_v44  ;;  %v11159_v22 = vpop.f32.mrb[170].mxu1 }
 0x438   : > { %3970 = vst [vmem:[#allocation2 + $0xf0] sm:$0xff] %v13874_v7  ;;  %4066 = vst [vmem:[#allocation2 + $0x100] sm:$0xff] %v4065_v47  ;;  %v13884_v51 = vsel %vm12877_vm9, %v3875_v38, %v3965_v31  ;;  %v4062_v36 = vsel %vm12883_vm10, %v4006_v15, %v4061_v52  ;;  %v13888_v6 = vpack.c.bf16 %v3770_v28, %v3769_v2  ;;  %11212 = vmatprep.subr.bf16.mxu0 %v13870_v53  ;;  %v3689_v10 = vpop.f32.mrb[171].mxu1  ;;  %v3971_v15 = vld [vmem:[#allocation2 + $0x108] sm:$0xff]  ;;  %v4067_v2 = vld [vmem:[#allocation2 + $0x118] sm:$0xff] }
 0x439   : > { %3967 = vst [vmem:[#allocation2 + $0xd8] sm:$0xff] %v13884_v51  ;;  %4063 = vst [vmem:[#allocation2 + $0xe8] sm:$0xff] %v4062_v36  ;;  %v3891_v17 = vshrl.u32 %v13878_v8, 16  ;;  %v3894_v50 = vshll.u32 %v13878_v8, 16  ;;  %v3743_v4 = vmul.f32 0.1, %v3695_v34  ;;  %v3698_v30 = vadd.f32 %v11159_v22, %v13733_v26  ;;  %4398 = vmatmul.mubr.bf16.gmra.mrb[196].mxu1 %v13825_v13  ;;  %11197 = vmatmul.mubr.bf16.gmra.mrb[128].mxu0 %v4062_v36 }
 0x43a   : > { %v3884_v43 = vshrl.u32 %v13888_v6, 16  ;;  %v3887_v1 = vshll.u32 %v13888_v6, 16  ;;  %v3741_v54 = vmul.f32 0.1, %v3687_v24  ;;  %v3690_v11 = vadd.f32 %v13733_v26, %v3689_v10  ;;  %4405 = vmatprep.mubr.bf16.mxu1 %v13789_v32  ;;  %11200 = vmatprep.mubr.bf16.mxu0 %v4065_v47 }
 0x43b   : > { %v3893_v16 = vrot.slane %v3891_v17, 7  ;;  %v4011_v60 = vrot.slane %v3894_v50, 1  ;;  %v3744_v57 = vmul.f32 0.1, %v3698_v30  ;;  %v3775_v62 = vmax.f32 %v3695_v34, %v3743_v4 }
 0x43c   : > { %v3886_v39 = vrot.slane %v3884_v43, 7  ;;  %v4009_v61 = vrot.slane %v3887_v1, 1  ;;  %v3742_v42 = vmul.f32 0.1, %v3690_v11  ;;  %v3773_v23 = vmax.f32 %v3687_v24, %v3741_v54 }
 0x43d   : > { %v3896_v48 = vor.u32 %v3894_v50, %v3893_v16  ;;  %v4012_v63 = vor.u32 %v4011_v60, %v3891_v17  ;;  %v3776_v33 = vmax.f32 %v3698_v30, %v3744_v57  ;;  %v11162_v3 = vpop.f32.mrb[172].mxu1 }
 0x43e   : > { %v3889_v19 = vor.u32 %v3887_v1, %v3886_v39  ;;  %v4010_v0 = vor.u32 %v4009_v61, %v3884_v43  ;;  %v3774_v35 = vmax.f32 %v3690_v11, %v3742_v42  ;;  %v3711_v40 = vadd.f32 %v11162_v3, %v13733_v26  ;;  %v3702_v47 = vpop.f32.mrb[173].mxu1  ;;  %v4073_v3 = vld [vmem:[#allocation2 + $0x148] sm:$0xff] }
 0x43f   : > { %v13903_v49 = vsel %vm12877_vm9, %v3896_v48, %v3974_v29  ;;  %v4071_v38 = vsel %vm12883_vm10, %v4012_v63, %v4070_v12  ;;  %v13907_v28 = vpack.c.bf16 %v3776_v33, %v3775_v62  ;;  %v3703_v44 = vadd.f32 %v13733_v26, %v3702_v47  ;;  %v11163_v36 = vpop.f32.mrb[174].mxu1  ;;  %v3980_v62 = vld [vmem:[#allocation2 + $0x150] sm:$0xff]  ;;  %v4076_v33 = vld [vmem:[#allocation2 + $0x160] sm:$0xff] }
 0x440   : > { %3976 = vst [vmem:[#allocation2 + $0x120] sm:$0xff] %v13903_v49  ;;  %4072 = vst [vmem:[#allocation2 + $0x130] sm:$0xff] %v4071_v38  ;;  %v13913_v31 = vsel %vm12877_vm9, %v3889_v19, %v3971_v15  ;;  %v13917_v52 = vsel %vm12883_vm10, %v4010_v0, %v4067_v2  ;;  %v13919_v34 = vpack.c.bf16 %v3774_v35, %v3773_v23  ;;  %v3747_v17 = vmul.f32 0.1, %v3711_v40  ;;  %v3705_v4 = vpop.f32.mrb[175].mxu1  ;;  %v3977_v35 = vld [vmem:[#allocation2 + $0x138] sm:$0xff] }
 0x441   : > { %3973 = vst [vmem:[#allocation2 + $0x108] sm:$0xff] %v13913_v31  ;;  %4069 = vst [vmem:[#allocation2 + $0x118] sm:$0xff] %v13917_v52  ;;  %v3905_v24 = vshrl.u32 %v13907_v28, 16  ;;  %v3908_v22 = vshll.u32 %v13907_v28, 16  ;;  %v3714_v50 = vadd.f32 %v11163_v36, %v13733_v26  ;;  %4406 = vmatmul.mubr.bf16.gmra.mrb[200].mxu1 %v13815_v58  ;;  %11201 = vmatmul.mubr.bf16.gmra.mrb[132].mxu0 %v13917_v52  ;;  %v3745_v43 = vmul.f32 0.1, %v3703_v44 }
 0x442   : > { %v3898_v30 = vshrl.u32 %v13919_v34, 16  ;;  %v3901_v10 = vshll.u32 %v13919_v34, 16  ;;  %v3706_v1 = vadd.f32 %v13733_v26, %v3705_v4  ;;  %4413 = vmatprep.mubr.bf16.mxu1 %v13829_v59  ;;  %11204 = vmatprep.mubr.bf16.mxu0 %v4071_v38  ;;  %v3779_v48 = vmax.f32 %v3711_v40, %v3747_v17 }
 0x443   : > { %v3907_v54 = vrot.slane %v3905_v24, 7  ;;  %v4015_v11 = vrot.slane %v3908_v22, 1  ;;  %v3748_v16 = vmul.f32 0.1, %v3714_v50  ;;  %v3777_v19 = vmax.f32 %v3703_v44, %v3745_v43  ;;  %v3986_v43 = vld [vmem:[#allocation2 + $0x180] sm:$0xff] }
 0x444   : > { %v3900_v60 = vrot.slane %v3898_v30, 7  ;;  %v4013_v57 = vrot.slane %v3901_v10, 1  ;;  %v3746_v39 = vmul.f32 0.1, %v3706_v1 }
 0x445   : > { %v3910_v61 = vor.u32 %v3908_v22, %v3907_v54  ;;  %v4016_v42 = vor.u32 %v4015_v11, %v3905_v24  ;;  %v3780_v63 = vmax.f32 %v3714_v50, %v3748_v16 }
 0x446   : > { %v3903_v29 = vor.u32 %v3901_v10, %v3900_v60  ;;  %v4014_v12 = vor.u32 %v4013_v57, %v3898_v30  ;;  %v3778_v0 = vmax.f32 %v3706_v1, %v3746_v39  ;;  %v4082_v1 = vld [vmem:[#allocation2 + $0x190] sm:$0xff]  ;;  %v3983_v57 = vld [vmem:[#allocation2 + $0x168] sm:$0xff]  ;;  %v4079_v39 = vld [vmem:[#allocation2 + $0x178] sm:$0xff] }
 0x447   : > { %v13935_v26 = vsel %vm12877_vm9, %v3910_v61, %v3980_v62  ;;  %v13939_v23 = vsel %vm12883_vm10, %v4016_v42, %v4076_v33  ;;  %v13941_v38 = vpack.c.bf16 %v3780_v63, %v3779_v48  ;;  %v12225_v48 = vld [vmem:[#allocation4 + $0x148] sm:$0xff]   ;;  %v12228_v62 = vld [vmem:[#allocation4 + $0x150] sm:$0xff]   ;;  %v4714_v33 = vld [vmem:[#allocation2 + $0x30] sm:$0xff] }
 0x448   : > { %3982 = vst [vmem:[#allocation2 + $0x150] sm:$0xff] %v13935_v26  ;;  %4078 = vst [vmem:[#allocation2 + $0x160] sm:$0xff] %v13939_v23  ;;  %v13947_v15 = vsel %vm12877_vm9, %v3903_v29, %v3977_v35  ;;  %v13951_v2 = vsel %vm12883_vm10, %v4014_v12, %v4073_v3  ;;  %v13953_v40 = vpack.c.bf16 %v3778_v0, %v3777_v19  ;;  %v4715_v63 = vld [vmem:[#allocation2 + $0x38] sm:$0xff]  ;;  %v12235_v29 = vld [vmem:[#allocation4 + $0x158] sm:$0xff]  }
 0x449   : > { %3979 = vst [vmem:[#allocation2 + $0x138] sm:$0xff] %v13947_v15  ;;  %4075 = vst [vmem:[#allocation2 + $0x148] sm:$0xff] %v13951_v2  ;;  %v3919_v47 = vshrl.u32 %v13941_v38, 16  ;;  %v3922_v44 = vshll.u32 %v13941_v38, 16  ;;  %4414 = vmatmul.mubr.bf16.gmra.mrb[204].mxu1 %v13854_v20  ;;  %11205 = vmatmul.mubr.bf16.gmra.mrb[136].mxu0 %v13951_v2  ;;  %v12242_v3 = vld [vmem:[#allocation4 + $0x170] sm:$0xff]  }
 0x44a   : > { %v3912_v36 = vshrl.u32 %v13953_v40, 16  ;;  %v3915_v24 = vshll.u32 %v13953_v40, 16  ;;  %4421 = vmatprep.mubr.bf16.mxu1 %v13819_v25  ;;  %11208 = vmatprep.mubr.bf16.mxu0 %v13939_v23 }
 0x44b   : > { %v3921_v22 = vrot.slane %v3919_v47, 7  ;;  %v4019_v17 = vrot.slane %v3922_v44, 1 }
 0x44c   : > { %v3914_v50 = vrot.slane %v3912_v36, 7  ;;  %v4017_v4 = vrot.slane %v3915_v24, 1 }
 0x44d   : > { %v3924_v30 = vor.u32 %v3922_v44, %v3921_v22  ;;  %v4020_v10 = vor.u32 %v4019_v17, %v3919_v47  ;;  %v12243_v47 = vld [vmem:[#allocation4 + $0x178] sm:$0xff]   ;;  %v12249_v22 = vld [vmem:[#allocation4 + $0x228] sm:$0xff]  }
 0x44e   : > { %v3917_v54 = vor.u32 %v3915_v24, %v3914_v50  ;;  %v4018_v11 = vor.u32 %v4017_v4, %v3912_v36  ;;  %v5389_v44 = vld [vmem:[#allocation2 + $0xc8] sm:$0xff]  ;;  %v5388_v36 = vld [vmem:[#allocation2 + $0xc0] sm:$0xff]  ;;  %v14067_v17 = vld [vmem:[#allocation2 + $0xb8] sm:$0xff] }
 0x44f   : > { %v13967_v16 = vsel %vm12877_vm9, %v3924_v30, %v3986_v43  ;;  %v13971_v60 = vsel %vm12883_vm10, %v4020_v10, %v4082_v1  ;;  %v14046_v24 = vld [vmem:[#allocation2 + $0x40] sm:$0xff]  ;;  %v14075_v1 = vld [vmem:[#allocation2 + $0xd0] sm:$0xff] }
 0x450   : > { %3988 = vst [vmem:[#allocation2 + $0x180] sm:$0xff] %v13967_v16  ;;  %4084 = vst [vmem:[#allocation2 + $0x190] sm:$0xff] %v13971_v60  ;;  %v13977_v61 = vsel %vm12877_vm9, %v3917_v54, %v3983_v57  ;;  %v13981_v42 = vsel %vm12883_vm10, %v4018_v11, %v4079_v39 }
 0x451   : > { %3985 = vst [vmem:[#allocation2 + $0x168] sm:$0xff] %v13977_v61  ;;  %4081 = vst [vmem:[#allocation2 + $0x178] sm:$0xff] %v13981_v42  ;;  %4422 = vmatmul.mubr.bf16.gmra.mrb[208].mxu1 %v13844_v46  ;;  %11209 = vmatmul.mubr.bf16.gmra.mrb[140].mxu0 %v13981_v42 }
 0x452   : > { %4429 = vmatprep.mubr.bf16.mxu1 %v13858_v56  ;;  %4984 = vmatprep.mubr.bf16.mxu0 %v13742_v55  ;;  %v12240_v55 = vld [vmem:[#allocation4 + $0x160] sm:$0xff]  }
 0x459   : > { %4430 = vmatmul.mubr.bf16.gmra.mrb[212].mxu1 %v13884_v51  ;;  %4985 = vmatmul.mubr.bf16.vlgmr.msra.gmra.mrb[144].mxu0 %v13765_v37  ;;  %v10076_v37 = vpop.f32.mrb[176].mxu1 }
 0x45a   : > { %11213 = vmatpush3.bf16.msra.mxu0 %v13870_v53  ;;  %4437 = vmatprep.mubr.bf16.mxu1 %v13848_v21  ;;  %v12241_v53 = vld [vmem:[#allocation4 + $0x168] sm:$0xff]   ;;  %v10077_v12 = vpop.f32.mrb[177].mxu1 }
 0x45b   : > { %4992 = vmatprep.mubr.bf16.mxu0 %v4715_v63  ;;  %11214 = vmatprep.subr.bf16.mxu0 %v12225_v48  ;;  %v13998_v19 = vadd.f32 %v10077_v12, %v10076_v37  ;;  %v10079_v0 = vpop.f32.mrb[178].mxu1  ;;  %v14100_v12 = vld [vmem:[#allocation2 + $0x130] sm:$0xff] }
 0x45e   : > { %11215 = vmatpush3.bf16.msra.mxu0 %v12225_v48 }
 0x45f   : > { %11216 = vmatprep.subr.bf16.mxu0 %v12228_v62 }
 0x461   : > { %4438 = vmatmul.mubr.bf16.gmra.mrb[216].mxu1 %v13874_v7  ;;  %4993 = vmatmul.mubr.bf16.gmra.mrb[148].mxu0 %v4714_v33 }
 0x462   : > { %4445 = vmatprep.mubr.bf16.mxu1 %v13888_v6  ;;  %5000 = vmatprep.mubr.bf16.mxu0 %v13769_v5  ;;  %v10080_v5 = vpop.f32.mrb[179].mxu1 }
 0x463   : > { %11217 = vmatpush3.bf16.msra.mxu0 %v12228_v62  ;;  %v14002_v35 = vadd.f32 %v10080_v5, %v10079_v0  ;;  %v14087_v62 = vld [vmem:[#allocation2 + $0x100] sm:$0xff] }
 0x464   : > { %11218 = vmatprep.subr.bf16.mxu0 %v12235_v29 }
 0x467   : > { %11219 = vmatpush3.bf16.msra.mxu0 %v12235_v29 }
 0x468   : > { %11220 = vmatprep.subr.bf16.mxu0 %v12240_v55 }
 0x469   : > { %4446 = vmatmul.mubr.bf16.gmra.mrb[220].mxu1 %v13913_v31  ;;  %5001 = vmatmul.mubr.bf16.gmra.mrb[152].mxu0 %v13795_v45  ;;  %v5377_v45 = vld [vmem:[#allocation2 + $0x68] sm:$0xff] }
 0x46a   : > { %4453 = vmatprep.mubr.bf16.mxu1 %v13878_v8  ;;  %5008 = vmatprep.mubr.bf16.mxu0 %v13759_v18  ;;  %v14008_v18 = vld [vmem:[#allocation4 + $0x200] sm:$0xff]  }
 0x46b   : > { %11221 = vmatpush3.bf16.msra.mxu0 %v12240_v55 }
 0x46c   : > { %11222 = vmatprep.subr.bf16.mxu0 %v12241_v53 }
 0x46f   : > { %11223 = vmatpush3.bf16.msra.mxu0 %v12241_v53 }
 0x470   : > { %11224 = vmatprep.subr.bf16.mxu0 %v12242_v3 }
 0x471   : > { %4454 = vmatmul.mubr.bf16.gmra.mrb[224].mxu1 %v13903_v49  ;;  %5009 = vmatmul.mubr.bf16.gmra.mrb[156].mxu0 %v13785_v41  ;;  %v5374_v41 = vld [vmem:[#allocation2 + $0x50] sm:$0xff] }
 0x472   : > { %4461 = vmatprep.mubr.bf16.mxu1 %v13919_v34  ;;  %5016 = vmatprep.mubr.bf16.mxu0 %v13799_v27  ;;  %v5376_v27 = vld [vmem:[#allocation2 + $0x60] sm:$0xff] }
 0x473   : > { %11225 = vmatpush3.bf16.msra.mxu0 %v12242_v3  ;;  %v5415_v3 = vld [vmem:[#allocation2 + $0x198] sm:$0xff] }
 0x474   : > { %11226 = vmatprep.subr.bf16.mxu0 %v12243_v47 }
 0x477   : > { %11227 = vmatpush3.bf16.msra.mxu0 %v12243_v47 }
 0x478   : > { %11260 = vmatprep.subr.bf16.mxu0 %v14008_v18 }
 0x479   : > { %4462 = vmatmul.mubr.bf16.gmra.mrb[228].mxu1 %v13947_v15  ;;  %5017 = vmatmul.mubr.bf16.gmra.mrb[160].mxu0 %v13825_v13  ;;  %v5383_v13 = vld [vmem:[#allocation2 + $0x98] sm:$0xff] }
 0x47a   : > { %4469 = vmatprep.mubr.bf16.mxu1 %v13907_v28  ;;  %5024 = vmatprep.mubr.bf16.mxu0 %v13789_v32  ;;  %v5373_v32 = vld [vmem:[#allocation2 + $0x48] sm:$0xff] }
 0x481   : > { %4470 = vmatmul.mubr.bf16.gmra.mrb[232].mxu1 %v13935_v26  ;;  %5025 = vmatmul.mubr.bf16.gmra.mrb[164].mxu0 %v13815_v58  ;;  %v5380_v58 = vld [vmem:[#allocation2 + $0x80] sm:$0xff] }
 0x482   : > { %4477 = vmatprep.mubr.bf16.mxu1 %v13953_v40  ;;  %5032 = vmatprep.mubr.bf16.mxu0 %v13829_v59 }
 0x489   : > { %4478 = vmatmul.mubr.bf16.gmra.mrb[236].mxu1 %v13977_v61  ;;  %5033 = vmatmul.mubr.bf16.gmra.mrb[168].mxu0 %v13854_v20 }
 0x48a   : > { %5040 = vmatprep.mubr.bf16.mxu0 %v13819_v25  ;;  %5643 = vmatprep.mubr.bf16.mxu1 %v4715_v63  ;;  %v5379_v25 = vld [vmem:[#allocation2 + $0x78] sm:$0xff] }
 0x491   : > { %5041 = vmatmul.mubr.bf16.gmra.mrb[172].mxu0 %v13844_v46  ;;  %5644 = vmatmul.mubr.bf16.vlgmr.msra.gmra.mrb[240].mxu1 %v4714_v33  ;;  %v5382_v46 = vld [vmem:[#allocation2 + $0x90] sm:$0xff] }
 0x492   : > { %5048 = vmatprep.mubr.bf16.mxu0 %v13858_v56  ;;  %5651 = vmatprep.mubr.bf16.mxu1 %v5374_v41 }
 0x499   : > { %5049 = vmatmul.mubr.bf16.gmra.mrb[176].mxu0 %v13884_v51  ;;  %5652 = vmatmul.mubr.bf16.gmra.mrb[244].mxu1 %v5373_v32 }
 0x49a   : > { %5056 = vmatprep.mubr.bf16.mxu0 %v13848_v21  ;;  %5659 = vmatprep.mubr.bf16.mxu1 %v5377_v45 }
 0x4a1   : > { %5057 = vmatmul.mubr.bf16.gmra.mrb[180].mxu0 %v13874_v7  ;;  %5660 = vmatmul.mubr.bf16.gmra.mrb[248].mxu1 %v5376_v27 }
 0x4a2   : > { %5064 = vmatprep.mubr.bf16.mxu0 %v13888_v6  ;;  %5667 = vmatprep.mubr.bf16.mxu1 %v5380_v58 }
 0x4a9   : > { %5065 = vmatmul.mubr.bf16.gmra.mrb[184].mxu0 %v13913_v31  ;;  %5668 = vmatmul.mubr.bf16.gmra.mrb[252].mxu1 %v5379_v25 }
 0x4aa   : > { %5072 = vmatprep.mubr.bf16.mxu0 %v13878_v8  ;;  %5675 = vmatprep.mubr.bf16.mxu1 %v5383_v13 }
 0x4b1   : > { %5073 = vmatmul.mubr.bf16.gmra.mrb[188].mxu0 %v13903_v49  ;;  %5676 = vmatmul.mubr.bf16.gmra.mrb[0].mxu1 %v5382_v46 }
 0x4b2   : > { %5080 = vmatprep.mubr.bf16.mxu0 %v13919_v34  ;;  %5683 = vmatprep.mubr.bf16.mxu1 %v13829_v59  ;;  %v4713_v59 = vld [vmem:[#allocation2 + $0x28] sm:$0xff] }
 0x4b9   : > { %5081 = vmatmul.mubr.bf16.gmra.mrb[192].mxu0 %v13947_v15  ;;  %5684 = vmatmul.mubr.bf16.gmra.mrb[4].mxu1 %v13854_v20  ;;  %v12245_v20 = vld [vmem:[#allocation4 + $0x208] sm:$0xff]  }
 0x4ba   : > { %5088 = vmatprep.mubr.bf16.mxu0 %v13907_v28  ;;  %5691 = vmatprep.mubr.bf16.mxu1 %v5389_v44 }
 0x4c1   : > { %5089 = vmatmul.mubr.bf16.gmra.mrb[196].mxu0 %v13935_v26  ;;  %5692 = vmatmul.mubr.bf16.gmra.mrb[8].mxu1 %v5388_v36  ;;  %v12254_v36 = vld [vmem:[%s15275_s9 + $0x10] sm:$0xff]  }
 0x4c2   : > { %5096 = vmatprep.mubr.bf16.mxu0 %v13953_v40  ;;  %5699 = vmatprep.mubr.bf16.mxu1 %v13858_v56  ;;  %v14050_v56 = vld [vmem:[#allocation2 + $0x58] sm:$0xff] }
 0x4c9   : > { %5097 = vmatmul.mubr.bf16.gmra.mrb[200].mxu0 %v13977_v61  ;;  %5700 = vmatmul.mubr.bf16.gmra.mrb[12].mxu1 %v13884_v51  ;;  %v12247_v51 = vld [vmem:[#allocation4 + $0x218] sm:$0xff]  }
 0x4ca   : > { %5104 = vmatprep.mubr.bf16.mxu0 %v13941_v38  ;;  %5707 = vmatprep.mubr.bf16.mxu1 %v13848_v21  ;;  %v12246_v21 = vld [vmem:[#allocation4 + $0x210] sm:$0xff]  }
 0x4d1   : > { %5105 = vmatmul.mubr.bf16.gmra.mrb[204].mxu0 %v13967_v16  ;;  %5708 = vmatmul.mubr.bf16.gmra.mrb[16].mxu1 %v13874_v7  ;;  %v14055_v7 = vld [vmem:[#allocation2 + $0x70] sm:$0xff] }
 0x4d2   : > { %11228 = vmatprep.mubr.bf16.mxu0 %v4713_v59  ;;  %5715 = vmatprep.mubr.bf16.mxu1 %v13888_v6  ;;  %v14059_v6 = vld [vmem:[#allocation2 + $0x88] sm:$0xff] }
 0x4d9   : > { %11229 = vmatmul.mubr.bf16.vlgmr.msra.gmra.mrb[112].mxu0 %v14046_v24  ;;  %5716 = vmatmul.mubr.bf16.gmra.mrb[20].mxu1 %v13913_v31  ;;  %v14063_v31 = vld [vmem:[#allocation2 + $0xa0] sm:$0xff] }
 0x4da   : > { %11261 = vmatpush3.bf16.msra.mxu0 %v14008_v18  ;;  %11232 = vmatprep.mubr.bf16.mxu0 %v14050_v56 }
 0x4db   : > { %5723 = vmatprep.mubr.bf16.mxu1 %v13878_v8  ;;  %11262 = vmatprep.subr.bf16.mxu0 %v12245_v20  ;;  %v12248_v8 = vld [vmem:[#allocation4 + $0x220] sm:$0xff]  }
 0x4de   : > { %11263 = vmatpush3.bf16.msra.mxu0 %v12245_v20 }
 0x4df   : > { %11264 = vmatprep.subr.bf16.mxu0 %v12246_v21 }
 0x4e1   : > { %11233 = vmatmul.mubr.bf16.gmra.mrb[116].mxu0 %v14055_v7  ;;  %5724 = vmatmul.mubr.bf16.gmra.mrb[24].mxu1 %v13903_v49 }
 0x4e2   : > { %11236 = vmatprep.mubr.bf16.mxu0 %v14059_v6  ;;  %5731 = vmatprep.mubr.bf16.mxu1 %v13919_v34  ;;  %v12250_v34 = vld [vmem:[#allocation4 + $0x230] sm:$0xff]  }
 0x4e3   : > { %11265 = vmatpush3.bf16.msra.mxu0 %v12246_v21 }
 0x4e4   : > { %11266 = vmatprep.subr.bf16.mxu0 %v12247_v51 }
 0x4e7   : > { %11267 = vmatpush3.bf16.msra.mxu0 %v12247_v51 }
 0x4e8   : > { %11268 = vmatprep.subr.bf16.mxu0 %v12248_v8 }
 0x4e9   : > { %11237 = vmatmul.mubr.bf16.gmra.mrb[120].mxu0 %v14063_v31  ;;  %5732 = vmatmul.mubr.bf16.gmra.mrb[28].mxu1 %v13947_v15  ;;  %v12251_v15 = vld [vmem:[#allocation4 + $0x238] sm:$0xff]  }
 0x4ea   : > { %11240 = vmatprep.mubr.bf16.mxu0 %v14067_v17  ;;  %5739 = vmatprep.mubr.bf16.mxu1 %v13907_v28  ;;  %v14079_v28 = vld [vmem:[#allocation2 + $0xe8] sm:$0xff] }
 0x4eb   : > { %11269 = vmatpush3.bf16.msra.mxu0 %v12248_v8  ;;  %v10082_v49 = vpop.f32.mrb[180].mxu1 }
 0x4ec   : > { %11270 = vmatprep.subr.bf16.mxu0 %v12249_v22  ;;  %v10083_v50 = vpop.f32.mrb[181].mxu1 }
 0x4ed   : > { %v14071_v4 = vadd.f32 %v10083_v50, %v10082_v49  ;;  %v10085_v30 = vpop.f32.mrb[182].mxu1  ;;  %v12255_v50 = vld [vmem:[%s15275_s9 + $0x18] sm:$0xff]  }
 0x4ee   : > { %v10086_v10 = vpop.f32.mrb[183].mxu1 }
 0x4ef   : > { %11271 = vmatpush3.bf16.msra.mxu0 %v12249_v22  ;;  %v14073_v43 = vadd.f32 %v10086_v10, %v10085_v30 }
 0x4f0   : > { %11272 = vmatprep.subr.bf16.mxu0 %v12250_v34 }
 0x4f1   : > { %11241 = vmatmul.mubr.bf16.gmra.mrb[124].mxu0 %v14075_v1  ;;  %5740 = vmatmul.mubr.bf16.gmra.mrb[32].mxu1 %v13935_v26  ;;  %v12252_v26 = vld [vmem:[%s15275_s9] sm:$0xff]  }
 0x4f2   : > { %11244 = vmatprep.mubr.bf16.mxu0 %v14079_v28  ;;  %5747 = vmatprep.mubr.bf16.mxu1 %v13953_v40 }
 0x4f3   : > { %11273 = vmatpush3.bf16.msra.mxu0 %v12250_v34  ;;  %11308 = vmatprep.subr.bf16.mxu1 %v12252_v26 }
 0x4f4   : > { %v10088_v54 = vpop.f32.mrb[184].mxu1  ;;  %11274 = vmatprep.subr.bf16.mxu0 %v12251_v15  ;;  %11309 = vmatpush3.bf16.msra.mxu1 %v12252_v26 }
 0x4f5   : > { %v10089_v11 = vpop.f32.mrb[185].mxu1 }
 0x4f6   : > { %v14083_v57 = vadd.f32 %v10089_v11, %v10088_v54  ;;  %v10091_v39 = vpop.f32.mrb[186].mxu1 }
 0x4f7   : > { %v10092_v48 = vpop.f32.mrb[187].mxu1  ;;  %11275 = vmatpush3.bf16.msra.mxu0 %v12251_v15 }
 0x4f8   : > { %v14085_v63 = vadd.f32 %v10092_v48, %v10091_v39 }
 0x4f9   : > { %11245 = vmatmul.mubr.bf16.gmra.mrb[128].mxu0 %v14087_v62  ;;  %5748 = vmatmul.mubr.bf16.gmra.mrb[36].mxu1 %v13977_v61 }
 0x4fa   : > { %11248 = vmatprep.mubr.bf16.mxu0 %v13917_v52  ;;  %5755 = vmatprep.mubr.bf16.mxu1 %v13941_v38  ;;  %v12342_v52 = vld [vmem:[#allocation2 + $0x8] sm:$0xff] }
 0x4fc   : > { %v10094_v40 = vpop.f32.mrb[188].mxu1 }
 0x4fd   : > { %v10095_v33 = vpop.f32.mrb[189].mxu1 }
 0x4fe   : > { %v14096_v29 = vadd.f32 %v10095_v33, %v10094_v40  ;;  %v10097_v55 = vpop.f32.mrb[190].mxu1 }
 0x4ff   : > { %v10098_v37 = vpop.f32.mrb[191].mxu1 }
 0x500   : > { %v14098_v53 = vadd.f32 %v10098_v37, %v10097_v55 }
 0x501   : > { %11249 = vmatmul.mubr.bf16.gmra.mrb[132].mxu0 %v14100_v12  ;;  %5756 = vmatmul.mubr.bf16.gmra.mrb[40].mxu1 %v13967_v16 }
 0x502   : > { %11252 = vmatprep.mubr.bf16.mxu0 %v13951_v2  ;;  %5763 = vmatprep.mubr.bf16.mxu1 %v12342_v52  ;;  %v12253_v2 = vld [vmem:[%s15275_s9 + $0x8] sm:$0xff]  }
 0x503   : > { %11310 = vmatprep.subr.bf16.mxu1 %v12253_v2 }
 0x504   : > { %v10100_v38 = vpop.f32.mrb[192].mxu1  ;;  %11311 = vmatpush3.bf16.msra.mxu1 %v12253_v2 }
 0x505   : > { %v10101_v61 = vpop.f32.mrb[193].mxu1  ;;  %11312 = vmatprep.subr.bf16.mxu1 %v12254_v36 }
 0x506   : > { %v14105_v0 = vadd.f32 %v10101_v61, %v10100_v38  ;;  %v10103_v5 = vpop.f32.mrb[194].mxu1 }
 0x507   : > { %v10104_v47 = vpop.f32.mrb[195].mxu1 }
 0x508   : > { %v14107_v18 = vadd.f32 %v10104_v47, %v10103_v5  ;;  %11313 = vmatpush3.bf16.msra.mxu1 %v12254_v36 }
 0x509   : > { %11253 = vmatmul.mubr.bf16.gmra.mrb[136].mxu0 %v13939_v23  ;;  %5764 = vmatmul.mubr.bf16.gmra.mrb[44].mxu1 %v5415_v3 }
 0x50a   : > { %11256 = vmatprep.mubr.bf16.mxu0 %v13981_v42  ;;  %11314 = vmatprep.subr.bf16.mxu1 %v12255_v50 }
 0x50c   : > { %v10106_v16 = vpop.f32.mrb[196].mxu1  ;;  %11315 = vmatpush3.bf16.msra.mxu1 %v12255_v50 }
 0x50d   : > { %v10107_v41 = vpop.f32.mrb[197].mxu1 }
 0x50e   : > { %v14114_v32 = vadd.f32 %v10107_v41, %v10106_v16  ;;  %v10109_v45 = vpop.f32.mrb[198].mxu1  ;;  %v5399_v41 = vld [vmem:[#allocation2 + $0x118] sm:$0xff] }
 0x50f   : > { %v10110_v27 = vpop.f32.mrb[199].mxu1 }
 0x510   : > { %v14116_v58 = vadd.f32 %v10110_v27, %v10109_v45 }
 0x511   : > { %11257 = vmatmul.mubr.bf16.gmra.mrb[140].mxu0 %v13971_v60 }
 0x512   : > { %11276 = vmatprep.mubr.bf16.mxu0 %v14046_v24 }
 0x514   : > { %v10112_v23 = vpop.f32.mrb[200].mxu1 }
 0x515   : > { %v10113_v42 = vpop.f32.mrb[201].mxu1 }
 0x516   : > { %v14120_v25 = vadd.f32 %v10113_v42, %v10112_v23  ;;  %v10115_v13 = vpop.f32.mrb[202].mxu1 }
 0x517   : > { %v10116_v46 = vpop.f32.mrb[203].mxu1 }
 0x518   : > { %v14122_v44 = vadd.f32 %v10116_v46, %v10115_v13 }
 0x519   : > { %11277 = vmatmul.mubr.bf16.vlgmr.msra.gmra.mrb[112].mxu0 %v14050_v56 }
 0x51a   : > { %11280 = vmatprep.mubr.bf16.mxu0 %v14055_v7 }
 0x51c   : > { %v10118_v59 = vpop.f32.mrb[204].mxu1 }
 0x51d   : > { %v10119_v60 = vpop.f32.mrb[205].mxu1 }
 0x51e   : > { %v14129_v20 = vadd.f32 %v10119_v60, %v10118_v59  ;;  %v10121_v24 = vpop.f32.mrb[206].mxu1 }
 0x51f   : > { %v10122_v21 = vpop.f32.mrb[207].mxu1 }
 0x520   : > { %v14131_v51 = vadd.f32 %v10122_v21, %v10121_v24 }
 0x521   : > { %11281 = vmatmul.mubr.bf16.gmra.mrb[116].mxu0 %v14059_v6 }
 0x522   : > { %11284 = vmatprep.mubr.bf16.mxu0 %v14063_v31 }
 0x524   : > { %v10124_v56 = vpop.f32.mrb[208].mxu1 }
 0x525   : > { %v10125_v7 = vpop.f32.mrb[209].mxu1 }
 0x526   : > { %v14135_v8 = vadd.f32 %v10125_v7, %v10124_v56  ;;  %v10127_v22 = vpop.f32.mrb[210].mxu1  ;;  %v5408_v7 = vld [vmem:[#allocation2 + $0x160] sm:$0xff] }
 0x527   : > { %v10128_v49 = vpop.f32.mrb[211].mxu1 }
 0x528   : > { %v14137_v34 = vadd.f32 %v10128_v49, %v10127_v22 }
 0x529   : > { %11285 = vmatmul.mubr.bf16.gmra.mrb[120].mxu0 %v14067_v17 }
 0x52a   : > { %11288 = vmatprep.mubr.bf16.mxu0 %v14075_v1 }
 0x52c   : > { %v10130_v30 = vpop.f32.mrb[212].mxu1  ;;  %v10212_v6 = vpop.f32.mrb[144].mxu0 }
 0x52d   : > { %v10131_v31 = vpop.f32.mrb[213].mxu1  ;;  %v10213_v10 = vpop.f32.mrb[145].mxu0 }
 0x52e   : > { %v14144_v15 = vadd.f32 %v10131_v31, %v10130_v30  ;;  %v10214_v54 = vadd.f32 %v10213_v10, %v10212_v6  ;;  %v10133_v11 = vpop.f32.mrb[214].mxu1  ;;  %v10215_v39 = vpop.f32.mrb[146].mxu0 }
 0x52f   : > { %v10134_v48 = vpop.f32.mrb[215].mxu1  ;;  %v10216_v26 = vpop.f32.mrb[147].mxu0 }
 0x530   : > { %v14147_v17 = vadd.f32 %v10214_v54, %v13998_v19  ;;  %v14149_v1 = vadd.f32 %v10134_v48, %v10133_v11  ;;  %v10217_v40 = vadd.f32 %v10216_v26, %v10215_v39 }
 0x531   : > { %11289 = vmatmul.mubr.bf16.gmra.mrb[124].mxu0 %v14079_v28 }
 0x532   : > { %v14153_v33 = vadd.f32 %v10217_v40, %v14002_v35  ;;  %11292 = vmatprep.mubr.bf16.mxu0 %v14087_v62  ;;  %v12256_v62 = vld [vmem:[%s15275_s9 + $0x20] sm:$0xff]  }
 0x533   : > { %11316 = vmatprep.subr.bf16.mxu1 %v12256_v62 }
 0x534   : > { %v10136_v55 = vpop.f32.mrb[216].mxu1  ;;  %v10218_v37 = vpop.f32.mrb[148].mxu0  ;;  %11317 = vmatpush3.bf16.msra.mxu1 %v12256_v62 }
 0x535   : > { %v10137_v52 = vpop.f32.mrb[217].mxu1  ;;  %v10219_v38 = vpop.f32.mrb[149].mxu0 }
 0x536   : > { %v14156_v61 = vadd.f32 %v10137_v52, %v10136_v55  ;;  %v10220_v5 = vadd.f32 %v10219_v38, %v10218_v37  ;;  %v10139_v3 = vpop.f32.mrb[218].mxu1  ;;  %v10221_v19 = vpop.f32.mrb[150].mxu0  ;;  %v12257_v55 = vld [vmem:[%s15275_s9 + $0x28] sm:$0xff]   ;;  %v5414_v37 = vld [vmem:[#allocation2 + $0x190] sm:$0xff] }
 0x537   : > { %v10140_v47 = vpop.f32.mrb[219].mxu1  ;;  %v10222_v2 = vpop.f32.mrb[151].mxu0  ;;  %11318 = vmatprep.subr.bf16.mxu1 %v12257_v55 }
 0x538   : > { %v14159_v16 = vadd.f32 %v10220_v5, %v14071_v4  ;;  %v14161_v28 = vadd.f32 %v10140_v47, %v10139_v3  ;;  %v10223_v35 = vadd.f32 %v10222_v2, %v10221_v19  ;;  %11319 = vmatpush3.bf16.msra.mxu1 %v12257_v55 }
 0x539   : > { %11293 = vmatmul.mubr.bf16.gmra.mrb[128].mxu0 %v5399_v41  ;;  %v5417_v41 = vld [vmem:[#allocation2 + $0x1a8] sm:$0xff] }
 0x53a   : > { %v14167_v45 = vadd.f32 %v10223_v35, %v14073_v43  ;;  %11296 = vmatprep.mubr.bf16.mxu0 %v14100_v12  ;;  %v5405_v12 = vld [vmem:[#allocation2 + $0x148] sm:$0xff] }
 0x53c   : > { %v10142_v27 = vpop.f32.mrb[220].mxu1  ;;  %v10224_v23 = vpop.f32.mrb[152].mxu0 }
 0x53d   : > { %v10143_v4 = vpop.f32.mrb[221].mxu1  ;;  %v10225_v42 = vpop.f32.mrb[153].mxu0 }
 0x53e   : > { %v14170_v13 = vadd.f32 %v10143_v4, %v10142_v27  ;;  %v10226_v46 = vadd.f32 %v10225_v42, %v10224_v23  ;;  %v10145_v36 = vpop.f32.mrb[222].mxu1  ;;  %v10227_v59 = vpop.f32.mrb[154].mxu0 }
 0x53f   : > { %v10146_v60 = vpop.f32.mrb[223].mxu1  ;;  %v10228_v24 = vpop.f32.mrb[155].mxu0 }
 0x540   : > { %v14173_v21 = vadd.f32 %v10226_v46, %v14083_v57  ;;  %v14175_v43 = vadd.f32 %v10146_v60, %v10145_v36  ;;  %v10229_v56 = vadd.f32 %v10228_v24, %v10227_v59 }
 0x541   : > { %11297 = vmatmul.mubr.bf16.gmra.mrb[132].mxu0 %v5405_v12 }
 0x542   : > { %v14178_v22 = vadd.f32 %v10229_v56, %v14085_v63  ;;  %11300 = vmatprep.mubr.bf16.mxu0 %v5408_v7  ;;  %v5411_v63 = vld [vmem:[#allocation2 + $0x178] sm:$0xff] }
 0x544   : > { %v10148_v49 = vpop.f32.mrb[224].mxu1  ;;  %v10230_v50 = vpop.f32.mrb[156].mxu0 }
 0x545   : > { %v10149_v30 = vpop.f32.mrb[225].mxu1  ;;  %v10231_v6 = vpop.f32.mrb[157].mxu0 }
 0x546   : > { %v14180_v31 = vadd.f32 %v10149_v30, %v10148_v49  ;;  %v10232_v10 = vadd.f32 %v10231_v6, %v10230_v50  ;;  %v10151_v54 = vpop.f32.mrb[226].mxu1  ;;  %v10233_v57 = vpop.f32.mrb[158].mxu0 }
 0x547   : > { %v10152_v11 = vpop.f32.mrb[227].mxu1  ;;  %v10234_v39 = vpop.f32.mrb[159].mxu0 }
 0x548   : > { %v14183_v48 = vadd.f32 %v10232_v10, %v14096_v29  ;;  %v14185_v26 = vadd.f32 %v10152_v11, %v10151_v54  ;;  %v10235_v40 = vadd.f32 %v10234_v39, %v10233_v57 }
 0x549   : > { %11301 = vmatmul.mubr.bf16.gmra.mrb[136].mxu0 %v5411_v63 }
 0x54a   : > { %v14191_v52 = vadd.f32 %v10235_v40, %v14098_v53  ;;  %11304 = vmatprep.mubr.bf16.mxu0 %v5414_v37 }
 0x54c   : > { %v10154_v38 = vpop.f32.mrb[228].mxu1  ;;  %v10236_v5 = vpop.f32.mrb[160].mxu0 }
 0x54d   : > { %v10155_v29 = vpop.f32.mrb[229].mxu1  ;;  %v10237_v3 = vpop.f32.mrb[161].mxu0 }
 0x54e   : > { %v14193_v19 = vadd.f32 %v10155_v29, %v10154_v38  ;;  %v10238_v47 = vadd.f32 %v10237_v3, %v10236_v5  ;;  %v10157_v2 = vpop.f32.mrb[230].mxu1  ;;  %v10239_v35 = vpop.f32.mrb[162].mxu0  ;;  %v12259_v3 = vld [vmem:[%s15275_s9 + $0x38] sm:$0xff]  }
 0x54f   : > { %v10158_v62 = vpop.f32.mrb[231].mxu1  ;;  %v10240_v27 = vpop.f32.mrb[163].mxu0 }
 0x550   : > { %v14196_v23 = vadd.f32 %v10238_v47, %v14105_v0  ;;  %v14198_v53 = vadd.f32 %v10158_v62, %v10157_v2  ;;  %v10241_v4 = vadd.f32 %v10240_v27, %v10239_v35 }
 0x551   : > { %11305 = vmatmul.mubr.bf16.gmra.mrb[140].mxu0 %v5417_v41 }
 0x552   : > { %v14201_v42 = vadd.f32 %v10241_v4, %v14107_v18  ;;  %v12258_v18 = vld [vmem:[%s15275_s9 + $0x30] sm:$0xff]  }
 0x553   : > { %11320 = vmatprep.subr.bf16.mxu1 %v12258_v18 }
 0x554   : > { %v10160_v46 = vpop.f32.mrb[232].mxu1  ;;  %v10242_v36 = vpop.f32.mrb[164].mxu0  ;;  %11321 = vmatpush3.bf16.msra.mxu1 %v12258_v18 }
 0x555   : > { %v10161_v59 = vpop.f32.mrb[233].mxu1  ;;  %v10243_v60 = vpop.f32.mrb[165].mxu0  ;;  %11322 = vmatprep.subr.bf16.mxu1 %v12259_v3 }
 0x556   : > { %v14203_v24 = vadd.f32 %v10161_v59, %v10160_v46  ;;  %v10244_v56 = vadd.f32 %v10243_v60, %v10242_v36  ;;  %v10163_v12 = vpop.f32.mrb[234].mxu1  ;;  %v10245_v7 = vpop.f32.mrb[166].mxu0 }
 0x557   : > { %v10164_v49 = vpop.f32.mrb[235].mxu1  ;;  %v10246_v50 = vpop.f32.mrb[167].mxu0 }
 0x558   : > { %v14206_v0 = vadd.f32 %v10244_v56, %v14114_v32  ;;  %v14208_v30 = vadd.f32 %v10164_v49, %v10163_v12  ;;  %v10247_v6 = vadd.f32 %v10246_v50, %v10245_v7  ;;  %11323 = vmatpush3.bf16.msra.mxu1 %v12259_v3 }
 0x55a   : > { %v14214_v10 = vadd.f32 %v10247_v6, %v14116_v58 }
 0x55c   : > { %v10166_v54 = vpop.f32.mrb[236].mxu1  ;;  %v10248_v57 = vpop.f32.mrb[168].mxu0 }
 0x55d   : > { %v10167_v11 = vpop.f32.mrb[237].mxu1  ;;  %v10249_v39 = vpop.f32.mrb[169].mxu0 }
 0x55e   : > { %v14216_v40 = vadd.f32 %v10167_v11, %v10166_v54  ;;  %v10250_v32 = vadd.f32 %v10249_v39, %v10248_v57  ;;  %v10169_v63 = vpop.f32.mrb[238].mxu1  ;;  %v10251_v55 = vpop.f32.mrb[170].mxu0 }
 0x55f   : > { %v10170_v37 = vpop.f32.mrb[239].mxu1  ;;  %v10252_v38 = vpop.f32.mrb[171].mxu0 }
 0x560   : > { %v14219_v5 = vadd.f32 %v10250_v32, %v14120_v25  ;;  %v14221_v29 = vadd.f32 %v10170_v37, %v10169_v63  ;;  %v10253_v58 = vadd.f32 %v10252_v38, %v10251_v55 }
 0x562   : > { %v14227_v47 = vadd.f32 %v10253_v58, %v14122_v44 }
 0x564   : > { %v10254_v2 = vpop.f32.mrb[172].mxu0  ;;  %v10348_v35 = vpop.f32.mrb[240].mxu1 }
 0x565   : > { %v10255_v41 = vpop.f32.mrb[173].mxu0  ;;  %v10349_v62 = vpop.f32.mrb[241].mxu1 }
 0x566   : > { %v10256_v27 = vadd.f32 %v10255_v41, %v10254_v2  ;;  %v10350_v4 = vadd.f32 %v10349_v62, %v10348_v35  ;;  %v10257_v25 = vpop.f32.mrb[174].mxu0  ;;  %v10351_v46 = vpop.f32.mrb[242].mxu1 }
 0x567   : > { %v10258_v36 = vpop.f32.mrb[175].mxu0  ;;  %v10352_v59 = vpop.f32.mrb[243].mxu1 }
 0x568   : > { %v14230_v60 = vadd.f32 %v10256_v27, %v14129_v20  ;;  %v10259_v56 = vadd.f32 %v10258_v36, %v10257_v25  ;;  %v10353_v12 = vadd.f32 %v10352_v59, %v10351_v46  ;;  %v14233_v44 = vadd.f32 %v14147_v17, %v10350_v4 }
 0x56a   : > { %v14236_v7 = vadd.f32 %v10259_v56, %v14131_v51  ;;  %v14239_v49 = vadd.f32 %v14153_v33, %v10353_v12 }
 0x56c   : > { %v10260_v50 = vpop.f32.mrb[176].mxu0  ;;  %v10354_v6 = vpop.f32.mrb[244].mxu1 }
 0x56d   : > { %v10261_v18 = vpop.f32.mrb[177].mxu0  ;;  %v10355_v54 = vpop.f32.mrb[245].mxu1 }
 0x56e   : > { %v10262_v57 = vadd.f32 %v10261_v18, %v10260_v50  ;;  %v10356_v11 = vadd.f32 %v10355_v54, %v10354_v6  ;;  %v10263_v39 = vpop.f32.mrb[178].mxu0  ;;  %v10357_v20 = vpop.f32.mrb[246].mxu1 }
 0x56f   : > { %v10264_v32 = vpop.f32.mrb[179].mxu0  ;;  %v10358_v63 = vpop.f32.mrb[247].mxu1 }
 0x570   : > { %v14242_v55 = vadd.f32 %v10262_v57, %v14135_v8  ;;  %v10265_v17 = vadd.f32 %v10264_v32, %v10263_v39  ;;  %v10359_v37 = vadd.f32 %v10358_v63, %v10357_v20  ;;  %v14245_v51 = vadd.f32 %v14159_v16, %v10356_v11 }
 0x572   : > { %v14248_v33 = vadd.f32 %v10265_v17, %v14137_v34  ;;  %v14251_v38 = vadd.f32 %v14167_v45, %v10359_v37 }
 0x574   : > { %v10266_v58 = vpop.f32.mrb[180].mxu0  ;;  %v10360_v3 = vpop.f32.mrb[248].mxu1 }
 0x575   : > { %v10267_v2 = vpop.f32.mrb[181].mxu0  ;;  %v10361_v35 = vpop.f32.mrb[249].mxu1 }
 0x576   : > { %v10268_v41 = vadd.f32 %v10267_v2, %v10266_v58  ;;  %v10362_v62 = vadd.f32 %v10361_v35, %v10360_v3  ;;  %v10269_v27 = vpop.f32.mrb[182].mxu0  ;;  %v10363_v8 = vpop.f32.mrb[250].mxu1 }
 0x577   : > { %v10270_v4 = vpop.f32.mrb[183].mxu0  ;;  %v10364_v25 = vpop.f32.mrb[251].mxu1 }
 0x578   : > { %v14254_v46 = vadd.f32 %v10268_v41, %v14144_v15  ;;  %v10271_v16 = vadd.f32 %v10270_v4, %v10269_v27  ;;  %v10365_v36 = vadd.f32 %v10364_v25, %v10363_v8  ;;  %v14257_v34 = vadd.f32 %v14173_v21, %v10362_v62 }
 0x57a   : > { %v14260_v45 = vadd.f32 %v10271_v16, %v14149_v1  ;;  %v14263_v59 = vadd.f32 %v14178_v22, %v10365_v36 }
 0x57c   : > { %v10272_v56 = vpop.f32.mrb[184].mxu0  ;;  %v10366_v12 = vpop.f32.mrb[252].mxu1 }
 0x57d   : > { %v10273_v50 = vpop.f32.mrb[185].mxu0  ;;  %v10367_v6 = vpop.f32.mrb[253].mxu1 }
 0x57e   : > { %v10274_v18 = vadd.f32 %v10273_v50, %v10272_v56  ;;  %v10368_v54 = vadd.f32 %v10367_v6, %v10366_v12  ;;  %v10275_v57 = vpop.f32.mrb[186].mxu0  ;;  %v10369_v15 = vpop.f32.mrb[254].mxu1 }
 0x57f   : > { %v10276_v11 = vpop.f32.mrb[187].mxu0  ;;  %v10370_v39 = vpop.f32.mrb[255].mxu1 }
 0x580   : > { %v14266_v20 = vadd.f32 %v10274_v18, %v14156_v61  ;;  %v10277_v21 = vadd.f32 %v10276_v11, %v10275_v57  ;;  %v10371_v32 = vadd.f32 %v10370_v39, %v10369_v15  ;;  %v14269_v1 = vadd.f32 %v14183_v48, %v10368_v54 }
 0x582   : > { %v14272_v22 = vadd.f32 %v10277_v21, %v14161_v28  ;;  %v14275_v63 = vadd.f32 %v14191_v52, %v10371_v32 }
 0x584   : > { %v10278_v17 = vpop.f32.mrb[188].mxu0  ;;  %v10372_v37 = vpop.f32.mrb[0].mxu1 }
 0x585   : > { %v10279_v58 = vpop.f32.mrb[189].mxu0  ;;  %v10373_v3 = vpop.f32.mrb[1].mxu1 }
 0x586   : > { %v10280_v2 = vadd.f32 %v10279_v58, %v10278_v17  ;;  %v10374_v35 = vadd.f32 %v10373_v3, %v10372_v37  ;;  %v10281_v41 = vpop.f32.mrb[190].mxu0  ;;  %v10375_v61 = vpop.f32.mrb[2].mxu1 }
 0x587   : > { %v10282_v62 = vpop.f32.mrb[191].mxu0  ;;  %v10376_v27 = vpop.f32.mrb[3].mxu1 }
 0x588   : > { %v14278_v8 = vadd.f32 %v10280_v2, %v14170_v13  ;;  %v10283_v48 = vadd.f32 %v10282_v62, %v10281_v41  ;;  %v10377_v4 = vadd.f32 %v10376_v27, %v10375_v61  ;;  %v14281_v28 = vadd.f32 %v14196_v23, %v10374_v35 }
 0x58a   : > { %v14284_v52 = vadd.f32 %v10283_v48, %v14175_v43  ;;  %v14287_v25 = vadd.f32 %v14201_v42, %v10377_v4 }
 0x58c   : > { %v10284_v16 = vpop.f32.mrb[192].mxu0  ;;  %v10378_v36 = vpop.f32.mrb[4].mxu1 }
 0x58d   : > { %v10285_v56 = vpop.f32.mrb[193].mxu0  ;;  %v10379_v12 = vpop.f32.mrb[5].mxu1 }
 0x58e   : > { %v10286_v50 = vadd.f32 %v10285_v56, %v10284_v16  ;;  %v10380_v6 = vadd.f32 %v10379_v12, %v10378_v36  ;;  %v10287_v18 = vpop.f32.mrb[194].mxu0  ;;  %v10381_v13 = vpop.f32.mrb[6].mxu1 }
 0x58f   : > { %v10288_v54 = vpop.f32.mrb[195].mxu0  ;;  %v10382_v57 = vpop.f32.mrb[7].mxu1 }
 0x590   : > { %v14290_v15 = vadd.f32 %v10286_v50, %v14180_v31  ;;  %v10289_v23 = vadd.f32 %v10288_v54, %v10287_v18  ;;  %v10383_v11 = vadd.f32 %v10382_v57, %v10381_v13  ;;  %v14293_v43 = vadd.f32 %v14206_v0, %v10380_v6 }
 0x592   : > { %v14296_v42 = vadd.f32 %v10289_v23, %v14185_v26  ;;  %v14299_v39 = vadd.f32 %v14214_v10, %v10383_v11 }
 0x594   : > { %v10290_v21 = vpop.f32.mrb[196].mxu0  ;;  %v10384_v32 = vpop.f32.mrb[8].mxu1 }
 0x595   : > { %v10291_v17 = vpop.f32.mrb[197].mxu0  ;;  %v10385_v37 = vpop.f32.mrb[9].mxu1 }
 0x596   : > { %v10292_v58 = vadd.f32 %v10291_v17, %v10290_v21  ;;  %v10386_v3 = vadd.f32 %v10385_v37, %v10384_v32  ;;  %v10293_v2 = vpop.f32.mrb[198].mxu0  ;;  %v10387_v31 = vpop.f32.mrb[10].mxu1 }
 0x597   : > { %v10294_v35 = vpop.f32.mrb[199].mxu0  ;;  %v10388_v41 = vpop.f32.mrb[11].mxu1 }
 0x598   : > { %v14302_v61 = vadd.f32 %v10292_v58, %v14193_v19  ;;  %v10295_v0 = vadd.f32 %v10294_v35, %v10293_v2  ;;  %v10389_v62 = vadd.f32 %v10388_v41, %v10387_v31  ;;  %v14305_v26 = vadd.f32 %v14219_v5, %v10386_v3 }
 0x59a   : > { %v14308_v10 = vadd.f32 %v10295_v0, %v14198_v53  ;;  %v14311_v27 = vadd.f32 %v14227_v47, %v10389_v62 }
 0x59c   : > { %v10296_v48 = vpop.f32.mrb[200].mxu0  ;;  %v10390_v4 = vpop.f32.mrb[12].mxu1 }
 0x59d   : > { %v10297_v16 = vpop.f32.mrb[201].mxu0  ;;  %v10391_v36 = vpop.f32.mrb[13].mxu1 }
 0x59e   : > { %v10298_v56 = vadd.f32 %v10297_v16, %v10296_v48  ;;  %v10392_v12 = vadd.f32 %v10391_v36, %v10390_v4  ;;  %v10299_v50 = vpop.f32.mrb[202].mxu0  ;;  %v10393_v19 = vpop.f32.mrb[14].mxu1 }
 0x59f   : > { %v10300_v6 = vpop.f32.mrb[203].mxu0  ;;  %v10394_v18 = vpop.f32.mrb[15].mxu1 }
 0x5a0   : > { %v14314_v13 = vadd.f32 %v10298_v56, %v14203_v24  ;;  %v10301_v5 = vadd.f32 %v10300_v6, %v10299_v50  ;;  %v10395_v54 = vadd.f32 %v10394_v18, %v10393_v19  ;;  %v14317_v53 = vadd.f32 %v14230_v60, %v10392_v12  ;;  %v12261_v12 = vld [vmem:[#allocation6 + $0x88] sm:$0xff]  }
 0x5a2   : > { %v14320_v47 = vadd.f32 %v10301_v5, %v14208_v30  ;;  %v14323_v57 = vadd.f32 %v14236_v7, %v10395_v54  ;;  %v12262_v5 = vld [vmem:[#allocation6 + $0x90] sm:$0xff]  }
 0x5a4   : > { %v10302_v23 = vpop.f32.mrb[204].mxu0  ;;  %v10396_v11 = vpop.f32.mrb[16].mxu1 }
 0x5a5   : > { %v10303_v21 = vpop.f32.mrb[205].mxu0  ;;  %v10397_v32 = vpop.f32.mrb[17].mxu1 }
 0x5a6   : > { %v10304_v17 = vadd.f32 %v10303_v21, %v10302_v23  ;;  %v10398_v37 = vadd.f32 %v10397_v32, %v10396_v11  ;;  %v10305_v58 = vpop.f32.mrb[206].mxu0  ;;  %v10399_v24 = vpop.f32.mrb[18].mxu1  ;;  %v12263_v23 = vld [vmem:[#allocation6 + $0x98] sm:$0xff]  }
 0x5a7   : > { %v10306_v3 = vpop.f32.mrb[207].mxu0  ;;  %v10400_v2 = vpop.f32.mrb[19].mxu1 }
 0x5a8   : > { %v14326_v31 = vadd.f32 %v10304_v17, %v14216_v40  ;;  %v10307_v60 = vadd.f32 %v10306_v3, %v10305_v58  ;;  %v10401_v35 = vadd.f32 %v10400_v2, %v10399_v24  ;;  %v14329_v30 = vadd.f32 %v14242_v55, %v10398_v37  ;;  %v12260_v55 = vld [vmem:[#allocation6 + $0x80] sm:$0xff]  }
 0x5a9   : > { %11356 = vmatprep.subr.bf16.mxu0 %v12260_v55  ;;  %v12268_v58 = vld [vmem:[#allocation6 + $0xa0] sm:$0xff]  }
 0x5aa   : > { %v14332_v7 = vadd.f32 %v10307_v60, %v14221_v29  ;;  %v14335_v41 = vadd.f32 %v14248_v33, %v10401_v35  ;;  %v12264_v29 = vld [vmem:[#allocation6 + $0x40] sm:$0xff]   ;;  %11357 = vmatpush3.bf16.msra.mxu0 %v12260_v55 }
 0x5ab   : > { %10492 = vmatprep.subr.bf16.mxu1 %v12264_v29  ;;  %11358 = vmatprep.subr.bf16.mxu0 %v12261_v12 }
 0x5ac   : > { %v10402_v0 = vpop.f32.mrb[20].mxu1 }
 0x5ad   : > { %v10403_v62 = vpop.f32.mrb[21].mxu1 }
 0x5ae   : > { %v10404_v48 = vadd.f32 %v10403_v62, %v10402_v0  ;;  %v10405_v4 = vpop.f32.mrb[22].mxu1  ;;  %11359 = vmatpush3.bf16.msra.mxu0 %v12261_v12 }
 0x5af   : > { %v10406_v16 = vpop.f32.mrb[23].mxu1  ;;  %11360 = vmatprep.subr.bf16.mxu0 %v12262_v5 }
 0x5b0   : > { %v10407_v36 = vadd.f32 %v10406_v16, %v10405_v4  ;;  %v14338_v40 = vadd.f32 %v14254_v46, %v10404_v48 }
 0x5b2   : > { %v14341_v56 = vadd.f32 %v14260_v45, %v10407_v36  ;;  %11361 = vmatpush3.bf16.msra.mxu0 %v12262_v5 }
 0x5b3   : > { %11362 = vmatprep.subr.bf16.mxu0 %v12263_v23 }
 0x5b4   : > { %v10408_v50 = vpop.f32.mrb[24].mxu1 }
 0x5b5   : > { %v10409_v19 = vpop.f32.mrb[25].mxu1 }
 0x5b6   : > { %v10410_v33 = vadd.f32 %v10409_v19, %v10408_v50  ;;  %v10411_v6 = vpop.f32.mrb[26].mxu1  ;;  %11363 = vmatpush3.bf16.msra.mxu0 %v12263_v23 }
 0x5b7   : > { %v10412_v18 = vpop.f32.mrb[27].mxu1  ;;  %11364 = vmatprep.subr.bf16.mxu0 %v12268_v58 }
 0x5b8   : > { %v10413_v54 = vadd.f32 %v10412_v18, %v10411_v6  ;;  %v14344_v46 = vadd.f32 %v14266_v20, %v10410_v33 }
 0x5ba   : > { %v14347_v45 = vadd.f32 %v14272_v22, %v10413_v54  ;;  %11365 = vmatpush3.bf16.msra.mxu0 %v12268_v58 }
 0x5bc   : > { %v10414_v11 = vpop.f32.mrb[28].mxu1 }
 0x5bd   : > { %v10415_v21 = vpop.f32.mrb[29].mxu1 }
 0x5be   : > { %v10416_v32 = vadd.f32 %v10415_v21, %v10414_v11  ;;  %v10417_v17 = vpop.f32.mrb[30].mxu1 }
 0x5bf   : > { %v10418_v37 = vpop.f32.mrb[31].mxu1 }
 0x5c0   : > { %v10419_v24 = vadd.f32 %v10418_v37, %v10417_v17  ;;  %v14350_v3 = vadd.f32 %v14278_v8, %v10416_v32 }
 0x5c2   : > { %v14353_v20 = vadd.f32 %v14284_v52, %v10419_v24 }
 0x5c4   : > { %v10420_v22 = vpop.f32.mrb[32].mxu1 }
 0x5c5   : > { %v10421_v2 = vpop.f32.mrb[33].mxu1 }
 0x5c6   : > { %v10422_v60 = vadd.f32 %v10421_v2, %v10420_v22  ;;  %v10423_v35 = vpop.f32.mrb[34].mxu1 }
 0x5c7   : > { %v10424_v0 = vpop.f32.mrb[35].mxu1 }
 0x5c8   : > { %v10425_v62 = vadd.f32 %v10424_v0, %v10423_v35  ;;  %v14356_v48 = vadd.f32 %v14290_v15, %v10422_v60 }
 0x5ca   : > { %v14359_v4 = vadd.f32 %v14296_v42, %v10425_v62 }
 0x5cc   : > { %v10426_v8 = vpop.f32.mrb[36].mxu1 }
 0x5cd   : > { %v10427_v16 = vpop.f32.mrb[37].mxu1 }
 0x5ce   : > { %v10428_v36 = vadd.f32 %v10427_v16, %v10426_v8  ;;  %v10429_v52 = vpop.f32.mrb[38].mxu1 }
 0x5cf   : > { %v10430_v55 = vpop.f32.mrb[39].mxu1 }
 0x5d0   : > { %v10431_v12 = vadd.f32 %v10430_v55, %v10429_v52  ;;  %v14362_v50 = vadd.f32 %v14302_v61, %v10428_v36 }
 0x5d2   : > { %v14365_v29 = vadd.f32 %v14308_v10, %v10431_v12 }
 0x5d4   : > { %v10432_v19 = vpop.f32.mrb[40].mxu1 }
 0x5d5   : > { %v10433_v33 = vpop.f32.mrb[41].mxu1 }
 0x5d6   : > { %v10434_v6 = vadd.f32 %v10433_v33, %v10432_v19  ;;  %v10435_v15 = vpop.f32.mrb[42].mxu1 }
 0x5d7   : > { %v10436_v18 = vpop.f32.mrb[43].mxu1 }
 0x5d8   : > { %v10437_v5 = vadd.f32 %v10436_v18, %v10435_v15  ;;  %v14368_v42 = vadd.f32 %v14314_v13, %v10434_v6  ;;  %v14382_v13 = vld [vmem:[%s15274_s8] ss:$0 sm:$0xff] }
 0x5da   : > { %v14371_v54 = vadd.f32 %v14320_v47, %v10437_v5 }
 0x5dc   : > { %v10438_v23 = vpop.f32.mrb[44].mxu1 }
 0x5dd   : > { %v10439_v11 = vpop.f32.mrb[45].mxu1 }
 0x5de   : > { %v10440_v21 = vadd.f32 %v10439_v11, %v10438_v23  ;;  %v10441_v61 = vpop.f32.mrb[46].mxu1 }
 0x5df   : > { %v10442_v32 = vpop.f32.mrb[47].mxu1 }
 0x5e0   : > { %v10443_v17 = vadd.f32 %v10442_v32, %v10441_v61  ;;  %v14374_v10 = vadd.f32 %v14326_v31, %v10440_v21 }
 0x5e2   : > { %v14377_v37 = vadd.f32 %v14332_v7, %v10443_v17  ;;  %v12265_v17 = vld [vmem:[#allocation6] sm:$0xff]  }
 0x5ec   : > { %v11278_v58 = vpop.f32.mrb[112].mxu0 }
 0x5ed   : > { %v11662_v47 = vadd.f32 %v14245_v51, %v11278_v58  ;;  %v5806_v24 = vpop.f32.mrb[113].mxu0 }
 0x5ee   : > { %v11665_v22 = vadd.f32 %v14233_v44, %v5806_v24  ;;  %v11279_v2 = vpop.f32.mrb[114].mxu0 }
 0x5ef   : > { %v6038_v60 = vadd.f32 %v11662_v47, %v14382_v13  ;;  %v11668_v31 = vadd.f32 %v14251_v38, %v11279_v2  ;;  %v5809_v35 = vpop.f32.mrb[115].mxu0  ;;  %v12266_v47 = vld [vmem:[#allocation6 + $0x48] sm:$0xff]  }
 0x5f0   : > { %v6036_v7 = vadd.f32 %v11665_v22, %v14382_v13  ;;  %v11671_v0 = vadd.f32 %v14239_v49, %v5809_v35 }
 0x5f1   : > { %v6070_v62 = vmul.f32 0.1, %v6038_v60  ;;  %v6039_v8 = vadd.f32 %v11668_v31, %v14382_v13 }
 0x5f2   : > { %v6068_v16 = vmul.f32 0.1, %v6036_v7  ;;  %v6037_v36 = vadd.f32 %v11671_v0, %v14382_v13  ;;  %v12269_v0 = vld [vmem:[#allocation6 + $0x50] sm:$0xff]  }
 0x5f3   : > { %v6071_v51 = vmul.f32 0.1, %v6039_v8  ;;  %v6102_v44 = vmax.f32 %v6038_v60, %v6070_v62 }
 0x5f4   : > { %v6069_v52 = vmul.f32 0.1, %v6037_v36  ;;  %v11282_v55 = vpop.f32.mrb[116].mxu0  ;;  %v6100_v38 = vmax.f32 %v6036_v7, %v6068_v16 }
 0x5f5   : > { %v6103_v12 = vmax.f32 %v6039_v8, %v6071_v51  ;;  %v11674_v19 = vadd.f32 %v14269_v1, %v11282_v55  ;;  %v5822_v33 = vpop.f32.mrb[117].mxu0 }
 0x5f6   : > { %v6101_v6 = vmax.f32 %v6037_v36, %v6069_v52  ;;  %v11677_v15 = vadd.f32 %v14257_v34, %v5822_v33  ;;  %v11283_v18 = vpop.f32.mrb[118].mxu0 }
 0x5f7   : > { %v6133_v49 = vpack.c.bf16 %v6103_v12, %v6102_v44  ;;  %v6042_v5 = vadd.f32 %v11674_v19, %v14382_v13  ;;  %v11680_v23 = vadd.f32 %v14275_v63, %v11283_v18  ;;  %v5825_v11 = vpop.f32.mrb[119].mxu0  ;;  %v12267_v63 = vld [vmem:[#allocation6 + $0x8] sm:$0xff]  }
 0x5f8   : > { %v6040_v21 = vadd.f32 %v11677_v15, %v14382_v13  ;;  %v11683_v61 = vadd.f32 %v14263_v59, %v5825_v11  ;;  %v6132_v32 = vpack.c.bf16 %v6101_v6, %v6100_v38  ;;  %v12271_v15 = vld [vmem:[#allocation6 + $0x58] sm:$0xff]  }
 0x5f9   : > { %v6074_v58 = vmul.f32 0.1, %v6042_v5  ;;  %v6043_v1 = vadd.f32 %v11680_v23, %v14382_v13 }
 0x5fa   : > { %v6072_v24 = vmul.f32 0.1, %v6040_v21  ;;  %v6041_v34 = vadd.f32 %v11683_v61, %v14382_v13  ;;  %11324 = vmatprep.mubr.bf16.mxu1 %v6132_v32 }
 0x5fb   : > { %v6075_v22 = vmul.f32 0.1, %v6043_v1  ;;  %11325 = vmatmul.mubr.bf16.vlgmr.msra.gmra.mrb[48].mxu1 %v6133_v49  ;;  %v6106_v31 = vmax.f32 %v6042_v5, %v6074_v58 }
 0x5fc   : > { %v6073_v2 = vmul.f32 0.1, %v6041_v34  ;;  %v11286_v60 = vpop.f32.mrb[120].mxu0  ;;  %10493 = vmatpush3.bf16.msra.mxu1 %v12265_v17  ;;  %v6104_v62 = vmax.f32 %v6040_v21, %v6072_v24 }
 0x5fd   : > { %v6107_v35 = vmax.f32 %v6043_v1, %v6075_v22  ;;  %v11686_v59 = vadd.f32 %v14293_v43, %v11286_v60  ;;  %v5838_v7 = vpop.f32.mrb[121].mxu0  ;;  %10494 = vmatprep.subr.bf16.mxu1 %v12266_v47  ;;  %v12270_v43 = vld [vmem:[#allocation6 + $0x10] sm:$0xff]  }
 0x5fe   : > { %v6105_v8 = vmax.f32 %v6041_v34, %v6073_v2  ;;  %v11689_v16 = vadd.f32 %v14281_v28, %v5838_v7  ;;  %v11287_v36 = vpop.f32.mrb[122].mxu0 }
 0x5ff   : > { %v6135_v51 = vpack.c.bf16 %v6107_v35, %v6106_v31  ;;  %v6046_v52 = vadd.f32 %v11686_v59, %v14382_v13  ;;  %v11692_v55 = vadd.f32 %v14299_v39, %v11287_v36  ;;  %v5841_v44 = vpop.f32.mrb[123].mxu0 }
 0x600   : > { %v6044_v12 = vadd.f32 %v11689_v16, %v14382_v13  ;;  %v11695_v19 = vadd.f32 %v14287_v25, %v5841_v44  ;;  %v6134_v33 = vpack.c.bf16 %v6105_v8, %v6104_v62  ;;  %10495 = vmatpush3.bf16.msra.mxu1 %v12267_v63 }
 0x601   : > { %v6078_v38 = vmul.f32 0.1, %v6046_v52  ;;  %v6047_v6 = vadd.f32 %v11692_v55, %v14382_v13  ;;  %10496 = vmatprep.subr.bf16.mxu1 %v12269_v0 }
 0x602   : > { %v6076_v28 = vmul.f32 0.1, %v6044_v12  ;;  %v6045_v18 = vadd.f32 %v11695_v19, %v14382_v13  ;;  %11328 = vmatprep.mubr.bf16.mxu1 %v6134_v33 }
 0x603   : > { %v6079_v49 = vmul.f32 0.1, %v6047_v6  ;;  %11329 = vmatmul.mubr.bf16.gmra.mrb[52].mxu1 %v6135_v51  ;;  %v6110_v23 = vmax.f32 %v6046_v52, %v6078_v38 }
 0x604   : > { %v6077_v39 = vmul.f32 0.1, %v6045_v18  ;;  %v11290_v5 = vpop.f32.mrb[124].mxu0  ;;  %10497 = vmatpush3.bf16.msra.mxu1 %v12270_v43  ;;  %v6108_v61 = vmax.f32 %v6044_v12, %v6076_v28 }
 0x605   : > { %v6111_v11 = vmax.f32 %v6047_v6, %v6079_v49  ;;  %v11698_v25 = vadd.f32 %v14317_v53, %v11290_v5  ;;  %v5854_v21 = vpop.f32.mrb[125].mxu0  ;;  %10498 = vmatprep.subr.bf16.mxu1 %v12271_v15 }
 0x606   : > { %v6109_v32 = vmax.f32 %v6045_v18, %v6077_v39  ;;  %v11701_v17 = vadd.f32 %v14305_v26, %v5854_v21  ;;  %v11291_v58 = vpop.f32.mrb[126].mxu0 }
 0x607   : > { %v6137_v1 = vpack.c.bf16 %v6111_v11, %v6110_v23  ;;  %v6050_v47 = vadd.f32 %v11698_v25, %v14382_v13  ;;  %v11704_v24 = vadd.f32 %v14323_v57, %v11291_v58  ;;  %v5857_v34 = vpop.f32.mrb[127].mxu0 }
 0x608   : > { %v6048_v22 = vadd.f32 %v11701_v17, %v14382_v13  ;;  %v11707_v2 = vadd.f32 %v14311_v27, %v5857_v34  ;;  %v6136_v60 = vpack.c.bf16 %v6109_v32, %v6108_v61 }
 0x609   : > { %v6082_v63 = vmul.f32 0.1, %v6050_v47  ;;  %v6051_v53 = vadd.f32 %v11704_v24, %v14382_v13 }
 0x60a   : > { %v6080_v31 = vmul.f32 0.1, %v6048_v22  ;;  %v6049_v35 = vadd.f32 %v11707_v2, %v14382_v13  ;;  %11332 = vmatprep.mubr.bf16.mxu1 %v6136_v60 }
 0x60b   : > { %v6083_v26 = vmul.f32 0.1, %v6051_v53  ;;  %11333 = vmatmul.mubr.bf16.gmra.mrb[56].mxu1 %v6137_v1  ;;  %v6114_v0 = vmax.f32 %v6050_v47, %v6082_v63 }
 0x60c   : > { %v6081_v59 = vmul.f32 0.1, %v6049_v35  ;;  %v11294_v7 = vpop.f32.mrb[128].mxu0  ;;  %v6112_v16 = vmax.f32 %v6048_v22, %v6080_v31 }
 0x60d   : > { %v6115_v62 = vmax.f32 %v6051_v53, %v6083_v26  ;;  %v11710_v57 = vadd.f32 %v14338_v40, %v11294_v7  ;;  %v5870_v8 = vpop.f32.mrb[129].mxu0 }
 0x60e   : > { %v6113_v36 = vmax.f32 %v6049_v35, %v6081_v59  ;;  %v11713_v27 = vadd.f32 %v14329_v30, %v5870_v8  ;;  %v11295_v51 = vpop.f32.mrb[130].mxu0 }
 0x60f   : > { %v6139_v52 = vpack.c.bf16 %v6115_v62, %v6114_v0  ;;  %v6054_v55 = vadd.f32 %v11710_v57, %v14382_v13  ;;  %v11716_v44 = vadd.f32 %v14341_v56, %v11295_v51  ;;  %v5873_v12 = vpop.f32.mrb[131].mxu0 }
 0x610   : > { %v6052_v19 = vadd.f32 %v11713_v27, %v14382_v13  ;;  %v11719_v33 = vadd.f32 %v14335_v41, %v5873_v12  ;;  %v6138_v43 = vpack.c.bf16 %v6113_v36, %v6112_v16 }
 0x611   : > { %v6086_v38 = vmul.f32 0.1, %v6054_v55  ;;  %v6055_v40 = vadd.f32 %v11716_v44, %v14382_v13 }
 0x612   : > { %v6084_v6 = vmul.f32 0.1, %v6052_v19  ;;  %v6053_v15 = vadd.f32 %v11719_v33, %v14382_v13  ;;  %11336 = vmatprep.mubr.bf16.mxu1 %v6138_v43 }
 0x613   : > { %v6087_v30 = vmul.f32 0.1, %v6055_v40  ;;  %11337 = vmatmul.mubr.bf16.gmra.mrb[60].mxu1 %v6139_v52  ;;  %v6118_v49 = vmax.f32 %v6054_v55, %v6086_v38 }
 0x614   : > { %v6085_v28 = vmul.f32 0.1, %v6053_v15  ;;  %v11298_v18 = vpop.f32.mrb[132].mxu0  ;;  %v6116_v23 = vmax.f32 %v6052_v19, %v6084_v6 }
 0x615   : > { %v6119_v39 = vmax.f32 %v6055_v40, %v6087_v30  ;;  %v11722_v56 = vadd.f32 %v14350_v3, %v11298_v18  ;;  %v5886_v5 = vpop.f32.mrb[133].mxu0 }
 0x616   : > { %v6117_v11 = vmax.f32 %v6053_v15, %v6085_v28  ;;  %v11725_v41 = vadd.f32 %v14344_v46, %v5886_v5  ;;  %v11299_v25 = vpop.f32.mrb[134].mxu0 }
 0x617   : > { %v6141_v21 = vpack.c.bf16 %v6119_v39, %v6118_v49  ;;  %v6058_v61 = vadd.f32 %v11722_v56, %v14382_v13  ;;  %v11728_v32 = vadd.f32 %v14353_v20, %v11299_v25  ;;  %v5889_v17 = vpop.f32.mrb[135].mxu0 }
 0x618   : > { %v6056_v58 = vadd.f32 %v11725_v41, %v14382_v13  ;;  %v11731_v1 = vadd.f32 %v14347_v45, %v5889_v17  ;;  %v6140_v47 = vpack.c.bf16 %v6117_v11, %v6116_v23  ;;  %v12272_v17 = vld [vmem:[#allocation6 + $0x18] sm:$0xff]  }
 0x619   : > { %v6090_v24 = vmul.f32 0.1, %v6058_v61  ;;  %v6059_v3 = vadd.f32 %v11728_v32, %v14382_v13  ;;  %10499 = vmatpush3.bf16.msra.mxu1 %v12272_v17 }
 0x61a   : > { %v6088_v34 = vmul.f32 0.1, %v6056_v58  ;;  %v6057_v22 = vadd.f32 %v11731_v1, %v14382_v13  ;;  %11340 = vmatprep.mubr.bf16.mxu1 %v6140_v47  ;;  %v12275_v1 = vld [vmem:[#allocation6 + $0x20] sm:$0xff]   ;;  %v12277_v47 = vld [vmem:[#allocation6 + $0x28] sm:$0xff]  }
 0x61b   : > { %v6091_v46 = vmul.f32 0.1, %v6059_v3  ;;  %11341 = vmatmul.mubr.bf16.gmra.mrb[64].mxu1 %v6141_v21  ;;  %v6122_v63 = vmax.f32 %v6058_v61, %v6090_v24  ;;  %v12279_v24 = vld [vmem:[#allocation6 + $0x70] sm:$0xff]  }
 0x61c   : > { %v6089_v2 = vmul.f32 0.1, %v6057_v22  ;;  %v11302_v60 = vpop.f32.mrb[136].mxu0  ;;  %v6120_v35 = vmax.f32 %v6056_v58, %v6088_v34  ;;  %v12274_v58 = vld [vmem:[#allocation6 + $0x60] sm:$0xff]   ;;  %v12273_v34 = vld [vmem:[#allocation6 + $0xa8] sm:$0xff]  }
 0x61d   : > { %v6123_v53 = vmax.f32 %v6059_v3, %v6091_v46  ;;  %v11734_v20 = vadd.f32 %v14362_v50, %v11302_v60  ;;  %v5902_v31 = vpop.f32.mrb[137].mxu0  ;;  %10500 = vmatprep.subr.bf16.mxu1 %v12274_v58  ;;  %v12280_v3 = vld [vmem:[#allocation6 + $0x30] sm:$0xff]   ;;  %v12282_v46 = vld [vmem:[#allocation6 + $0x38] sm:$0xff]   ;;  %11366 = vmatprep.subr.bf16.mxu0 %v12273_v34 }
 0x61e   : > { %v6121_v26 = vmax.f32 %v6057_v22, %v6089_v2  ;;  %v11737_v45 = vadd.f32 %v14356_v48, %v5902_v31  ;;  %v11303_v59 = vpop.f32.mrb[138].mxu0  ;;  %10501 = vmatpush3.bf16.msra.mxu1 %v12275_v1  ;;  %v12281_v22 = vld [vmem:[#allocation6 + $0x78] sm:$0xff]   ;;  %11367 = vmatpush3.bf16.msra.mxu0 %v12273_v34  ;;  %v12278_v2 = vld [vmem:[#allocation6 + $0xb0] sm:$0xff]   ;;  %v12300_v31 = vld [vmem:[#allocation6 + $0x1c0] sm:$0xff]  }
 0x61f   : > { %v6143_v7 = vpack.c.bf16 %v6123_v53, %v6122_v63  ;;  %v6062_v0 = vadd.f32 %v11734_v20, %v14382_v13  ;;  %v11740_v62 = vadd.f32 %v14365_v29, %v11303_v59  ;;  %v5905_v57 = vpop.f32.mrb[139].mxu0  ;;  %v6780_v60 = vld [vmem:[#allocation2] sm:$0xff]  ;;  %11368 = vmatprep.subr.bf16.mxu0 %v12278_v2  ;;  %v12283_v63 = vld [vmem:[#allocation6 + $0xb8] sm:$0xff]   ;;  %v6782_v53 = vld [vmem:[#allocation2 + $0x10] sm:$0xff] }
 0x620   : > { %v6060_v8 = vadd.f32 %v11737_v45, %v14382_v13  ;;  %v11743_v16 = vadd.f32 %v14359_v4, %v5905_v57  ;;  %v6142_v36 = vpack.c.bf16 %v6121_v26, %v6120_v35  ;;  %11372 = vmatprep.mubr.bf16.mxu0 %v6782_v53  ;;  %v12284_v20 = vld [vmem:[#allocation6 + $0x100] sm:$0xff]   ;;  %v12303_v26 = vld [vmem:[#allocation6 + $0x1c8] sm:$0xff]   ;;  %v12306_v59 = vld [vmem:[#allocation6 + $0x1d0] sm:$0xff]  }
 0x621   : > { %v6094_v27 = vmul.f32 0.1, %v6062_v0  ;;  %v6063_v50 = vadd.f32 %v11740_v62, %v14382_v13  ;;  %v12301_v35 = vld [vmem:[#allocation6 + $0x180] sm:$0xff]   ;;  %v12304_v45 = vld [vmem:[#allocation6 + $0x188] sm:$0xff]   ;;  %v12310_v62 = vld [vmem:[#allocation6 + $0x198] sm:$0xff]  }
 0x622   : > { %v6092_v51 = vmul.f32 0.1, %v6060_v8  ;;  %v6061_v52 = vadd.f32 %v11743_v16, %v14382_v13  ;;  %11344 = vmatprep.mubr.bf16.mxu1 %v6142_v36  ;;  %11369 = vmatpush3.bf16.msra.mxu0 %v12278_v2  ;;  %v12311_v57 = vld [vmem:[#allocation6 + $0x1e0] sm:$0xff]   ;;  %v12313_v16 = vld [vmem:[#allocation6 + $0x1e8] sm:$0xff]   ;;  %v14451_v36 = vld [vmem:[%s15276_s10] ss:$0 sm:$0xff] }
 0x623   : > { %v6095_v48 = vmul.f32 0.1, %v6063_v50  ;;  %11345 = vmatmul.mubr.bf16.gmra.mrb[68].mxu1 %v6143_v7  ;;  %v6126_v12 = vmax.f32 %v6062_v0, %v6094_v27  ;;  %11370 = vmatprep.subr.bf16.mxu0 %v12283_v63  ;;  %v12307_v7 = vld [vmem:[#allocation6 + $0x190] sm:$0xff]   ;;  %v12309_v0 = vld [vmem:[#allocation6 + $0x1d8] sm:$0xff]   ;;  %v12314_v27 = vld [vmem:[#allocation6 + $0x1a8] sm:$0xff]  }
 0x624   : > { %v6093_v55 = vmul.f32 0.1, %v6061_v52  ;;  %v11306_v44 = vpop.f32.mrb[140].mxu0  ;;  %v6124_v43 = vmax.f32 %v6060_v8, %v6092_v51  ;;  %v12312_v8 = vld [vmem:[#allocation6 + $0x1a0] sm:$0xff]  }
 0x625   : > { %v6127_v19 = vmax.f32 %v6063_v50, %v6095_v48  ;;  %v11746_v29 = vadd.f32 %v14374_v10, %v11306_v44  ;;  %v5918_v33 = vpop.f32.mrb[141].mxu0  ;;  %v6639_v53 = vld [vmem:[#allocation2 + $0x30] sm:$0xff] }
 0x626   : > { %v6125_v38 = vmax.f32 %v6061_v52, %v6093_v55  ;;  %v11749_v4 = vadd.f32 %v14368_v42, %v5918_v33  ;;  %v11307_v40 = vpop.f32.mrb[142].mxu0  ;;  %11371 = vmatpush3.bf16.msra.mxu0 %v12283_v63 }
 0x627   : > { %v6145_v6 = vpack.c.bf16 %v6127_v19, %v6126_v12  ;;  %v6066_v15 = vadd.f32 %v11746_v29, %v14382_v13  ;;  %v11752_v30 = vadd.f32 %v14377_v37, %v11307_v40  ;;  %v5921_v28 = vpop.f32.mrb[143].mxu0  ;;  %10628 = vmatprep.subr.bf16.mxu0 %v12284_v20  ;;  %v12316_v29 = vld [vmem:[#allocation6 + $0x1f0] sm:$0xff]  }
 0x628   : > { %v6064_v18 = vadd.f32 %v11749_v4, %v14382_v13  ;;  %v11755_v49 = vadd.f32 %v14371_v54, %v5921_v28  ;;  %v6144_v39 = vpack.c.bf16 %v6125_v38, %v6124_v43  ;;  %v12343_v54 = vld [vmem:[#allocation2 + $0x8] sm:$0xff]  ;;  %v12317_v38 = vld [vmem:[#allocation6 + $0x1b0] sm:$0xff]  }
 0x629   : > { %v6098_v56 = vmul.f32 0.1, %v6066_v15  ;;  %v6067_v10 = vadd.f32 %v11752_v30, %v14382_v13  ;;  %v12318_v4 = vld [vmem:[#allocation6 + $0x1f8] sm:$0xff]   ;;  %v6735_v20 = vld [vmem:[#allocation2 + $0x40] sm:$0xff] }
 0x62a   : > { %v6096_v5 = vmul.f32 0.1, %v6064_v18  ;;  %v6065_v23 = vadd.f32 %v11755_v49, %v14382_v13  ;;  %11348 = vmatprep.mubr.bf16.mxu1 %v6144_v39  ;;  %v12276_v13 = vld [vmem:[#allocation6 + $0x68] sm:$0xff]   ;;  %v12319_v28 = vld [vmem:[#allocation6 + $0x1b8] sm:$0xff]  }
 0x62b   : > { %v6099_v42 = vmul.f32 0.1, %v6067_v10  ;;  %11349 = vmatmul.mubr.bf16.gmra.mrb[72].mxu1 %v6145_v6  ;;  %v6130_v41 = vmax.f32 %v6066_v15, %v6098_v56  ;;  %10502 = vmatprep.subr.bf16.mxu1 %v12276_v13 }
 0x62c   : > { %v6097_v11 = vmul.f32 0.1, %v6065_v23  ;;  %v6128_v21 = vmax.f32 %v6064_v18, %v6096_v5  ;;  %10503 = vmatpush3.bf16.msra.mxu1 %v12277_v47 }
 0x62d   : > { %v6131_v25 = vmax.f32 %v6067_v10, %v6099_v42  ;;  %10504 = vmatprep.subr.bf16.mxu1 %v12279_v24 }
 0x62e   : > { %v6129_v37 = vmax.f32 %v6065_v23, %v6097_v11 }
 0x62f   : > { %v6147_v61 = vpack.c.bf16 %v6131_v25, %v6130_v41 }
 0x630   : > { %v6146_v32 = vpack.c.bf16 %v6129_v37, %v6128_v21  ;;  %10505 = vmatpush3.bf16.msra.mxu1 %v12280_v3 }
 0x631   : > { %10506 = vmatprep.subr.bf16.mxu1 %v12281_v22 }
 0x632   : > { %11352 = vmatprep.mubr.bf16.mxu1 %v6146_v32 }
 0x633   : > { %11353 = vmatmul.mubr.bf16.gmra.mrb[76].mxu1 %v6147_v61 }
 0x634   : > { %7052 = vmatprep.mubr.bf16.mxu1 %v12343_v54  ;;  %10507 = vmatpush3.bf16.msra.mxu1 %v12282_v46 }
 0x635   : > { %10764 = vmatprep.subr.bf16.mxu1 %v12300_v31 }
 0x63b   : > { %7053 = vmatmul.mubr.bf16.vlgmr.msra.gmra.mrb[80].mxu1 %v6780_v60 }
 0x63c   : > { %10765 = vmatpush3.bf16.msra.mxu1 %v12301_v35 }
 0x63d   : > { %10766 = vmatprep.subr.bf16.mxu1 %v12303_v26 }
 0x640   : > { %10767 = vmatpush3.bf16.msra.mxu1 %v12304_v45 }
 0x641   : > { %10768 = vmatprep.subr.bf16.mxu1 %v12306_v59  ;;  %v12285_v59 = vld [vmem:[#allocation6 + $0xc0] sm:$0xff]  }
 0x644   : > { %10769 = vmatpush3.bf16.msra.mxu1 %v12307_v7 }
 0x645   : > { %10770 = vmatprep.subr.bf16.mxu1 %v12309_v0 }
 0x648   : > { %10771 = vmatpush3.bf16.msra.mxu1 %v12310_v62  ;;  %v6636_v62 = vld [vmem:[#allocation2 + $0x18] sm:$0xff] }
 0x649   : > { %10772 = vmatprep.subr.bf16.mxu1 %v12311_v57  ;;  %v6732_v57 = vld [vmem:[#allocation2 + $0x28] sm:$0xff] }
 0x64c   : > { %10773 = vmatpush3.bf16.msra.mxu1 %v12312_v8 }
 0x64d   : > { %10774 = vmatprep.subr.bf16.mxu1 %v12313_v16 }
 0x650   : > { %10775 = vmatpush3.bf16.msra.mxu1 %v12314_v27 }
 0x651   : > { %10776 = vmatprep.subr.bf16.mxu1 %v12316_v29 }
 0x654   : > { %10777 = vmatpush3.bf16.msra.mxu1 %v12317_v38 }
 0x655   : > { %10778 = vmatprep.subr.bf16.mxu1 %v12318_v4 }
 0x658   : > { %10779 = vmatpush3.bf16.msra.mxu1 %v12319_v28 }
 0x6ce   : > { %v11326_v50 = vpop.f32.mrb[48].mxu1 }
 0x6cf   : > { %v6262_v51 = vadd.f32 %v11326_v50, %v14451_v36  ;;  %v6253_v52 = vpop.f32.mrb[49].mxu1  ;;  %v12286_v50 = vld [vmem:[#allocation6 + $0x108] sm:$0xff]  }
 0x6d0   : > { %v6254_v48 = vadd.f32 %v14451_v36, %v6253_v52  ;;  %v11327_v55 = vpop.f32.mrb[50].mxu1 }
 0x6d1   : > { %v6382_v44 = vmul.f32 0.1, %v6262_v51  ;;  %v6265_v12 = vadd.f32 %v11327_v55, %v14451_v36  ;;  %v6256_v19 = vpop.f32.mrb[51].mxu1 }
 0x6d2   : > { %v6380_v33 = vmul.f32 0.1, %v6254_v48  ;;  %v6257_v43 = vadd.f32 %v14451_v36, %v6256_v19 }
 0x6d3   : > { %v6414_v40 = vmax.f32 %v6262_v51, %v6382_v44  ;;  %v6383_v6 = vmul.f32 0.1, %v6265_v12 }
 0x6d4   : > { %v6412_v15 = vmax.f32 %v6254_v48, %v6380_v33  ;;  %v6381_v30 = vmul.f32 0.1, %v6257_v43 }
 0x6d5   : > { %6446 = vst [vmem:[%s14462_s28 + $0x10] sm:$0xff] %v6414_v40  ;;  %v6415_v18 = vmax.f32 %v6265_v12, %v6383_v6 }
 0x6d6   : > { %6444 = vst [vmem:[%s14462_s28] sm:$0xff] %v6412_v15  ;;  %v6413_v49 = vmax.f32 %v6257_v43, %v6381_v30  ;;  %v11330_v39 = vpop.f32.mrb[52].mxu1 }
 0x6d7   : > { %6447 = vst [vmem:[%s14462_s28 + $0x18] sm:$0xff] %v6415_v18  ;;  %v14468_v56 = vpack.c.bf16 %v6415_v18, %v6414_v40  ;;  %v6278_v10 = vadd.f32 %v11330_v39, %v14451_v36  ;;  %v6269_v5 = vpop.f32.mrb[53].mxu1  ;;  %v12288_v39 = vld [vmem:[#allocation6 + $0x110] sm:$0xff]  }
 0x6d8   : > { %6445 = vst [vmem:[%s14462_s28 + $0x8] sm:$0xff] %v6413_v49  ;;  %v6476_v23 = vpack.c.bf16 %v6413_v49, %v6412_v15  ;;  %v6270_v42 = vadd.f32 %v14451_v36, %v6269_v5  ;;  %v11331_v11 = vpop.f32.mrb[54].mxu1  ;;  %v12287_v15 = vld [vmem:[#allocation6 + $0xc8] sm:$0xff]  }
 0x6d9   : > { %6493 = vst [vmem:[#allocation2 + $0x38] sm:$0xff] %v14468_v56  ;;  %v6516_v41 = vshrl.u32 %v14468_v56, 16  ;;  %v6519_v25 = vshll.u32 %v14468_v56, 16  ;;  %v6386_v21 = vmul.f32 0.1, %v6278_v10  ;;  %v6281_v37 = vadd.f32 %v11331_v11, %v14451_v36  ;;  %v6272_v61 = vpop.f32.mrb[55].mxu1 }
 0x6da   : > { %6492 = vst [vmem:[#allocation2 + $0x20] sm:$0xff] %v6476_v23  ;;  %v6509_v32 = vshrl.u32 %v6476_v23, 16  ;;  %v6512_v54 = vshll.u32 %v6476_v23, 16  ;;  %v6384_v17 = vmul.f32 0.1, %v6270_v42  ;;  %v6273_v58 = vadd.f32 %v14451_v36, %v6272_v61  ;;  %7060 = vmatprep.mubr.bf16.mxu1 %v6476_v23 }
 0x6db   : > { %v6518_v1 = vrot.slane %v6516_v41, 7  ;;  %v6686_v13 = vrot.slane %v6519_v25, 1  ;;  %v6418_v47 = vmax.f32 %v6278_v10, %v6386_v21  ;;  %v6387_v24 = vmul.f32 0.1, %v6281_v37  ;;  %v6645_v21 = vld [vmem:[#allocation2 + $0x60] sm:$0xff] }
 0x6dc   : > { %v6511_v3 = vrot.slane %v6509_v32, 7  ;;  %v6684_v34 = vrot.slane %v6512_v54, 1  ;;  %v6416_v22 = vmax.f32 %v6270_v42, %v6384_v17  ;;  %v6385_v46 = vmul.f32 0.1, %v6273_v58 }
 0x6dd   : > { %v6521_v2 = vor.u32 %v6519_v25, %v6518_v1  ;;  %v6687_v60 = vor.u32 %v6686_v13, %v6516_v41  ;;  %6450 = vst [vmem:[%s14462_s28 + $0x30] sm:$0xff] %v6418_v47  ;;  %v6419_v63 = vmax.f32 %v6281_v37, %v6387_v24  ;;  %v6642_v1 = vld [vmem:[#allocation2 + $0x48] sm:$0xff]  ;;  %v6738_v13 = vld [vmem:[#allocation2 + $0x58] sm:$0xff] }
 0x6de   : > { %v6514_v31 = vor.u32 %v6512_v54, %v6511_v3  ;;  %v6685_v35 = vor.u32 %v6684_v34, %v6509_v32  ;;  %6448 = vst [vmem:[%s14462_s28 + $0x20] sm:$0xff] %v6416_v22  ;;  %v6417_v26 = vmax.f32 %v6273_v58, %v6385_v46  ;;  %v11334_v45 = vpop.f32.mrb[56].mxu1  ;;  %v12289_v34 = vld [vmem:[#allocation6 + $0xd0] sm:$0xff]  }
 0x6df   : > { %v14482_v7 = vsel %vm12877_vm9, %v6521_v2, %v6639_v53  ;;  %v6736_v0 = vsel %vm12883_vm10, %v6687_v60, %v6735_v20  ;;  %6451 = vst [vmem:[%s14462_s28 + $0x38] sm:$0xff] %v6419_v63  ;;  %v14487_v8 = vpack.c.bf16 %v6419_v63, %v6418_v47  ;;  %v6294_v16 = vadd.f32 %v11334_v45, %v14451_v36  ;;  %v6285_v27 = vpop.f32.mrb[57].mxu1  ;;  %v12290_v53 = vld [vmem:[#allocation6 + $0x118] sm:$0xff]  }
 0x6e0   : > { %6641 = vst [vmem:[#allocation2 + $0x30] sm:$0xff] %v14482_v7  ;;  %6737 = vst [vmem:[#allocation2 + $0x40] sm:$0xff] %v6736_v0  ;;  %v6637_v51 = vsel %vm12877_vm9, %v6514_v31, %v6636_v62  ;;  %v6733_v52 = vsel %vm12883_vm10, %v6685_v35, %v6732_v57  ;;  %v14496_v48 = vpack.c.bf16 %v6417_v26, %v6416_v22  ;;  %v11335_v44 = vpop.f32.mrb[58].mxu1  ;;  %v7410_v14 = vld [vmem:[#allocation2 + $0x38] sm:$0xff] }
 0x6e1   : > { %6449 = vst [vmem:[%s14462_s28 + $0x28] sm:$0xff] %v6417_v26  ;;  %v6286_v55 = vadd.f32 %v14451_v36, %v6285_v27  ;;  %6638 = vst [vmem:[#allocation2 + $0x18] sm:$0xff] %v6637_v51  ;;  %v6530_v12 = vshrl.u32 %v14487_v8, 16  ;;  %v6533_v19 = vshll.u32 %v14487_v8, 16  ;;  %v6390_v29 = vmul.f32 0.1, %v6294_v16  ;;  %7061 = vmatmul.mubr.bf16.gmra.mrb[84].mxu1 %v6637_v51  ;;  %11373 = vmatmul.mubr.bf16.vlgmr.msra.gmra.mrb[208].mxu0 %v6733_v52 }
 0x6e2   : > { %6734 = vst [vmem:[#allocation2 + $0x28] sm:$0xff] %v6733_v52  ;;  %6495 = vst [vmem:[#allocation2 + $0x68] sm:$0xff] %v14487_v8  ;;  %v6297_v33 = vadd.f32 %v11335_v44, %v14451_v36  ;;  %v6288_v43 = vpop.f32.mrb[59].mxu1  ;;  %v6523_v38 = vshrl.u32 %v14496_v48, 16  ;;  %v6526_v4 = vshll.u32 %v14496_v48, 16  ;;  %10629 = vmatpush3.bf16.msra.mxu0 %v12285_v59  ;;  %7068 = vmatprep.mubr.bf16.mxu1 %v14468_v56  ;;  %v6741_v56 = vld [vmem:[#allocation2 + $0x70] sm:$0xff] }
 0x6e3   : > { %6494 = vst [vmem:[#allocation2 + $0x50] sm:$0xff] %v14496_v48  ;;  %v6388_v40 = vmul.f32 0.1, %v6286_v55  ;;  %v6289_v6 = vadd.f32 %v14451_v36, %v6288_v43  ;;  %v6532_v30 = vrot.slane %v6530_v12, 7  ;;  %v6690_v28 = vrot.slane %v6533_v19, 1  ;;  %11376 = vmatprep.mubr.bf16.mxu0 %v6736_v0  ;;  %10630 = vmatprep.subr.bf16.mxu0 %v12286_v50 }
 0x6e4   : > { %v6422_v18 = vmax.f32 %v6294_v16, %v6390_v29  ;;  %v6391_v49 = vmul.f32 0.1, %v6297_v33  ;;  %v6525_v10 = vrot.slane %v6523_v38, 7  ;;  %v6688_v5 = vrot.slane %v6526_v4, 1 }
 0x6e5   : > { %v6420_v23 = vmax.f32 %v6286_v55, %v6388_v40  ;;  %v6389_v42 = vmul.f32 0.1, %v6289_v6  ;;  %v6535_v11 = vor.u32 %v6533_v19, %v6532_v30  ;;  %v6691_v41 = vor.u32 %v6690_v28, %v6530_v12  ;;  %v12292_v19 = vld [vmem:[#allocation6 + $0x120] sm:$0xff]  }
 0x6e6   : > { %6454 = vst [vmem:[%s14462_s28 + $0x50] sm:$0xff] %v6422_v18  ;;  %v6423_v25 = vmax.f32 %v6297_v33, %v6391_v49  ;;  %v6528_v37 = vor.u32 %v6526_v4, %v6525_v10  ;;  %v6689_v61 = vor.u32 %v6688_v5, %v6523_v38  ;;  %v11338_v54 = vpop.f32.mrb[60].mxu1  ;;  %10631 = vmatpush3.bf16.msra.mxu0 %v12287_v15  ;;  %v6651_v38 = vld [vmem:[#allocation2 + $0x90] sm:$0xff]  ;;  %v6747_v4 = vld [vmem:[#allocation2 + $0xa0] sm:$0xff]  ;;  %v6648_v49 = vld [vmem:[#allocation2 + $0x78] sm:$0xff] }
 0x6e7   : > { %6452 = vst [vmem:[%s14462_s28 + $0x40] sm:$0xff] %v6420_v23  ;;  %v6421_v32 = vmax.f32 %v6289_v6, %v6389_v42  ;;  %v14512_v17 = vsel %vm12877_vm9, %v6535_v11, %v6645_v21  ;;  %v6742_v58 = vsel %vm12883_vm10, %v6691_v41, %v6741_v56  ;;  %v6310_v24 = vadd.f32 %v11338_v54, %v14451_v36  ;;  %v6301_v3 = vpop.f32.mrb[61].mxu1  ;;  %v12293_v42 = vld [vmem:[#allocation6 + $0xe0] sm:$0xff]  }
 0x6e8   : > { %6455 = vst [vmem:[%s14462_s28 + $0x58] sm:$0xff] %v6423_v25  ;;  %v14517_v47 = vpack.c.bf16 %v6423_v25, %v6422_v18  ;;  %10632 = vmatprep.subr.bf16.mxu0 %v12288_v39  ;;  %6647 = vst [vmem:[#allocation2 + $0x60] sm:$0xff] %v14512_v17  ;;  %v14523_v22 = vsel %vm12877_vm9, %v6528_v37, %v6642_v1  ;;  %v6739_v46 = vsel %vm12883_vm10, %v6689_v61, %v6738_v13  ;;  %v11339_v63 = vpop.f32.mrb[62].mxu1  ;;  %v6744_v39 = vld [vmem:[#allocation2 + $0x88] sm:$0xff]  ;;  %v12294_v37 = vld [vmem:[#allocation6 + $0x128] sm:$0xff]  }
 0x6e9   : > { %6743 = vst [vmem:[#allocation2 + $0x70] sm:$0xff] %v6742_v58  ;;  %6453 = vst [vmem:[%s14462_s28 + $0x48] sm:$0xff] %v6421_v32  ;;  %v14528_v2 = vpack.c.bf16 %v6421_v32, %v6420_v23  ;;  %v6302_v60 = vadd.f32 %v14451_v36, %v6301_v3  ;;  %v6394_v35 = vmul.f32 0.1, %v6310_v24  ;;  %v6313_v26 = vadd.f32 %v11339_v63, %v14451_v36  ;;  %v6304_v45 = vpop.f32.mrb[63].mxu1  ;;  %v7406_v9 = vld [vmem:[#allocation2 + $0x18] sm:$0xff] }
 0x6ea   : > { %6644 = vst [vmem:[#allocation2 + $0x48] sm:$0xff] %v14523_v22  ;;  %6740 = vst [vmem:[#allocation2 + $0x58] sm:$0xff] %v6739_v46  ;;  %v6544_v20 = vshrl.u32 %v14517_v47, 16  ;;  %v6547_v31 = vshll.u32 %v14517_v47, 16  ;;  %7069 = vmatmul.mubr.bf16.gmra.mrb[88].mxu1 %v14482_v7  ;;  %11377 = vmatmul.mubr.bf16.gmra.mrb[212].mxu0 %v6739_v46  ;;  %v6305_v57 = vadd.f32 %v14451_v36, %v6304_v45  ;;  %v12291_v7 = vld [vmem:[#allocation6 + $0xd8] sm:$0xff]  }
 0x6eb   : > { %6497 = vst [vmem:[#allocation2 + $0x98] sm:$0xff] %v14517_v47  ;;  %6496 = vst [vmem:[#allocation2 + $0x80] sm:$0xff] %v14528_v2  ;;  %v6537_v59 = vshrl.u32 %v14528_v2, 16  ;;  %v6540_v0 = vshll.u32 %v14528_v2, 16  ;;  %v6392_v62 = vmul.f32 0.1, %v6302_v60  ;;  %7076 = vmatprep.mubr.bf16.mxu1 %v14496_v48  ;;  %11380 = vmatprep.mubr.bf16.mxu0 %v6742_v58  ;;  %v6426_v50 = vmax.f32 %v6310_v24, %v6394_v35 }
 0x6ec   : > { %v6546_v16 = vrot.slane %v6544_v20, 7  ;;  %v6694_v27 = vrot.slane %v6547_v31, 1  ;;  %v6395_v51 = vmul.f32 0.1, %v6313_v26  ;;  %10633 = vmatpush3.bf16.msra.mxu0 %v12289_v34  ;;  %v6393_v12 = vmul.f32 0.1, %v6305_v57 }
 0x6ed   : > { %v6539_v52 = vrot.slane %v6537_v59, 7  ;;  %v6692_v55 = vrot.slane %v6540_v0, 1  ;;  %v6424_v44 = vmax.f32 %v6302_v60, %v6392_v62  ;;  %10634 = vmatprep.subr.bf16.mxu0 %v12290_v53  ;;  %6458 = vst [vmem:[%s14462_s28 + $0x70] sm:$0xff] %v6426_v50 }
 0x6ee   : > { %v6549_v29 = vor.u32 %v6547_v31, %v6546_v16  ;;  %v6695_v33 = vor.u32 %v6694_v27, %v6544_v20  ;;  %v6427_v43 = vmax.f32 %v6313_v26, %v6395_v51  ;;  %v6425_v15 = vmax.f32 %v6305_v57, %v6393_v12  ;;  %v11342_v30 = vpop.f32.mrb[64].mxu1  ;;  %v12295_v20 = vld [vmem:[#allocation6 + $0xe8] sm:$0xff]   ;;  %v6657_v57 = vld [vmem:[#allocation2 + $0xc0] sm:$0xff]  ;;  %v6753_v16 = vld [vmem:[#allocation2 + $0xd0] sm:$0xff] }
 0x6ef   : > { %v6542_v40 = vor.u32 %v6540_v0, %v6539_v52  ;;  %v6693_v6 = vor.u32 %v6692_v55, %v6537_v59  ;;  %6456 = vst [vmem:[%s14462_s28 + $0x60] sm:$0xff] %v6424_v44  ;;  %v6326_v5 = vadd.f32 %v11342_v30, %v14451_v36  ;;  %v6317_v23 = vpop.f32.mrb[65].mxu1  ;;  %v12296_v59 = vld [vmem:[#allocation6 + $0x130] sm:$0xff]   ;;  %v6750_v12 = vld [vmem:[#allocation2 + $0xb8] sm:$0xff]  ;;  %v12298_v30 = vld [vmem:[#allocation6 + $0x138] sm:$0xff]  }
 0x6f0   : > { %v14546_v28 = vsel %vm12877_vm9, %v6549_v29, %v6651_v38  ;;  %v6748_v18 = vsel %vm12883_vm10, %v6695_v33, %v6747_v4  ;;  %6459 = vst [vmem:[%s14462_s28 + $0x78] sm:$0xff] %v6427_v43  ;;  %v14551_v10 = vpack.c.bf16 %v6427_v43, %v6426_v50  ;;  %10635 = vmatpush3.bf16.msra.mxu0 %v12291_v7  ;;  %6457 = vst [vmem:[%s14462_s28 + $0x68] sm:$0xff] %v6425_v15  ;;  %v11343_v56 = vpop.f32.mrb[66].mxu1  ;;  %v12297_v43 = vld [vmem:[#allocation6 + $0xf0] sm:$0xff]  }
 0x6f1   : > { %6653 = vst [vmem:[#allocation2 + $0x90] sm:$0xff] %v14546_v28  ;;  %6749 = vst [vmem:[#allocation2 + $0xa0] sm:$0xff] %v6748_v18  ;;  %v14557_v11 = vsel %vm12877_vm9, %v6542_v40, %v6648_v49  ;;  %v6745_v41 = vsel %vm12883_vm10, %v6693_v6, %v6744_v39  ;;  %v14562_v25 = vpack.c.bf16 %v6425_v15, %v6424_v44  ;;  %10636 = vmatprep.subr.bf16.mxu0 %v12292_v19  ;;  %v6320_v1 = vpop.f32.mrb[67].mxu1  ;;  %v6654_v44 = vld [vmem:[#allocation2 + $0xa8] sm:$0xff] }
 0x6f2   : > { %v6318_v21 = vadd.f32 %v14451_v36, %v6317_v23  ;;  %6650 = vst [vmem:[#allocation2 + $0x78] sm:$0xff] %v14557_v11  ;;  %6746 = vst [vmem:[#allocation2 + $0x88] sm:$0xff] %v6745_v41  ;;  %v6558_v61 = vshrl.u32 %v14551_v10, 16  ;;  %v6561_v32 = vshll.u32 %v14551_v10, 16  ;;  %v6398_v54 = vmul.f32 0.1, %v6326_v5  ;;  %7077 = vmatmul.mubr.bf16.gmra.mrb[92].mxu1 %v14523_v22  ;;  %11381 = vmatmul.mubr.bf16.gmra.mrb[216].mxu0 %v6745_v41 }
 0x6f3   : > { %6499 = vst [vmem:[#allocation2 + $0xc8] sm:$0xff] %v14551_v10  ;;  %v6329_v58 = vadd.f32 %v11343_v56, %v14451_v36  ;;  %6498 = vst [vmem:[#allocation2 + $0xb0] sm:$0xff] %v14562_v25  ;;  %v6551_v13 = vshrl.u32 %v14562_v25, 16  ;;  %v6554_v24 = vshll.u32 %v14562_v25, 16  ;;  %v6321_v34 = vadd.f32 %v14451_v36, %v6320_v1  ;;  %7084 = vmatprep.mubr.bf16.mxu1 %v14487_v8 }
 0x6f4   : > { %v6396_v3 = vmul.f32 0.1, %v6318_v21  ;;  %11384 = vmatprep.mubr.bf16.mxu0 %v6748_v18  ;;  %v6560_v46 = vrot.slane %v6558_v61, 7  ;;  %v6698_v60 = vrot.slane %v6561_v32, 1  ;;  %v6430_v63 = vmax.f32 %v6326_v5, %v6398_v54  ;;  %10637 = vmatpush3.bf16.msra.mxu0 %v12293_v42 }
 0x6f5   : > { %v6399_v53 = vmul.f32 0.1, %v6329_v58  ;;  %v6553_v31 = vrot.slane %v6551_v13, 7  ;;  %v6696_v35 = vrot.slane %v6554_v24, 1  ;;  %v6397_v45 = vmul.f32 0.1, %v6321_v34  ;;  %10638 = vmatprep.subr.bf16.mxu0 %v12294_v37 }
 0x6f6   : > { %v6428_v26 = vmax.f32 %v6318_v21, %v6396_v3  ;;  %v6563_v0 = vor.u32 %v6561_v32, %v6560_v46  ;;  %v6699_v62 = vor.u32 %v6698_v60, %v6558_v61  ;;  %6462 = vst [vmem:[%s14462_s28 + $0x90] sm:$0xff] %v6430_v63  ;;  %v11346_v7 = vpop.f32.mrb[68].mxu1  ;;  %v14609_v3 = vld [vmem:[#allocation6 + $0x140] sm:$0xff]  }
 0x6f7   : > { %v6431_v8 = vmax.f32 %v6329_v58, %v6399_v53  ;;  %v6556_v27 = vor.u32 %v6554_v24, %v6553_v31  ;;  %v6697_v50 = vor.u32 %v6696_v35, %v6551_v13  ;;  %v6429_v51 = vmax.f32 %v6321_v34, %v6397_v45  ;;  %v6333_v33 = vpop.f32.mrb[69].mxu1  ;;  %v12299_v58 = vld [vmem:[#allocation6 + $0xf8] sm:$0xff]   ;;  %v6759_v53 = vld [vmem:[#allocation2 + $0x100] sm:$0xff] }
 0x6f8   : > { %6460 = vst [vmem:[%s14462_s28 + $0x80] sm:$0xff] %v6428_v26  ;;  %v14580_v52 = vsel %vm12877_vm9, %v6563_v0, %v6657_v57  ;;  %v6754_v55 = vsel %vm12883_vm10, %v6699_v62, %v6753_v16  ;;  %v6342_v29 = vadd.f32 %v11346_v7, %v14451_v36  ;;  %10639 = vmatpush3.bf16.msra.mxu0 %v12295_v20  ;;  %v11347_v15 = vpop.f32.mrb[70].mxu1  ;;  %v6660_v0 = vld [vmem:[#allocation2 + $0xd8] sm:$0xff]  ;;  %v6756_v62 = vld [vmem:[#allocation2 + $0xe8] sm:$0xff] }
 0x6f9   : > { %6463 = vst [vmem:[%s14462_s28 + $0x98] sm:$0xff] %v6431_v8  ;;  %v14585_v19 = vpack.c.bf16 %v6431_v8, %v6430_v63  ;;  %6659 = vst [vmem:[#allocation2 + $0xc0] sm:$0xff] %v14580_v52  ;;  %v14591_v38 = vsel %vm12877_vm9, %v6556_v27, %v6654_v44  ;;  %v6751_v4 = vsel %vm12883_vm10, %v6697_v50, %v6750_v12  ;;  %10640 = vmatprep.subr.bf16.mxu0 %v12296_v59  ;;  %v6336_v23 = vpop.f32.mrb[71].mxu1  ;;  %v6663_v63 = vld [vmem:[#allocation2 + $0xf0] sm:$0xff] }
 0x6fa   : > { %6755 = vst [vmem:[#allocation2 + $0xd0] sm:$0xff] %v6754_v55  ;;  %6461 = vst [vmem:[%s14462_s28 + $0x88] sm:$0xff] %v6429_v51  ;;  %v14596_v40 = vpack.c.bf16 %v6429_v51, %v6428_v26  ;;  %v6334_v6 = vadd.f32 %v14451_v36, %v6333_v33  ;;  %v6402_v39 = vmul.f32 0.1, %v6342_v29  ;;  %v6345_v5 = vadd.f32 %v11347_v15, %v14451_v36 }
 0x6fb   : > { %6656 = vst [vmem:[#allocation2 + $0xa8] sm:$0xff] %v14591_v38  ;;  %6752 = vst [vmem:[#allocation2 + $0xb8] sm:$0xff] %v6751_v4  ;;  %v6572_v18 = vshrl.u32 %v14585_v19, 16  ;;  %v6575_v49 = vshll.u32 %v14585_v19, 16  ;;  %7085 = vmatmul.mubr.bf16.gmra.mrb[96].mxu1 %v14512_v17  ;;  %11385 = vmatmul.mubr.bf16.gmra.mrb[220].mxu0 %v6751_v4  ;;  %v6337_v56 = vadd.f32 %v14451_v36, %v6336_v23 }
 0x6fc   : > { %6501 = vst [vmem:[#allocation2 + $0xf8] sm:$0xff] %v14585_v19  ;;  %v6565_v42 = vshrl.u32 %v14596_v40, 16  ;;  %v6568_v41 = vshll.u32 %v14596_v40, 16  ;;  %v6400_v21 = vmul.f32 0.1, %v6334_v6  ;;  %7092 = vmatprep.mubr.bf16.mxu1 %v14528_v2  ;;  %11388 = vmatprep.mubr.bf16.mxu0 %v6754_v55  ;;  %v6434_v32 = vmax.f32 %v6342_v29, %v6402_v39 }
 0x6fd   : > { %v6574_v37 = vrot.slane %v6572_v18, 7  ;;  %v6702_v61 = vrot.slane %v6575_v49, 1  ;;  %v6403_v54 = vmul.f32 0.1, %v6345_v5  ;;  %10641 = vmatpush3.bf16.msra.mxu0 %v12297_v43  ;;  %v6401_v24 = vmul.f32 0.1, %v6337_v56 }
 0x6fe   : > { %v6567_v17 = vrot.slane %v6565_v42, 7  ;;  %v6700_v1 = vrot.slane %v6568_v41, 1  ;;  %v6432_v13 = vmax.f32 %v6334_v6, %v6400_v21  ;;  %10642 = vmatprep.subr.bf16.mxu0 %v12298_v30  ;;  %6466 = vst [vmem:[%s14462_s28 + $0xb0] sm:$0xff] %v6434_v32  ;;  %v11350_v26 = vpop.f32.mrb[72].mxu1 }
 0x6ff   : > { %v6577_v34 = vor.u32 %v6575_v49, %v6574_v37  ;;  %v6703_v46 = vor.u32 %v6702_v61, %v6572_v18  ;;  %v6435_v60 = vmax.f32 %v6345_v5, %v6403_v54  ;;  %v6433_v35 = vmax.f32 %v6337_v56, %v6401_v24  ;;  %v6349_v16 = vpop.f32.mrb[73].mxu1  ;;  %v6765_v54 = vld [vmem:[#allocation2 + $0x130] sm:$0xff] }
 0x700   : > { %v6570_v20 = vor.u32 %v6568_v41, %v6567_v17  ;;  %v6701_v31 = vor.u32 %v6700_v1, %v6565_v42  ;;  %6464 = vst [vmem:[%s14462_s28 + $0xa0] sm:$0xff] %v6432_v13  ;;  %v6358_v57 = vadd.f32 %v11350_v26, %v14451_v36  ;;  %v6350_v7 = vadd.f32 %v14451_v36, %v6349_v16  ;;  %v11351_v55 = vpop.f32.mrb[74].mxu1 }
 0x701   : > { %v14615_v45 = vsel %vm12877_vm9, %v6577_v34, %v6663_v63  ;;  %v6760_v59 = vsel %vm12883_vm10, %v6703_v46, %v6759_v53  ;;  %6467 = vst [vmem:[%s14462_s28 + $0xb8] sm:$0xff] %v6435_v60  ;;  %v14620_v8 = vpack.c.bf16 %v6435_v60, %v6434_v32  ;;  %10643 = vmatpush3.bf16.msra.mxu0 %v12299_v58  ;;  %6465 = vst [vmem:[%s14462_s28 + $0xa8] sm:$0xff] %v6433_v35  ;;  %v6352_v43 = vpop.f32.mrb[75].mxu1  ;;  %v6669_v32 = vld [vmem:[#allocation2 + $0x120] sm:$0xff]  ;;  %v6666_v46 = vld [vmem:[#allocation2 + $0x108] sm:$0xff] }
 0x702   : > { %6665 = vst [vmem:[#allocation2 + $0xf0] sm:$0xff] %v14615_v45  ;;  %6761 = vst [vmem:[#allocation2 + $0x100] sm:$0xff] %v6760_v59  ;;  %v14626_v27 = vsel %vm12877_vm9, %v6570_v20, %v6660_v0  ;;  %v6757_v50 = vsel %vm12883_vm10, %v6701_v31, %v6756_v62  ;;  %v14631_v51 = vpack.c.bf16 %v6433_v35, %v6432_v13  ;;  %11404 = vmatprep.subr.bf16.mxu0 %v14609_v3  ;;  %v6762_v60 = vld [vmem:[#allocation2 + $0x118] sm:$0xff] }
 0x703   : > { %6662 = vst [vmem:[#allocation2 + $0xd8] sm:$0xff] %v14626_v27  ;;  %6758 = vst [vmem:[#allocation2 + $0xe8] sm:$0xff] %v6757_v50  ;;  %v6586_v44 = vshrl.u32 %v14620_v8, 16  ;;  %v6589_v12 = vshll.u32 %v14620_v8, 16  ;;  %v6406_v29 = vmul.f32 0.1, %v6358_v57  ;;  %v6361_v33 = vadd.f32 %v11351_v55, %v14451_v36  ;;  %7093 = vmatmul.mubr.bf16.gmra.mrb[100].mxu1 %v14557_v11  ;;  %11389 = vmatmul.mubr.bf16.gmra.mrb[224].mxu0 %v6757_v50 }
 0x704   : > { %v6579_v4 = vshrl.u32 %v14631_v51, 16  ;;  %v6582_v6 = vshll.u32 %v14631_v51, 16  ;;  %v6404_v15 = vmul.f32 0.1, %v6350_v7  ;;  %v6353_v30 = vadd.f32 %v14451_v36, %v6352_v43  ;;  %7100 = vmatprep.mubr.bf16.mxu1 %v14517_v47  ;;  %11392 = vmatprep.mubr.bf16.mxu0 %v6760_v59 }
 0x705   : > { %v6588_v18 = vrot.slane %v6586_v44, 7  ;;  %v6706_v49 = vrot.slane %v6589_v12, 1  ;;  %v6438_v39 = vmax.f32 %v6358_v57, %v6406_v29  ;;  %v6407_v5 = vmul.f32 0.1, %v6361_v33 }
 0x706   : > { %v6581_v23 = vrot.slane %v6579_v4, 7  ;;  %v6704_v42 = vrot.slane %v6582_v6, 1  ;;  %v6436_v41 = vmax.f32 %v6350_v7, %v6404_v15  ;;  %v6405_v21 = vmul.f32 0.1, %v6353_v30  ;;  %v11354_v13 = vpop.f32.mrb[76].mxu1 }
 0x707   : > { %v6591_v56 = vor.u32 %v6589_v12, %v6588_v18  ;;  %v6707_v37 = vor.u32 %v6706_v49, %v6586_v44  ;;  %6470 = vst [vmem:[%s14462_s28 + $0xd0] sm:$0xff] %v6438_v39  ;;  %v6439_v61 = vmax.f32 %v6361_v33, %v6407_v5  ;;  %v6374_v53 = vadd.f32 %v11354_v13, %v14451_v36  ;;  %v6365_v20 = vpop.f32.mrb[77].mxu1 }
 0x708   : > { %v6584_v58 = vor.u32 %v6582_v6, %v6581_v23  ;;  %v6705_v17 = vor.u32 %v6704_v42, %v6579_v4  ;;  %6468 = vst [vmem:[%s14462_s28 + $0xc0] sm:$0xff] %v6436_v41  ;;  %v6437_v1 = vmax.f32 %v6353_v30, %v6405_v21  ;;  %v6366_v59 = vadd.f32 %v14451_v36, %v6365_v20  ;;  %v11355_v0 = vpop.f32.mrb[78].mxu1  ;;  %v6675_v42 = vld [vmem:[#allocation2 + $0x150] sm:$0xff] }
 0x709   : > { %v14648_v24 = vsel %vm12877_vm9, %v6591_v56, %v6669_v32  ;;  %v6766_v34 = vsel %vm12883_vm10, %v6707_v37, %v6765_v54  ;;  %6471 = vst [vmem:[%s14462_s28 + $0xd8] sm:$0xff] %v6439_v61  ;;  %v14653_v63 = vpack.c.bf16 %v6439_v61, %v6438_v39  ;;  %v6410_v16 = vmul.f32 0.1, %v6374_v53  ;;  %v6368_v7 = vpop.f32.mrb[79].mxu1  ;;  %v6672_v32 = vld [vmem:[#allocation2 + $0x138] sm:$0xff]  ;;  %v6768_v54 = vld [vmem:[#allocation2 + $0x148] sm:$0xff] }
 0x70a   : > { %6671 = vst [vmem:[#allocation2 + $0x120] sm:$0xff] %v14648_v24  ;;  %6767 = vst [vmem:[#allocation2 + $0x130] sm:$0xff] %v6766_v34  ;;  %v14659_v31 = vsel %vm12877_vm9, %v6584_v58, %v6666_v46  ;;  %v14663_v35 = vsel %vm12883_vm10, %v6705_v17, %v6762_v60  ;;  %v14666_v26 = vpack.c.bf16 %v6437_v1, %v6436_v41  ;;  %v6408_v12 = vmul.f32 0.1, %v6366_v59 }
 0x70b   : > { %6469 = vst [vmem:[%s14462_s28 + $0xc8] sm:$0xff] %v6437_v1  ;;  %6668 = vst [vmem:[#allocation2 + $0x108] sm:$0xff] %v14659_v31  ;;  %v6600_v62 = vshrl.u32 %v14653_v63, 16  ;;  %v6603_v57 = vshll.u32 %v14653_v63, 16  ;;  %v6377_v50 = vadd.f32 %v11355_v0, %v14451_v36  ;;  %7101 = vmatmul.mubr.bf16.gmra.mrb[104].mxu1 %v14546_v28  ;;  %11393 = vmatmul.mubr.bf16.gmra.mrb[228].mxu0 %v14663_v35 }
 0x70c   : > { %6764 = vst [vmem:[#allocation2 + $0x118] sm:$0xff] %v14663_v35  ;;  %v6593_v55 = vshrl.u32 %v14666_v26, 16  ;;  %v6596_v44 = vshll.u32 %v14666_v26, 16  ;;  %v6369_v29 = vadd.f32 %v14451_v36, %v6368_v7  ;;  %7108 = vmatprep.mubr.bf16.mxu1 %v14562_v25  ;;  %11396 = vmatprep.mubr.bf16.mxu0 %v6766_v34  ;;  %v6442_v4 = vmax.f32 %v6374_v53, %v6410_v16  ;;  %v6771_v36 = vld [vmem:[#allocation2 + $0x160] sm:$0xff]  ;;  %v6777_v7 = vld [vmem:[#allocation2 + $0x190] sm:$0xff] }
 0x70d   : > { %v6602_v33 = vrot.slane %v6600_v62, 7  ;;  %v6710_v43 = vrot.slane %v6603_v57, 1  ;;  %v6411_v6 = vmul.f32 0.1, %v6377_v50  ;;  %v6440_v18 = vmax.f32 %v6366_v59, %v6408_v12 }
 0x70e   : > { %v6595_v15 = vrot.slane %v6593_v55, 7  ;;  %v6708_v30 = vrot.slane %v6596_v44, 1  ;;  %v6409_v49 = vmul.f32 0.1, %v6369_v29  ;;  %6474 = vst [vmem:[%s14462_s28 + $0xf0] sm:$0xff] %v6442_v4 }
 0x70f   : > { %v6605_v39 = vor.u32 %v6603_v57, %v6602_v33  ;;  %v6711_v5 = vor.u32 %v6710_v43, %v6600_v62  ;;  %v6443_v23 = vmax.f32 %v6377_v50, %v6411_v6  ;;  %6472 = vst [vmem:[%s14462_s28 + $0xe0] sm:$0xff] %v6440_v18  ;;  %v6681_v50 = vld [vmem:[#allocation2 + $0x180] sm:$0xff]  ;;  %v6678_v33 = vld [vmem:[#allocation2 + $0x168] sm:$0xff]  ;;  %v6774_v43 = vld [vmem:[#allocation2 + $0x178] sm:$0xff] }
 0x710   : > { %v6598_v41 = vor.u32 %v6596_v44, %v6595_v15  ;;  %v6709_v21 = vor.u32 %v6708_v30, %v6593_v55  ;;  %v6441_v56 = vmax.f32 %v6369_v29, %v6409_v49  ;;  %v7407_v15 = vld [vmem:[#allocation2 + $0x20] sm:$0xff]  ;;  %v12305_v30 = vld [vmem:[#allocation6 + $0x148] sm:$0xff]   ;;  %v7409_v49 = vld [vmem:[#allocation2 + $0x30] sm:$0xff] }
 0x711   : > { %v14684_v37 = vsel %vm12877_vm9, %v6605_v39, %v6675_v42  ;;  %v14688_v61 = vsel %vm12883_vm10, %v6711_v5, %v6771_v36  ;;  %6475 = vst [vmem:[%s14462_s28 + $0xf8] sm:$0xff] %v6443_v23  ;;  %v14691_v58 = vpack.c.bf16 %v6443_v23, %v6442_v4  ;;  %v12315_v39 = vld [vmem:[#allocation6 + $0x158] sm:$0xff]   ;;  %v10508_v5 = vpop.f32.mrb[80].mxu1  ;;  %v12321_v23 = vld [vmem:[#allocation6 + $0x168] sm:$0xff]  }
 0x712   : > { %6677 = vst [vmem:[#allocation2 + $0x150] sm:$0xff] %v14684_v37  ;;  %6773 = vst [vmem:[#allocation2 + $0x160] sm:$0xff] %v14688_v61  ;;  %v14697_v17 = vsel %vm12877_vm9, %v6598_v41, %v6672_v32  ;;  %v14701_v1 = vsel %vm12883_vm10, %v6709_v21, %v6768_v54  ;;  %v14704_v13 = vpack.c.bf16 %v6441_v56, %v6440_v18  ;;  %v12308_v18 = vld [vmem:[#allocation6 + $0x150] sm:$0xff]   ;;  %v10509_v42 = vpop.f32.mrb[81].mxu1  ;;  %v7416_v36 = vld [vmem:[#allocation2 + $0x68] sm:$0xff] }
 0x713   : > { %6473 = vst [vmem:[%s14462_s28 + $0xe8] sm:$0xff] %v6441_v56  ;;  %6674 = vst [vmem:[#allocation2 + $0x138] sm:$0xff] %v14697_v17  ;;  %v6614_v34 = vshrl.u32 %v14691_v58, 16  ;;  %v6617_v46 = vshll.u32 %v14691_v58, 16  ;;  %7109 = vmatmul.mubr.bf16.gmra.mrb[108].mxu1 %v14591_v38  ;;  %11397 = vmatmul.mubr.bf16.gmra.mrb[232].mxu0 %v14701_v1  ;;  %v14747_v41 = vadd.f32 %v10509_v42, %v10508_v5  ;;  %v10511_v21 = vpop.f32.mrb[82].mxu1  ;;  %v12322_v32 = vld [vmem:[#allocation6 + $0x170] sm:$0xff]  }
 0x714   : > { %6770 = vst [vmem:[#allocation2 + $0x148] sm:$0xff] %v14701_v1  ;;  %v6607_v60 = vshrl.u32 %v14704_v13, 16  ;;  %v6610_v53 = vshll.u32 %v14704_v13, 16  ;;  %7116 = vmatprep.mubr.bf16.mxu1 %v14551_v10  ;;  %11400 = vmatprep.mubr.bf16.mxu0 %v14688_v61  ;;  %v7415_v54 = vld [vmem:[#allocation2 + $0x60] sm:$0xff]  ;;  %v14845_v42 = vld [vmem:[#allocation2 + $0x130] sm:$0xff] }
 0x715   : > { %v6616_v20 = vrot.slane %v6614_v34, 7  ;;  %v6714_v59 = vrot.slane %v6617_v46, 1 }
 0x716   : > { %v6609_v0 = vrot.slane %v6607_v60, 7  ;;  %v6712_v62 = vrot.slane %v6610_v53, 1 }
 0x717   : > { %v6619_v57 = vor.u32 %v6617_v46, %v6616_v20  ;;  %v6715_v16 = vor.u32 %v6714_v59, %v6614_v34  ;;  %v12323_v34 = vld [vmem:[#allocation6 + $0x178] sm:$0xff]   ;;  %v12325_v20 = vld [vmem:[#allocation6 + $0x208] sm:$0xff]   ;;  %v14791_v59 = vld [vmem:[#allocation2 + $0x40] sm:$0xff] }
 0x718   : > { %v6612_v55 = vor.u32 %v6610_v53, %v6609_v0  ;;  %v6713_v44 = vor.u32 %v6712_v62, %v6607_v60  ;;  %v8084_v46 = vld [vmem:[#allocation2 + $0xc8] sm:$0xff]  ;;  %v8083_v60 = vld [vmem:[#allocation2 + $0xc0] sm:$0xff]  ;;  %v12329_v0 = vld [vmem:[#allocation6 + $0x228] sm:$0xff]  }
 0x719   : > { %v14718_v12 = vsel %vm12877_vm9, %v6619_v57, %v6681_v50  ;;  %v14722_v29 = vsel %vm12883_vm10, %v6715_v16, %v6777_v7  ;;  %v7408_v53 = vld [vmem:[#allocation2 + $0x28] sm:$0xff]  ;;  %v14812_v62 = vld [vmem:[#allocation2 + $0xb8] sm:$0xff] }
 0x71a   : > { %6683 = vst [vmem:[#allocation2 + $0x180] sm:$0xff] %v14718_v12  ;;  %6779 = vst [vmem:[#allocation2 + $0x190] sm:$0xff] %v14722_v29  ;;  %v14728_v4 = vsel %vm12877_vm9, %v6612_v55, %v6678_v33  ;;  %v14732_v6 = vsel %vm12883_vm10, %v6713_v44, %v6774_v43  ;;  %v14820_v44 = vld [vmem:[#allocation2 + $0xd0] sm:$0xff] }
 0x71b   : > { %6680 = vst [vmem:[#allocation2 + $0x168] sm:$0xff] %v14728_v4  ;;  %6776 = vst [vmem:[#allocation2 + $0x178] sm:$0xff] %v14732_v6  ;;  %7117 = vmatmul.mubr.bf16.gmra.mrb[112].mxu1 %v14580_v52  ;;  %11401 = vmatmul.mubr.bf16.gmra.mrb[236].mxu0 %v14732_v6 }
 0x71c   : > { %7124 = vmatprep.mubr.bf16.mxu1 %v14596_v40  ;;  %7679 = vmatprep.mubr.bf16.mxu0 %v7407_v15 }
 0x723   : > { %7125 = vmatmul.mubr.bf16.gmra.mrb[116].mxu1 %v14626_v27  ;;  %7680 = vmatmul.mubr.bf16.vlgmr.msra.gmra.mrb[240].mxu0 %v7406_v9 }
 0x724   : > { %11405 = vmatpush3.bf16.msra.mxu0 %v14609_v3  ;;  %7132 = vmatprep.mubr.bf16.mxu1 %v14585_v19  ;;  %v12320_v3 = vld [vmem:[#allocation6 + $0x160] sm:$0xff]  }
 0x725   : > { %7687 = vmatprep.mubr.bf16.mxu0 %v7410_v14  ;;  %11406 = vmatprep.subr.bf16.mxu0 %v12305_v30 }
 0x728   : > { %11407 = vmatpush3.bf16.msra.mxu0 %v12305_v30 }
 0x729   : > { %11408 = vmatprep.subr.bf16.mxu0 %v12308_v18 }
 0x72b   : > { %7133 = vmatmul.mubr.bf16.gmra.mrb[120].mxu1 %v14615_v45  ;;  %7688 = vmatmul.mubr.bf16.gmra.mrb[244].mxu0 %v7409_v49 }
 0x72c   : > { %7140 = vmatprep.mubr.bf16.mxu1 %v14631_v51  ;;  %7695 = vmatprep.mubr.bf16.mxu0 %v14496_v48  ;;  %v10512_v48 = vpop.f32.mrb[83].mxu1 }
 0x72d   : > { %11409 = vmatpush3.bf16.msra.mxu0 %v12308_v18  ;;  %v14750_v56 = vadd.f32 %v10512_v48, %v10511_v21  ;;  %v14832_v18 = vld [vmem:[#allocation2 + $0x100] sm:$0xff]  ;;  %v8110_v48 = vld [vmem:[#allocation2 + $0x198] sm:$0xff] }
 0x72e   : > { %11410 = vmatprep.subr.bf16.mxu0 %v12315_v39 }
 0x731   : > { %11411 = vmatpush3.bf16.msra.mxu0 %v12315_v39 }
 0x732   : > { %11412 = vmatprep.subr.bf16.mxu0 %v12320_v3 }
 0x733   : > { %7141 = vmatmul.mubr.bf16.gmra.mrb[124].mxu1 %v14659_v31  ;;  %7696 = vmatmul.mubr.bf16.gmra.mrb[248].mxu0 %v14523_v22  ;;  %v14755_v22 = vld [vmem:[#allocation6 + $0x200] sm:$0xff]  }
 0x734   : > { %7148 = vmatprep.mubr.bf16.mxu1 %v14620_v8  ;;  %7703 = vmatprep.mubr.bf16.mxu0 %v7416_v36 }
 0x735   : > { %11413 = vmatpush3.bf16.msra.mxu0 %v12320_v3 }
 0x736   : > { %11414 = vmatprep.subr.bf16.mxu0 %v12321_v23 }
 0x739   : > { %11415 = vmatpush3.bf16.msra.mxu0 %v12321_v23 }
 0x73a   : > { %11416 = vmatprep.subr.bf16.mxu0 %v12322_v32 }
 0x73b   : > { %7149 = vmatmul.mubr.bf16.gmra.mrb[128].mxu1 %v14648_v24  ;;  %7704 = vmatmul.mubr.bf16.gmra.mrb[252].mxu0 %v7415_v54 }
 0x73c   : > { %7156 = vmatprep.mubr.bf16.mxu1 %v14666_v26  ;;  %7711 = vmatprep.mubr.bf16.mxu0 %v14528_v2  ;;  %v8069_v2 = vld [vmem:[#allocation2 + $0x50] sm:$0xff] }
 0x73d   : > { %11417 = vmatpush3.bf16.msra.mxu0 %v12322_v32 }
 0x73e   : > { %11418 = vmatprep.subr.bf16.mxu0 %v12323_v34 }
 0x741   : > { %11419 = vmatpush3.bf16.msra.mxu0 %v12323_v34 }
 0x742   : > { %11452 = vmatprep.subr.bf16.mxu0 %v14755_v22 }
 0x743   : > { %7157 = vmatmul.mubr.bf16.gmra.mrb[132].mxu1 %v14697_v17  ;;  %7712 = vmatmul.mubr.bf16.gmra.mrb[0].mxu0 %v14557_v11  ;;  %v8078_v11 = vld [vmem:[#allocation2 + $0x98] sm:$0xff] }
 0x744   : > { %7164 = vmatprep.mubr.bf16.mxu1 %v14653_v63  ;;  %7719 = vmatprep.mubr.bf16.mxu0 %v14517_v47  ;;  %v8068_v47 = vld [vmem:[#allocation2 + $0x48] sm:$0xff] }
 0x74b   : > { %7165 = vmatmul.mubr.bf16.gmra.mrb[136].mxu1 %v14684_v37  ;;  %7720 = vmatmul.mubr.bf16.gmra.mrb[4].mxu0 %v14546_v28  ;;  %v8075_v28 = vld [vmem:[#allocation2 + $0x80] sm:$0xff] }
 0x74c   : > { %7172 = vmatprep.mubr.bf16.mxu1 %v14704_v13  ;;  %7727 = vmatprep.mubr.bf16.mxu0 %v14562_v25  ;;  %v8077_v25 = vld [vmem:[#allocation2 + $0x90] sm:$0xff] }
 0x753   : > { %7173 = vmatmul.mubr.bf16.gmra.mrb[140].mxu1 %v14728_v4  ;;  %7728 = vmatmul.mubr.bf16.gmra.mrb[8].mxu0 %v14591_v38  ;;  %v8080_v38 = vld [vmem:[#allocation2 + $0xa8] sm:$0xff] }
 0x754   : > { %7735 = vmatprep.mubr.bf16.mxu0 %v14551_v10  ;;  %8338 = vmatprep.mubr.bf16.mxu1 %v7410_v14  ;;  %v8074_v10 = vld [vmem:[#allocation2 + $0x78] sm:$0xff] }
 0x75b   : > { %7736 = vmatmul.mubr.bf16.gmra.mrb[12].mxu0 %v14580_v52  ;;  %8339 = vmatmul.mubr.bf16.vlgmr.msra.gmra.mrb[144].mxu1 %v7409_v49  ;;  %v8081_v52 = vld [vmem:[#allocation2 + $0xb0] sm:$0xff] }
 0x75c   : > { %7743 = vmatprep.mubr.bf16.mxu0 %v14596_v40  ;;  %8346 = vmatprep.mubr.bf16.mxu1 %v8069_v2 }
 0x763   : > { %7744 = vmatmul.mubr.bf16.gmra.mrb[48].mxu0 %v14626_v27  ;;  %8347 = vmatmul.mubr.bf16.gmra.mrb[148].mxu1 %v8068_v47 }
 0x764   : > { %7751 = vmatprep.mubr.bf16.mxu0 %v14585_v19  ;;  %8354 = vmatprep.mubr.bf16.mxu1 %v7416_v36 }
 0x76b   : > { %7752 = vmatmul.mubr.bf16.gmra.mrb[52].mxu0 %v14615_v45  ;;  %8355 = vmatmul.mubr.bf16.gmra.mrb[152].mxu1 %v7415_v54 }
 0x76c   : > { %7759 = vmatprep.mubr.bf16.mxu0 %v14631_v51  ;;  %8362 = vmatprep.mubr.bf16.mxu1 %v8075_v28 }
 0x773   : > { %7760 = vmatmul.mubr.bf16.gmra.mrb[56].mxu0 %v14659_v31  ;;  %8363 = vmatmul.mubr.bf16.gmra.mrb[156].mxu1 %v8074_v10 }
 0x774   : > { %7767 = vmatprep.mubr.bf16.mxu0 %v14620_v8  ;;  %8370 = vmatprep.mubr.bf16.mxu1 %v8078_v11 }
 0x77b   : > { %7768 = vmatmul.mubr.bf16.gmra.mrb[60].mxu0 %v14648_v24  ;;  %8371 = vmatmul.mubr.bf16.gmra.mrb[160].mxu1 %v8077_v25 }
 0x77c   : > { %7775 = vmatprep.mubr.bf16.mxu0 %v14666_v26  ;;  %8378 = vmatprep.mubr.bf16.mxu1 %v8081_v52 }
 0x783   : > { %7776 = vmatmul.mubr.bf16.gmra.mrb[64].mxu0 %v14697_v17  ;;  %8379 = vmatmul.mubr.bf16.gmra.mrb[164].mxu1 %v8080_v38  ;;  %v12334_v38 = vld [vmem:[%s15279_s13 + $0x10] sm:$0xff]  }
 0x784   : > { %7783 = vmatprep.mubr.bf16.mxu0 %v14653_v63  ;;  %8386 = vmatprep.mubr.bf16.mxu1 %v8084_v46 }
 0x78b   : > { %7784 = vmatmul.mubr.bf16.gmra.mrb[68].mxu0 %v14684_v37  ;;  %8387 = vmatmul.mubr.bf16.gmra.mrb[168].mxu1 %v8083_v60 }
 0x78c   : > { %7791 = vmatprep.mubr.bf16.mxu0 %v14704_v13  ;;  %8394 = vmatprep.mubr.bf16.mxu1 %v14596_v40  ;;  %v14795_v40 = vld [vmem:[#allocation2 + $0x58] sm:$0xff] }
 0x793   : > { %7792 = vmatmul.mubr.bf16.gmra.mrb[72].mxu0 %v14728_v4  ;;  %8395 = vmatmul.mubr.bf16.gmra.mrb[172].mxu1 %v14626_v27  ;;  %v12327_v27 = vld [vmem:[#allocation6 + $0x218] sm:$0xff]  }
 0x794   : > { %7799 = vmatprep.mubr.bf16.mxu0 %v14691_v58  ;;  %8402 = vmatprep.mubr.bf16.mxu1 %v14585_v19  ;;  %v12326_v19 = vld [vmem:[#allocation6 + $0x210] sm:$0xff]  }
 0x79b   : > { %7800 = vmatmul.mubr.bf16.gmra.mrb[76].mxu0 %v14718_v12  ;;  %8403 = vmatmul.mubr.bf16.gmra.mrb[176].mxu1 %v14615_v45  ;;  %v14800_v45 = vld [vmem:[#allocation2 + $0x70] sm:$0xff] }
 0x79c   : > { %11420 = vmatprep.mubr.bf16.mxu0 %v7408_v53  ;;  %8410 = vmatprep.mubr.bf16.mxu1 %v14631_v51  ;;  %v14804_v51 = vld [vmem:[#allocation2 + $0x88] sm:$0xff] }
 0x7a3   : > { %11421 = vmatmul.mubr.bf16.vlgmr.msra.gmra.mrb[208].mxu0 %v14791_v59  ;;  %8411 = vmatmul.mubr.bf16.gmra.mrb[180].mxu1 %v14659_v31  ;;  %v14808_v31 = vld [vmem:[#allocation2 + $0xa0] sm:$0xff] }
 0x7a4   : > { %11453 = vmatpush3.bf16.msra.mxu0 %v14755_v22  ;;  %11424 = vmatprep.mubr.bf16.mxu0 %v14795_v40 }
 0x7a5   : > { %8418 = vmatprep.mubr.bf16.mxu1 %v14620_v8  ;;  %11454 = vmatprep.subr.bf16.mxu0 %v12325_v20  ;;  %v12328_v8 = vld [vmem:[#allocation6 + $0x220] sm:$0xff]  }
 0x7a8   : > { %11455 = vmatpush3.bf16.msra.mxu0 %v12325_v20 }
 0x7a9   : > { %11456 = vmatprep.subr.bf16.mxu0 %v12326_v19 }
 0x7ab   : > { %11425 = vmatmul.mubr.bf16.gmra.mrb[212].mxu0 %v14800_v45  ;;  %8419 = vmatmul.mubr.bf16.gmra.mrb[184].mxu1 %v14648_v24 }
 0x7ac   : > { %11428 = vmatprep.mubr.bf16.mxu0 %v14804_v51  ;;  %8426 = vmatprep.mubr.bf16.mxu1 %v14666_v26  ;;  %v12330_v26 = vld [vmem:[#allocation6 + $0x230] sm:$0xff]  }
 0x7ad   : > { %11457 = vmatpush3.bf16.msra.mxu0 %v12326_v19 }
 0x7ae   : > { %11458 = vmatprep.subr.bf16.mxu0 %v12327_v27 }
 0x7b1   : > { %11459 = vmatpush3.bf16.msra.mxu0 %v12327_v27 }
 0x7b2   : > { %11460 = vmatprep.subr.bf16.mxu0 %v12328_v8 }
 0x7b3   : > { %11429 = vmatmul.mubr.bf16.gmra.mrb[216].mxu0 %v14808_v31  ;;  %8427 = vmatmul.mubr.bf16.gmra.mrb[188].mxu1 %v14697_v17  ;;  %v12331_v17 = vld [vmem:[#allocation6 + $0x238] sm:$0xff]  }
 0x7b4   : > { %11432 = vmatprep.mubr.bf16.mxu0 %v14812_v62  ;;  %8434 = vmatprep.mubr.bf16.mxu1 %v14653_v63  ;;  %v10514_v24 = vpop.f32.mrb[84].mxu1  ;;  %v14824_v63 = vld [vmem:[#allocation2 + $0xe8] sm:$0xff] }
 0x7b5   : > { %11461 = vmatpush3.bf16.msra.mxu0 %v12328_v8  ;;  %v10515_v57 = vpop.f32.mrb[85].mxu1 }
 0x7b6   : > { %11462 = vmatprep.subr.bf16.mxu0 %v12329_v0  ;;  %v14816_v16 = vadd.f32 %v10515_v57, %v10514_v24  ;;  %v10517_v50 = vpop.f32.mrb[86].mxu1  ;;  %v12335_v24 = vld [vmem:[%s15279_s13 + $0x18] sm:$0xff]  }
 0x7b7   : > { %v10518_v7 = vpop.f32.mrb[87].mxu1 }
 0x7b8   : > { %v14818_v55 = vadd.f32 %v10518_v7, %v10517_v50 }
 0x7b9   : > { %11463 = vmatpush3.bf16.msra.mxu0 %v12329_v0 }
 0x7ba   : > { %11464 = vmatprep.subr.bf16.mxu0 %v12330_v26 }
 0x7bb   : > { %11433 = vmatmul.mubr.bf16.gmra.mrb[220].mxu0 %v14820_v44  ;;  %8435 = vmatmul.mubr.bf16.gmra.mrb[192].mxu1 %v14684_v37  ;;  %v12332_v37 = vld [vmem:[%s15279_s13] sm:$0xff]  }
 0x7bc   : > { %11436 = vmatprep.mubr.bf16.mxu0 %v14824_v63  ;;  %8442 = vmatprep.mubr.bf16.mxu1 %v14704_v13 }
 0x7bd   : > { %11465 = vmatpush3.bf16.msra.mxu0 %v12330_v26  ;;  %v10520_v33 = vpop.f32.mrb[88].mxu1  ;;  %11500 = vmatprep.subr.bf16.mxu1 %v12332_v37 }
 0x7be   : > { %11466 = vmatprep.subr.bf16.mxu0 %v12331_v17  ;;  %v10521_v43 = vpop.f32.mrb[89].mxu1  ;;  %11501 = vmatpush3.bf16.msra.mxu1 %v12332_v37 }
 0x7bf   : > { %v14828_v15 = vadd.f32 %v10521_v43, %v10520_v33  ;;  %v10523_v30 = vpop.f32.mrb[90].mxu1 }
 0x7c0   : > { %v10524_v9 = vpop.f32.mrb[91].mxu1 }
 0x7c1   : > { %11467 = vmatpush3.bf16.msra.mxu0 %v12331_v17  ;;  %v14830_v14 = vadd.f32 %v10524_v9, %v10523_v30 }
 0x7c3   : > { %11437 = vmatmul.mubr.bf16.gmra.mrb[224].mxu0 %v14832_v18  ;;  %8443 = vmatmul.mubr.bf16.gmra.mrb[196].mxu1 %v14728_v4 }
 0x7c4   : > { %11440 = vmatprep.mubr.bf16.mxu0 %v14663_v35  ;;  %8450 = vmatprep.mubr.bf16.mxu1 %v14691_v58  ;;  %v12344_v35 = vld [vmem:[#allocation2 + $0x8] sm:$0xff] }
 0x7c5   : > { %v10526_v13 = vpop.f32.mrb[92].mxu1 }
 0x7c6   : > { %v10527_v49 = vpop.f32.mrb[93].mxu1 }
 0x7c7   : > { %v14841_v39 = vadd.f32 %v10527_v49, %v10526_v13  ;;  %v10529_v3 = vpop.f32.mrb[94].mxu1 }
 0x7c8   : > { %v10530_v5 = vpop.f32.mrb[95].mxu1 }
 0x7c9   : > { %v14843_v23 = vadd.f32 %v10530_v5, %v10529_v3 }
 0x7cb   : > { %11441 = vmatmul.mubr.bf16.gmra.mrb[228].mxu0 %v14845_v42  ;;  %8451 = vmatmul.mubr.bf16.gmra.mrb[200].mxu1 %v14718_v12 }
 0x7cc   : > { %11444 = vmatprep.mubr.bf16.mxu0 %v14701_v1  ;;  %8458 = vmatprep.mubr.bf16.mxu1 %v12344_v35  ;;  %v12333_v1 = vld [vmem:[%s15279_s13 + $0x8] sm:$0xff]  }
 0x7cd   : > { %11502 = vmatprep.subr.bf16.mxu1 %v12333_v1 }
 0x7ce   : > { %v10532_v58 = vpop.f32.mrb[96].mxu1  ;;  %11503 = vmatpush3.bf16.msra.mxu1 %v12333_v1  ;;  %v8094_v1 = vld [vmem:[#allocation2 + $0x118] sm:$0xff] }
 0x7cf   : > { %v10533_v4 = vpop.f32.mrb[97].mxu1  ;;  %11504 = vmatprep.subr.bf16.mxu1 %v12334_v38 }
 0x7d0   : > { %v14850_v36 = vadd.f32 %v10533_v4, %v10532_v58  ;;  %v10535_v21 = vpop.f32.mrb[98].mxu1 }
 0x7d1   : > { %v10536_v32 = vpop.f32.mrb[99].mxu1 }
 0x7d2   : > { %v14852_v54 = vadd.f32 %v10536_v32, %v10535_v21  ;;  %11505 = vmatpush3.bf16.msra.mxu1 %v12334_v38 }
 0x7d3   : > { %11445 = vmatmul.mubr.bf16.gmra.mrb[232].mxu0 %v14688_v61  ;;  %8459 = vmatmul.mubr.bf16.gmra.mrb[204].mxu1 %v8110_v48 }
 0x7d4   : > { %11448 = vmatprep.mubr.bf16.mxu0 %v14732_v6  ;;  %11506 = vmatprep.subr.bf16.mxu1 %v12335_v24 }
 0x7d6   : > { %v10538_v12 = vpop.f32.mrb[100].mxu1  ;;  %11507 = vmatpush3.bf16.msra.mxu1 %v12335_v24 }
 0x7d7   : > { %v10539_v34 = vpop.f32.mrb[101].mxu1 }
 0x7d8   : > { %v14859_v22 = vadd.f32 %v10539_v34, %v10538_v12  ;;  %v10541_v2 = vpop.f32.mrb[102].mxu1 }
 0x7d9   : > { %v10542_v47 = vpop.f32.mrb[103].mxu1 }
 0x7da   : > { %v14861_v28 = vadd.f32 %v10542_v47, %v10541_v2 }
 0x7db   : > { %11449 = vmatmul.mubr.bf16.gmra.mrb[236].mxu0 %v14722_v29 }
 0x7dc   : > { %11468 = vmatprep.mubr.bf16.mxu0 %v14791_v59 }
 0x7de   : > { %v10544_v61 = vpop.f32.mrb[104].mxu1 }
 0x7df   : > { %v10545_v6 = vpop.f32.mrb[105].mxu1 }
 0x7e0   : > { %v14865_v10 = vadd.f32 %v10545_v6, %v10544_v61  ;;  %v10547_v11 = vpop.f32.mrb[106].mxu1 }
 0x7e1   : > { %v10548_v25 = vpop.f32.mrb[107].mxu1 }
 0x7e2   : > { %v14867_v52 = vadd.f32 %v10548_v25, %v10547_v11 }
 0x7e3   : > { %11469 = vmatmul.mubr.bf16.vlgmr.msra.gmra.mrb[208].mxu0 %v14795_v40 }
 0x7e4   : > { %11472 = vmatprep.mubr.bf16.mxu0 %v14800_v45 }
 0x7e6   : > { %v10550_v46 = vpop.f32.mrb[108].mxu1 }
 0x7e7   : > { %v10551_v29 = vpop.f32.mrb[109].mxu1 }
 0x7e8   : > { %v14874_v60 = vadd.f32 %v10551_v29, %v10550_v46  ;;  %v10553_v53 = vpop.f32.mrb[110].mxu1 }
 0x7e9   : > { %v10554_v20 = vpop.f32.mrb[111].mxu1 }
 0x7ea   : > { %v14876_v59 = vadd.f32 %v10554_v20, %v10553_v53  ;;  %v8103_v20 = vld [vmem:[#allocation2 + $0x160] sm:$0xff] }
 0x7eb   : > { %11473 = vmatmul.mubr.bf16.gmra.mrb[212].mxu0 %v14804_v51 }
 0x7ec   : > { %11476 = vmatprep.mubr.bf16.mxu0 %v14808_v31 }
 0x7ee   : > { %v10556_v40 = vpop.f32.mrb[112].mxu1 }
 0x7ef   : > { %v10557_v19 = vpop.f32.mrb[113].mxu1 }
 0x7f0   : > { %v14880_v45 = vadd.f32 %v10557_v19, %v10556_v40  ;;  %v10559_v27 = vpop.f32.mrb[114].mxu1 }
 0x7f1   : > { %v10560_v8 = vpop.f32.mrb[115].mxu1 }
 0x7f2   : > { %v14882_v0 = vadd.f32 %v10560_v8, %v10559_v27 }
 0x7f3   : > { %11477 = vmatmul.mubr.bf16.gmra.mrb[216].mxu0 %v14812_v62 }
 0x7f4   : > { %11480 = vmatprep.mubr.bf16.mxu0 %v14820_v44 }
 0x7f6   : > { %v10562_v26 = vpop.f32.mrb[116].mxu1  ;;  %v10644_v51 = vpop.f32.mrb[240].mxu0 }
 0x7f7   : > { %v10563_v31 = vpop.f32.mrb[117].mxu1  ;;  %v10645_v57 = vpop.f32.mrb[241].mxu0 }
 0x7f8   : > { %v14889_v50 = vadd.f32 %v10563_v31, %v10562_v26  ;;  %v10646_v7 = vadd.f32 %v10645_v57, %v10644_v51  ;;  %v10565_v17 = vpop.f32.mrb[118].mxu1  ;;  %v10647_v33 = vpop.f32.mrb[242].mxu0 }
 0x7f9   : > { %v10566_v43 = vpop.f32.mrb[119].mxu1  ;;  %v10648_v30 = vpop.f32.mrb[243].mxu0 }
 0x7fa   : > { %v14892_v62 = vadd.f32 %v10646_v7, %v14747_v41  ;;  %v14894_v44 = vadd.f32 %v10566_v43, %v10565_v17  ;;  %v10649_v9 = vadd.f32 %v10648_v30, %v10647_v33  ;;  %v12337_v30 = vld [vmem:[%s15279_s13 + $0x28] sm:$0xff]  }
 0x7fb   : > { %11481 = vmatmul.mubr.bf16.gmra.mrb[220].mxu0 %v14824_v63 }
 0x7fc   : > { %v14898_v37 = vadd.f32 %v10649_v9, %v14750_v56  ;;  %11484 = vmatprep.mubr.bf16.mxu0 %v14832_v18  ;;  %v12336_v18 = vld [vmem:[%s15279_s13 + $0x20] sm:$0xff]   ;;  %v8109_v9 = vld [vmem:[#allocation2 + $0x190] sm:$0xff] }
 0x7fd   : > { %11508 = vmatprep.subr.bf16.mxu1 %v12336_v18 }
 0x7fe   : > { %v10568_v13 = vpop.f32.mrb[120].mxu1  ;;  %v10650_v49 = vpop.f32.mrb[244].mxu0  ;;  %11509 = vmatpush3.bf16.msra.mxu1 %v12336_v18 }
 0x7ff   : > { %v10569_v3 = vpop.f32.mrb[121].mxu1  ;;  %v10651_v5 = vpop.f32.mrb[245].mxu0  ;;  %11510 = vmatprep.subr.bf16.mxu1 %v12337_v30 }
 0x800   : > { %v14901_v35 = vadd.f32 %v10569_v3, %v10568_v13  ;;  %v10652_v58 = vadd.f32 %v10651_v5, %v10650_v49  ;;  %v10571_v4 = vpop.f32.mrb[122].mxu1  ;;  %v10653_v41 = vpop.f32.mrb[246].mxu0 }
 0x801   : > { %v10572_v21 = vpop.f32.mrb[123].mxu1  ;;  %v10654_v48 = vpop.f32.mrb[247].mxu0 }
 0x802   : > { %v14904_v32 = vadd.f32 %v10652_v58, %v14816_v16  ;;  %v14906_v63 = vadd.f32 %v10572_v21, %v10571_v4  ;;  %v10655_v56 = vadd.f32 %v10654_v48, %v10653_v41  ;;  %11511 = vmatpush3.bf16.msra.mxu1 %v12337_v30  ;;  %v8112_v48 = vld [vmem:[#allocation2 + $0x1a8] sm:$0xff] }
 0x803   : > { %11485 = vmatmul.mubr.bf16.gmra.mrb[224].mxu0 %v8094_v1 }
 0x804   : > { %v14912_v12 = vadd.f32 %v10655_v56, %v14818_v55  ;;  %11488 = vmatprep.mubr.bf16.mxu0 %v14845_v42  ;;  %v8100_v42 = vld [vmem:[#allocation2 + $0x148] sm:$0xff] }
 0x806   : > { %v10574_v34 = vpop.f32.mrb[124].mxu1  ;;  %v10656_v2 = vpop.f32.mrb[248].mxu0 }
 0x807   : > { %v10575_v16 = vpop.f32.mrb[125].mxu1  ;;  %v10657_v47 = vpop.f32.mrb[249].mxu0 }
 0x808   : > { %v14915_v61 = vadd.f32 %v10575_v16, %v10574_v34  ;;  %v10658_v6 = vadd.f32 %v10657_v47, %v10656_v2  ;;  %v10577_v11 = vpop.f32.mrb[126].mxu1  ;;  %v10659_v25 = vpop.f32.mrb[250].mxu0 }
 0x809   : > { %v10578_v38 = vpop.f32.mrb[127].mxu1  ;;  %v10660_v46 = vpop.f32.mrb[251].mxu0 }
 0x80a   : > { %v14918_v29 = vadd.f32 %v10658_v6, %v14828_v15  ;;  %v14920_v55 = vadd.f32 %v10578_v38, %v10577_v11  ;;  %v10661_v53 = vadd.f32 %v10660_v46, %v10659_v25 }
 0x80b   : > { %11489 = vmatmul.mubr.bf16.gmra.mrb[228].mxu0 %v8100_v42 }
 0x80c   : > { %v14923_v40 = vadd.f32 %v10661_v53, %v14830_v14  ;;  %11492 = vmatprep.mubr.bf16.mxu0 %v8103_v20  ;;  %v8106_v14 = vld [vmem:[#allocation2 + $0x178] sm:$0xff] }
 0x80e   : > { %v10580_v19 = vpop.f32.mrb[128].mxu1  ;;  %v10662_v27 = vpop.f32.mrb[252].mxu0 }
 0x80f   : > { %v10581_v8 = vpop.f32.mrb[129].mxu1  ;;  %v10663_v24 = vpop.f32.mrb[253].mxu0 }
 0x810   : > { %v14925_v26 = vadd.f32 %v10581_v8, %v10580_v19  ;;  %v10664_v51 = vadd.f32 %v10663_v24, %v10662_v27  ;;  %v10583_v31 = vpop.f32.mrb[130].mxu1  ;;  %v10665_v15 = vpop.f32.mrb[254].mxu0 }
 0x811   : > { %v10584_v57 = vpop.f32.mrb[131].mxu1  ;;  %v10666_v7 = vpop.f32.mrb[255].mxu0 }
 0x812   : > { %v14928_v17 = vadd.f32 %v10664_v51, %v14841_v39  ;;  %v14930_v33 = vadd.f32 %v10584_v57, %v10583_v31  ;;  %v10667_v43 = vadd.f32 %v10666_v7, %v10665_v15 }
 0x813   : > { %11493 = vmatmul.mubr.bf16.gmra.mrb[232].mxu0 %v8106_v14 }
 0x814   : > { %v14936_v13 = vadd.f32 %v10667_v43, %v14843_v23  ;;  %11496 = vmatprep.mubr.bf16.mxu0 %v8109_v9 }
 0x816   : > { %v10586_v49 = vpop.f32.mrb[132].mxu1  ;;  %v10668_v3 = vpop.f32.mrb[0].mxu0 }
 0x817   : > { %v10587_v39 = vpop.f32.mrb[133].mxu1  ;;  %v10669_v5 = vpop.f32.mrb[1].mxu0 }
 0x818   : > { %v14938_v58 = vadd.f32 %v10587_v39, %v10586_v49  ;;  %v10670_v4 = vadd.f32 %v10669_v5, %v10668_v3  ;;  %v10589_v41 = vpop.f32.mrb[134].mxu1  ;;  %v10671_v21 = vpop.f32.mrb[2].mxu0  ;;  %v12339_v3 = vld [vmem:[%s15279_s13 + $0x38] sm:$0xff]  }
 0x819   : > { %v10590_v56 = vpop.f32.mrb[135].mxu1  ;;  %v10672_v1 = vpop.f32.mrb[3].mxu0 }
 0x81a   : > { %v14941_v18 = vadd.f32 %v10670_v4, %v14850_v36  ;;  %v14943_v23 = vadd.f32 %v10590_v56, %v10589_v41  ;;  %v10673_v34 = vadd.f32 %v10672_v1, %v10671_v21 }
 0x81b   : > { %11497 = vmatmul.mubr.bf16.gmra.mrb[236].mxu0 %v8112_v48 }
 0x81c   : > { %v14946_v2 = vadd.f32 %v10673_v34, %v14852_v54  ;;  %v12338_v54 = vld [vmem:[%s15279_s13 + $0x30] sm:$0xff]  }
 0x81d   : > { %11512 = vmatprep.subr.bf16.mxu1 %v12338_v54 }
 0x81e   : > { %v10592_v16 = vpop.f32.mrb[136].mxu1  ;;  %v10674_v47 = vpop.f32.mrb[4].mxu0  ;;  %11513 = vmatpush3.bf16.msra.mxu1 %v12338_v54 }
 0x81f   : > { %v10593_v6 = vpop.f32.mrb[137].mxu1  ;;  %v10675_v11 = vpop.f32.mrb[5].mxu0  ;;  %11514 = vmatprep.subr.bf16.mxu1 %v12339_v3 }
 0x820   : > { %v14948_v25 = vadd.f32 %v10593_v6, %v10592_v16  ;;  %v10676_v38 = vadd.f32 %v10675_v11, %v10674_v47  ;;  %v10595_v46 = vpop.f32.mrb[138].mxu1  ;;  %v10677_v53 = vpop.f32.mrb[6].mxu0 }
 0x821   : > { %v10596_v42 = vpop.f32.mrb[139].mxu1  ;;  %v10678_v20 = vpop.f32.mrb[7].mxu0 }
 0x822   : > { %v14951_v36 = vadd.f32 %v10676_v38, %v14859_v22  ;;  %v14953_v19 = vadd.f32 %v10596_v42, %v10595_v46  ;;  %v10679_v27 = vadd.f32 %v10678_v20, %v10677_v53  ;;  %11515 = vmatpush3.bf16.msra.mxu1 %v12339_v3 }
 0x824   : > { %v14959_v8 = vadd.f32 %v10679_v27, %v14861_v28 }
 0x826   : > { %v10598_v24 = vpop.f32.mrb[140].mxu1  ;;  %v10680_v51 = vpop.f32.mrb[8].mxu0 }
 0x827   : > { %v10599_v31 = vpop.f32.mrb[141].mxu1  ;;  %v10681_v15 = vpop.f32.mrb[9].mxu0 }
 0x828   : > { %v14961_v57 = vadd.f32 %v10599_v31, %v10598_v24  ;;  %v10682_v22 = vadd.f32 %v10681_v15, %v10680_v51  ;;  %v10601_v7 = vpop.f32.mrb[142].mxu1  ;;  %v10683_v43 = vpop.f32.mrb[10].mxu0 }
 0x829   : > { %v10602_v14 = vpop.f32.mrb[143].mxu1  ;;  %v10684_v30 = vpop.f32.mrb[11].mxu0 }
 0x82a   : > { %v14964_v9 = vadd.f32 %v10682_v22, %v14865_v10  ;;  %v14966_v49 = vadd.f32 %v10602_v14, %v10601_v7  ;;  %v10685_v28 = vadd.f32 %v10684_v30, %v10683_v43 }
 0x82c   : > { %v14972_v39 = vadd.f32 %v10685_v28, %v14867_v52 }
 0x82e   : > { %v10686_v5 = vpop.f32.mrb[12].mxu0  ;;  %v10780_v4 = vpop.f32.mrb[144].mxu1 }
 0x82f   : > { %v10687_v41 = vpop.f32.mrb[13].mxu0  ;;  %v10781_v21 = vpop.f32.mrb[145].mxu1 }
 0x830   : > { %v10688_v48 = vadd.f32 %v10687_v41, %v10686_v5  ;;  %v10782_v56 = vadd.f32 %v10781_v21, %v10780_v4  ;;  %v10689_v10 = vpop.f32.mrb[14].mxu0  ;;  %v10783_v1 = vpop.f32.mrb[146].mxu1 }
 0x831   : > { %v10690_v34 = vpop.f32.mrb[15].mxu0  ;;  %v10784_v16 = vpop.f32.mrb[147].mxu1 }
 0x832   : > { %v14975_v47 = vadd.f32 %v10688_v48, %v14874_v60  ;;  %v10691_v6 = vadd.f32 %v10690_v34, %v10689_v10  ;;  %v10785_v11 = vadd.f32 %v10784_v16, %v10783_v1  ;;  %v14978_v52 = vadd.f32 %v14892_v62, %v10782_v56 }
 0x834   : > { %v14981_v38 = vadd.f32 %v10691_v6, %v14876_v59  ;;  %v14984_v46 = vadd.f32 %v14898_v37, %v10785_v11 }
 0x836   : > { %v10692_v53 = vpop.f32.mrb[48].mxu0  ;;  %v10786_v42 = vpop.f32.mrb[148].mxu1 }
 0x837   : > { %v10693_v20 = vpop.f32.mrb[49].mxu0  ;;  %v10787_v27 = vpop.f32.mrb[149].mxu1 }
 0x838   : > { %v10694_v54 = vadd.f32 %v10693_v20, %v10692_v53  ;;  %v10788_v24 = vadd.f32 %v10787_v27, %v10786_v42  ;;  %v10695_v51 = vpop.f32.mrb[50].mxu0  ;;  %v10789_v60 = vpop.f32.mrb[150].mxu1 }
 0x839   : > { %v10696_v31 = vpop.f32.mrb[51].mxu0  ;;  %v10790_v15 = vpop.f32.mrb[151].mxu1 }
 0x83a   : > { %v14987_v22 = vadd.f32 %v10694_v54, %v14880_v45  ;;  %v10697_v62 = vadd.f32 %v10696_v31, %v10695_v51  ;;  %v10791_v7 = vadd.f32 %v10790_v15, %v10789_v60  ;;  %v14990_v59 = vadd.f32 %v14904_v32, %v10788_v24 }
 0x83c   : > { %v14993_v37 = vadd.f32 %v10697_v62, %v14882_v0  ;;  %v14996_v43 = vadd.f32 %v14912_v12, %v10791_v7 }
 0x83e   : > { %v10698_v14 = vpop.f32.mrb[52].mxu0  ;;  %v10792_v30 = vpop.f32.mrb[152].mxu1 }
 0x83f   : > { %v10699_v28 = vpop.f32.mrb[53].mxu0  ;;  %v10793_v3 = vpop.f32.mrb[153].mxu1 }
 0x840   : > { %v10700_v5 = vadd.f32 %v10699_v28, %v10698_v14  ;;  %v10794_v4 = vadd.f32 %v10793_v3, %v10792_v30  ;;  %v10701_v41 = vpop.f32.mrb[54].mxu0  ;;  %v10795_v45 = vpop.f32.mrb[154].mxu1 }
 0x841   : > { %v10702_v21 = vpop.f32.mrb[55].mxu0  ;;  %v10796_v48 = vpop.f32.mrb[155].mxu1 }
 0x842   : > { %v14999_v56 = vadd.f32 %v10700_v5, %v14889_v50  ;;  %v10703_v32 = vadd.f32 %v10702_v21, %v10701_v41  ;;  %v10797_v10 = vadd.f32 %v10796_v48, %v10795_v45  ;;  %v15002_v0 = vadd.f32 %v14918_v29, %v10794_v4 }
 0x844   : > { %v15005_v12 = vadd.f32 %v10703_v32, %v14894_v44  ;;  %v15008_v1 = vadd.f32 %v14923_v40, %v10797_v10 }
 0x846   : > { %v10704_v34 = vpop.f32.mrb[56].mxu0  ;;  %v10798_v16 = vpop.f32.mrb[156].mxu1 }
 0x847   : > { %v10705_v6 = vpop.f32.mrb[57].mxu0  ;;  %v10799_v11 = vpop.f32.mrb[157].mxu1 }
 0x848   : > { %v10706_v53 = vadd.f32 %v10705_v6, %v10704_v34  ;;  %v10800_v42 = vadd.f32 %v10799_v11, %v10798_v16  ;;  %v10707_v20 = vpop.f32.mrb[58].mxu0  ;;  %v10801_v50 = vpop.f32.mrb[158].mxu1 }
 0x849   : > { %v10708_v27 = vpop.f32.mrb[59].mxu0  ;;  %v10802_v54 = vpop.f32.mrb[159].mxu1 }
 0x84a   : > { %v15011_v24 = vadd.f32 %v10706_v53, %v14901_v35  ;;  %v10709_v29 = vadd.f32 %v10708_v27, %v10707_v20  ;;  %v10803_v51 = vadd.f32 %v10802_v54, %v10801_v50  ;;  %v15014_v44 = vadd.f32 %v14928_v17, %v10800_v42 }
 0x84c   : > { %v15017_v40 = vadd.f32 %v10709_v29, %v14906_v63  ;;  %v15020_v60 = vadd.f32 %v14936_v13, %v10803_v51 }
 0x84e   : > { %v10710_v31 = vpop.f32.mrb[60].mxu0  ;;  %v10804_v15 = vpop.f32.mrb[160].mxu1 }
 0x84f   : > { %v10711_v62 = vpop.f32.mrb[61].mxu0  ;;  %v10805_v7 = vpop.f32.mrb[161].mxu1 }
 0x850   : > { %v10712_v14 = vadd.f32 %v10711_v62, %v10710_v31  ;;  %v10806_v30 = vadd.f32 %v10805_v7, %v10804_v15  ;;  %v10713_v28 = vpop.f32.mrb[62].mxu0  ;;  %v10807_v35 = vpop.f32.mrb[162].mxu1 }
 0x851   : > { %v10714_v3 = vpop.f32.mrb[63].mxu0  ;;  %v10808_v5 = vpop.f32.mrb[163].mxu1 }
 0x852   : > { %v15023_v4 = vadd.f32 %v10712_v14, %v14915_v61  ;;  %v10715_v17 = vadd.f32 %v10714_v3, %v10713_v28  ;;  %v10809_v41 = vadd.f32 %v10808_v5, %v10807_v35  ;;  %v15026_v63 = vadd.f32 %v14941_v18, %v10806_v30 }
 0x854   : > { %v15029_v13 = vadd.f32 %v10715_v17, %v14920_v55  ;;  %v15032_v45 = vadd.f32 %v14946_v2, %v10809_v41 }
 0x856   : > { %v10716_v21 = vpop.f32.mrb[64].mxu0  ;;  %v10810_v48 = vpop.f32.mrb[164].mxu1 }
 0x857   : > { %v10717_v32 = vpop.f32.mrb[65].mxu0  ;;  %v10811_v10 = vpop.f32.mrb[165].mxu1 }
 0x858   : > { %v10718_v34 = vadd.f32 %v10717_v32, %v10716_v21  ;;  %v10812_v16 = vadd.f32 %v10811_v10, %v10810_v48  ;;  %v10719_v6 = vpop.f32.mrb[66].mxu0  ;;  %v10813_v61 = vpop.f32.mrb[166].mxu1 }
 0x859   : > { %v10720_v11 = vpop.f32.mrb[67].mxu0  ;;  %v10814_v53 = vpop.f32.mrb[167].mxu1 }
 0x85a   : > { %v15035_v42 = vadd.f32 %v10718_v34, %v14925_v26  ;;  %v10721_v18 = vadd.f32 %v10720_v11, %v10719_v6  ;;  %v10815_v20 = vadd.f32 %v10814_v53, %v10813_v61  ;;  %v15038_v55 = vadd.f32 %v14951_v36, %v10812_v16 }
 0x85c   : > { %v15041_v2 = vadd.f32 %v10721_v18, %v14930_v33  ;;  %v15044_v50 = vadd.f32 %v14959_v8, %v10815_v20 }
 0x85e   : > { %v10722_v27 = vpop.f32.mrb[68].mxu0  ;;  %v10816_v54 = vpop.f32.mrb[168].mxu1 }
 0x85f   : > { %v10723_v29 = vpop.f32.mrb[69].mxu0  ;;  %v10817_v51 = vpop.f32.mrb[169].mxu1 }
 0x860   : > { %v10724_v31 = vadd.f32 %v10723_v29, %v10722_v27  ;;  %v10818_v15 = vadd.f32 %v10817_v51, %v10816_v54  ;;  %v10725_v62 = vpop.f32.mrb[70].mxu0  ;;  %v10819_v26 = vpop.f32.mrb[170].mxu1 }
 0x861   : > { %v10726_v7 = vpop.f32.mrb[71].mxu0  ;;  %v10820_v14 = vpop.f32.mrb[171].mxu1 }
 0x862   : > { %v15047_v30 = vadd.f32 %v10724_v31, %v14938_v58  ;;  %v10727_v36 = vadd.f32 %v10726_v7, %v10725_v62  ;;  %v10821_v28 = vadd.f32 %v10820_v14, %v10819_v26  ;;  %v15050_v33 = vadd.f32 %v14964_v9, %v10818_v15 }
 0x864   : > { %v15053_v8 = vadd.f32 %v10727_v36, %v14943_v23  ;;  %v15056_v35 = vadd.f32 %v14972_v39, %v10821_v28 }
 0x866   : > { %v10728_v3 = vpop.f32.mrb[72].mxu0  ;;  %v10822_v5 = vpop.f32.mrb[172].mxu1 }
 0x867   : > { %v10729_v17 = vpop.f32.mrb[73].mxu0  ;;  %v10823_v41 = vpop.f32.mrb[173].mxu1 }
 0x868   : > { %v10730_v21 = vadd.f32 %v10729_v17, %v10728_v3  ;;  %v10824_v48 = vadd.f32 %v10823_v41, %v10822_v5  ;;  %v10731_v32 = vpop.f32.mrb[74].mxu0  ;;  %v10825_v58 = vpop.f32.mrb[174].mxu1 }
 0x869   : > { %v10732_v10 = vpop.f32.mrb[75].mxu0  ;;  %v10826_v34 = vpop.f32.mrb[175].mxu1 }
 0x86a   : > { %v15059_v16 = vadd.f32 %v10730_v21, %v14948_v25  ;;  %v10733_v9 = vadd.f32 %v10732_v10, %v10731_v32  ;;  %v10827_v6 = vadd.f32 %v10826_v34, %v10825_v58  ;;  %v15062_v23 = vadd.f32 %v14975_v47, %v10824_v48 }
 0x86c   : > { %v15065_v39 = vadd.f32 %v10733_v9, %v14953_v19  ;;  %v15068_v61 = vadd.f32 %v14981_v38, %v10827_v6 }
 0x86e   : > { %v10734_v11 = vpop.f32.mrb[76].mxu0  ;;  %v10828_v53 = vpop.f32.mrb[176].mxu1 }
 0x86f   : > { %v10735_v18 = vpop.f32.mrb[77].mxu0  ;;  %v10829_v20 = vpop.f32.mrb[177].mxu1 }
 0x870   : > { %v10736_v27 = vadd.f32 %v10735_v18, %v10734_v11  ;;  %v10830_v54 = vadd.f32 %v10829_v20, %v10828_v53  ;;  %v10737_v29 = vpop.f32.mrb[78].mxu0  ;;  %v10831_v25 = vpop.f32.mrb[178].mxu1 }
 0x871   : > { %v10738_v51 = vpop.f32.mrb[79].mxu0  ;;  %v10832_v31 = vpop.f32.mrb[179].mxu1 }
 0x872   : > { %v11840_v15 = vadd.f32 %v10736_v27, %v14961_v57  ;;  %v10739_v47 = vadd.f32 %v10738_v51, %v10737_v29  ;;  %v10833_v62 = vadd.f32 %v10832_v31, %v10831_v25  ;;  %v15072_v19 = vadd.f32 %v14987_v22, %v10830_v54 }
 0x874   : > { %v11846_v38 = vadd.f32 %v10739_v47, %v14966_v49  ;;  %v15076_v26 = vadd.f32 %v14993_v37, %v10833_v62 }
 0x876   : > { %v10834_v7 = vpop.f32.mrb[180].mxu1 }
 0x877   : > { %v10835_v14 = vpop.f32.mrb[181].mxu1 }
 0x878   : > { %v10836_v36 = vadd.f32 %v10835_v14, %v10834_v7  ;;  %v10837_v28 = vpop.f32.mrb[182].mxu1 }
 0x879   : > { %v10838_v3 = vpop.f32.mrb[183].mxu1 }
 0x87a   : > { %v10839_v5 = vadd.f32 %v10838_v3, %v10837_v28  ;;  %v15079_v17 = vadd.f32 %v14999_v56, %v10836_v36 }
 0x87c   : > { %v15082_v57 = vadd.f32 %v15005_v12, %v10839_v5 }
 0x87e   : > { %v10840_v41 = vpop.f32.mrb[184].mxu1 }
 0x87f   : > { %v10841_v22 = vpop.f32.mrb[185].mxu1 }
 0x880   : > { %v10842_v21 = vadd.f32 %v10841_v22, %v10840_v41  ;;  %v10843_v48 = vpop.f32.mrb[186].mxu1 }
 0x881   : > { %v10844_v49 = vpop.f32.mrb[187].mxu1 }
 0x882   : > { %v10845_v32 = vadd.f32 %v10844_v49, %v10843_v48  ;;  %v15085_v37 = vadd.f32 %v15011_v24, %v10842_v21 }
 0x884   : > { %v15088_v58 = vadd.f32 %v15017_v40, %v10845_v32 }
 0x886   : > { %v10846_v10 = vpop.f32.mrb[188].mxu1 }
 0x887   : > { %v10847_v34 = vpop.f32.mrb[189].mxu1 }
 0x888   : > { %v10848_v9 = vadd.f32 %v10847_v34, %v10846_v10  ;;  %v10849_v56 = vpop.f32.mrb[190].mxu1 }
 0x889   : > { %v10850_v6 = vpop.f32.mrb[191].mxu1 }
 0x88a   : > { %v10851_v11 = vadd.f32 %v10850_v6, %v10849_v56  ;;  %v15091_v12 = vadd.f32 %v15023_v4, %v10848_v9  ;;  %v15121_v56 = vld [vmem:[%s15278_s12] ss:$0 sm:$0xff] }
 0x88c   : > { %v15094_v53 = vadd.f32 %v15029_v13, %v10851_v11 }
 0x88e   : > { %v10852_v18 = vpop.f32.mrb[192].mxu1 }
 0x88f   : > { %v10853_v20 = vpop.f32.mrb[193].mxu1 }
 0x890   : > { %v10854_v27 = vadd.f32 %v10853_v20, %v10852_v18  ;;  %v10855_v24 = vpop.f32.mrb[194].mxu1 }
 0x891   : > { %v10856_v54 = vpop.f32.mrb[195].mxu1 }
 0x892   : > { %v10857_v29 = vadd.f32 %v10856_v54, %v10855_v24  ;;  %v15097_v40 = vadd.f32 %v15035_v42, %v10854_v27 }
 0x894   : > { %v15100_v25 = vadd.f32 %v15041_v2, %v10857_v29 }
 0x896   : > { %v10858_v51 = vpop.f32.mrb[196].mxu1 }
 0x897   : > { %v10859_v31 = vpop.f32.mrb[197].mxu1 }
 0x898   : > { %v10860_v47 = vadd.f32 %v10859_v31, %v10858_v51  ;;  %v10861_v4 = vpop.f32.mrb[198].mxu1 }
 0x899   : > { %v10862_v62 = vpop.f32.mrb[199].mxu1 }
 0x89a   : > { %v10863_v7 = vadd.f32 %v10862_v62, %v10861_v4  ;;  %v15103_v13 = vadd.f32 %v15047_v30, %v10860_v47 }
 0x89c   : > { %v15106_v14 = vadd.f32 %v15053_v8, %v10863_v7 }
 0x89e   : > { %v10864_v36 = vpop.f32.mrb[200].mxu1 }
 0x89f   : > { %v10865_v28 = vpop.f32.mrb[201].mxu1 }
 0x8a0   : > { %v10866_v3 = vadd.f32 %v10865_v28, %v10864_v36  ;;  %v10867_v42 = vpop.f32.mrb[202].mxu1 }
 0x8a1   : > { %v10868_v5 = vpop.f32.mrb[203].mxu1 }
 0x8a2   : > { %v10869_v41 = vadd.f32 %v10868_v5, %v10867_v42  ;;  %v15109_v2 = vadd.f32 %v15059_v16, %v10866_v3 }
 0x8a4   : > { %v15112_v22 = vadd.f32 %v15065_v39, %v10869_v41 }
 0x8a6   : > { %v10870_v21 = vpop.f32.mrb[204].mxu1 }
 0x8a7   : > { %v10871_v48 = vpop.f32.mrb[205].mxu1 }
 0x8a8   : > { %v10872_v49 = vadd.f32 %v10871_v48, %v10870_v21  ;;  %v10873_v30 = vpop.f32.mrb[206].mxu1 }
 0x8a9   : > { %v10874_v32 = vpop.f32.mrb[207].mxu1 }
 0x8aa   : > { %v10875_v10 = vadd.f32 %v10874_v32, %v10873_v30  ;;  %v15114_v8 = vadd.f32 %v11840_v15, %v10872_v49 }
 0x8ac   : > { %v15116_v34 = vadd.f32 %v11846_v38, %v10875_v10 }
 0x8b6   : > { %v11470_v9 = vpop.f32.mrb[208].mxu0 }
 0x8b7   : > { %v11758_v16 = vadd.f32 %v14990_v59, %v11470_v9  ;;  %v8501_v39 = vpop.f32.mrb[209].mxu0 }
 0x8b8   : > { %v11761_v6 = vadd.f32 %v14978_v52, %v8501_v39  ;;  %v11471_v11 = vpop.f32.mrb[210].mxu0 }
 0x8b9   : > { %v8733_v18 = vadd.f32 %v11758_v16, %v15121_v56  ;;  %v11764_v20 = vadd.f32 %v14996_v43, %v11471_v11  ;;  %v8504_v15 = vpop.f32.mrb[211].mxu0 }
 0x8ba   : > { %v8731_v38 = vadd.f32 %v11761_v6, %v15121_v56  ;;  %v11767_v27 = vadd.f32 %v14984_v46, %v8504_v15 }
 0x8bb   : > { %v8765_v24 = vmul.f32 0.1, %v8733_v18  ;;  %v8734_v54 = vadd.f32 %v11764_v20, %v15121_v56 }
 0x8bc   : > { %v8763_v29 = vmul.f32 0.1, %v8731_v38  ;;  %v8732_v51 = vadd.f32 %v11767_v27, %v15121_v56 }
 0x8bd   : > { %v8766_v59 = vmul.f32 0.1, %v8734_v54  ;;  %v8797_v52 = vmax.f32 %v8733_v18, %v8765_v24 }
 0x8be   : > { %v8764_v31 = vmul.f32 0.1, %v8732_v51  ;;  %v11474_v47 = vpop.f32.mrb[212].mxu0  ;;  %v8795_v43 = vmax.f32 %v8731_v38, %v8763_v29 }
 0x8bf   : > { %v8798_v4 = vmax.f32 %v8734_v54, %v8766_v59  ;;  %v11770_v62 = vadd.f32 %v15014_v44, %v11474_v47  ;;  %v8517_v7 = vpop.f32.mrb[213].mxu0 }
 0x8c0   : > { %v8796_v36 = vmax.f32 %v8732_v51, %v8764_v31  ;;  %v11773_v28 = vadd.f32 %v15002_v0, %v8517_v7  ;;  %v11475_v3 = vpop.f32.mrb[214].mxu0 }
 0x8c1   : > { %v8828_v46 = vpack.c.bf16 %v8798_v4, %v8797_v52  ;;  %v8737_v42 = vadd.f32 %v11770_v62, %v15121_v56  ;;  %v11776_v5 = vadd.f32 %v15020_v60, %v11475_v3  ;;  %v8520_v41 = vpop.f32.mrb[215].mxu0 }
 0x8c2   : > { %v8735_v21 = vadd.f32 %v11773_v28, %v15121_v56  ;;  %v11779_v48 = vadd.f32 %v15008_v1, %v8520_v41  ;;  %v8827_v49 = vpack.c.bf16 %v8796_v36, %v8795_v43 }
 0x8c3   : > { %v8769_v30 = vmul.f32 0.1, %v8737_v42  ;;  %v8738_v44 = vadd.f32 %v11776_v5, %v15121_v56 }
 0x8c4   : > { %v8767_v32 = vmul.f32 0.1, %v8735_v21  ;;  %v8736_v10 = vadd.f32 %v11779_v48, %v15121_v56  ;;  %11516 = vmatprep.mubr.bf16.mxu1 %v8827_v49 }
 0x8c5   : > { %v8770_v0 = vmul.f32 0.1, %v8738_v44  ;;  %11517 = vmatmul.mubr.bf16.vlgmr.msra.gmra.mrb[208].mxu1 %v8828_v46  ;;  %v8801_v39 = vmax.f32 %v8737_v42, %v8769_v30 }
 0x8c6   : > { %v8768_v9 = vmul.f32 0.1, %v8736_v10  ;;  %v11478_v16 = vpop.f32.mrb[216].mxu0  ;;  %v8799_v18 = vmax.f32 %v8735_v21, %v8767_v32 }
 0x8c7   : > { %v8802_v6 = vmax.f32 %v8738_v44, %v8770_v0  ;;  %v11782_v60 = vadd.f32 %v15038_v55, %v11478_v16  ;;  %v8533_v11 = vpop.f32.mrb[217].mxu0 }
 0x8c8   : > { %v8800_v20 = vmax.f32 %v8736_v10, %v8768_v9  ;;  %v11785_v1 = vadd.f32 %v15026_v63, %v8533_v11  ;;  %v11479_v15 = vpop.f32.mrb[218].mxu0 }
 0x8c9   : > { %v8830_v38 = vpack.c.bf16 %v8802_v6, %v8801_v39  ;;  %v8741_v27 = vadd.f32 %v11782_v60, %v15121_v56  ;;  %v11788_v24 = vadd.f32 %v15044_v50, %v11479_v15  ;;  %v8536_v54 = vpop.f32.mrb[219].mxu0 }
 0x8ca   : > { %v8739_v29 = vadd.f32 %v11785_v1, %v15121_v56  ;;  %v11791_v51 = vadd.f32 %v15032_v45, %v8536_v54  ;;  %v8829_v59 = vpack.c.bf16 %v8800_v20, %v8799_v18 }
 0x8cb   : > { %v8773_v31 = vmul.f32 0.1, %v8741_v27  ;;  %v8742_v55 = vadd.f32 %v11788_v24, %v15121_v56 }
 0x8cc   : > { %v8771_v47 = vmul.f32 0.1, %v8739_v29  ;;  %v8740_v52 = vadd.f32 %v11791_v51, %v15121_v56  ;;  %11520 = vmatprep.mubr.bf16.mxu1 %v8829_v59 }
 0x8cd   : > { %v8774_v63 = vmul.f32 0.1, %v8742_v55  ;;  %11521 = vmatmul.mubr.bf16.gmra.mrb[212].mxu1 %v8830_v38  ;;  %v8805_v7 = vmax.f32 %v8741_v27, %v8773_v31 }
 0x8ce   : > { %v8772_v4 = vmul.f32 0.1, %v8740_v52  ;;  %v11482_v62 = vpop.f32.mrb[220].mxu0  ;;  %v8803_v28 = vmax.f32 %v8739_v29, %v8771_v47 }
 0x8cf   : > { %v8806_v43 = vmax.f32 %v8742_v55, %v8774_v63  ;;  %v11794_v50 = vadd.f32 %v15062_v23, %v11482_v62  ;;  %v8549_v36 = vpop.f32.mrb[221].mxu0 }
 0x8d0   : > { %v8804_v3 = vmax.f32 %v8740_v52, %v8772_v4  ;;  %v11797_v45 = vadd.f32 %v15050_v33, %v8549_v36  ;;  %v11483_v46 = vpop.f32.mrb[222].mxu0 }
 0x8d1   : > { %v8832_v42 = vpack.c.bf16 %v8806_v43, %v8805_v7  ;;  %v8745_v5 = vadd.f32 %v11794_v50, %v15121_v56  ;;  %v11800_v41 = vadd.f32 %v15068_v61, %v11483_v46  ;;  %v8552_v21 = vpop.f32.mrb[223].mxu0 }
 0x8d2   : > { %v8743_v48 = vadd.f32 %v11797_v45, %v15121_v56  ;;  %v11803_v49 = vadd.f32 %v15056_v35, %v8552_v21  ;;  %v8831_v30 = vpack.c.bf16 %v8804_v3, %v8803_v28 }
 0x8d3   : > { %v8777_v44 = vmul.f32 0.1, %v8745_v5  ;;  %v8746_v23 = vadd.f32 %v11800_v41, %v15121_v56 }
 0x8d4   : > { %v8775_v32 = vmul.f32 0.1, %v8743_v48  ;;  %v8744_v10 = vadd.f32 %v11803_v49, %v15121_v56  ;;  %11524 = vmatprep.mubr.bf16.mxu1 %v8831_v30 }
 0x8d5   : > { %v8778_v33 = vmul.f32 0.1, %v8746_v23  ;;  %11525 = vmatmul.mubr.bf16.gmra.mrb[216].mxu1 %v8832_v42  ;;  %v8809_v16 = vmax.f32 %v8745_v5, %v8777_v44 }
 0x8d6   : > { %v8776_v0 = vmul.f32 0.1, %v8744_v10  ;;  %v11486_v9 = vpop.f32.mrb[224].mxu0  ;;  %v8807_v60 = vmax.f32 %v8743_v48, %v8775_v32 }
 0x8d7   : > { %v8810_v39 = vmax.f32 %v8746_v23, %v8778_v33  ;;  %v11806_v61 = vadd.f32 %v15079_v17, %v11486_v9  ;;  %v8565_v6 = vpop.f32.mrb[225].mxu0 }
 0x8d8   : > { %v8808_v11 = vmax.f32 %v8744_v10, %v8776_v0  ;;  %v11809_v35 = vadd.f32 %v15072_v19, %v8565_v6  ;;  %v11487_v18 = vpop.f32.mrb[226].mxu0 }
 0x8d9   : > { %v8834_v20 = vpack.c.bf16 %v8810_v39, %v8809_v16  ;;  %v8749_v1 = vadd.f32 %v11806_v61, %v15121_v56  ;;  %v11812_v15 = vadd.f32 %v15082_v57, %v11487_v18  ;;  %v8568_v38 = vpop.f32.mrb[227].mxu0 }
 0x8da   : > { %v8747_v27 = vadd.f32 %v11809_v35, %v15121_v56  ;;  %v11815_v24 = vadd.f32 %v15076_v26, %v8568_v38  ;;  %v8833_v54 = vpack.c.bf16 %v8808_v11, %v8807_v60 }
 0x8db   : > { %v8781_v29 = vmul.f32 0.1, %v8749_v1  ;;  %v8750_v17 = vadd.f32 %v11812_v15, %v15121_v56 }
 0x8dc   : > { %v8779_v51 = vmul.f32 0.1, %v8747_v27  ;;  %v8748_v59 = vadd.f32 %v11815_v24, %v15121_v56  ;;  %11528 = vmatprep.mubr.bf16.mxu1 %v8833_v54 }
 0x8dd   : > { %v8782_v19 = vmul.f32 0.1, %v8750_v17  ;;  %11529 = vmatmul.mubr.bf16.gmra.mrb[220].mxu1 %v8834_v20  ;;  %v8813_v47 = vmax.f32 %v8749_v1, %v8781_v29 }
 0x8de   : > { %v8780_v31 = vmul.f32 0.1, %v8748_v59  ;;  %v11490_v55 = vpop.f32.mrb[228].mxu0  ;;  %v8811_v4 = vmax.f32 %v8747_v27, %v8779_v51 }
 0x8df   : > { %v8814_v52 = vmax.f32 %v8750_v17, %v8782_v19  ;;  %v11818_v57 = vadd.f32 %v15091_v12, %v11490_v55  ;;  %v8581_v63 = vpop.f32.mrb[229].mxu0 }
 0x8e0   : > { %v8812_v62 = vmax.f32 %v8748_v59, %v8780_v31  ;;  %v11821_v26 = vadd.f32 %v15085_v37, %v8581_v63  ;;  %v11491_v7 = vpop.f32.mrb[230].mxu0 }
 0x8e1   : > { %v8836_v43 = vpack.c.bf16 %v8814_v52, %v8813_v47  ;;  %v8753_v50 = vadd.f32 %v11818_v57, %v15121_v56  ;;  %v11824_v36 = vadd.f32 %v15094_v53, %v11491_v7  ;;  %v8584_v28 = vpop.f32.mrb[231].mxu0 }
 0x8e2   : > { %v8751_v3 = vadd.f32 %v11821_v26, %v15121_v56  ;;  %v11827_v45 = vadd.f32 %v15088_v58, %v8584_v28  ;;  %v8835_v46 = vpack.c.bf16 %v8812_v62, %v8811_v4 }
 0x8e3   : > { %v8785_v42 = vmul.f32 0.1, %v8753_v50  ;;  %v8754_v12 = vadd.f32 %v11824_v36, %v15121_v56 }
 0x8e4   : > { %v8783_v5 = vmul.f32 0.1, %v8751_v3  ;;  %v8752_v41 = vadd.f32 %v11827_v45, %v15121_v56  ;;  %11532 = vmatprep.mubr.bf16.mxu1 %v8835_v46 }
 0x8e5   : > { %v8786_v37 = vmul.f32 0.1, %v8754_v12  ;;  %11533 = vmatmul.mubr.bf16.gmra.mrb[224].mxu1 %v8836_v43  ;;  %v8817_v49 = vmax.f32 %v8753_v50, %v8785_v42 }
 0x8e6   : > { %v8784_v21 = vmul.f32 0.1, %v8752_v41  ;;  %v11494_v48 = vpop.f32.mrb[232].mxu0  ;;  %v8815_v23 = vmax.f32 %v8751_v3, %v8783_v5 }
 0x8e7   : > { %v8818_v30 = vmax.f32 %v8754_v12, %v8786_v37  ;;  %v11830_v53 = vadd.f32 %v15103_v13, %v11494_v48  ;;  %v8597_v44 = vpop.f32.mrb[233].mxu0 }
 0x8e8   : > { %v8816_v32 = vmax.f32 %v8752_v41, %v8784_v21  ;;  %v11833_v58 = vadd.f32 %v15097_v40, %v8597_v44  ;;  %v11495_v10 = vpop.f32.mrb[234].mxu0 }
 0x8e9   : > { %v8838_v33 = vpack.c.bf16 %v8818_v30, %v8817_v49  ;;  %v8757_v0 = vadd.f32 %v11830_v53, %v15121_v56  ;;  %v11836_v9 = vadd.f32 %v15106_v14, %v11495_v10  ;;  %v8600_v16 = vpop.f32.mrb[235].mxu0 }
 0x8ea   : > { %v8755_v39 = vadd.f32 %v11833_v58, %v15121_v56  ;;  %v11839_v61 = vadd.f32 %v15100_v25, %v8600_v16  ;;  %v8837_v6 = vpack.c.bf16 %v8816_v32, %v8815_v23 }
 0x8eb   : > { %v8789_v60 = vmul.f32 0.1, %v8757_v0  ;;  %v8758_v13 = vadd.f32 %v11836_v9, %v15121_v56 }
 0x8ec   : > { %v8787_v11 = vmul.f32 0.1, %v8755_v39  ;;  %v8756_v35 = vadd.f32 %v11839_v61, %v15121_v56  ;;  %11536 = vmatprep.mubr.bf16.mxu1 %v8837_v6 }
 0x8ed   : > { %v8790_v40 = vmul.f32 0.1, %v8758_v13  ;;  %11537 = vmatmul.mubr.bf16.gmra.mrb[228].mxu1 %v8838_v33  ;;  %v8821_v1 = vmax.f32 %v8757_v0, %v8789_v60 }
 0x8ee   : > { %v8788_v18 = vmul.f32 0.1, %v8756_v35  ;;  %v11498_v20 = vpop.f32.mrb[236].mxu0  ;;  %v8819_v27 = vmax.f32 %v8755_v39, %v8787_v11 }
 0x8ef   : > { %v8822_v15 = vmax.f32 %v8758_v13, %v8790_v40  ;;  %v11842_v14 = vadd.f32 %v15114_v8, %v11498_v20  ;;  %v8613_v38 = vpop.f32.mrb[237].mxu0 }
 0x8f0   : > { %v8820_v24 = vmax.f32 %v8756_v35, %v8788_v18  ;;  %v11845_v25 = vadd.f32 %v15109_v2, %v8613_v38  ;;  %v11499_v54 = vpop.f32.mrb[238].mxu0 }
 0x8f1   : > { %v8840_v29 = vpack.c.bf16 %v8822_v15, %v8821_v1  ;;  %v8761_v17 = vadd.f32 %v11842_v14, %v15121_v56  ;;  %v11848_v51 = vadd.f32 %v15116_v34, %v11499_v54  ;;  %v8616_v59 = vpop.f32.mrb[239].mxu0 }
 0x8f2   : > { %v8759_v19 = vadd.f32 %v11845_v25, %v15121_v56  ;;  %v11851_v31 = vadd.f32 %v15112_v22, %v8616_v59  ;;  %v8839_v55 = vpack.c.bf16 %v8820_v24, %v8819_v27  ;;  %v15190_v22 = vld [vmem:[%s15280_s14] ss:$0 sm:$0xff] }
 0x8f3   : > { %v8793_v47 = vmul.f32 0.1, %v8761_v17  ;;  %v8762_v8 = vadd.f32 %v11848_v51, %v15121_v56 }
 0x8f4   : > { %v8791_v52 = vmul.f32 0.1, %v8759_v19  ;;  %v8760_v57 = vadd.f32 %v11851_v31, %v15121_v56  ;;  %11540 = vmatprep.mubr.bf16.mxu1 %v8839_v55 }
 0x8f5   : > { %v8794_v2 = vmul.f32 0.1, %v8762_v8  ;;  %11541 = vmatmul.mubr.bf16.gmra.mrb[232].mxu1 %v8840_v29  ;;  %v8825_v4 = vmax.f32 %v8761_v17, %v8793_v47 }
 0x8f6   : > { %v8792_v63 = vmul.f32 0.1, %v8760_v57  ;;  %v8823_v34 = vmax.f32 %v8759_v19, %v8791_v52 }
 0x8f7   : > { %v8826_v62 = vmax.f32 %v8762_v8, %v8794_v2 }
 0x8f8   : > { %v8824_v26 = vmax.f32 %v8760_v57, %v8792_v63 }
 0x8f9   : > { %v8842_v7 = vpack.c.bf16 %v8826_v62, %v8825_v4 }
 0x8fa   : > { %v8841_v43 = vpack.c.bf16 %v8824_v26, %v8823_v34 }
 0x8fc   : > { %11544 = vmatprep.mubr.bf16.mxu1 %v8841_v43 }
 0x8fd   : > { %11545 = vmatmul.mubr.bf16.gmra.mrb[236].mxu1 %v8842_v7 }
 0x998   : > { %v11518_v56 = vpop.f32.mrb[208].mxu1 }
 0x999   : > { %v8957_v50 = vadd.f32 %v11518_v56, %v15190_v22  ;;  %v8948_v36 = vpop.f32.mrb[209].mxu1 }
 0x99a   : > { %v8949_v28 = vadd.f32 %v15190_v22, %v8948_v36  ;;  %v11519_v3 = vpop.f32.mrb[210].mxu1 }
 0x99b   : > { %9077 = vst [vmem:[%s15197_s24 + $0x10] sm:$0xff] %v8957_v50  ;;  %v8960_v45 = vadd.f32 %v11519_v3, %v15190_v22  ;;  %v8951_v46 = vpop.f32.mrb[211].mxu1 }
 0x99c   : > { %9075 = vst [vmem:[%s15197_s24] sm:$0xff] %v8949_v28  ;;  %v8952_v42 = vadd.f32 %v15190_v22, %v8951_v46 }
 0x99d   : > { %9078 = vst [vmem:[%s15197_s24 + $0x18] sm:$0xff] %v8960_v45 }
 0x99e   : > { %9076 = vst [vmem:[%s15197_s24 + $0x8] sm:$0xff] %v8952_v42 }
 0x9a0   : > { %v11522_v12 = vpop.f32.mrb[212].mxu1 }
 0x9a1   : > { %v8973_v5 = vadd.f32 %v11522_v12, %v15190_v22  ;;  %v8964_v41 = vpop.f32.mrb[213].mxu1 }
 0x9a2   : > { %v8965_v37 = vadd.f32 %v15190_v22, %v8964_v41  ;;  %v11523_v21 = vpop.f32.mrb[214].mxu1 }
 0x9a3   : > { %9081 = vst [vmem:[%s15197_s24 + $0x30] sm:$0xff] %v8973_v5  ;;  %v8976_v48 = vadd.f32 %v11523_v21, %v15190_v22  ;;  %v8967_v49 = vpop.f32.mrb[215].mxu1 }
 0x9a4   : > { %9079 = vst [vmem:[%s15197_s24 + $0x20] sm:$0xff] %v8965_v37  ;;  %v8968_v30 = vadd.f32 %v15190_v22, %v8967_v49 }
 0x9a5   : > { %9082 = vst [vmem:[%s15197_s24 + $0x38] sm:$0xff] %v8976_v48 }
 0x9a6   : > { %9080 = vst [vmem:[%s15197_s24 + $0x28] sm:$0xff] %v8968_v30 }
 0x9a8   : > { %v11526_v53 = vpop.f32.mrb[216].mxu1 }
 0x9a9   : > { %v8989_v44 = vadd.f32 %v11526_v53, %v15190_v22  ;;  %v8980_v23 = vpop.f32.mrb[217].mxu1 }
 0x9aa   : > { %v8981_v32 = vadd.f32 %v15190_v22, %v8980_v23  ;;  %v11527_v58 = vpop.f32.mrb[218].mxu1 }
 0x9ab   : > { %9085 = vst [vmem:[%s15197_s24 + $0x50] sm:$0xff] %v8989_v44  ;;  %v8992_v10 = vadd.f32 %v11527_v58, %v15190_v22  ;;  %v8983_v33 = vpop.f32.mrb[219].mxu1 }
 0x9ac   : > { %9083 = vst [vmem:[%s15197_s24 + $0x40] sm:$0xff] %v8981_v32  ;;  %v8984_v0 = vadd.f32 %v15190_v22, %v8983_v33 }
 0x9ad   : > { %9086 = vst [vmem:[%s15197_s24 + $0x58] sm:$0xff] %v8992_v10 }
 0x9ae   : > { %9084 = vst [vmem:[%s15197_s24 + $0x48] sm:$0xff] %v8984_v0 }
 0x9b0   : > { %v11530_v9 = vpop.f32.mrb[220].mxu1 }
 0x9b1   : > { %v9005_v16 = vadd.f32 %v11530_v9, %v15190_v22  ;;  %v8996_v39 = vpop.f32.mrb[221].mxu1 }
 0x9b2   : > { %v8997_v61 = vadd.f32 %v15190_v22, %v8996_v39  ;;  %v11531_v6 = vpop.f32.mrb[222].mxu1 }
 0x9b3   : > { %9089 = vst [vmem:[%s15197_s24 + $0x70] sm:$0xff] %v9005_v16  ;;  %v9008_v60 = vadd.f32 %v11531_v6, %v15190_v22  ;;  %v8999_v13 = vpop.f32.mrb[223].mxu1 }
 0x9b4   : > { %9087 = vst [vmem:[%s15197_s24 + $0x60] sm:$0xff] %v8997_v61  ;;  %v9000_v11 = vadd.f32 %v15190_v22, %v8999_v13 }
 0x9b5   : > { %9090 = vst [vmem:[%s15197_s24 + $0x78] sm:$0xff] %v9008_v60 }
 0x9b6   : > { %9088 = vst [vmem:[%s15197_s24 + $0x68] sm:$0xff] %v9000_v11 }
 0x9b8   : > { %v11534_v35 = vpop.f32.mrb[224].mxu1 }
 0x9b9   : > { %v9021_v40 = vadd.f32 %v11534_v35, %v15190_v22  ;;  %v9012_v18 = vpop.f32.mrb[225].mxu1 }
 0x9ba   : > { %v9013_v20 = vadd.f32 %v15190_v22, %v9012_v18  ;;  %v11535_v1 = vpop.f32.mrb[226].mxu1 }
 0x9bb   : > { %9093 = vst [vmem:[%s15197_s24 + $0x90] sm:$0xff] %v9021_v40  ;;  %v9024_v15 = vadd.f32 %v11535_v1, %v15190_v22  ;;  %v9015_v14 = vpop.f32.mrb[227].mxu1 }
 0x9bc   : > { %9091 = vst [vmem:[%s15197_s24 + $0x80] sm:$0xff] %v9013_v20  ;;  %v9016_v38 = vadd.f32 %v15190_v22, %v9015_v14 }
 0x9bd   : > { %9094 = vst [vmem:[%s15197_s24 + $0x98] sm:$0xff] %v9024_v15 }
 0x9be   : > { %9092 = vst [vmem:[%s15197_s24 + $0x88] sm:$0xff] %v9016_v38 }
 0x9c0   : > { %v11538_v27 = vpop.f32.mrb[228].mxu1 }
 0x9c1   : > { %v9037_v24 = vadd.f32 %v11538_v27, %v15190_v22  ;;  %v9028_v25 = vpop.f32.mrb[229].mxu1 }
 0x9c2   : > { %v9029_v54 = vadd.f32 %v15190_v22, %v9028_v25  ;;  %v11539_v29 = vpop.f32.mrb[230].mxu1 }
 0x9c3   : > { %9097 = vst [vmem:[%s15197_s24 + $0xb0] sm:$0xff] %v9037_v24  ;;  %v9040_v17 = vadd.f32 %v11539_v29, %v15190_v22  ;;  %v9031_v51 = vpop.f32.mrb[231].mxu1 }
 0x9c4   : > { %9095 = vst [vmem:[%s15197_s24 + $0xa0] sm:$0xff] %v9029_v54  ;;  %v9032_v59 = vadd.f32 %v15190_v22, %v9031_v51 }
 0x9c5   : > { %9098 = vst [vmem:[%s15197_s24 + $0xb8] sm:$0xff] %v9040_v17 }
 0x9c6   : > { %9096 = vst [vmem:[%s15197_s24 + $0xa8] sm:$0xff] %v9032_v59 }
 0x9c8   : > { %v11542_v19 = vpop.f32.mrb[232].mxu1 }
 0x9c9   : > { %v9053_v31 = vadd.f32 %v11542_v19, %v15190_v22  ;;  %v9044_v55 = vpop.f32.mrb[233].mxu1 }
 0x9ca   : > { %v9045_v47 = vadd.f32 %v15190_v22, %v9044_v55  ;;  %v11543_v8 = vpop.f32.mrb[234].mxu1 }
 0x9cb   : > { %9101 = vst [vmem:[%s15197_s24 + $0xd0] sm:$0xff] %v9053_v31  ;;  %v9056_v52 = vadd.f32 %v11543_v8, %v15190_v22  ;;  %v9047_v57 = vpop.f32.mrb[235].mxu1 }
 0x9cc   : > { %9099 = vst [vmem:[%s15197_s24 + $0xc0] sm:$0xff] %v9045_v47  ;;  %v9048_v2 = vadd.f32 %v15190_v22, %v9047_v57 }
 0x9cd   : > { %9102 = vst [vmem:[%s15197_s24 + $0xd8] sm:$0xff] %v9056_v52 }
 0x9ce   : > { %9100 = vst [vmem:[%s15197_s24 + $0xc8] sm:$0xff] %v9048_v2 }
 0x9d0   : > { %v11546_v63 = vpop.f32.mrb[236].mxu1 }
 0x9d1   : > { %v9069_v4 = vadd.f32 %v11546_v63, %v15190_v22  ;;  %v9060_v62 = vpop.f32.mrb[237].mxu1 }
 0x9d2   : > { %v9061_v34 = vadd.f32 %v15190_v22, %v9060_v62  ;;  %v11547_v26 = vpop.f32.mrb[238].mxu1 }
 0x9d3   : > { %9105 = vst [vmem:[%s15197_s24 + $0xf0] sm:$0xff] %v9069_v4  ;;  %v9072_v7 = vadd.f32 %v11547_v26, %v15190_v22  ;;  %v9063_v43 = vpop.f32.mrb[239].mxu1 }
 0x9d4   : > { %9103 = vst [vmem:[%s15197_s24 + $0xe0] sm:$0xff] %v9061_v34  ;;  %v9064_v56 = vadd.f32 %v15190_v22, %v9063_v43 }
 0x9d5   : > { %9106 = vst [vmem:[%s15197_s24 + $0xf8] sm:$0xff] %v9072_v7 }
 0x9d6   : > { %9104 = vst [vmem:[%s15197_s24 + $0xe8] sm:$0xff] %v9064_v56 }
 0x9d7 PF: > { %s15306_s22 = sld [smem:[#allocation10_spill]] }
 0x9dd   : > { %s29_s21 = sadd.s32 1, %s15306_s22  }
 0x9de   : > { %p26_p5 = scmp.ge.s32.totalorder %s29_s21, 4  }
 0x9e0   :  { %28 = sbr.rel (!%p26_p5) target bundleno = 5 (0x5), region = 140 }
 0x9e7   :  { %9144 = vsyncpa [#allocation5], 1 }
 0x9e8   :  { %9146 = vsyncpa [#allocation5 + $0x1], 1 }
 0x9e9   :  { %9147 = vsyncpa [#allocation7], 1 }

</bundles_post_ra>
